<compile_context>
chip_gen: v7x
topology: tpu7x:2x2x1
jax: 0.10.0
libtpu: 0.0.40
codegen_flags: <defaults>
</compile_context>

<pallas_src>
import math
import functools

import jax
import jax.numpy as jnp
from jax.experimental import pallas as pl
from jax.experimental.pallas import tpu as pltpu


def _round_up(x, m):
    return (x + m - 1) // m * m


# ----------------------------------------------------------------------------
# Pallas kernel 1: K-tiled GEMM + bias (+ LeakyReLU).  bf16 operands, f32 acc.
# grid = (M tiles, K tiles); output block is revisited along K (accumulator).
# ----------------------------------------------------------------------------
def _mm_bias_kernel(x_ref, w_ref, b_ref, o_ref, acc_ref, *, neg_slope):
    @pl.when(pl.program_id(1) == 0)
    def _init():
        acc_ref[...] = jnp.zeros_like(acc_ref)

    acc_ref[...] += jnp.dot(x_ref[...], w_ref[...],
                            preferred_element_type=jnp.float32)

    @pl.when(pl.program_id(1) == pl.num_programs(1) - 1)
    def _finish():
        acc = acc_ref[...] + b_ref[...]
        if neg_slope is not None:
            acc = jnp.where(acc >= 0.0, acc, acc * neg_slope)
        o_ref[...] = acc


def _pick_tk(kp):
    # Largest K tile <= 1024 that divides the (128-aligned) padded K.
    for t in (1024, 896, 768, 640, 512, 384, 256, 128):
        if kp % t == 0:
            return t
    return kp


def matmul_bias_padded(xp, wp, bp, neg_slope, tm):
    """xp: (Mp, Kp) bf16, wp: (Kp, Np) bf16, bp: (1, Np) f32 -> (Mp, Np) f32."""
    Mp, Kp = xp.shape
    _, Np = wp.shape
    tk = _pick_tk(Kp)
    grid = (Mp // tm, Kp // tk)
    return pl.pallas_call(
        functools.partial(_mm_bias_kernel, neg_slope=neg_slope),
        out_shape=jax.ShapeDtypeStruct((Mp, Np), jnp.float32),
        grid=grid,
        in_specs=[
            pl.BlockSpec((tm, tk), lambda i, k: (i, k)),
            pl.BlockSpec((tk, Np), lambda i, k: (k, 0)),
            pl.BlockSpec((1, Np), lambda i, k: (0, 0)),
        ],
        out_specs=pl.BlockSpec((tm, Np), lambda i, k: (i, 0)),
        scratch_shapes=[pltpu.VMEM((tm, Np), jnp.float32)],
        compiler_params=pltpu.CompilerParams(
            dimension_semantics=("parallel", "arbitrary"),
            vmem_limit_bytes=32 * 1024 * 1024),
    )(xp, wp, bp)


# ----------------------------------------------------------------------------
# Pallas kernel 2: fused Attention_layer + BatchNorm3d(affine=False).
#   x      : (M, C) f32, rows ordered (n, h, w, d)  -> D consecutive rows share
#            one spatial position.
#   mask   : (M, M) f32 block-diagonal (1 where rows share a spatial position).
#   Computes k/q/v (1x1x1 convs), depth-attention, output 1x1x1 conv, residual
#   add and batch-norm, all in VMEM; output is lane-dense (M, C).
# ----------------------------------------------------------------------------
def _atten_bn_kernel(x_ref, mask_ref, wk_ref, bk_ref, wq_ref, bq_ref,
                     wv_ref, bv_ref, wo_ref, bo_ref, o_ref, *, scale, eps):
    x = x_ref[...]                                   # (M, C) f32
    xb = x.astype(jnp.bfloat16)
    k = jnp.dot(xb, wk_ref[...], preferred_element_type=jnp.float32) + bk_ref[...]
    q = jnp.dot(xb, wq_ref[...], preferred_element_type=jnp.float32) + bq_ref[...]
    v = jnp.dot(xb, wv_ref[...], preferred_element_type=jnp.float32) + bv_ref[...]
    q = q * scale                                    # fold 1/sqrt(S) into q

    mask = mask_ref[...]                             # (M, M)
    # g[r, c] = <q_row r, k_row c>; r = query depth slot, c = key depth slot.
    g = jax.lax.dot_general(q, k, (((1,), (1,)), ((), ())),
                            preferred_element_type=jnp.float32)
    g = g + (mask - 1.0) * 1e30                      # out-of-block -> -1e30
    g = g - jnp.max(g, axis=1, keepdims=True)
    e = jnp.exp(g) * mask                            # exact zeros off-block
    a = e * pl.reciprocal(jnp.sum(e, axis=1, keepdims=True), approx=True)
    att = jnp.dot(a, v, preferred_element_type=jnp.float32)   # (M, S)

    ao = jnp.dot(att.astype(jnp.bfloat16), wo_ref[...],
                 preferred_element_type=jnp.float32) + bo_ref[...]  # (M, C)
    y = x + ao                                       # atten_factor = 1

    # BatchNorm3d(affine=False), training-mode batch statistics (biased var).
    mean = jnp.mean(y, axis=0, keepdims=True)
    var = jnp.mean(jnp.square(y - mean), axis=0, keepdims=True)
    o_ref[...] = (y - mean) * jax.lax.rsqrt(var + eps)


def atten_bn(x, ap, eps=1e-5):
    """x: (N, H, W, D, C) channels-last f32; fused Attention_layer + BatchNorm."""
    N, H, W, D, C = x.shape
    M = N * H * W * D
    S = C // 2
    xm = x.reshape(M, C)
    blk = jnp.arange(M, dtype=jnp.int32) // D        # spatial-position id per row
    mask = (blk[:, None] == blk[None, :]).astype(jnp.float32)

    full = lambda shape: pl.BlockSpec(shape, lambda i: (0, 0))
    out = pl.pallas_call(
        functools.partial(_atten_bn_kernel, scale=1.0 / math.sqrt(S), eps=eps),
        out_shape=jax.ShapeDtypeStruct((M, C), jnp.float32),
        grid=(1,),
        in_specs=[
            full((M, C)), full((M, M)),
            full((C, S)), full((1, S)),
            full((C, S)), full((1, S)),
            full((C, S)), full((1, S)),
            full((S, C)), full((1, C)),
        ],
        out_specs=full((M, C)),
        compiler_params=pltpu.CompilerParams(
            dimension_semantics=("arbitrary",),
            vmem_limit_bytes=32 * 1024 * 1024),
    )(xm, mask, ap["wk"], ap["bk"], ap["wq"], ap["bq"],
      ap["wv"], ap["bv"], ap["wo"], ap["bo"])
    return out.reshape(N, H, W, D, C)


# ----------------------------------------------------------------------------
# Conv3d via bf16 im2col + the K-tiled Pallas GEMM.  Channels-last layout
# (N, H, W, D, C); kernel/stride/pad given in (d, h, w) order like the module.
# TODO(synk): im2col patches are materialized by XLA (tiny at these sizes);
#             a tap-indexed BlockSpec reduction axis would avoid that copy.
# ----------------------------------------------------------------------------
def conv3d_cl(x, conv_p, k, cout, stride, pad, neg_slope=0.1):
    wm, bm = conv_p                                  # pre-padded bf16 / f32
    N, H, W, D, C = x.shape
    kd, kh, kw = k
    sd, sh, sw = stride
    pd, ph, pw = pad
    xt = jnp.pad(x.astype(jnp.bfloat16),
                 ((0, 0), (ph, ph), (pw, pw), (pd, pd), (0, 0)))
    Ho = (H + 2 * ph - kh) // sh + 1
    Wo = (W + 2 * pw - kw) // sw + 1
    Do = (D + 2 * pd - kd) // sd + 1

    patches = []
    for a in range(kd):                              # (kd, kh, kw) order matches
        for b_ in range(kh):                         # the weight reshape below
            for c_ in range(kw):
                patches.append(
                    xt[:, b_:b_ + Ho * sh:sh, c_:c_ + Wo * sw:sw,
                       a:a + Do * sd:sd, :])
    pat = jnp.concatenate(patches, axis=-1)          # (N,Ho,Wo,Do, kd*kh*kw*C)

    M = N * Ho * Wo * Do
    K = kd * kh * kw * C
    Kp, _ = wm.shape
    Mp0 = _round_up(max(M, 16), 16)
    tm = min(256, Mp0)
    Mp = _round_up(Mp0, tm)
    pat = pat.reshape(M, K)
    if Mp == M and Kp == K:
        xp = pat
    else:
        xp = jnp.zeros((Mp, Kp), jnp.bfloat16).at[:M, :K].set(pat)

    y = matmul_bias_padded(xp, wm, bm, neg_slope, tm)[:M, :cout]
    return y.reshape(N, Ho, Wo, Do, cout)


# ----------------------------------------------------------------------------
# Deterministic parameter init (kaiming-like; synthetic, not a checkpoint) and
# one-time preparation (reshape / pad / bf16-cast of GEMM weights).
# ----------------------------------------------------------------------------
def init_conv(key, cin, cout, k):
    kd, kh, kw = k
    fan_in = cin * kd * kh * kw
    kw_, kb_ = jax.random.split(key)
    w = jax.random.normal(kw_, (kd, kh, kw, cin, cout),
                          jnp.float32) * math.sqrt(2.0 / fan_in)
    b = jax.random.normal(kb_, (cout,), jnp.float32) * 0.01
    return w, b


def init_atten(key, c):
    s = c // 2
    ks = jax.random.split(key, 8)

    def lin(kw_, kb_, cin, cout):
        return (jax.random.normal(kw_, (cin, cout), jnp.float32)
                * math.sqrt(2.0 / cin),
                jax.random.normal(kb_, (cout,), jnp.float32) * 0.01)

    wk, bk = lin(ks[0], ks[1], c, s)
    wq, bq = lin(ks[2], ks[3], c, s)
    wv, bv = lin(ks[4], ks[5], c, s)
    wo, bo = lin(ks[6], ks[7], s, c)
    return dict(wk=wk, bk=bk, wq=wq, bq=bq, wv=wv, bv=bv, wo=wo, bo=bo)


def init_params(key):
    ks = jax.random.split(key, 10)
    return {
        "conv1":  init_conv(ks[0], 6, 32, (1, 1, 1)),
        "at1":    init_atten(ks[1], 32),
        "conv2":  init_conv(ks[2], 32, 128, (3, 3, 3)),
        "conv31": init_conv(ks[3], 128, 128, (1, 1, 1)),
        "conv33": init_conv(ks[4], 128, 128, (1, 3, 3)),
        "at3":    init_atten(ks[5], 256),
        "conv41": init_conv(ks[6], 256, 256, (1, 1, 1)),
        "conv43": init_conv(ks[7], 256, 256, (1, 3, 3)),
        "at4":    init_atten(ks[8], 512),
        "conv5":  init_conv(ks[9], 512, 128, (3, 3, 3)),
        # self.conv3 is defined in __init__ but never called in forward(): omitted.
    }


def prepare_conv(w, b):
    kd, kh, kw, cin, cout = w.shape
    K = kd * kh * kw * cin
    Kp = _round_up(max(K, 128), 128)
    Np = _round_up(max(cout, 128), 128)
    wm = jnp.zeros((Kp, Np), jnp.bfloat16).at[:K, :cout].set(
        w.reshape(K, cout).astype(jnp.bfloat16))
    bm = jnp.zeros((1, Np), jnp.float32).at[0, :cout].set(b)
    return (wm, bm)


def prepare_atten(p):
    c16 = lambda a: a.astype(jnp.bfloat16)
    row = lambda a: a.reshape(1, -1).astype(jnp.float32)
    return dict(wk=c16(p["wk"]), bk=row(p["bk"]),
                wq=c16(p["wq"]), bq=row(p["bq"]),
                wv=c16(p["wv"]), bv=row(p["bv"]),
                wo=c16(p["wo"]), bo=row(p["bo"]))


def prepare_params(raw):
    prepared = {}
    for name, val in raw.items():
        if name.startswith("conv"):
            prepared[name] = prepare_conv(*val)
        else:
            prepared[name] = prepare_atten(val)
    return prepared


# ----------------------------------------------------------------------------
# FeatExtractor.forward (channels-last internally; NCDHW at the boundaries).
# ----------------------------------------------------------------------------
def feat_extractor(params, x):
    out = jnp.transpose(x, (0, 3, 4, 2, 1))          # NCDHW -> (N, H, W, D, C)

    out = conv3d_cl(out, params["conv1"], (1, 1, 1), 32, (1, 1, 1), (0, 0, 0))
    out = atten_bn(out, params["at1"])               # at1 + bn1 fused

    out = conv3d_cl(out, params["conv2"], (3, 3, 3), 128, (2, 2, 2), (1, 1, 1))
    out1 = conv3d_cl(out, params["conv33"], (1, 3, 3), 128, (1, 1, 1), (0, 1, 1))
    out3 = conv3d_cl(out, params["conv31"], (1, 1, 1), 128, (1, 1, 1), (0, 0, 0))
    out = jnp.concatenate([out1, out3], axis=-1)
    out = atten_bn(out, params["at3"])               # at3 + bn3 fused

    out1 = conv3d_cl(out, params["conv41"], (1, 1, 1), 256, (1, 1, 1), (0, 0, 0))
    out3 = conv3d_cl(out, params["conv43"], (1, 3, 3), 256, (1, 1, 1), (0, 1, 1))
    out = jnp.concatenate([out1, out3], axis=-1)
    out = atten_bn(out, params["at4"])               # at4 + bn4 fused

    out = conv3d_cl(out, params["conv5"], (3, 3, 3), 128, (1, 1, 1), (1, 1, 1))
    return jnp.transpose(out, (0, 4, 3, 1, 2))       # -> NCDHW


if __name__ == "__main__":
    key = jax.random.PRNGKey(0)
    pkey, xkey = jax.random.split(key)
    params = prepare_params(init_params(pkey))       # pad/cast weights ONCE
    # N=1, C_in=6 (conv1 expects 6 channels), D=4 lights, H=W=8
    x = jax.random.normal(xkey, (1, 6, 4, 8, 8), jnp.float32)

    out = jax.jit(feat_extractor)(params, x)
    jax.block_until_ready(out)
    assert out.shape == (1, 128, 2, 4, 4), out.shape
    assert jnp.all(jnp.isfinite(out))
    print("KERNEL_OK")
</pallas_src>

<mosaic_0001>
module attributes {stable_mosaic.version = 11 : i64} {
  func.func @_mm_bias_kernel(%arg0: i32, %arg1: i32, %arg2: memref<256x128xbf16, #tpu.memory_space<vmem>>, %arg3: memref<128x128xbf16, #tpu.memory_space<vmem>>, %arg4: memref<1x128xf32, #tpu.memory_space<vmem>>, %arg5: memref<256x128xf32, #tpu.memory_space<vmem>>, %arg6: memref<256x128xf32, #tpu.memory_space<vmem>>) attributes {dimension_semantics = [#tpu.dimension_semantics<parallel>, #tpu.dimension_semantics<arbitrary>], iteration_bounds = array<i64: 1, 1>, scalar_prefetch = 0 : i64, scratch_operands = 1 : i64, tpu.core_type = #tpu.core_type<tc>, window_params = [{transform_indices = @transform_0, window_bounds = array<i64: 256, 128>}, {transform_indices = @transform_1, window_bounds = array<i64: 128, 128>}, {pipeline_mode = #tpu.pipeline_mode<synchronous>, transform_indices = @transform_2, window_bounds = array<i64: 1, 128>}, {transform_indices = @transform_3, window_bounds = array<i64: 256, 128>}]} {
    %c0_i32 = arith.constant 0 : i32
    %0 = arith.cmpi eq, %arg1, %c0_i32 : i32
    %1 = arith.extui %0 : i1 to i32
    %c0_i32_0 = arith.constant 0 : i32
    %2 = arith.cmpi ne, %1, %c0_i32_0 : i32
    scf.if %2 {
      %cst_10 = arith.constant 0.000000e+00 : f32
      %12 = vector.broadcast %cst_10 : f32 to vector<256x128xf32>
      %c0_11 = arith.constant 0 : index
      %c0_12 = arith.constant 0 : index
      %13 = vector.load %arg6[%c0_11, %c0_12] : memref<256x128xf32, #tpu.memory_space<vmem>>, vector<256x128xf32>
      tpu.vector_store %arg6[%c0_11, %c0_12], %12 {strides = array<i32>} : memref<256x128xf32, #tpu.memory_space<vmem>>, vector<256x128xf32>,
    } else {
    }
    %c0 = arith.constant 0 : index
    %c0_1 = arith.constant 0 : index
    %3 = vector.load %arg6[%c0, %c0_1] : memref<256x128xf32, #tpu.memory_space<vmem>>, vector<256x128xf32>
    %c0_2 = arith.constant 0 : index
    %c0_3 = arith.constant 0 : index
    %4 = vector.load %arg2[%c0_2, %c0_3] : memref<256x128xbf16, #tpu.memory_space<vmem>>, vector<256x128xbf16>
    %c0_4 = arith.constant 0 : index
    %c0_5 = arith.constant 0 : index
    %5 = vector.load %arg3[%c0_4, %c0_5] : memref<128x128xbf16, #tpu.memory_space<vmem>>, vector<128x128xbf16>
    %cst = arith.constant dense<0.000000e+00> : vector<256x128xf32>
    %6 = tpu.matmul %4, %5, %cst {dimension_numbers = #tpu.dot_dimension_numbers<[1], [0], [0], [1], [0, 0, 1, 1], [], []>} : vector<256x128xbf16>, vector<128x128xbf16>, vector<256x128xf32> -> vector<256x128xf32>
    %7 = arith.addf %3, %6 : vector<256x128xf32>
    %c0_6 = arith.constant 0 : index
    %c0_7 = arith.constant 0 : index
    %8 = vector.load %arg6[%c0_6, %c0_7] : memref<256x128xf32, #tpu.memory_space<vmem>>, vector<256x128xf32>
    tpu.vector_store %arg6[%c0_6, %c0_7], %7 {strides = array<i32>} : memref<256x128xf32, #tpu.memory_space<vmem>>, vector<256x128xf32>,
    %c0_i32_8 = arith.constant 0 : i32
    %9 = arith.cmpi eq, %arg1, %c0_i32_8 : i32
    %10 = arith.extui %9 : i1 to i32
    %c0_i32_9 = arith.constant 0 : i32
    %11 = arith.cmpi ne, %10, %c0_i32_9 : i32
    scf.if %11 {
      %c0_10 = arith.constant 0 : index
      %c0_11 = arith.constant 0 : index
      %12 = vector.load %arg6[%c0_10, %c0_11] : memref<256x128xf32, #tpu.memory_space<vmem>>, vector<256x128xf32>
      %c0_12 = arith.constant 0 : index
      %c0_13 = arith.constant 0 : index
      %13 = vector.load %arg4[%c0_12, %c0_13] : memref<1x128xf32, #tpu.memory_space<vmem>>, vector<1x128xf32>
      %14 = vector.broadcast %13 : vector<1x128xf32> to vector<256x128xf32>
      %15 = arith.addf %12, %14 : vector<256x128xf32>
      %cst_14 = arith.constant 0.000000e+00 : f32
      %16 = vector.broadcast %cst_14 : f32 to vector<256x128xf32>
      %17 = arith.cmpf oge, %15, %16 : vector<256x128xf32>
      %cst_15 = arith.constant 1.000000e-01 : f32
      %18 = vector.broadcast %cst_15 : f32 to vector<256x128xf32>
      %19 = arith.mulf %15, %18 : vector<256x128xf32>
      %20 = arith.select %17, %15, %19 : vector<256x128xi1>, vector<256x128xf32>
      %c0_16 = arith.constant 0 : index
      %c0_17 = arith.constant 0 : index
      %21 = vector.load %arg5[%c0_16, %c0_17] : memref<256x128xf32, #tpu.memory_space<vmem>>, vector<256x128xf32>
      tpu.vector_store %arg5[%c0_16, %c0_17], %20 {strides = array<i32>} : memref<256x128xf32, #tpu.memory_space<vmem>>, vector<256x128xf32>,
    } else {
    }
    return
  }
  func.func @transform_0(%arg0: i32, %arg1: i32) -> (i32, i32) {
    %c0_i32 = arith.constant 0 : i32
    return %arg0, %arg1 : i32, i32
  }
  func.func @transform_1(%arg0: i32, %arg1: i32) -> (i32, i32) {
    %c0_i32 = arith.constant 0 : i32
    %c0_i32_0 = arith.constant 0 : i32
    return %arg1, %c0_i32 : i32, i32
  }
  func.func @transform_2(%arg0: i32, %arg1: i32) -> (i32, i32) {
    %c0_i32 = arith.constant 0 : i32
    %c0_i32_0 = arith.constant 0 : i32
    %c0_i32_1 = arith.constant 0 : i32
    return %c0_i32, %c0_i32_0 : i32, i32
  }
  func.func @transform_3(%arg0: i32, %arg1: i32) -> (i32, i32) {
    %c0_i32 = arith.constant 0 : i32
    %c0_i32_0 = arith.constant 0 : i32
    return %arg0, %c0_i32 : i32, i32
  }
}

module attributes {stable_mosaic.version = 11 : i64} {
  func.func @_atten_bn_kernel(%arg0: i32, %arg1: memref<256x32xf32, #tpu.memory_space<vmem>>, %arg2: memref<256x256xf32, #tpu.memory_space<vmem>>, %arg3: memref<32x16xbf16, #tpu.memory_space<vmem>>, %arg4: memref<1x16xf32, #tpu.memory_space<vmem>>, %arg5: memref<32x16xbf16, #tpu.memory_space<vmem>>, %arg6: memref<1x16xf32, #tpu.memory_space<vmem>>, %arg7: memref<32x16xbf16, #tpu.memory_space<vmem>>, %arg8: memref<1x16xf32, #tpu.memory_space<vmem>>, %arg9: memref<16x32xbf16, #tpu.memory_space<vmem>>, %arg10: memref<1x32xf32, #tpu.memory_space<vmem>>, %arg11: memref<256x32xf32, #tpu.memory_space<vmem>>) attributes {dimension_semantics = [#tpu.dimension_semantics<arbitrary>], iteration_bounds = array<i64: 1>, scalar_prefetch = 0 : i64, scratch_operands = 0 : i64, tpu.core_type = #tpu.core_type<tc>, window_params = [{pipeline_mode = #tpu.pipeline_mode<synchronous>, transform_indices = @transform_0, window_bounds = array<i64: 256, 32>}, {pipeline_mode = #tpu.pipeline_mode<synchronous>, transform_indices = @transform_1, window_bounds = array<i64: 256, 256>}, {pipeline_mode = #tpu.pipeline_mode<synchronous>, transform_indices = @transform_2, window_bounds = array<i64: 32, 16>}, {pipeline_mode = #tpu.pipeline_mode<synchronous>, transform_indices = @transform_3, window_bounds = array<i64: 1, 16>}, {pipeline_mode = #tpu.pipeline_mode<synchronous>, transform_indices = @transform_4, window_bounds = array<i64: 32, 16>}, {pipeline_mode = #tpu.pipeline_mode<synchronous>, transform_indices = @transform_5, window_bounds = array<i64: 1, 16>}, {pipeline_mode = #tpu.pipeline_mode<synchronous>, transform_indices = @transform_6, window_bounds = array<i64: 32, 16>}, {pipeline_mode = #tpu.pipeline_mode<synchronous>, transform_indices = @transform_7, window_bounds = array<i64: 1, 16>}, {pipeline_mode = #tpu.pipeline_mode<synchronous>, transform_indices = @transform_8, window_bounds = array<i64: 16, 32>}, {pipeline_mode = #tpu.pipeline_mode<synchronous>, transform_indices = @transform_9, window_bounds = array<i64: 1, 32>}, {pipeline_mode = #tpu.pipeline_mode<synchronous>, transform_indices = @transform_10, window_bounds = array<i64: 256, 32>}]} {
    %c0 = arith.constant 0 : index
    %c0_0 = arith.constant 0 : index
    %0 = vector.load %arg1[%c0, %c0_0] : memref<256x32xf32, #tpu.memory_space<vmem>>, vector<256x32xf32>
    %1 = arith.truncf %0 : vector<256x32xf32> to vector<256x32xbf16>
    %c0_1 = arith.constant 0 : index
    %c0_2 = arith.constant 0 : index
    %2 = vector.load %arg3[%c0_1, %c0_2] : memref<32x16xbf16, #tpu.memory_space<vmem>>, vector<32x16xbf16>
    %cst = arith.constant dense<0.000000e+00> : vector<256x16xf32>
    %3 = tpu.matmul %1, %2, %cst {dimension_numbers = #tpu.dot_dimension_numbers<[1], [0], [0], [1], [0, 0, 1, 1], [], []>} : vector<256x32xbf16>, vector<32x16xbf16>, vector<256x16xf32> -> vector<256x16xf32>
    %c0_3 = arith.constant 0 : index
    %c0_4 = arith.constant 0 : index
    %4 = vector.load %arg4[%c0_3, %c0_4] : memref<1x16xf32, #tpu.memory_space<vmem>>, vector<1x16xf32>
    %5 = vector.broadcast %4 : vector<1x16xf32> to vector<256x16xf32>
    %6 = arith.addf %3, %5 : vector<256x16xf32>
    %c0_5 = arith.constant 0 : index
    %c0_6 = arith.constant 0 : index
    %7 = vector.load %arg5[%c0_5, %c0_6] : memref<32x16xbf16, #tpu.memory_space<vmem>>, vector<32x16xbf16>
    %cst_7 = arith.constant dense<0.000000e+00> : vector<256x16xf32>
    %8 = tpu.matmul %1, %7, %cst_7 {dimension_numbers = #tpu.dot_dimension_numbers<[1], [0], [0], [1], [0, 0, 1, 1], [], []>} : vector<256x32xbf16>, vector<32x16xbf16>, vector<256x16xf32> -> vector<256x16xf32>
    %c0_8 = arith.constant 0 : index
    %c0_9 = arith.constant 0 : index
    %9 = vector.load %arg6[%c0_8, %c0_9] : memref<1x16xf32, #tpu.memory_space<vmem>>, vector<1x16xf32>
    %10 = vector.broadcast %9 : vector<1x16xf32> to vector<256x16xf32>
    %11 = arith.addf %8, %10 : vector<256x16xf32>
    %c0_10 = arith.constant 0 : index
    %c0_11 = arith.constant 0 : index
    %12 = vector.load %arg7[%c0_10, %c0_11] : memref<32x16xbf16, #tpu.memory_space<vmem>>, vector<32x16xbf16>
    %cst_12 = arith.constant dense<0.000000e+00> : vector<256x16xf32>
    %13 = tpu.matmul %1, %12, %cst_12 {dimension_numbers = #tpu.dot_dimension_numbers<[1], [0], [0], [1], [0, 0, 1, 1], [], []>} : vector<256x32xbf16>, vector<32x16xbf16>, vector<256x16xf32> -> vector<256x16xf32>
    %c0_13 = arith.constant 0 : index
    %c0_14 = arith.constant 0 : index
    %14 = vector.load %arg8[%c0_13, %c0_14] : memref<1x16xf32, #tpu.memory_space<vmem>>, vector<1x16xf32>
    %15 = vector.broadcast %14 : vector<1x16xf32> to vector<256x16xf32>
    %16 = arith.addf %13, %15 : vector<256x16xf32>
    %cst_15 = arith.constant 2.500000e-01 : f32
    %17 = vector.broadcast %cst_15 : f32 to vector<256x16xf32>
    %18 = arith.mulf %11, %17 : vector<256x16xf32>
    %c0_16 = arith.constant 0 : index
    %c0_17 = arith.constant 0 : index
    %19 = vector.load %arg2[%c0_16, %c0_17] : memref<256x256xf32, #tpu.memory_space<vmem>>, vector<256x256xf32>
    %cst_18 = arith.constant dense<0.000000e+00> : vector<256x256xf32>
    %20 = tpu.matmul %18, %6, %cst_18 {dimension_numbers = #tpu.dot_dimension_numbers<[1], [1], [0], [0], [0, 0, 1, 0], [], []>} : vector<256x16xf32>, vector<256x16xf32>, vector<256x256xf32> -> vector<256x256xf32>
    %cst_19 = arith.constant 1.000000e+00 : f32
    %21 = vector.broadcast %cst_19 : f32 to vector<256x256xf32>
    %22 = arith.subf %19, %21 : vector<256x256xf32>
    %cst_20 = arith.constant 1.000000e+30 : f32
    %23 = vector.broadcast %cst_20 : f32 to vector<256x256xf32>
    %24 = arith.mulf %22, %23 : vector<256x256xf32>
    %25 = arith.addf %20, %24 : vector<256x256xf32>
    %cst_21 = arith.constant dense<0xFF800000> : vector<256xf32>
    %26 = vector.multi_reduction <maximumf>, %25, %cst_21 [1] : vector<256x256xf32> to vector<256xf32>
    %27 = vector.shape_cast %26 : vector<256xf32> to vector<256x1xf32>
    %28 = vector.broadcast %27 : vector<256x1xf32> to vector<256x256xf32>
    %29 = arith.subf %25, %28 : vector<256x256xf32>
    %30 = math.exp %29 : vector<256x256xf32>
    %31 = arith.mulf %30, %19 : vector<256x256xf32>
    %cst_22 = arith.constant dense<0.000000e+00> : vector<256xf32>
    %32 = vector.multi_reduction <add>, %31, %cst_22 [1] : vector<256x256xf32> to vector<256xf32>
    %33 = vector.shape_cast %32 : vector<256xf32> to vector<256x1xf32>
    %34 = tpu.reciprocal %33 {approx = true} : vector<256x1xf32> -> vector<256x1xf32>
    %35 = vector.broadcast %34 : vector<256x1xf32> to vector<256x256xf32>
    %36 = arith.mulf %31, %35 : vector<256x256xf32>
    %cst_23 = arith.constant dense<0.000000e+00> : vector<256x16xf32>
    %37 = tpu.matmul %36, %16, %cst_23 {dimension_numbers = #tpu.dot_dimension_numbers<[1], [0], [0], [1], [0, 0, 1, 1], [], []>} : vector<256x256xf32>, vector<256x16xf32>, vector<256x16xf32> -> vector<256x16xf32>
    %38 = arith.truncf %37 : vector<256x16xf32> to vector<256x16xbf16>
    %c0_24 = arith.constant 0 : index
    %c0_25 = arith.constant 0 : index
    %39 = vector.load %arg9[%c0_24, %c0_25] : memref<16x32xbf16, #tpu.memory_space<vmem>>, vector<16x32xbf16>
    %cst_26 = arith.constant dense<0.000000e+00> : vector<256x32xf32>
    %40 = tpu.matmul %38, %39, %cst_26 {dimension_numbers = #tpu.dot_dimension_numbers<[1], [0], [0], [1], [0, 0, 1, 1], [], []>} : vector<256x16xbf16>, vector<16x32xbf16>, vector<256x32xf32> -> vector<256x32xf32>
    %c0_27 = arith.constant 0 : index
    %c0_28 = arith.constant 0 : index
    %41 = vector.load %arg10[%c0_27, %c0_28] : memref<1x32xf32, #tpu.memory_space<vmem>>, vector<1x32xf32>
    %42 = vector.broadcast %41 : vector<1x32xf32> to vector<256x32xf32>
    %43 = arith.addf %40, %42 : vector<256x32xf32>
    %44 = arith.addf %0, %43 : vector<256x32xf32>
    %cst_29 = arith.constant dense<0.000000e+00> : vector<32xf32>
    %45 = vector.multi_reduction <add>, %44, %cst_29 [0] : vector<256x32xf32> to vector<32xf32>
    %46 = vector.shape_cast %45 : vector<32xf32> to vector<1x32xf32>
    %cst_30 = arith.constant 2.560000e+02 : f32
    %47 = vector.broadcast %cst_30 : f32 to vector<1x32xf32>
    %48 = arith.divf %46, %47 : vector<1x32xf32>
    %49 = vector.broadcast %48 : vector<1x32xf32> to vector<256x32xf32>
    %50 = arith.subf %44, %49 : vector<256x32xf32>
    %51 = arith.mulf %50, %50 : vector<256x32xf32>
    %cst_31 = arith.constant dense<0.000000e+00> : vector<32xf32>
    %52 = vector.multi_reduction <add>, %51, %cst_31 [0] : vector<256x32xf32> to vector<32xf32>
    %53 = vector.shape_cast %52 : vector<32xf32> to vector<1x32xf32>
    %cst_32 = arith.constant 2.560000e+02 : f32
    %54 = vector.broadcast %cst_32 : f32 to vector<1x32xf32>
    %55 = arith.divf %53, %54 : vector<1x32xf32>
    %56 = vector.broadcast %48 : vector<1x32xf32> to vector<256x32xf32>
    %57 = arith.subf %44, %56 : vector<256x32xf32>
    %cst_33 = arith.constant 9.99999974E-6 : f32
    %58 = vector.broadcast %cst_33 : f32 to vector<1x32xf32>
    %59 = arith.addf %55, %58 : vector<1x32xf32>
    %60 = math.rsqrt %59 : vector<1x32xf32>
    %61 = vector.broadcast %60 : vector<1x32xf32> to vector<256x32xf32>
    %62 = arith.mulf %57, %61 : vector<256x32xf32>
    %c0_34 = arith.constant 0 : index
    %c0_35 = arith.constant 0 : index
    %63 = vector.load %arg11[%c0_34, %c0_35] : memref<256x32xf32, #tpu.memory_space<vmem>>, vector<256x32xf32>
    tpu.vector_store %arg11[%c0_34, %c0_35], %62 {strides = array<i32>} : memref<256x32xf32, #tpu.memory_space<vmem>>, vector<256x32xf32>,
    return
  }
  func.func @transform_0(%arg0: i32) -> (i32, i32) {
    %c0_i32 = arith.constant 0 : i32
    %c0_i32_0 = arith.constant 0 : i32
    %c0_i32_1 = arith.constant 0 : i32
    return %c0_i32, %c0_i32_0 : i32, i32
  }
  func.func @transform_1(%arg0: i32) -> (i32, i32) {
    %c0_i32 = arith.constant 0 : i32
    %c0_i32_0 = arith.constant 0 : i32
    %c0_i32_1 = arith.constant 0 : i32
    return %c0_i32, %c0_i32_0 : i32, i32
  }
  func.func @transform_2(%arg0: i32) -> (i32, i32) {
    %c0_i32 = arith.constant 0 : i32
    %c0_i32_0 = arith.constant 0 : i32
    %c0_i32_1 = arith.constant 0 : i32
    return %c0_i32, %c0_i32_0 : i32, i32
  }
  func.func @transform_3(%arg0: i32) -> (i32, i32) {
    %c0_i32 = arith.constant 0 : i32
    %c0_i32_0 = arith.constant 0 : i32
    %c0_i32_1 = arith.constant 0 : i32
    return %c0_i32, %c0_i32_0 : i32, i32
  }
  func.func @transform_4(%arg0: i32) -> (i32, i32) {
    %c0_i32 = arith.constant 0 : i32
    %c0_i32_0 = arith.constant 0 : i32
    %c0_i32_1 = arith.constant 0 : i32
    return %c0_i32, %c0_i32_0 : i32, i32
  }
  func.func @transform_5(%arg0: i32) -> (i32, i32) {
    %c0_i32 = arith.constant 0 : i32
    %c0_i32_0 = arith.constant 0 : i32
    %c0_i32_1 = arith.constant 0 : i32
    return %c0_i32, %c0_i32_0 : i32, i32
  }
  func.func @transform_6(%arg0: i32) -> (i32, i32) {
    %c0_i32 = arith.constant 0 : i32
    %c0_i32_0 = arith.constant 0 : i32
    %c0_i32_1 = arith.constant 0 : i32
    return %c0_i32, %c0_i32_0 : i32, i32
  }
  func.func @transform_7(%arg0: i32) -> (i32, i32) {
    %c0_i32 = arith.constant 0 : i32
    %c0_i32_0 = arith.constant 0 : i32
    %c0_i32_1 = arith.constant 0 : i32
    return %c0_i32, %c0_i32_0 : i32, i32
  }
  func.func @transform_8(%arg0: i32) -> (i32, i32) {
    %c0_i32 = arith.constant 0 : i32
    %c0_i32_0 = arith.constant 0 : i32
    %c0_i32_1 = arith.constant 0 : i32
    return %c0_i32, %c0_i32_0 : i32, i32
  }
  func.func @transform_9(%arg0: i32) -> (i32, i32) {
    %c0_i32 = arith.constant 0 : i32
    %c0_i32_0 = arith.constant 0 : i32
    %c0_i32_1 = arith.constant 0 : i32
    return %c0_i32, %c0_i32_0 : i32, i32
  }
  func.func @transform_10(%arg0: i32) -> (i32, i32) {
    %c0_i32 = arith.constant 0 : i32
    %c0_i32_0 = arith.constant 0 : i32
    %c0_i32_1 = arith.constant 0 : i32
    return %c0_i32, %c0_i32_0 : i32, i32
  }
}

module attributes {stable_mosaic.version = 11 : i64} {
  func.func @_mm_bias_kernel(%arg0: i32, %arg1: i32, %arg2: memref<32x896xbf16, #tpu.memory_space<vmem>>, %arg3: memref<896x128xbf16, #tpu.memory_space<vmem>>, %arg4: memref<1x128xf32, #tpu.memory_space<vmem>>, %arg5: memref<32x128xf32, #tpu.memory_space<vmem>>, %arg6: memref<32x128xf32, #tpu.memory_space<vmem>>) attributes {dimension_semantics = [#tpu.dimension_semantics<parallel>, #tpu.dimension_semantics<arbitrary>], iteration_bounds = array<i64: 1, 1>, scalar_prefetch = 0 : i64, scratch_operands = 1 : i64, tpu.core_type = #tpu.core_type<tc>, window_params = [{transform_indices = @transform_0, window_bounds = array<i64: 32, 896>}, {transform_indices = @transform_1, window_bounds = array<i64: 896, 128>}, {pipeline_mode = #tpu.pipeline_mode<synchronous>, transform_indices = @transform_2, window_bounds = array<i64: 1, 128>}, {transform_indices = @transform_3, window_bounds = array<i64: 32, 128>}]} {
    %c0_i32 = arith.constant 0 : i32
    %0 = arith.cmpi eq, %arg1, %c0_i32 : i32
    %1 = arith.extui %0 : i1 to i32
    %c0_i32_0 = arith.constant 0 : i32
    %2 = arith.cmpi ne, %1, %c0_i32_0 : i32
    scf.if %2 {
      %cst_10 = arith.constant 0.000000e+00 : f32
      %12 = vector.broadcast %cst_10 : f32 to vector<32x128xf32>
      %c0_11 = arith.constant 0 : index
      %c0_12 = arith.constant 0 : index
      %13 = vector.load %arg6[%c0_11, %c0_12] : memref<32x128xf32, #tpu.memory_space<vmem>>, vector<32x128xf32>
      tpu.vector_store %arg6[%c0_11, %c0_12], %12 {strides = array<i32>} : memref<32x128xf32, #tpu.memory_space<vmem>>, vector<32x128xf32>,
    } else {
    }
    %c0 = arith.constant 0 : index
    %c0_1 = arith.constant 0 : index
    %3 = vector.load %arg6[%c0, %c0_1] : memref<32x128xf32, #tpu.memory_space<vmem>>, vector<32x128xf32>
    %c0_2 = arith.constant 0 : index
    %c0_3 = arith.constant 0 : index
    %4 = vector.load %arg2[%c0_2, %c0_3] : memref<32x896xbf16, #tpu.memory_space<vmem>>, vector<32x896xbf16>
    %c0_4 = arith.constant 0 : index
    %c0_5 = arith.constant 0 : index
    %5 = vector.load %arg3[%c0_4, %c0_5] : memref<896x128xbf16, #tpu.memory_space<vmem>>, vector<896x128xbf16>
    %cst = arith.constant dense<0.000000e+00> : vector<32x128xf32>
    %6 = tpu.matmul %4, %5, %cst {dimension_numbers = #tpu.dot_dimension_numbers<[1], [0], [0], [1], [0, 0, 1, 1], [], []>} : vector<32x896xbf16>, vector<896x128xbf16>, vector<32x128xf32> -> vector<32x128xf32>
    %7 = arith.addf %3, %6 : vector<32x128xf32>
    %c0_6 = arith.constant 0 : index
    %c0_7 = arith.constant 0 : index
    %8 = vector.load %arg6[%c0_6, %c0_7] : memref<32x128xf32, #tpu.memory_space<vmem>>, vector<32x128xf32>
    tpu.vector_store %arg6[%c0_6, %c0_7], %7 {strides = array<i32>} : memref<32x128xf32, #tpu.memory_space<vmem>>, vector<32x128xf32>,
    %c0_i32_8 = arith.constant 0 : i32
    %9 = arith.cmpi eq, %arg1, %c0_i32_8 : i32
    %10 = arith.extui %9 : i1 to i32
    %c0_i32_9 = arith.constant 0 : i32
    %11 = arith.cmpi ne, %10, %c0_i32_9 : i32
    scf.if %11 {
      %c0_10 = arith.constant 0 : index
      %c0_11 = arith.constant 0 : index
      %12 = vector.load %arg6[%c0_10, %c0_11] : memref<32x128xf32, #tpu.memory_space<vmem>>, vector<32x128xf32>
      %c0_12 = arith.constant 0 : index
      %c0_13 = arith.constant 0 : index
      %13 = vector.load %arg4[%c0_12, %c0_13] : memref<1x128xf32, #tpu.memory_space<vmem>>, vector<1x128xf32>
      %14 = vector.broadcast %13 : vector<1x128xf32> to vector<32x128xf32>
      %15 = arith.addf %12, %14 : vector<32x128xf32>
      %cst_14 = arith.constant 0.000000e+00 : f32
      %16 = vector.broadcast %cst_14 : f32 to vector<32x128xf32>
      %17 = arith.cmpf oge, %15, %16 : vector<32x128xf32>
      %cst_15 = arith.constant 1.000000e-01 : f32
      %18 = vector.broadcast %cst_15 : f32 to vector<32x128xf32>
      %19 = arith.mulf %15, %18 : vector<32x128xf32>
      %20 = arith.select %17, %15, %19 : vector<32x128xi1>, vector<32x128xf32>
      %c0_16 = arith.constant 0 : index
      %c0_17 = arith.constant 0 : index
      %21 = vector.load %arg5[%c0_16, %c0_17] : memref<32x128xf32, #tpu.memory_space<vmem>>, vector<32x128xf32>
      tpu.vector_store %arg5[%c0_16, %c0_17], %20 {strides = array<i32>} : memref<32x128xf32, #tpu.memory_space<vmem>>, vector<32x128xf32>,
    } else {
    }
    return
  }
  func.func @transform_0(%arg0: i32, %arg1: i32) -> (i32, i32) {
    %c0_i32 = arith.constant 0 : i32
    return %arg0, %arg1 : i32, i32
  }
  func.func @transform_1(%arg0: i32, %arg1: i32) -> (i32, i32) {
    %c0_i32 = arith.constant 0 : i32
    %c0_i32_0 = arith.constant 0 : i32
    return %arg1, %c0_i32 : i32, i32
  }
  func.func @transform_2(%arg0: i32, %arg1: i32) -> (i32, i32) {
    %c0_i32 = arith.constant 0 : i32
    %c0_i32_0 = arith.constant 0 : i32
    %c0_i32_1 = arith.constant 0 : i32
    return %c0_i32, %c0_i32_0 : i32, i32
  }
  func.func @transform_3(%arg0: i32, %arg1: i32) -> (i32, i32) {
    %c0_i32 = arith.constant 0 : i32
    %c0_i32_0 = arith.constant 0 : i32
    return %arg0, %c0_i32 : i32, i32
  }
}

module attributes {stable_mosaic.version = 11 : i64} {
  func.func @_mm_bias_kernel(%arg0: i32, %arg1: i32, %arg2: memref<32x128xbf16, #tpu.memory_space<vmem>>, %arg3: memref<128x128xbf16, #tpu.memory_space<vmem>>, %arg4: memref<1x128xf32, #tpu.memory_space<vmem>>, %arg5: memref<32x128xf32, #tpu.memory_space<vmem>>, %arg6: memref<32x128xf32, #tpu.memory_space<vmem>>) attributes {dimension_semantics = [#tpu.dimension_semantics<parallel>, #tpu.dimension_semantics<arbitrary>], iteration_bounds = array<i64: 1, 1>, scalar_prefetch = 0 : i64, scratch_operands = 1 : i64, tpu.core_type = #tpu.core_type<tc>, window_params = [{transform_indices = @transform_0, window_bounds = array<i64: 32, 128>}, {transform_indices = @transform_1, window_bounds = array<i64: 128, 128>}, {pipeline_mode = #tpu.pipeline_mode<synchronous>, transform_indices = @transform_2, window_bounds = array<i64: 1, 128>}, {transform_indices = @transform_3, window_bounds = array<i64: 32, 128>}]} {
    %c0_i32 = arith.constant 0 : i32
    %0 = arith.cmpi eq, %arg1, %c0_i32 : i32
    %1 = arith.extui %0 : i1 to i32
    %c0_i32_0 = arith.constant 0 : i32
    %2 = arith.cmpi ne, %1, %c0_i32_0 : i32
    scf.if %2 {
      %cst_10 = arith.constant 0.000000e+00 : f32
      %12 = vector.broadcast %cst_10 : f32 to vector<32x128xf32>
      %c0_11 = arith.constant 0 : index
      %c0_12 = arith.constant 0 : index
      %13 = vector.load %arg6[%c0_11, %c0_12] : memref<32x128xf32, #tpu.memory_space<vmem>>, vector<32x128xf32>
      tpu.vector_store %arg6[%c0_11, %c0_12], %12 {strides = array<i32>} : memref<32x128xf32, #tpu.memory_space<vmem>>, vector<32x128xf32>,
    } else {
    }
    %c0 = arith.constant 0 : index
    %c0_1 = arith.constant 0 : index
    %3 = vector.load %arg6[%c0, %c0_1] : memref<32x128xf32, #tpu.memory_space<vmem>>, vector<32x128xf32>
    %c0_2 = arith.constant 0 : index
    %c0_3 = arith.constant 0 : index
    %4 = vector.load %arg2[%c0_2, %c0_3] : memref<32x128xbf16, #tpu.memory_space<vmem>>, vector<32x128xbf16>
    %c0_4 = arith.constant 0 : index
    %c0_5 = arith.constant 0 : index
    %5 = vector.load %arg3[%c0_4, %c0_5] : memref<128x128xbf16, #tpu.memory_space<vmem>>, vector<128x128xbf16>
    %cst = arith.constant dense<0.000000e+00> : vector<32x128xf32>
    %6 = tpu.matmul %4, %5, %cst {dimension_numbers = #tpu.dot_dimension_numbers<[1], [0], [0], [1], [0, 0, 1, 1], [], []>} : vector<32x128xbf16>, vector<128x128xbf16>, vector<32x128xf32> -> vector<32x128xf32>
    %7 = arith.addf %3, %6 : vector<32x128xf32>
    %c0_6 = arith.constant 0 : index
    %c0_7 = arith.constant 0 : index
    %8 = vector.load %arg6[%c0_6, %c0_7] : memref<32x128xf32, #tpu.memory_space<vmem>>, vector<32x128xf32>
    tpu.vector_store %arg6[%c0_6, %c0_7], %7 {strides = array<i32>} : memref<32x128xf32, #tpu.memory_space<vmem>>, vector<32x128xf32>,
    %c0_i32_8 = arith.constant 0 : i32
    %9 = arith.cmpi eq, %arg1, %c0_i32_8 : i32
    %10 = arith.extui %9 : i1 to i32
    %c0_i32_9 = arith.constant 0 : i32
    %11 = arith.cmpi ne, %10, %c0_i32_9 : i32
    scf.if %11 {
      %c0_10 = arith.constant 0 : index
      %c0_11 = arith.constant 0 : index
      %12 = vector.load %arg6[%c0_10, %c0_11] : memref<32x128xf32, #tpu.memory_space<vmem>>, vector<32x128xf32>
      %c0_12 = arith.constant 0 : index
      %c0_13 = arith.constant 0 : index
      %13 = vector.load %arg4[%c0_12, %c0_13] : memref<1x128xf32, #tpu.memory_space<vmem>>, vector<1x128xf32>
      %14 = vector.broadcast %13 : vector<1x128xf32> to vector<32x128xf32>
      %15 = arith.addf %12, %14 : vector<32x128xf32>
      %cst_14 = arith.constant 0.000000e+00 : f32
      %16 = vector.broadcast %cst_14 : f32 to vector<32x128xf32>
      %17 = arith.cmpf oge, %15, %16 : vector<32x128xf32>
      %cst_15 = arith.constant 1.000000e-01 : f32
      %18 = vector.broadcast %cst_15 : f32 to vector<32x128xf32>
      %19 = arith.mulf %15, %18 : vector<32x128xf32>
      %20 = arith.select %17, %15, %19 : vector<32x128xi1>, vector<32x128xf32>
      %c0_16 = arith.constant 0 : index
      %c0_17 = arith.constant 0 : index
      %21 = vector.load %arg5[%c0_16, %c0_17] : memref<32x128xf32, #tpu.memory_space<vmem>>, vector<32x128xf32>
      tpu.vector_store %arg5[%c0_16, %c0_17], %20 {strides = array<i32>} : memref<32x128xf32, #tpu.memory_space<vmem>>, vector<32x128xf32>,
    } else {
    }
    return
  }
  func.func @transform_0(%arg0: i32, %arg1: i32) -> (i32, i32) {
    %c0_i32 = arith.constant 0 : i32
    return %arg0, %arg1 : i32, i32
  }
  func.func @transform_1(%arg0: i32, %arg1: i32) -> (i32, i32) {
    %c0_i32 = arith.constant 0 : i32
    %c0_i32_0 = arith.constant 0 : i32
    return %arg1, %c0_i32 : i32, i32
  }
  func.func @transform_2(%arg0: i32, %arg1: i32) -> (i32, i32) {
    %c0_i32 = arith.constant 0 : i32
    %c0_i32_0 = arith.constant 0 : i32
    %c0_i32_1 = arith.constant 0 : i32
    return %c0_i32, %c0_i32_0 : i32, i32
  }
  func.func @transform_3(%arg0: i32, %arg1: i32) -> (i32, i32) {
    %c0_i32 = arith.constant 0 : i32
    %c0_i32_0 = arith.constant 0 : i32
    return %arg0, %c0_i32 : i32, i32
  }
}

module attributes {stable_mosaic.version = 11 : i64} {
  func.func @_atten_bn_kernel(%arg0: i32, %arg1: memref<32x256xf32, #tpu.memory_space<vmem>>, %arg2: memref<32x32xf32, #tpu.memory_space<vmem>>, %arg3: memref<256x128xbf16, #tpu.memory_space<vmem>>, %arg4: memref<1x128xf32, #tpu.memory_space<vmem>>, %arg5: memref<256x128xbf16, #tpu.memory_space<vmem>>, %arg6: memref<1x128xf32, #tpu.memory_space<vmem>>, %arg7: memref<256x128xbf16, #tpu.memory_space<vmem>>, %arg8: memref<1x128xf32, #tpu.memory_space<vmem>>, %arg9: memref<128x256xbf16, #tpu.memory_space<vmem>>, %arg10: memref<1x256xf32, #tpu.memory_space<vmem>>, %arg11: memref<32x256xf32, #tpu.memory_space<vmem>>) attributes {dimension_semantics = [#tpu.dimension_semantics<arbitrary>], iteration_bounds = array<i64: 1>, scalar_prefetch = 0 : i64, scratch_operands = 0 : i64, tpu.core_type = #tpu.core_type<tc>, window_params = [{pipeline_mode = #tpu.pipeline_mode<synchronous>, transform_indices = @transform_0, window_bounds = array<i64: 32, 256>}, {pipeline_mode = #tpu.pipeline_mode<synchronous>, transform_indices = @transform_1, window_bounds = array<i64: 32, 32>}, {pipeline_mode = #tpu.pipeline_mode<synchronous>, transform_indices = @transform_2, window_bounds = array<i64: 256, 128>}, {pipeline_mode = #tpu.pipeline_mode<synchronous>, transform_indices = @transform_3, window_bounds = array<i64: 1, 128>}, {pipeline_mode = #tpu.pipeline_mode<synchronous>, transform_indices = @transform_4, window_bounds = array<i64: 256, 128>}, {pipeline_mode = #tpu.pipeline_mode<synchronous>, transform_indices = @transform_5, window_bounds = array<i64: 1, 128>}, {pipeline_mode = #tpu.pipeline_mode<synchronous>, transform_indices = @transform_6, window_bounds = array<i64: 256, 128>}, {pipeline_mode = #tpu.pipeline_mode<synchronous>, transform_indices = @transform_7, window_bounds = array<i64: 1, 128>}, {pipeline_mode = #tpu.pipeline_mode<synchronous>, transform_indices = @transform_8, window_bounds = array<i64: 128, 256>}, {pipeline_mode = #tpu.pipeline_mode<synchronous>, transform_indices = @transform_9, window_bounds = array<i64: 1, 256>}, {pipeline_mode = #tpu.pipeline_mode<synchronous>, transform_indices = @transform_10, window_bounds = array<i64: 32, 256>}]} {
    %c0 = arith.constant 0 : index
    %c0_0 = arith.constant 0 : index
    %0 = vector.load %arg1[%c0, %c0_0] : memref<32x256xf32, #tpu.memory_space<vmem>>, vector<32x256xf32>
    %1 = arith.truncf %0 : vector<32x256xf32> to vector<32x256xbf16>
    %c0_1 = arith.constant 0 : index
    %c0_2 = arith.constant 0 : index
    %2 = vector.load %arg3[%c0_1, %c0_2] : memref<256x128xbf16, #tpu.memory_space<vmem>>, vector<256x128xbf16>
    %cst = arith.constant dense<0.000000e+00> : vector<32x128xf32>
    %3 = tpu.matmul %1, %2, %cst {dimension_numbers = #tpu.dot_dimension_numbers<[1], [0], [0], [1], [0, 0, 1, 1], [], []>} : vector<32x256xbf16>, vector<256x128xbf16>, vector<32x128xf32> -> vector<32x128xf32>
    %c0_3 = arith.constant 0 : index
    %c0_4 = arith.constant 0 : index
    %4 = vector.load %arg4[%c0_3, %c0_4] : memref<1x128xf32, #tpu.memory_space<vmem>>, vector<1x128xf32>
    %5 = vector.broadcast %4 : vector<1x128xf32> to vector<32x128xf32>
    %6 = arith.addf %3, %5 : vector<32x128xf32>
    %c0_5 = arith.constant 0 : index
    %c0_6 = arith.constant 0 : index
    %7 = vector.load %arg5[%c0_5, %c0_6] : memref<256x128xbf16, #tpu.memory_space<vmem>>, vector<256x128xbf16>
    %cst_7 = arith.constant dense<0.000000e+00> : vector<32x128xf32>
    %8 = tpu.matmul %1, %7, %cst_7 {dimension_numbers = #tpu.dot_dimension_numbers<[1], [0], [0], [1], [0, 0, 1, 1], [], []>} : vector<32x256xbf16>, vector<256x128xbf16>, vector<32x128xf32> -> vector<32x128xf32>
    %c0_8 = arith.constant 0 : index
    %c0_9 = arith.constant 0 : index
    %9 = vector.load %arg6[%c0_8, %c0_9] : memref<1x128xf32, #tpu.memory_space<vmem>>, vector<1x128xf32>
    %10 = vector.broadcast %9 : vector<1x128xf32> to vector<32x128xf32>
    %11 = arith.addf %8, %10 : vector<32x128xf32>
    %c0_10 = arith.constant 0 : index
    %c0_11 = arith.constant 0 : index
    %12 = vector.load %arg7[%c0_10, %c0_11] : memref<256x128xbf16, #tpu.memory_space<vmem>>, vector<256x128xbf16>
    %cst_12 = arith.constant dense<0.000000e+00> : vector<32x128xf32>
    %13 = tpu.matmul %1, %12, %cst_12 {dimension_numbers = #tpu.dot_dimension_numbers<[1], [0], [0], [1], [0, 0, 1, 1], [], []>} : vector<32x256xbf16>, vector<256x128xbf16>, vector<32x128xf32> -> vector<32x128xf32>
    %c0_13 = arith.constant 0 : index
    %c0_14 = arith.constant 0 : index
    %14 = vector.load %arg8[%c0_13, %c0_14] : memref<1x128xf32, #tpu.memory_space<vmem>>, vector<1x128xf32>
    %15 = vector.broadcast %14 : vector<1x128xf32> to vector<32x128xf32>
    %16 = arith.addf %13, %15 : vector<32x128xf32>
    %cst_15 = arith.constant 0.0883883461 : f32
    %17 = vector.broadcast %cst_15 : f32 to vector<32x128xf32>
    %18 = arith.mulf %11, %17 : vector<32x128xf32>
    %c0_16 = arith.constant 0 : index
    %c0_17 = arith.constant 0 : index
    %19 = vector.load %arg2[%c0_16, %c0_17] : memref<32x32xf32, #tpu.memory_space<vmem>>, vector<32x32xf32>
    %cst_18 = arith.constant dense<0.000000e+00> : vector<32x32xf32>
    %20 = tpu.matmul %18, %6, %cst_18 {dimension_numbers = #tpu.dot_dimension_numbers<[1], [1], [0], [0], [0, 0, 1, 0], [], []>} : vector<32x128xf32>, vector<32x128xf32>, vector<32x32xf32> -> vector<32x32xf32>
    %cst_19 = arith.constant 1.000000e+00 : f32
    %21 = vector.broadcast %cst_19 : f32 to vector<32x32xf32>
    %22 = arith.subf %19, %21 : vector<32x32xf32>
    %cst_20 = arith.constant 1.000000e+30 : f32
    %23 = vector.broadcast %cst_20 : f32 to vector<32x32xf32>
    %24 = arith.mulf %22, %23 : vector<32x32xf32>
    %25 = arith.addf %20, %24 : vector<32x32xf32>
    %cst_21 = arith.constant dense<0xFF800000> : vector<32xf32>
    %26 = vector.multi_reduction <maximumf>, %25, %cst_21 [1] : vector<32x32xf32> to vector<32xf32>
    %27 = vector.shape_cast %26 : vector<32xf32> to vector<32x1xf32>
    %28 = vector.broadcast %27 : vector<32x1xf32> to vector<32x32xf32>
    %29 = arith.subf %25, %28 : vector<32x32xf32>
    %30 = math.exp %29 : vector<32x32xf32>
    %31 = arith.mulf %30, %19 : vector<32x32xf32>
    %cst_22 = arith.constant dense<0.000000e+00> : vector<32xf32>
    %32 = vector.multi_reduction <add>, %31, %cst_22 [1] : vector<32x32xf32> to vector<32xf32>
    %33 = vector.shape_cast %32 : vector<32xf32> to vector<32x1xf32>
    %34 = tpu.reciprocal %33 {approx = true} : vector<32x1xf32> -> vector<32x1xf32>
    %35 = vector.broadcast %34 : vector<32x1xf32> to vector<32x32xf32>
    %36 = arith.mulf %31, %35 : vector<32x32xf32>
    %cst_23 = arith.constant dense<0.000000e+00> : vector<32x128xf32>
    %37 = tpu.matmul %36, %16, %cst_23 {dimension_numbers = #tpu.dot_dimension_numbers<[1], [0], [0], [1], [0, 0, 1, 1], [], []>} : vector<32x32xf32>, vector<32x128xf32>, vector<32x128xf32> -> vector<32x128xf32>
    %38 = arith.truncf %37 : vector<32x128xf32> to vector<32x128xbf16>
    %c0_24 = arith.constant 0 : index
    %c0_25 = arith.constant 0 : index
    %39 = vector.load %arg9[%c0_24, %c0_25] : memref<128x256xbf16, #tpu.memory_space<vmem>>, vector<128x256xbf16>
    %cst_26 = arith.constant dense<0.000000e+00> : vector<32x256xf32>
    %40 = tpu.matmul %38, %39, %cst_26 {dimension_numbers = #tpu.dot_dimension_numbers<[1], [0], [0], [1], [0, 0, 1, 1], [], []>} : vector<32x128xbf16>, vector<128x256xbf16>, vector<32x256xf32> -> vector<32x256xf32>
    %c0_27 = arith.constant 0 : index
    %c0_28 = arith.constant 0 : index
    %41 = vector.load %arg10[%c0_27, %c0_28] : memref<1x256xf32, #tpu.memory_space<vmem>>, vector<1x256xf32>
    %42 = vector.broadcast %41 : vector<1x256xf32> to vector<32x256xf32>
    %43 = arith.addf %40, %42 : vector<32x256xf32>
    %44 = arith.addf %0, %43 : vector<32x256xf32>
    %cst_29 = arith.constant dense<0.000000e+00> : vector<256xf32>
    %45 = vector.multi_reduction <add>, %44, %cst_29 [0] : vector<32x256xf32> to vector<256xf32>
    %46 = vector.shape_cast %45 : vector<256xf32> to vector<1x256xf32>
    %cst_30 = arith.constant 3.200000e+01 : f32
    %47 = vector.broadcast %cst_30 : f32 to vector<1x256xf32>
    %48 = arith.divf %46, %47 : vector<1x256xf32>
    %49 = vector.broadcast %48 : vector<1x256xf32> to vector<32x256xf32>
    %50 = arith.subf %44, %49 : vector<32x256xf32>
    %51 = arith.mulf %50, %50 : vector<32x256xf32>
    %cst_31 = arith.constant dense<0.000000e+00> : vector<256xf32>
    %52 = vector.multi_reduction <add>, %51, %cst_31 [0] : vector<32x256xf32> to vector<256xf32>
    %53 = vector.shape_cast %52 : vector<256xf32> to vector<1x256xf32>
    %cst_32 = arith.constant 3.200000e+01 : f32
    %54 = vector.broadcast %cst_32 : f32 to vector<1x256xf32>
    %55 = arith.divf %53, %54 : vector<1x256xf32>
    %56 = vector.broadcast %48 : vector<1x256xf32> to vector<32x256xf32>
    %57 = arith.subf %44, %56 : vector<32x256xf32>
    %cst_33 = arith.constant 9.99999974E-6 : f32
    %58 = vector.broadcast %cst_33 : f32 to vector<1x256xf32>
    %59 = arith.addf %55, %58 : vector<1x256xf32>
    %60 = math.rsqrt %59 : vector<1x256xf32>
    %61 = vector.broadcast %60 : vector<1x256xf32> to vector<32x256xf32>
    %62 = arith.mulf %57, %61 : vector<32x256xf32>
    %c0_34 = arith.constant 0 : index
    %c0_35 = arith.constant 0 : index
    %63 = vector.load %arg11[%c0_34, %c0_35] : memref<32x256xf32, #tpu.memory_space<vmem>>, vector<32x256xf32>
    tpu.vector_store %arg11[%c0_34, %c0_35], %62 {strides = array<i32>} : memref<32x256xf32, #tpu.memory_space<vmem>>, vector<32x256xf32>,
    return
  }
  func.func @transform_0(%arg0: i32) -> (i32, i32) {
    %c0_i32 = arith.constant 0 : i32
    %c0_i32_0 = arith.constant 0 : i32
    %c0_i32_1 = arith.constant 0 : i32
    return %c0_i32, %c0_i32_0 : i32, i32
  }
  func.func @transform_1(%arg0: i32) -> (i32, i32) {
    %c0_i32 = arith.constant 0 : i32
    %c0_i32_0 = arith.constant 0 : i32
    %c0_i32_1 = arith.constant 0 : i32
    return %c0_i32, %c0_i32_0 : i32, i32
  }
  func.func @transform_2(%arg0: i32) -> (i32, i32) {
    %c0_i32 = arith.constant 0 : i32
    %c0_i32_0 = arith.constant 0 : i32
    %c0_i32_1 = arith.constant 0 : i32
    return %c0_i32, %c0_i32_0 : i32, i32
  }
  func.func @transform_3(%arg0: i32) -> (i32, i32) {
    %c0_i32 = arith.constant 0 : i32
    %c0_i32_0 = arith.constant 0 : i32
    %c0_i32_1 = arith.constant 0 : i32
    return %c0_i32, %c0_i32_0 : i32, i32
  }
  func.func @transform_4(%arg0: i32) -> (i32, i32) {
    %c0_i32 = arith.constant 0 : i32
    %c0_i32_0 = arith.constant 0 : i32
    %c0_i32_1 = arith.constant 0 : i32
    return %c0_i32, %c0_i32_0 : i32, i32
  }
  func.func @transform_5(%arg0: i32) -> (i32, i32) {
    %c0_i32 = arith.constant 0 : i32
    %c0_i32_0 = arith.constant 0 : i32
    %c0_i32_1 = arith.constant 0 : i32
    return %c0_i32, %c0_i32_0 : i32, i32
  }
  func.func @transform_6(%arg0: i32) -> (i32, i32) {
    %c0_i32 = arith.constant 0 : i32
    %c0_i32_0 = arith.constant 0 : i32
    %c0_i32_1 = arith.constant 0 : i32
    return %c0_i32, %c0_i32_0 : i32, i32
  }
  func.func @transform_7(%arg0: i32) -> (i32, i32) {
    %c0_i32 = arith.constant 0 : i32
    %c0_i32_0 = arith.constant 0 : i32
    %c0_i32_1 = arith.constant 0 : i32
    return %c0_i32, %c0_i32_0 : i32, i32
  }
  func.func @transform_8(%arg0: i32) -> (i32, i32) {
    %c0_i32 = arith.constant 0 : i32
    %c0_i32_0 = arith.constant 0 : i32
    %c0_i32_1 = arith.constant 0 : i32
    return %c0_i32, %c0_i32_0 : i32, i32
  }
  func.func @transform_9(%arg0: i32) -> (i32, i32) {
    %c0_i32 = arith.constant 0 : i32
    %c0_i32_0 = arith.constant 0 : i32
    %c0_i32_1 = arith.constant 0 : i32
    return %c0_i32, %c0_i32_0 : i32, i32
  }
  func.func @transform_10(%arg0: i32) -> (i32, i32) {
    %c0_i32 = arith.constant 0 : i32
    %c0_i32_0 = arith.constant 0 : i32
    %c0_i32_1 = arith.constant 0 : i32
    return %c0_i32, %c0_i32_0 : i32, i32
  }
}

module attributes {stable_mosaic.version = 11 : i64} {
  func.func @_mm_bias_kernel(%arg0: i32, %arg1: i32, %arg2: memref<32x384xbf16, #tpu.memory_space<vmem>>, %arg3: memref<384x128xbf16, #tpu.memory_space<vmem>>, %arg4: memref<1x128xf32, #tpu.memory_space<vmem>>, %arg5: memref<32x128xf32, #tpu.memory_space<vmem>>, %arg6: memref<32x128xf32, #tpu.memory_space<vmem>>) attributes {dimension_semantics = [#tpu.dimension_semantics<parallel>, #tpu.dimension_semantics<arbitrary>], iteration_bounds = array<i64: 1, 3>, scalar_prefetch = 0 : i64, scratch_operands = 1 : i64, tpu.core_type = #tpu.core_type<tc>, window_params = [{transform_indices = @transform_0, window_bounds = array<i64: 32, 384>}, {transform_indices = @transform_1, window_bounds = array<i64: 384, 128>}, {pipeline_mode = #tpu.pipeline_mode<synchronous>, transform_indices = @transform_2, window_bounds = array<i64: 1, 128>}, {transform_indices = @transform_3, window_bounds = array<i64: 32, 128>}]} {
    %c0_i32 = arith.constant 0 : i32
    %0 = arith.cmpi eq, %arg1, %c0_i32 : i32
    %1 = arith.extui %0 : i1 to i32
    %c0_i32_0 = arith.constant 0 : i32
    %2 = arith.cmpi ne, %1, %c0_i32_0 : i32
    scf.if %2 {
      %cst_9 = arith.constant 0.000000e+00 : f32
      %12 = vector.broadcast %cst_9 : f32 to vector<32x128xf32>
      %c0_10 = arith.constant 0 : index
      %c0_11 = arith.constant 0 : index
      %13 = vector.load %arg6[%c0_10, %c0_11] : memref<32x128xf32, #tpu.memory_space<vmem>>, vector<32x128xf32>
      tpu.vector_store %arg6[%c0_10, %c0_11], %12 {strides = array<i32>} : memref<32x128xf32, #tpu.memory_space<vmem>>, vector<32x128xf32>,
    } else {
    }
    %c0 = arith.constant 0 : index
    %c0_1 = arith.constant 0 : index
    %3 = vector.load %arg6[%c0, %c0_1] : memref<32x128xf32, #tpu.memory_space<vmem>>, vector<32x128xf32>
    %c0_2 = arith.constant 0 : index
    %c0_3 = arith.constant 0 : index
    %4 = vector.load %arg2[%c0_2, %c0_3] : memref<32x384xbf16, #tpu.memory_space<vmem>>, vector<32x384xbf16>
    %c0_4 = arith.constant 0 : index
    %c0_5 = arith.constant 0 : index
    %5 = vector.load %arg3[%c0_4, %c0_5] : memref<384x128xbf16, #tpu.memory_space<vmem>>, vector<384x128xbf16>
    %cst = arith.constant dense<0.000000e+00> : vector<32x128xf32>
    %6 = tpu.matmul %4, %5, %cst {dimension_numbers = #tpu.dot_dimension_numbers<[1], [0], [0], [1], [0, 0, 1, 1], [], []>} : vector<32x384xbf16>, vector<384x128xbf16>, vector<32x128xf32> -> vector<32x128xf32>
    %7 = arith.addf %3, %6 : vector<32x128xf32>
    %c0_6 = arith.constant 0 : index
    %c0_7 = arith.constant 0 : index
    %8 = vector.load %arg6[%c0_6, %c0_7] : memref<32x128xf32, #tpu.memory_space<vmem>>, vector<32x128xf32>
    tpu.vector_store %arg6[%c0_6, %c0_7], %7 {strides = array<i32>} : memref<32x128xf32, #tpu.memory_space<vmem>>, vector<32x128xf32>,
    %c2_i32 = arith.constant 2 : i32
    %9 = arith.cmpi eq, %arg1, %c2_i32 : i32
    %10 = arith.extui %9 : i1 to i32
    %c0_i32_8 = arith.constant 0 : i32
    %11 = arith.cmpi ne, %10, %c0_i32_8 : i32
    scf.if %11 {
      %c0_9 = arith.constant 0 : index
      %c0_10 = arith.constant 0 : index
      %12 = vector.load %arg6[%c0_9, %c0_10] : memref<32x128xf32, #tpu.memory_space<vmem>>, vector<32x128xf32>
      %c0_11 = arith.constant 0 : index
      %c0_12 = arith.constant 0 : index
      %13 = vector.load %arg4[%c0_11, %c0_12] : memref<1x128xf32, #tpu.memory_space<vmem>>, vector<1x128xf32>
      %14 = vector.broadcast %13 : vector<1x128xf32> to vector<32x128xf32>
      %15 = arith.addf %12, %14 : vector<32x128xf32>
      %cst_13 = arith.constant 0.000000e+00 : f32
      %16 = vector.broadcast %cst_13 : f32 to vector<32x128xf32>
      %17 = arith.cmpf oge, %15, %16 : vector<32x128xf32>
      %cst_14 = arith.constant 1.000000e-01 : f32
      %18 = vector.broadcast %cst_14 : f32 to vector<32x128xf32>
      %19 = arith.mulf %15, %18 : vector<32x128xf32>
      %20 = arith.select %17, %15, %19 : vector<32x128xi1>, vector<32x128xf32>
      %c0_15 = arith.constant 0 : index
      %c0_16 = arith.constant 0 : index
      %21 = vector.load %arg5[%c0_15, %c0_16] : memref<32x128xf32, #tpu.memory_space<vmem>>, vector<32x128xf32>
      tpu.vector_store %arg5[%c0_15, %c0_16], %20 {strides = array<i32>} : memref<32x128xf32, #tpu.memory_space<vmem>>, vector<32x128xf32>,
    } else {
    }
    return
  }
  func.func @transform_0(%arg0: i32, %arg1: i32) -> (i32, i32) {
    %c0_i32 = arith.constant 0 : i32
    return %arg0, %arg1 : i32, i32
  }
  func.func @transform_1(%arg0: i32, %arg1: i32) -> (i32, i32) {
    %c0_i32 = arith.constant 0 : i32
    %c0_i32_0 = arith.constant 0 : i32
    return %arg1, %c0_i32 : i32, i32
  }
  func.func @transform_2(%arg0: i32, %arg1: i32) -> (i32, i32) {
    %c0_i32 = arith.constant 0 : i32
    %c0_i32_0 = arith.constant 0 : i32
    %c0_i32_1 = arith.constant 0 : i32
    return %c0_i32, %c0_i32_0 : i32, i32
  }
  func.func @transform_3(%arg0: i32, %arg1: i32) -> (i32, i32) {
    %c0_i32 = arith.constant 0 : i32
    %c0_i32_0 = arith.constant 0 : i32
    return %arg0, %c0_i32 : i32, i32
  }
}

module attributes {stable_mosaic.version = 11 : i64} {
  func.func @_mm_bias_kernel(%arg0: i32, %arg1: i32, %arg2: memref<32x256xbf16, #tpu.memory_space<vmem>>, %arg3: memref<256x256xbf16, #tpu.memory_space<vmem>>, %arg4: memref<1x256xf32, #tpu.memory_space<vmem>>, %arg5: memref<32x256xf32, #tpu.memory_space<vmem>>, %arg6: memref<32x256xf32, #tpu.memory_space<vmem>>) attributes {dimension_semantics = [#tpu.dimension_semantics<parallel>, #tpu.dimension_semantics<arbitrary>], iteration_bounds = array<i64: 1, 1>, scalar_prefetch = 0 : i64, scratch_operands = 1 : i64, tpu.core_type = #tpu.core_type<tc>, window_params = [{transform_indices = @transform_0, window_bounds = array<i64: 32, 256>}, {transform_indices = @transform_1, window_bounds = array<i64: 256, 256>}, {pipeline_mode = #tpu.pipeline_mode<synchronous>, transform_indices = @transform_2, window_bounds = array<i64: 1, 256>}, {transform_indices = @transform_3, window_bounds = array<i64: 32, 256>}]} {
    %c0_i32 = arith.constant 0 : i32
    %0 = arith.cmpi eq, %arg1, %c0_i32 : i32
    %1 = arith.extui %0 : i1 to i32
    %c0_i32_0 = arith.constant 0 : i32
    %2 = arith.cmpi ne, %1, %c0_i32_0 : i32
    scf.if %2 {
      %cst_10 = arith.constant 0.000000e+00 : f32
      %12 = vector.broadcast %cst_10 : f32 to vector<32x256xf32>
      %c0_11 = arith.constant 0 : index
      %c0_12 = arith.constant 0 : index
      %13 = vector.load %arg6[%c0_11, %c0_12] : memref<32x256xf32, #tpu.memory_space<vmem>>, vector<32x256xf32>
      tpu.vector_store %arg6[%c0_11, %c0_12], %12 {strides = array<i32>} : memref<32x256xf32, #tpu.memory_space<vmem>>, vector<32x256xf32>,
    } else {
    }
    %c0 = arith.constant 0 : index
    %c0_1 = arith.constant 0 : index
    %3 = vector.load %arg6[%c0, %c0_1] : memref<32x256xf32, #tpu.memory_space<vmem>>, vector<32x256xf32>
    %c0_2 = arith.constant 0 : index
    %c0_3 = arith.constant 0 : index
    %4 = vector.load %arg2[%c0_2, %c0_3] : memref<32x256xbf16, #tpu.memory_space<vmem>>, vector<32x256xbf16>
    %c0_4 = arith.constant 0 : index
    %c0_5 = arith.constant 0 : index
    %5 = vector.load %arg3[%c0_4, %c0_5] : memref<256x256xbf16, #tpu.memory_space<vmem>>, vector<256x256xbf16>
    %cst = arith.constant dense<0.000000e+00> : vector<32x256xf32>
    %6 = tpu.matmul %4, %5, %cst {dimension_numbers = #tpu.dot_dimension_numbers<[1], [0], [0], [1], [0, 0, 1, 1], [], []>} : vector<32x256xbf16>, vector<256x256xbf16>, vector<32x256xf32> -> vector<32x256xf32>
    %7 = arith.addf %3, %6 : vector<32x256xf32>
    %c0_6 = arith.constant 0 : index
    %c0_7 = arith.constant 0 : index
    %8 = vector.load %arg6[%c0_6, %c0_7] : memref<32x256xf32, #tpu.memory_space<vmem>>, vector<32x256xf32>
    tpu.vector_store %arg6[%c0_6, %c0_7], %7 {strides = array<i32>} : memref<32x256xf32, #tpu.memory_space<vmem>>, vector<32x256xf32>,
    %c0_i32_8 = arith.constant 0 : i32
    %9 = arith.cmpi eq, %arg1, %c0_i32_8 : i32
    %10 = arith.extui %9 : i1 to i32
    %c0_i32_9 = arith.constant 0 : i32
    %11 = arith.cmpi ne, %10, %c0_i32_9 : i32
    scf.if %11 {
      %c0_10 = arith.constant 0 : index
      %c0_11 = arith.constant 0 : index
      %12 = vector.load %arg6[%c0_10, %c0_11] : memref<32x256xf32, #tpu.memory_space<vmem>>, vector<32x256xf32>
      %c0_12 = arith.constant 0 : index
      %c0_13 = arith.constant 0 : index
      %13 = vector.load %arg4[%c0_12, %c0_13] : memref<1x256xf32, #tpu.memory_space<vmem>>, vector<1x256xf32>
      %14 = vector.broadcast %13 : vector<1x256xf32> to vector<32x256xf32>
      %15 = arith.addf %12, %14 : vector<32x256xf32>
      %cst_14 = arith.constant 0.000000e+00 : f32
      %16 = vector.broadcast %cst_14 : f32 to vector<32x256xf32>
      %17 = arith.cmpf oge, %15, %16 : vector<32x256xf32>
      %cst_15 = arith.constant 1.000000e-01 : f32
      %18 = vector.broadcast %cst_15 : f32 to vector<32x256xf32>
      %19 = arith.mulf %15, %18 : vector<32x256xf32>
      %20 = arith.select %17, %15, %19 : vector<32x256xi1>, vector<32x256xf32>
      %c0_16 = arith.constant 0 : index
      %c0_17 = arith.constant 0 : index
      %21 = vector.load %arg5[%c0_16, %c0_17] : memref<32x256xf32, #tpu.memory_space<vmem>>, vector<32x256xf32>
      tpu.vector_store %arg5[%c0_16, %c0_17], %20 {strides = array<i32>} : memref<32x256xf32, #tpu.memory_space<vmem>>, vector<32x256xf32>,
    } else {
    }
    return
  }
  func.func @transform_0(%arg0: i32, %arg1: i32) -> (i32, i32) {
    %c0_i32 = arith.constant 0 : i32
    return %arg0, %arg1 : i32, i32
  }
  func.func @transform_1(%arg0: i32, %arg1: i32) -> (i32, i32) {
    %c0_i32 = arith.constant 0 : i32
    %c0_i32_0 = arith.constant 0 : i32
    return %arg1, %c0_i32 : i32, i32
  }
  func.func @transform_2(%arg0: i32, %arg1: i32) -> (i32, i32) {
    %c0_i32 = arith.constant 0 : i32
    %c0_i32_0 = arith.constant 0 : i32
    %c0_i32_1 = arith.constant 0 : i32
    return %c0_i32, %c0_i32_0 : i32, i32
  }
  func.func @transform_3(%arg0: i32, %arg1: i32) -> (i32, i32) {
    %c0_i32 = arith.constant 0 : i32
    %c0_i32_0 = arith.constant 0 : i32
    return %arg0, %c0_i32 : i32, i32
  }
}

module attributes {stable_mosaic.version = 11 : i64} {
  func.func @_atten_bn_kernel(%arg0: i32, %arg1: memref<32x512xf32, #tpu.memory_space<vmem>>, %arg2: memref<32x32xf32, #tpu.memory_space<vmem>>, %arg3: memref<512x256xbf16, #tpu.memory_space<vmem>>, %arg4: memref<1x256xf32, #tpu.memory_space<vmem>>, %arg5: memref<512x256xbf16, #tpu.memory_space<vmem>>, %arg6: memref<1x256xf32, #tpu.memory_space<vmem>>, %arg7: memref<512x256xbf16, #tpu.memory_space<vmem>>, %arg8: memref<1x256xf32, #tpu.memory_space<vmem>>, %arg9: memref<256x512xbf16, #tpu.memory_space<vmem>>, %arg10: memref<1x512xf32, #tpu.memory_space<vmem>>, %arg11: memref<32x512xf32, #tpu.memory_space<vmem>>) attributes {dimension_semantics = [#tpu.dimension_semantics<arbitrary>], iteration_bounds = array<i64: 1>, scalar_prefetch = 0 : i64, scratch_operands = 0 : i64, tpu.core_type = #tpu.core_type<tc>, window_params = [{pipeline_mode = #tpu.pipeline_mode<synchronous>, transform_indices = @transform_0, window_bounds = array<i64: 32, 512>}, {pipeline_mode = #tpu.pipeline_mode<synchronous>, transform_indices = @transform_1, window_bounds = array<i64: 32, 32>}, {pipeline_mode = #tpu.pipeline_mode<synchronous>, transform_indices = @transform_2, window_bounds = array<i64: 512, 256>}, {pipeline_mode = #tpu.pipeline_mode<synchronous>, transform_indices = @transform_3, window_bounds = array<i64: 1, 256>}, {pipeline_mode = #tpu.pipeline_mode<synchronous>, transform_indices = @transform_4, window_bounds = array<i64: 512, 256>}, {pipeline_mode = #tpu.pipeline_mode<synchronous>, transform_indices = @transform_5, window_bounds = array<i64: 1, 256>}, {pipeline_mode = #tpu.pipeline_mode<synchronous>, transform_indices = @transform_6, window_bounds = array<i64: 512, 256>}, {pipeline_mode = #tpu.pipeline_mode<synchronous>, transform_indices = @transform_7, window_bounds = array<i64: 1, 256>}, {pipeline_mode = #tpu.pipeline_mode<synchronous>, transform_indices = @transform_8, window_bounds = array<i64: 256, 512>}, {pipeline_mode = #tpu.pipeline_mode<synchronous>, transform_indices = @transform_9, window_bounds = array<i64: 1, 512>}, {pipeline_mode = #tpu.pipeline_mode<synchronous>, transform_indices = @transform_10, window_bounds = array<i64: 32, 512>}]} {
    %c0 = arith.constant 0 : index
    %c0_0 = arith.constant 0 : index
    %0 = vector.load %arg1[%c0, %c0_0] : memref<32x512xf32, #tpu.memory_space<vmem>>, vector<32x512xf32>
    %1 = arith.truncf %0 : vector<32x512xf32> to vector<32x512xbf16>
    %c0_1 = arith.constant 0 : index
    %c0_2 = arith.constant 0 : index
    %2 = vector.load %arg3[%c0_1, %c0_2] : memref<512x256xbf16, #tpu.memory_space<vmem>>, vector<512x256xbf16>
    %cst = arith.constant dense<0.000000e+00> : vector<32x256xf32>
    %3 = tpu.matmul %1, %2, %cst {dimension_numbers = #tpu.dot_dimension_numbers<[1], [0], [0], [1], [0, 0, 1, 1], [], []>} : vector<32x512xbf16>, vector<512x256xbf16>, vector<32x256xf32> -> vector<32x256xf32>
    %c0_3 = arith.constant 0 : index
    %c0_4 = arith.constant 0 : index
    %4 = vector.load %arg4[%c0_3, %c0_4] : memref<1x256xf32, #tpu.memory_space<vmem>>, vector<1x256xf32>
    %5 = vector.broadcast %4 : vector<1x256xf32> to vector<32x256xf32>
    %6 = arith.addf %3, %5 : vector<32x256xf32>
    %c0_5 = arith.constant 0 : index
    %c0_6 = arith.constant 0 : index
    %7 = vector.load %arg5[%c0_5, %c0_6] : memref<512x256xbf16, #tpu.memory_space<vmem>>, vector<512x256xbf16>
    %cst_7 = arith.constant dense<0.000000e+00> : vector<32x256xf32>
    %8 = tpu.matmul %1, %7, %cst_7 {dimension_numbers = #tpu.dot_dimension_numbers<[1], [0], [0], [1], [0, 0, 1, 1], [], []>} : vector<32x512xbf16>, vector<512x256xbf16>, vector<32x256xf32> -> vector<32x256xf32>
    %c0_8 = arith.constant 0 : index
    %c0_9 = arith.constant 0 : index
    %9 = vector.load %arg6[%c0_8, %c0_9] : memref<1x256xf32, #tpu.memory_space<vmem>>, vector<1x256xf32>
    %10 = vector.broadcast %9 : vector<1x256xf32> to vector<32x256xf32>
    %11 = arith.addf %8, %10 : vector<32x256xf32>
    %c0_10 = arith.constant 0 : index
    %c0_11 = arith.constant 0 : index
    %12 = vector.load %arg7[%c0_10, %c0_11] : memref<512x256xbf16, #tpu.memory_space<vmem>>, vector<512x256xbf16>
    %cst_12 = arith.constant dense<0.000000e+00> : vector<32x256xf32>
    %13 = tpu.matmul %1, %12, %cst_12 {dimension_numbers = #tpu.dot_dimension_numbers<[1], [0], [0], [1], [0, 0, 1, 1], [], []>} : vector<32x512xbf16>, vector<512x256xbf16>, vector<32x256xf32> -> vector<32x256xf32>
    %c0_13 = arith.constant 0 : index
    %c0_14 = arith.constant 0 : index
    %14 = vector.load %arg8[%c0_13, %c0_14] : memref<1x256xf32, #tpu.memory_space<vmem>>, vector<1x256xf32>
    %15 = vector.broadcast %14 : vector<1x256xf32> to vector<32x256xf32>
    %16 = arith.addf %13, %15 : vector<32x256xf32>
    %cst_15 = arith.constant 6.250000e-02 : f32
    %17 = vector.broadcast %cst_15 : f32 to vector<32x256xf32>
    %18 = arith.mulf %11, %17 : vector<32x256xf32>
    %c0_16 = arith.constant 0 : index
    %c0_17 = arith.constant 0 : index
    %19 = vector.load %arg2[%c0_16, %c0_17] : memref<32x32xf32, #tpu.memory_space<vmem>>, vector<32x32xf32>
    %cst_18 = arith.constant dense<0.000000e+00> : vector<32x32xf32>
    %20 = tpu.matmul %18, %6, %cst_18 {dimension_numbers = #tpu.dot_dimension_numbers<[1], [1], [0], [0], [0, 0, 1, 0], [], []>} : vector<32x256xf32>, vector<32x256xf32>, vector<32x32xf32> -> vector<32x32xf32>
    %cst_19 = arith.constant 1.000000e+00 : f32
    %21 = vector.broadcast %cst_19 : f32 to vector<32x32xf32>
    %22 = arith.subf %19, %21 : vector<32x32xf32>
    %cst_20 = arith.constant 1.000000e+30 : f32
    %23 = vector.broadcast %cst_20 : f32 to vector<32x32xf32>
    %24 = arith.mulf %22, %23 : vector<32x32xf32>
    %25 = arith.addf %20, %24 : vector<32x32xf32>
    %cst_21 = arith.constant dense<0xFF800000> : vector<32xf32>
    %26 = vector.multi_reduction <maximumf>, %25, %cst_21 [1] : vector<32x32xf32> to vector<32xf32>
    %27 = vector.shape_cast %26 : vector<32xf32> to vector<32x1xf32>
    %28 = vector.broadcast %27 : vector<32x1xf32> to vector<32x32xf32>
    %29 = arith.subf %25, %28 : vector<32x32xf32>
    %30 = math.exp %29 : vector<32x32xf32>
    %31 = arith.mulf %30, %19 : vector<32x32xf32>
    %cst_22 = arith.constant dense<0.000000e+00> : vector<32xf32>
    %32 = vector.multi_reduction <add>, %31, %cst_22 [1] : vector<32x32xf32> to vector<32xf32>
    %33 = vector.shape_cast %32 : vector<32xf32> to vector<32x1xf32>
    %34 = tpu.reciprocal %33 {approx = true} : vector<32x1xf32> -> vector<32x1xf32>
    %35 = vector.broadcast %34 : vector<32x1xf32> to vector<32x32xf32>
    %36 = arith.mulf %31, %35 : vector<32x32xf32>
    %cst_23 = arith.constant dense<0.000000e+00> : vector<32x256xf32>
    %37 = tpu.matmul %36, %16, %cst_23 {dimension_numbers = #tpu.dot_dimension_numbers<[1], [0], [0], [1], [0, 0, 1, 1], [], []>} : vector<32x32xf32>, vector<32x256xf32>, vector<32x256xf32> -> vector<32x256xf32>
    %38 = arith.truncf %37 : vector<32x256xf32> to vector<32x256xbf16>
    %c0_24 = arith.constant 0 : index
    %c0_25 = arith.constant 0 : index
    %39 = vector.load %arg9[%c0_24, %c0_25] : memref<256x512xbf16, #tpu.memory_space<vmem>>, vector<256x512xbf16>
    %cst_26 = arith.constant dense<0.000000e+00> : vector<32x512xf32>
    %40 = tpu.matmul %38, %39, %cst_26 {dimension_numbers = #tpu.dot_dimension_numbers<[1], [0], [0], [1], [0, 0, 1, 1], [], []>} : vector<32x256xbf16>, vector<256x512xbf16>, vector<32x512xf32> -> vector<32x512xf32>
    %c0_27 = arith.constant 0 : index
    %c0_28 = arith.constant 0 : index
    %41 = vector.load %arg10[%c0_27, %c0_28] : memref<1x512xf32, #tpu.memory_space<vmem>>, vector<1x512xf32>
    %42 = vector.broadcast %41 : vector<1x512xf32> to vector<32x512xf32>
    %43 = arith.addf %40, %42 : vector<32x512xf32>
    %44 = arith.addf %0, %43 : vector<32x512xf32>
    %cst_29 = arith.constant dense<0.000000e+00> : vector<512xf32>
    %45 = vector.multi_reduction <add>, %44, %cst_29 [0] : vector<32x512xf32> to vector<512xf32>
    %46 = vector.shape_cast %45 : vector<512xf32> to vector<1x512xf32>
    %cst_30 = arith.constant 3.200000e+01 : f32
    %47 = vector.broadcast %cst_30 : f32 to vector<1x512xf32>
    %48 = arith.divf %46, %47 : vector<1x512xf32>
    %49 = vector.broadcast %48 : vector<1x512xf32> to vector<32x512xf32>
    %50 = arith.subf %44, %49 : vector<32x512xf32>
    %51 = arith.mulf %50, %50 : vector<32x512xf32>
    %cst_31 = arith.constant dense<0.000000e+00> : vector<512xf32>
    %52 = vector.multi_reduction <add>, %51, %cst_31 [0] : vector<32x512xf32> to vector<512xf32>
    %53 = vector.shape_cast %52 : vector<512xf32> to vector<1x512xf32>
    %cst_32 = arith.constant 3.200000e+01 : f32
    %54 = vector.broadcast %cst_32 : f32 to vector<1x512xf32>
    %55 = arith.divf %53, %54 : vector<1x512xf32>
    %56 = vector.broadcast %48 : vector<1x512xf32> to vector<32x512xf32>
    %57 = arith.subf %44, %56 : vector<32x512xf32>
    %cst_33 = arith.constant 9.99999974E-6 : f32
    %58 = vector.broadcast %cst_33 : f32 to vector<1x512xf32>
    %59 = arith.addf %55, %58 : vector<1x512xf32>
    %60 = math.rsqrt %59 : vector<1x512xf32>
    %61 = vector.broadcast %60 : vector<1x512xf32> to vector<32x512xf32>
    %62 = arith.mulf %57, %61 : vector<32x512xf32>
    %c0_34 = arith.constant 0 : index
    %c0_35 = arith.constant 0 : index
    %63 = vector.load %arg11[%c0_34, %c0_35] : memref<32x512xf32, #tpu.memory_space<vmem>>, vector<32x512xf32>
    tpu.vector_store %arg11[%c0_34, %c0_35], %62 {strides = array<i32>} : memref<32x512xf32, #tpu.memory_space<vmem>>, vector<32x512xf32>,
    return
  }
  func.func @transform_0(%arg0: i32) -> (i32, i32) {
    %c0_i32 = arith.constant 0 : i32
    %c0_i32_0 = arith.constant 0 : i32
    %c0_i32_1 = arith.constant 0 : i32
    return %c0_i32, %c0_i32_0 : i32, i32
  }
  func.func @transform_1(%arg0: i32) -> (i32, i32) {
    %c0_i32 = arith.constant 0 : i32
    %c0_i32_0 = arith.constant 0 : i32
    %c0_i32_1 = arith.constant 0 : i32
    return %c0_i32, %c0_i32_0 : i32, i32
  }
  func.func @transform_2(%arg0: i32) -> (i32, i32) {
    %c0_i32 = arith.constant 0 : i32
    %c0_i32_0 = arith.constant 0 : i32
    %c0_i32_1 = arith.constant 0 : i32
    return %c0_i32, %c0_i32_0 : i32, i32
  }
  func.func @transform_3(%arg0: i32) -> (i32, i32) {
    %c0_i32 = arith.constant 0 : i32
    %c0_i32_0 = arith.constant 0 : i32
    %c0_i32_1 = arith.constant 0 : i32
    return %c0_i32, %c0_i32_0 : i32, i32
  }
  func.func @transform_4(%arg0: i32) -> (i32, i32) {
    %c0_i32 = arith.constant 0 : i32
    %c0_i32_0 = arith.constant 0 : i32
    %c0_i32_1 = arith.constant 0 : i32
    return %c0_i32, %c0_i32_0 : i32, i32
  }
  func.func @transform_5(%arg0: i32) -> (i32, i32) {
    %c0_i32 = arith.constant 0 : i32
    %c0_i32_0 = arith.constant 0 : i32
    %c0_i32_1 = arith.constant 0 : i32
    return %c0_i32, %c0_i32_0 : i32, i32
  }
  func.func @transform_6(%arg0: i32) -> (i32, i32) {
    %c0_i32 = arith.constant 0 : i32
    %c0_i32_0 = arith.constant 0 : i32
    %c0_i32_1 = arith.constant 0 : i32
    return %c0_i32, %c0_i32_0 : i32, i32
  }
  func.func @transform_7(%arg0: i32) -> (i32, i32) {
    %c0_i32 = arith.constant 0 : i32
    %c0_i32_0 = arith.constant 0 : i32
    %c0_i32_1 = arith.constant 0 : i32
    return %c0_i32, %c0_i32_0 : i32, i32
  }
  func.func @transform_8(%arg0: i32) -> (i32, i32) {
    %c0_i32 = arith.constant 0 : i32
    %c0_i32_0 = arith.constant 0 : i32
    %c0_i32_1 = arith.constant 0 : i32
    return %c0_i32, %c0_i32_0 : i32, i32
  }
  func.func @transform_9(%arg0: i32) -> (i32, i32) {
    %c0_i32 = arith.constant 0 : i32
    %c0_i32_0 = arith.constant 0 : i32
    %c0_i32_1 = arith.constant 0 : i32
    return %c0_i32, %c0_i32_0 : i32, i32
  }
  func.func @transform_10(%arg0: i32) -> (i32, i32) {
    %c0_i32 = arith.constant 0 : i32
    %c0_i32_0 = arith.constant 0 : i32
    %c0_i32_1 = arith.constant 0 : i32
    return %c0_i32, %c0_i32_0 : i32, i32
  }
}

module attributes {stable_mosaic.version = 11 : i64} {
  func.func @_mm_bias_kernel(%arg0: i32, %arg1: i32, %arg2: memref<32x768xbf16, #tpu.memory_space<vmem>>, %arg3: memref<768x256xbf16, #tpu.memory_space<vmem>>, %arg4: memref<1x256xf32, #tpu.memory_space<vmem>>, %arg5: memref<32x256xf32, #tpu.memory_space<vmem>>, %arg6: memref<32x256xf32, #tpu.memory_space<vmem>>) attributes {dimension_semantics = [#tpu.dimension_semantics<parallel>, #tpu.dimension_semantics<arbitrary>], iteration_bounds = array<i64: 1, 3>, scalar_prefetch = 0 : i64, scratch_operands = 1 : i64, tpu.core_type = #tpu.core_type<tc>, window_params = [{transform_indices = @transform_0, window_bounds = array<i64: 32, 768>}, {transform_indices = @transform_1, window_bounds = array<i64: 768, 256>}, {pipeline_mode = #tpu.pipeline_mode<synchronous>, transform_indices = @transform_2, window_bounds = array<i64: 1, 256>}, {transform_indices = @transform_3, window_bounds = array<i64: 32, 256>}]} {
    %c0_i32 = arith.constant 0 : i32
    %0 = arith.cmpi eq, %arg1, %c0_i32 : i32
    %1 = arith.extui %0 : i1 to i32
    %c0_i32_0 = arith.constant 0 : i32
    %2 = arith.cmpi ne, %1, %c0_i32_0 : i32
    scf.if %2 {
      %cst_9 = arith.constant 0.000000e+00 : f32
      %12 = vector.broadcast %cst_9 : f32 to vector<32x256xf32>
      %c0_10 = arith.constant 0 : index
      %c0_11 = arith.constant 0 : index
      %13 = vector.load %arg6[%c0_10, %c0_11] : memref<32x256xf32, #tpu.memory_space<vmem>>, vector<32x256xf32>
      tpu.vector_store %arg6[%c0_10, %c0_11], %12 {strides = array<i32>} : memref<32x256xf32, #tpu.memory_space<vmem>>, vector<32x256xf32>,
    } else {
    }
    %c0 = arith.constant 0 : index
    %c0_1 = arith.constant 0 : index
    %3 = vector.load %arg6[%c0, %c0_1] : memref<32x256xf32, #tpu.memory_space<vmem>>, vector<32x256xf32>
    %c0_2 = arith.constant 0 : index
    %c0_3 = arith.constant 0 : index
    %4 = vector.load %arg2[%c0_2, %c0_3] : memref<32x768xbf16, #tpu.memory_space<vmem>>, vector<32x768xbf16>
    %c0_4 = arith.constant 0 : index
    %c0_5 = arith.constant 0 : index
    %5 = vector.load %arg3[%c0_4, %c0_5] : memref<768x256xbf16, #tpu.memory_space<vmem>>, vector<768x256xbf16>
    %cst = arith.constant dense<0.000000e+00> : vector<32x256xf32>
    %6 = tpu.matmul %4, %5, %cst {dimension_numbers = #tpu.dot_dimension_numbers<[1], [0], [0], [1], [0, 0, 1, 1], [], []>} : vector<32x768xbf16>, vector<768x256xbf16>, vector<32x256xf32> -> vector<32x256xf32>
    %7 = arith.addf %3, %6 : vector<32x256xf32>
    %c0_6 = arith.constant 0 : index
    %c0_7 = arith.constant 0 : index
    %8 = vector.load %arg6[%c0_6, %c0_7] : memref<32x256xf32, #tpu.memory_space<vmem>>, vector<32x256xf32>
    tpu.vector_store %arg6[%c0_6, %c0_7], %7 {strides = array<i32>} : memref<32x256xf32, #tpu.memory_space<vmem>>, vector<32x256xf32>,
    %c2_i32 = arith.constant 2 : i32
    %9 = arith.cmpi eq, %arg1, %c2_i32 : i32
    %10 = arith.extui %9 : i1 to i32
    %c0_i32_8 = arith.constant 0 : i32
    %11 = arith.cmpi ne, %10, %c0_i32_8 : i32
    scf.if %11 {
      %c0_9 = arith.constant 0 : index
      %c0_10 = arith.constant 0 : index
      %12 = vector.load %arg6[%c0_9, %c0_10] : memref<32x256xf32, #tpu.memory_space<vmem>>, vector<32x256xf32>
      %c0_11 = arith.constant 0 : index
      %c0_12 = arith.constant 0 : index
      %13 = vector.load %arg4[%c0_11, %c0_12] : memref<1x256xf32, #tpu.memory_space<vmem>>, vector<1x256xf32>
      %14 = vector.broadcast %13 : vector<1x256xf32> to vector<32x256xf32>
      %15 = arith.addf %12, %14 : vector<32x256xf32>
      %cst_13 = arith.constant 0.000000e+00 : f32
      %16 = vector.broadcast %cst_13 : f32 to vector<32x256xf32>
      %17 = arith.cmpf oge, %15, %16 : vector<32x256xf32>
      %cst_14 = arith.constant 1.000000e-01 : f32
      %18 = vector.broadcast %cst_14 : f32 to vector<32x256xf32>
      %19 = arith.mulf %15, %18 : vector<32x256xf32>
      %20 = arith.select %17, %15, %19 : vector<32x256xi1>, vector<32x256xf32>
      %c0_15 = arith.constant 0 : index
      %c0_16 = arith.constant 0 : index
      %21 = vector.load %arg5[%c0_15, %c0_16] : memref<32x256xf32, #tpu.memory_space<vmem>>, vector<32x256xf32>
      tpu.vector_store %arg5[%c0_15, %c0_16], %20 {strides = array<i32>} : memref<32x256xf32, #tpu.memory_space<vmem>>, vector<32x256xf32>,
    } else {
    }
    return
  }
  func.func @transform_0(%arg0: i32, %arg1: i32) -> (i32, i32) {
    %c0_i32 = arith.constant 0 : i32
    return %arg0, %arg1 : i32, i32
  }
  func.func @transform_1(%arg0: i32, %arg1: i32) -> (i32, i32) {
    %c0_i32 = arith.constant 0 : i32
    %c0_i32_0 = arith.constant 0 : i32
    return %arg1, %c0_i32 : i32, i32
  }
  func.func @transform_2(%arg0: i32, %arg1: i32) -> (i32, i32) {
    %c0_i32 = arith.constant 0 : i32
    %c0_i32_0 = arith.constant 0 : i32
    %c0_i32_1 = arith.constant 0 : i32
    return %c0_i32, %c0_i32_0 : i32, i32
  }
  func.func @transform_3(%arg0: i32, %arg1: i32) -> (i32, i32) {
    %c0_i32 = arith.constant 0 : i32
    %c0_i32_0 = arith.constant 0 : i32
    return %arg0, %c0_i32 : i32, i32
  }
}

module attributes {stable_mosaic.version = 11 : i64} {
  func.func @_mm_bias_kernel(%arg0: i32, %arg1: i32, %arg2: memref<32x768xbf16, #tpu.memory_space<vmem>>, %arg3: memref<768x128xbf16, #tpu.memory_space<vmem>>, %arg4: memref<1x128xf32, #tpu.memory_space<vmem>>, %arg5: memref<32x128xf32, #tpu.memory_space<vmem>>, %arg6: memref<32x128xf32, #tpu.memory_space<vmem>>) attributes {dimension_semantics = [#tpu.dimension_semantics<parallel>, #tpu.dimension_semantics<arbitrary>], iteration_bounds = array<i64: 1, 18>, scalar_prefetch = 0 : i64, scratch_operands = 1 : i64, tpu.core_type = #tpu.core_type<tc>, window_params = [{transform_indices = @transform_0, window_bounds = array<i64: 32, 768>}, {transform_indices = @transform_1, window_bounds = array<i64: 768, 128>}, {pipeline_mode = #tpu.pipeline_mode<synchronous>, transform_indices = @transform_2, window_bounds = array<i64: 1, 128>}, {transform_indices = @transform_3, window_bounds = array<i64: 32, 128>}]} {
    %c0_i32 = arith.constant 0 : i32
    %0 = arith.cmpi eq, %arg1, %c0_i32 : i32
    %1 = arith.extui %0 : i1 to i32
    %c0_i32_0 = arith.constant 0 : i32
    %2 = arith.cmpi ne, %1, %c0_i32_0 : i32
    scf.if %2 {
      %cst_9 = arith.constant 0.000000e+00 : f32
      %12 = vector.broadcast %cst_9 : f32 to vector<32x128xf32>
      %c0_10 = arith.constant 0 : index
      %c0_11 = arith.constant 0 : index
      %13 = vector.load %arg6[%c0_10, %c0_11] : memref<32x128xf32, #tpu.memory_space<vmem>>, vector<32x128xf32>
      tpu.vector_store %arg6[%c0_10, %c0_11], %12 {strides = array<i32>} : memref<32x128xf32, #tpu.memory_space<vmem>>, vector<32x128xf32>,
    } else {
    }
    %c0 = arith.constant 0 : index
    %c0_1 = arith.constant 0 : index
    %3 = vector.load %arg6[%c0, %c0_1] : memref<32x128xf32, #tpu.memory_space<vmem>>, vector<32x128xf32>
    %c0_2 = arith.constant 0 : index
    %c0_3 = arith.constant 0 : index
    %4 = vector.load %arg2[%c0_2, %c0_3] : memref<32x768xbf16, #tpu.memory_space<vmem>>, vector<32x768xbf16>
    %c0_4 = arith.constant 0 : index
    %c0_5 = arith.constant 0 : index
    %5 = vector.load %arg3[%c0_4, %c0_5] : memref<768x128xbf16, #tpu.memory_space<vmem>>, vector<768x128xbf16>
    %cst = arith.constant dense<0.000000e+00> : vector<32x128xf32>
    %6 = tpu.matmul %4, %5, %cst {dimension_numbers = #tpu.dot_dimension_numbers<[1], [0], [0], [1], [0, 0, 1, 1], [], []>} : vector<32x768xbf16>, vector<768x128xbf16>, vector<32x128xf32> -> vector<32x128xf32>
    %7 = arith.addf %3, %6 : vector<32x128xf32>
    %c0_6 = arith.constant 0 : index
    %c0_7 = arith.constant 0 : index
    %8 = vector.load %arg6[%c0_6, %c0_7] : memref<32x128xf32, #tpu.memory_space<vmem>>, vector<32x128xf32>
    tpu.vector_store %arg6[%c0_6, %c0_7], %7 {strides = array<i32>} : memref<32x128xf32, #tpu.memory_space<vmem>>, vector<32x128xf32>,
    %c17_i32 = arith.constant 17 : i32
    %9 = arith.cmpi eq, %arg1, %c17_i32 : i32
    %10 = arith.extui %9 : i1 to i32
    %c0_i32_8 = arith.constant 0 : i32
    %11 = arith.cmpi ne, %10, %c0_i32_8 : i32
    scf.if %11 {
      %c0_9 = arith.constant 0 : index
      %c0_10 = arith.constant 0 : index
      %12 = vector.load %arg6[%c0_9, %c0_10] : memref<32x128xf32, #tpu.memory_space<vmem>>, vector<32x128xf32>
      %c0_11 = arith.constant 0 : index
      %c0_12 = arith.constant 0 : index
      %13 = vector.load %arg4[%c0_11, %c0_12] : memref<1x128xf32, #tpu.memory_space<vmem>>, vector<1x128xf32>
      %14 = vector.broadcast %13 : vector<1x128xf32> to vector<32x128xf32>
      %15 = arith.addf %12, %14 : vector<32x128xf32>
      %cst_13 = arith.constant 0.000000e+00 : f32
      %16 = vector.broadcast %cst_13 : f32 to vector<32x128xf32>
      %17 = arith.cmpf oge, %15, %16 : vector<32x128xf32>
      %cst_14 = arith.constant 1.000000e-01 : f32
      %18 = vector.broadcast %cst_14 : f32 to vector<32x128xf32>
      %19 = arith.mulf %15, %18 : vector<32x128xf32>
      %20 = arith.select %17, %15, %19 : vector<32x128xi1>, vector<32x128xf32>
      %c0_15 = arith.constant 0 : index
      %c0_16 = arith.constant 0 : index
      %21 = vector.load %arg5[%c0_15, %c0_16] : memref<32x128xf32, #tpu.memory_space<vmem>>, vector<32x128xf32>
      tpu.vector_store %arg5[%c0_15, %c0_16], %20 {strides = array<i32>} : memref<32x128xf32, #tpu.memory_space<vmem>>, vector<32x128xf32>,
    } else {
    }
    return
  }
  func.func @transform_0(%arg0: i32, %arg1: i32) -> (i32, i32) {
    %c0_i32 = arith.constant 0 : i32
    return %arg0, %arg1 : i32, i32
  }
  func.func @transform_1(%arg0: i32, %arg1: i32) -> (i32, i32) {
    %c0_i32 = arith.constant 0 : i32
    %c0_i32_0 = arith.constant 0 : i32
    return %arg1, %c0_i32 : i32, i32
  }
  func.func @transform_2(%arg0: i32, %arg1: i32) -> (i32, i32) {
    %c0_i32 = arith.constant 0 : i32
    %c0_i32_0 = arith.constant 0 : i32
    %c0_i32_1 = arith.constant 0 : i32
    return %c0_i32, %c0_i32_0 : i32, i32
  }
  func.func @transform_3(%arg0: i32, %arg1: i32) -> (i32, i32) {
    %c0_i32 = arith.constant 0 : i32
    %c0_i32_0 = arith.constant 0 : i32
    return %arg0, %c0_i32 : i32, i32
  }
}

</mosaic_0001>

<bundles_post_ra>
// kernel: feat_extractor.10
= control target key start
LH: loop header
LB: loop body
LE: loop exit
PB: predicated region body
PF: predicated region fallthrough
CT: control target
= control target key end

     0   :  { %8 = vsyncpa [#allocation4], 0  ;;  %s1149_s0 = inlined_call_operand.vmem [shape: bf16[256,128], index: 0, kind: input, shape index: {}]   ;;  %s1150_s1 = inlined_call_operand.hbm [shape: bf16[128,128], index: 1, kind: input, shape index: {}]   ;;  %s1151_s2 = inlined_call_operand.hbm [shape: f32[1,128], index: 2, kind: input, shape index: {}]   ;;  %s1152_s3 = inlined_call_operand.vmem [shape: f32[256,128], index: 3, kind: output, shape index: {}]  }
   0x1   :  { %9 = vsyncpa [#allocation6], 0  ;;  %s923_s12 = smov [#allocation3]   ;;  %s875_s16 = scalar_lea.hbm %s1150_s1, 1024 }
   0x2   :  { %s17_s13 = sshll.u32 %s923_s12, 4  ;;  %p876_p0 = scmp.ne.s32.totalorder %s1150_s1, %s875_s16  ;;  %s18_s13 = int_to_ptr.vmem [resolvable:$true] %s17_s13 }
   0x3   :  { %p879_p1 = scmp.lt.u32.totalorder %s875_s16, %s1150_s1 }
   0x5   :  { %p881_p2 = pnand %p879_p1, %p876_p0 }
   0x7   :  { %884 = shalt.err (!%p881_p2)
}
   0x8   :  { %s885_s21 = scalar_lea.vmem %s18_s13, 1024  ;;  %p890_p4 = scmp.lt.s32.totalorder %s18_s13, %s18_s13 }
   0x9   :  { %p886_p3 = scmp.ne.s32.totalorder %s18_s13, %s885_s21  ;;  %p891_p5 = scmp.lt.s32.totalorder %s885_s21, %s885_s21 }
   0xb   :  { %p892_p6 = por %p891_p5, %p890_p4 }
   0xd   :  { %p893_p7 = pnand %p892_p6, %p886_p3 }
   0xf   :  { %896 = shalt.err (!%p893_p7)
}
  0x10   :  { %s924_s22 = smov 64   ;;  %s925_s23 = smov 4  }
  0x11   :  { %23 = dma.hbm_to_vmem [thread:$0]  %s1150_s1, 1024, %s18_s13, [#allocation4], %s924_s22, %s924_s22, %s925_s23  }
  0x12   :  { %s926_s26 = smov [#allocation5]   ;;  %s897_s30 = scalar_lea.hbm %s1151_s2, 16 }
  0x13   :  { %s30_s27 = sshll.u32 %s926_s26, 4  ;;  %p898_p8 = scmp.ne.s32.totalorder %s1151_s2, %s897_s30  ;;  %s31_s27 = int_to_ptr.vmem [resolvable:$true] %s30_s27 }
  0x14   :  { %p901_p9 = scmp.lt.u32.totalorder %s897_s30, %s1151_s2 }
  0x16   :  { %p903_p10 = pnand %p901_p9, %p898_p8 }
  0x18   :  { %906 = shalt.err (!%p903_p10)
}
  0x19   :  { %s907_s8 = scalar_lea.vmem %s31_s27, 16  ;;  %s911_s1 = scalar_lea.vmem %s31_s27, 32 }
  0x1a   :  { %p908_p11 = scmp.ne.s32.totalorder %s31_s27, %s907_s8  ;;  %p912_p12 = scmp.lt.s32.totalorder %s31_s27, %s31_s27 }
  0x1b   :  { %p913_p13 = scmp.lt.s32.totalorder %s911_s1, %s907_s8 }
  0x1d   :  { %p914_p0 = por %p913_p13, %p912_p12 }
  0x1f   :  { %p915_p1 = pnand %p914_p0, %p908_p11 }
  0x21   :  { %918 = shalt.err (!%p915_p1)
}
  0x22   :  { %33 = dma.hbm_to_vmem [thread:$0]  %s1151_s2, 16, %s31_s27, [#allocation6]  }
  0x23   :  { %919 = dma.done.wait [#allocation4], 1024  }
  0x24   :  { %920 = vsyncadd [#allocation4], 4294966272 }
  0x25   :  { %921 = dma.done.wait [#allocation6], 16  }
  0x26   :  { %922 = vsyncadd [#allocation6], 4294967280  ;;  %v851_v0 = vld [vmem:[#allocation3] sm:$0xff]   ;;  %v852_v1 = vld [vmem:[#allocation3 + $0x8] sm:$0xff]  }
  0x27   :  { %783 = vmatprep.subr.bf16.mxu0 %v851_v0  ;;  %831 = vmatprep.subr.bf16.mxu1 %v851_v0  ;;  %v853_v2 = vld [vmem:[#allocation3 + $0x10] sm:$0xff]   ;;  %v854_v3 = vld [vmem:[#allocation3 + $0x18] sm:$0xff]   ;;  %v859_v4 = vld [vmem:[%s1149_s0] sm:$0xff]  }
  0x28   :  { %784 = vmatpush3.bf16.msra.mxu0 %v851_v0  ;;  %839 = vmatpush3.bf16.msra.mxu1 %v851_v0  ;;  %v860_v5 = vld [vmem:[%s1149_s0 + $0x40] sm:$0xff]   ;;  %v856_v7 = vld [vmem:[#allocation3 + $0x28] sm:$0xff]   ;;  %v857_v8 = vld [vmem:[#allocation3 + $0x30] sm:$0xff]  }
  0x29   :  { %785 = vmatprep.subr.bf16.mxu0 %v852_v1  ;;  %832 = vmatprep.subr.bf16.mxu1 %v852_v1  ;;  %v855_v6 = vld [vmem:[#allocation3 + $0x20] sm:$0xff]   ;;  %v858_v9 = vld [vmem:[#allocation3 + $0x38] sm:$0xff]   ;;  %v861_v10 = vld [vmem:[%s1149_s0 + $0x8] sm:$0xff]  }
  0x2a   :  { %799 = vmatprep.mubr.bf16.mxu0 %v859_v4  ;;  %815 = vmatprep.mubr.bf16.mxu1 %v860_v5  ;;  %v862_v11 = vld [vmem:[%s1149_s0 + $0x48] sm:$0xff]   ;;  %v863_v12 = vld [vmem:[%s1149_s0 + $0x10] sm:$0xff]   ;;  %v865_v14 = vld [vmem:[%s1149_s0 + $0x18] sm:$0xff]  }
  0x2b   :  { %v864_v13 = vld [vmem:[%s1149_s0 + $0x50] sm:$0xff]   ;;  %v866_v15 = vld [vmem:[%s1149_s0 + $0x58] sm:$0xff]   ;;  %v867_v16 = vld [vmem:[%s1149_s0 + $0x20] sm:$0xff]  }
  0x2c   :  { %786 = vmatpush3.bf16.msra.mxu0 %v852_v1  ;;  %840 = vmatpush3.bf16.msra.mxu1 %v852_v1  ;;  %v868_v17 = vld [vmem:[%s1149_s0 + $0x60] sm:$0xff]   ;;  %v869_v18 = vld [vmem:[%s1149_s0 + $0x28] sm:$0xff]   ;;  %v871_v20 = vld [vmem:[%s1149_s0 + $0x30] sm:$0xff]  }
  0x2d   :  { %787 = vmatprep.subr.bf16.mxu0 %v853_v2  ;;  %833 = vmatprep.subr.bf16.mxu1 %v853_v2  ;;  %v870_v19 = vld [vmem:[%s1149_s0 + $0x68] sm:$0xff]   ;;  %v872_v21 = vld [vmem:[%s1149_s0 + $0x70] sm:$0xff]   ;;  %v873_v22 = vld [vmem:[%s1149_s0 + $0x38] sm:$0xff]  }
  0x2e   :  { %v874_v23 = vld [vmem:[%s1149_s0 + $0x78] sm:$0xff]   ;;  %v1019_v24 = vld [vmem:[#allocation5] ss:$0 sm:$0xff] }
  0x30   :  { %788 = vmatpush3.bf16.msra.mxu0 %v853_v2  ;;  %841 = vmatpush3.bf16.msra.mxu1 %v853_v2 }
  0x31   :  { %789 = vmatprep.subr.bf16.mxu0 %v854_v3  ;;  %834 = vmatprep.subr.bf16.mxu1 %v854_v3 }
  0x34   :  { %790 = vmatpush3.bf16.msra.mxu0 %v854_v3  ;;  %842 = vmatpush3.bf16.msra.mxu1 %v854_v3 }
  0x35   :  { %791 = vmatprep.subr.bf16.mxu0 %v855_v6  ;;  %835 = vmatprep.subr.bf16.mxu1 %v855_v6 }
  0x38   :  { %792 = vmatpush3.bf16.msra.mxu0 %v855_v6  ;;  %843 = vmatpush3.bf16.msra.mxu1 %v855_v6 }
  0x39   :  { %793 = vmatprep.subr.bf16.mxu0 %v856_v7  ;;  %836 = vmatprep.subr.bf16.mxu1 %v856_v7 }
  0x3c   :  { %794 = vmatpush3.bf16.msra.mxu0 %v856_v7  ;;  %844 = vmatpush3.bf16.msra.mxu1 %v856_v7 }
  0x3d   :  { %795 = vmatprep.subr.bf16.mxu0 %v857_v8  ;;  %837 = vmatprep.subr.bf16.mxu1 %v857_v8 }
  0x40   :  { %796 = vmatpush3.bf16.msra.mxu0 %v857_v8  ;;  %845 = vmatpush3.bf16.msra.mxu1 %v857_v8 }
  0x41   :  { %797 = vmatprep.subr.bf16.mxu0 %v858_v9  ;;  %838 = vmatprep.subr.bf16.mxu1 %v858_v9 }
  0x44   :  { %798 = vmatpush3.bf16.msra.mxu0 %v858_v9  ;;  %846 = vmatpush3.bf16.msra.mxu1 %v858_v9 }
  0x47   :  { %800 = vmatmul.mubr.bf16.vlgmr.msra.gmra.mrb[0].mxu0 %v861_v10  ;;  %816 = vmatmul.mubr.bf16.vlgmr.msra.gmra.mrb[0].mxu1 %v862_v11 }
  0x48   :  { %803 = vmatprep.mubr.bf16.mxu0 %v863_v12  ;;  %819 = vmatprep.mubr.bf16.mxu1 %v864_v13 }
  0x4f   :  { %804 = vmatmul.mubr.bf16.gmra.mrb[4].mxu0 %v865_v14  ;;  %820 = vmatmul.mubr.bf16.gmra.mrb[4].mxu1 %v866_v15 }
  0x50   :  { %807 = vmatprep.mubr.bf16.mxu0 %v867_v16  ;;  %823 = vmatprep.mubr.bf16.mxu1 %v868_v17 }
  0x57   :  { %808 = vmatmul.mubr.bf16.gmra.mrb[8].mxu0 %v869_v18  ;;  %824 = vmatmul.mubr.bf16.gmra.mrb[8].mxu1 %v870_v19 }
  0x58   :  { %811 = vmatprep.mubr.bf16.mxu0 %v871_v20  ;;  %827 = vmatprep.mubr.bf16.mxu1 %v872_v21 }
  0x5f   :  { %812 = vmatmul.mubr.bf16.gmra.mrb[12].mxu0 %v873_v22  ;;  %828 = vmatmul.mubr.bf16.gmra.mrb[12].mxu1 %v874_v23 }
 0x11a   :  { %v801_v25 = vpop.f32.mrb[0].mxu0  ;;  %v817_v26 = vpop.f32.mrb[0].mxu1 }
 0x11b   :  { %v570_v27 = vadd.f32 %v801_v25, %v1019_v24  ;;  %v586_v28 = vadd.f32 %v817_v26, %v1019_v24  ;;  %v335_v29 = vpop.f32.mrb[1].mxu0  ;;  %v399_v30 = vpop.f32.mrb[1].mxu1 }
 0x11c   :  { %v568_v31 = vadd.f32 %v1019_v24, %v335_v29  ;;  %v584_v32 = vadd.f32 %v1019_v24, %v399_v30  ;;  %v802_v33 = vpop.f32.mrb[2].mxu0  ;;  %v818_v34 = vpop.f32.mrb[2].mxu1 }
 0x11d   :  { %vm602_vm0 = vcmp.ge.f32.partialorder %v570_v27, 0.0  ;;  %v634_v35 = vmul.f32 0.1, %v570_v27  ;;  %vm618_vm1 = vcmp.ge.f32.partialorder %v586_v28, 0.0  ;;  %v650_v36 = vmul.f32 0.1, %v586_v28 }
 0x11e   :  { %vm600_vm2 = vcmp.ge.f32.partialorder %v568_v31, 0.0  ;;  %v632_v37 = vmul.f32 0.1, %v568_v31  ;;  %vm616_vm3 = vcmp.ge.f32.partialorder %v584_v32, 0.0  ;;  %v648_v38 = vmul.f32 0.1, %v584_v32 }
 0x11f   :  { %v666_v39 = vsel %vm602_vm0, %v570_v27, %v634_v35  ;;  %v682_v40 = vsel %vm618_vm1, %v586_v28, %v650_v36  ;;  %v571_v41 = vadd.f32 %v802_v33, %v1019_v24  ;;  %v587_v42 = vadd.f32 %v818_v34, %v1019_v24  ;;  %v338_v43 = vpop.f32.mrb[3].mxu0  ;;  %v402_v44 = vpop.f32.mrb[3].mxu1 }
 0x120   :  { %698 = vst [vmem:[%s1152_s3 + $0x10] sm:$0xff] %v666_v39  ;;  %714 = vst [vmem:[%s1152_s3 + $0x90] sm:$0xff] %v682_v40  ;;  %v664_v45 = vsel %vm600_vm2, %v568_v31, %v632_v37  ;;  %v680_v46 = vsel %vm616_vm3, %v584_v32, %v648_v38  ;;  %v569_v47 = vadd.f32 %v1019_v24, %v338_v43 }
 0x121   :  { %v585_v48 = vadd.f32 %v1019_v24, %v402_v44  ;;  %696 = vst [vmem:[%s1152_s3] sm:$0xff] %v664_v45  ;;  %712 = vst [vmem:[%s1152_s3 + $0x80] sm:$0xff] %v680_v46  ;;  %vm603_vm4 = vcmp.ge.f32.partialorder %v571_v41, 0.0  ;;  %v635_v49 = vmul.f32 0.1, %v571_v41  ;;  %vm619_vm5 = vcmp.ge.f32.partialorder %v587_v42, 0.0 }
 0x122   :  { %v651_v50 = vmul.f32 0.1, %v587_v42  ;;  %vm601_vm6 = vcmp.ge.f32.partialorder %v569_v47, 0.0  ;;  %v633_v51 = vmul.f32 0.1, %v569_v47  ;;  %v805_v55 = vpop.f32.mrb[4].mxu0 }
 0x123   :  { %vm617_vm7 = vcmp.ge.f32.partialorder %v585_v48, 0.0  ;;  %v649_v52 = vmul.f32 0.1, %v585_v48  ;;  %v667_v53 = vsel %vm603_vm4, %v571_v41, %v635_v49  ;;  %v821_v56 = vpop.f32.mrb[4].mxu1  ;;  %v574_v59 = vadd.f32 %v805_v55, %v1019_v24  ;;  %v351_v61 = vpop.f32.mrb[5].mxu0 }
 0x124   :  { %v683_v54 = vsel %vm619_vm5, %v587_v42, %v651_v50  ;;  %699 = vst [vmem:[%s1152_s3 + $0x18] sm:$0xff] %v667_v53  ;;  %v665_v57 = vsel %vm601_vm6, %v569_v47, %v633_v51  ;;  %v590_v60 = vadd.f32 %v821_v56, %v1019_v24  ;;  %v415_v62 = vpop.f32.mrb[5].mxu1  ;;  %v572_v63 = vadd.f32 %v1019_v24, %v351_v61  ;;  %v806_v1 = vpop.f32.mrb[6].mxu0 }
 0x125   :  { %715 = vst [vmem:[%s1152_s3 + $0x98] sm:$0xff] %v683_v54  ;;  %v681_v58 = vsel %vm617_vm7, %v585_v48, %v649_v52  ;;  %697 = vst [vmem:[%s1152_s3 + $0x8] sm:$0xff] %v665_v57  ;;  %v588_v0 = vadd.f32 %v1019_v24, %v415_v62  ;;  %v822_v2 = vpop.f32.mrb[6].mxu1  ;;  %vm606_vm8 = vcmp.ge.f32.partialorder %v574_v59, 0.0  ;;  %v638_v3 = vmul.f32 0.1, %v574_v59 }
 0x126   :  { %713 = vst [vmem:[%s1152_s3 + $0x88] sm:$0xff] %v681_v58  ;;  %vm622_vm9 = vcmp.ge.f32.partialorder %v590_v60, 0.0  ;;  %v654_v4 = vmul.f32 0.1, %v590_v60  ;;  %vm604_vm10 = vcmp.ge.f32.partialorder %v572_v63, 0.0  ;;  %v575_v9 = vadd.f32 %v806_v1, %v1019_v24  ;;  %v354_v11 = vpop.f32.mrb[7].mxu0 }
 0x127   :  { %v636_v5 = vmul.f32 0.1, %v572_v63  ;;  %vm620_vm11 = vcmp.ge.f32.partialorder %v588_v0, 0.0  ;;  %v652_v6 = vmul.f32 0.1, %v588_v0  ;;  %v670_v7 = vsel %vm606_vm8, %v574_v59, %v638_v3  ;;  %v418_v12 = vpop.f32.mrb[7].mxu1 }
 0x128   :  { %v686_v8 = vsel %vm622_vm9, %v590_v60, %v654_v4  ;;  %v591_v10 = vadd.f32 %v822_v2, %v1019_v24  ;;  %702 = vst [vmem:[%s1152_s3 + $0x30] sm:$0xff] %v670_v7  ;;  %v573_v15 = vadd.f32 %v1019_v24, %v354_v11  ;;  %v589_v16 = vadd.f32 %v1019_v24, %v418_v12 }
 0x129   :  { %718 = vst [vmem:[%s1152_s3 + $0xb0] sm:$0xff] %v686_v8  ;;  %v668_v13 = vsel %vm604_vm10, %v572_v63, %v636_v5  ;;  %v684_v14 = vsel %vm620_vm11, %v588_v0, %v652_v6  ;;  %vm607_vm12 = vcmp.ge.f32.partialorder %v575_v9, 0.0  ;;  %v639_v17 = vmul.f32 0.1, %v575_v9 }
 0x12a   :  { %700 = vst [vmem:[%s1152_s3 + $0x20] sm:$0xff] %v668_v13  ;;  %716 = vst [vmem:[%s1152_s3 + $0xa0] sm:$0xff] %v684_v14  ;;  %vm623_vm13 = vcmp.ge.f32.partialorder %v591_v10, 0.0  ;;  %v655_v18 = vmul.f32 0.1, %v591_v10  ;;  %vm605_vm14 = vcmp.ge.f32.partialorder %v573_v15, 0.0 }
 0x12b   :  { %v637_v19 = vmul.f32 0.1, %v573_v15  ;;  %vm621_vm15 = vcmp.ge.f32.partialorder %v589_v16, 0.0  ;;  %v653_v20 = vmul.f32 0.1, %v589_v16  ;;  %v671_v21 = vsel %vm607_vm12, %v575_v9, %v639_v17  ;;  %v809_v23 = vpop.f32.mrb[8].mxu0 }
 0x12c   :  { %v687_v22 = vsel %vm623_vm13, %v591_v10, %v655_v18  ;;  %v825_v25 = vpop.f32.mrb[8].mxu1  ;;  %703 = vst [vmem:[%s1152_s3 + $0x38] sm:$0xff] %v671_v21  ;;  %v578_v28 = vadd.f32 %v809_v23, %v1019_v24  ;;  %v367_v30 = vpop.f32.mrb[9].mxu0 }
 0x12d   :  { %719 = vst [vmem:[%s1152_s3 + $0xb8] sm:$0xff] %v687_v22  ;;  %v669_v26 = vsel %vm605_vm14, %v573_v15, %v637_v19  ;;  %v685_v27 = vsel %vm621_vm15, %v589_v16, %v653_v20  ;;  %v594_v29 = vadd.f32 %v825_v25, %v1019_v24  ;;  %v431_v31 = vpop.f32.mrb[9].mxu1  ;;  %v576_v32 = vadd.f32 %v1019_v24, %v367_v30  ;;  %v810_v34 = vpop.f32.mrb[10].mxu0 }
 0x12e   :  { %701 = vst [vmem:[%s1152_s3 + $0x28] sm:$0xff] %v669_v26  ;;  %717 = vst [vmem:[%s1152_s3 + $0xa8] sm:$0xff] %v685_v27  ;;  %v592_v33 = vadd.f32 %v1019_v24, %v431_v31  ;;  %v826_v35 = vpop.f32.mrb[10].mxu1  ;;  %vm610_vm0 = vcmp.ge.f32.partialorder %v578_v28, 0.0  ;;  %v642_v36 = vmul.f32 0.1, %v578_v28  ;;  %v579_v42 = vadd.f32 %v810_v34, %v1019_v24 }
 0x12f   :  { %vm626_vm1 = vcmp.ge.f32.partialorder %v594_v29, 0.0  ;;  %v658_v37 = vmul.f32 0.1, %v594_v29  ;;  %vm608_vm2 = vcmp.ge.f32.partialorder %v576_v32, 0.0  ;;  %v640_v38 = vmul.f32 0.1, %v576_v32 }
 0x130   :  { %vm624_vm3 = vcmp.ge.f32.partialorder %v592_v33, 0.0  ;;  %v656_v39 = vmul.f32 0.1, %v592_v33  ;;  %v674_v40 = vsel %vm610_vm0, %v578_v28, %v642_v36  ;;  %v595_v43 = vadd.f32 %v826_v35, %v1019_v24  ;;  %v370_v44 = vpop.f32.mrb[11].mxu0  ;;  %v434_v45 = vpop.f32.mrb[11].mxu1 }
 0x131   :  { %v690_v41 = vsel %vm626_vm1, %v594_v29, %v658_v37  ;;  %706 = vst [vmem:[%s1152_s3 + $0x50] sm:$0xff] %v674_v40  ;;  %v672_v46 = vsel %vm608_vm2, %v576_v32, %v640_v38  ;;  %v577_v48 = vadd.f32 %v1019_v24, %v370_v44  ;;  %v593_v49 = vadd.f32 %v1019_v24, %v434_v45 }
 0x132   :  { %722 = vst [vmem:[%s1152_s3 + $0xd0] sm:$0xff] %v690_v41  ;;  %v688_v47 = vsel %vm624_vm3, %v592_v33, %v656_v39  ;;  %v813_v50 = vpop.f32.mrb[12].mxu0  ;;  %v829_v51 = vpop.f32.mrb[12].mxu1  ;;  %704 = vst [vmem:[%s1152_s3 + $0x40] sm:$0xff] %v672_v46  ;;  %vm611_vm4 = vcmp.ge.f32.partialorder %v579_v42, 0.0  ;;  %vm627_vm5 = vcmp.ge.f32.partialorder %v595_v43, 0.0 }
 0x133   :  { %720 = vst [vmem:[%s1152_s3 + $0xc0] sm:$0xff] %v688_v47  ;;  %v643_v52 = vmul.f32 0.1, %v579_v42  ;;  %v659_v53 = vmul.f32 0.1, %v595_v43  ;;  %vm609_vm6 = vcmp.ge.f32.partialorder %v577_v48, 0.0  ;;  %v582_v58 = vadd.f32 %v813_v50, %v1019_v24 }
 0x134   :  { %v641_v54 = vmul.f32 0.1, %v577_v48  ;;  %vm625_vm7 = vcmp.ge.f32.partialorder %v593_v49, 0.0  ;;  %v657_v55 = vmul.f32 0.1, %v593_v49  ;;  %v598_v59 = vadd.f32 %v829_v51, %v1019_v24  ;;  %v383_v60 = vpop.f32.mrb[13].mxu0 }
 0x135   :  { %v675_v56 = vsel %vm611_vm4, %v579_v42, %v643_v52  ;;  %v691_v57 = vsel %vm627_vm5, %v595_v43, %v659_v53  ;;  %v447_v61 = vpop.f32.mrb[13].mxu1  ;;  %v580_v0 = vadd.f32 %v1019_v24, %v383_v60  ;;  %v814_v2 = vpop.f32.mrb[14].mxu0  ;;  %vm614_vm8 = vcmp.ge.f32.partialorder %v582_v58, 0.0 }
 0x136   :  { %707 = vst [vmem:[%s1152_s3 + $0x58] sm:$0xff] %v675_v56  ;;  %723 = vst [vmem:[%s1152_s3 + $0xd8] sm:$0xff] %v691_v57  ;;  %v673_v62 = vsel %vm609_vm6, %v577_v48, %v641_v54  ;;  %v689_v63 = vsel %vm625_vm7, %v593_v49, %v657_v55  ;;  %v596_v1 = vadd.f32 %v1019_v24, %v447_v61  ;;  %v830_v3 = vpop.f32.mrb[14].mxu1  ;;  %v646_v4 = vmul.f32 0.1, %v582_v58  ;;  %v386_v12 = vpop.f32.mrb[15].mxu0 }
 0x137   :  { %705 = vst [vmem:[%s1152_s3 + $0x48] sm:$0xff] %v673_v62  ;;  %721 = vst [vmem:[%s1152_s3 + $0xc8] sm:$0xff] %v689_v63  ;;  %vm630_vm9 = vcmp.ge.f32.partialorder %v598_v59, 0.0  ;;  %v662_v5 = vmul.f32 0.1, %v598_v59  ;;  %vm612_vm10 = vcmp.ge.f32.partialorder %v580_v0, 0.0  ;;  %v583_v10 = vadd.f32 %v814_v2, %v1019_v24 }
 0x138   :  { %v644_v6 = vmul.f32 0.1, %v580_v0  ;;  %vm628_vm11 = vcmp.ge.f32.partialorder %v596_v1, 0.0  ;;  %v660_v7 = vmul.f32 0.1, %v596_v1  ;;  %v678_v8 = vsel %vm614_vm8, %v582_v58, %v646_v4  ;;  %v450_v13 = vpop.f32.mrb[15].mxu1 }
 0x139   :  { %v694_v9 = vsel %vm630_vm9, %v598_v59, %v662_v5  ;;  %v599_v11 = vadd.f32 %v830_v3, %v1019_v24  ;;  %710 = vst [vmem:[%s1152_s3 + $0x70] sm:$0xff] %v678_v8  ;;  %v581_v16 = vadd.f32 %v1019_v24, %v386_v12  ;;  %v597_v17 = vadd.f32 %v1019_v24, %v450_v13 }
 0x13a   :  { %726 = vst [vmem:[%s1152_s3 + $0xf0] sm:$0xff] %v694_v9  ;;  %v676_v14 = vsel %vm612_vm10, %v580_v0, %v644_v6  ;;  %v692_v15 = vsel %vm628_vm11, %v596_v1, %v660_v7  ;;  %vm615_vm12 = vcmp.ge.f32.partialorder %v583_v10, 0.0  ;;  %v647_v18 = vmul.f32 0.1, %v583_v10 }
 0x13b   :  { %708 = vst [vmem:[%s1152_s3 + $0x60] sm:$0xff] %v676_v14  ;;  %724 = vst [vmem:[%s1152_s3 + $0xe0] sm:$0xff] %v692_v15  ;;  %vm631_vm13 = vcmp.ge.f32.partialorder %v599_v11, 0.0  ;;  %v663_v19 = vmul.f32 0.1, %v599_v11  ;;  %vm613_vm14 = vcmp.ge.f32.partialorder %v581_v16, 0.0 }
 0x13c   :  { %v645_v20 = vmul.f32 0.1, %v581_v16  ;;  %vm629_vm15 = vcmp.ge.f32.partialorder %v597_v17, 0.0  ;;  %v661_v21 = vmul.f32 0.1, %v597_v17  ;;  %v679_v22 = vsel %vm615_vm12, %v583_v10, %v647_v18 }
 0x13d   :  { %v695_v23 = vsel %vm631_vm13, %v599_v11, %v663_v19  ;;  %711 = vst [vmem:[%s1152_s3 + $0x78] sm:$0xff] %v679_v22 }
 0x13e   :  { %727 = vst [vmem:[%s1152_s3 + $0xf8] sm:$0xff] %v695_v23  ;;  %v677_v24 = vsel %vm613_vm14, %v581_v16, %v645_v20  ;;  %v693_v25 = vsel %vm629_vm15, %v597_v17, %v661_v21 }
 0x13f   :  { %709 = vst [vmem:[%s1152_s3 + $0x68] sm:$0xff] %v677_v24  ;;  %725 = vst [vmem:[%s1152_s3 + $0xe8] sm:$0xff] %v693_v25 }
 0x140   :  { %732 = vsyncpa [#allocation4], 1 }
 0x141   :  { %733 = vsyncpa [#allocation6], 1 }

// kernel: feat_extractor.11
= control target key start
LH: loop header
LB: loop body
LE: loop exit
PB: predicated region body
PF: predicated region fallthrough
CT: control target
= control target key end

     0   :  { %15 = vsyncpa [#allocation3], 0  ;;  %s6067_s0 = inlined_call_operand.vmem [shape: f32[256,32], index: 0, kind: input, shape index: {}]   ;;  %s6068_s1 = inlined_call_operand.vmem [shape: f32[256,256], index: 1, kind: input, shape index: {}]   ;;  %s6069_s2 = inlined_call_operand.vmem [shape: bf16[32,16], index: 2, kind: input, shape index: {}]   ;;  %s6070_s3 = inlined_call_operand.hbm [shape: f32[1,16], index: 3, kind: input, shape index: {}]   ;;  %s6071_s4 = inlined_call_operand.vmem [shape: bf16[32,16], index: 4, kind: input, shape index: {}]   ;;  %s6072_s5 = inlined_call_operand.hbm [shape: f32[1,16], index: 5, kind: input, shape index: {}]   ;;  %s6073_s6 = inlined_call_operand.vmem [shape: bf16[32,16], index: 6, kind: input, shape index: {}]   ;;  %s6074_s7 = inlined_call_operand.hbm [shape: f32[1,16], index: 7, kind: input, shape index: {}]   ;;  %s6075_s8 = inlined_call_operand.hbm [shape: bf16[16,32], index: 8, kind: input, shape index: {}]   ;;  %s6076_s9 = inlined_call_operand.hbm [shape: f32[1,32], index: 9, kind: input, shape index: {}]   ;;  %s6077_s10 = inlined_call_operand.vmem [shape: f32[256,32], index: 10, kind: output, shape index: {}]  }
   0x1   :  { %16 = vsyncpa [#allocation5], 0 }
   0x2   :  { %17 = vsyncpa [#allocation8], 0  ;;  %s3764_s13 = smov [#allocation4]   ;;  %s3765_s15 = smov [#allocation7]  }
   0x3   :  { %s42_s14 = sshll.u32 %s3764_s13, 4  ;;  %s63_s16 = sshll.u32 %s3765_s15, 4  ;;  %s43_s14 = int_to_ptr.vmem [resolvable:$true] %s42_s14  ;;  %s3827_s16 = int_to_ptr.vmem [resolvable:$true] %s63_s16 }
   0x4   :  { %s3648_s19 = scalar_lea.hbm %s6072_s5, 16 }
   0x5   :  { %p3649_p0 = scmp.ne.s32.totalorder %s6072_s5, %s3648_s19  ;;  %p3652_p1 = scmp.lt.u32.totalorder %s3648_s19, %s6072_s5 }
   0x7   :  { %p3654_p2 = pnand %p3652_p1, %p3649_p0 }
   0x9   :  { %3657 = shalt.err (!%p3654_p2)
}
   0xa   :  { %s3658_s24 = scalar_lea.vmem %s43_s14, 16  ;;  %s3662_s25 = scalar_lea.vmem %s43_s14, 32 }
   0xb   :  { %p3659_p3 = scmp.ne.s32.totalorder %s43_s14, %s3658_s24  ;;  %p3663_p4 = scmp.lt.s32.totalorder %s43_s14, %s43_s14 }
   0xc   :  { %p3664_p5 = scmp.lt.s32.totalorder %s3662_s25, %s3658_s24 }
   0xe   :  { %p3665_p6 = por %p3664_p5, %p3663_p4 }
  0x10   :  { %p3666_p7 = pnand %p3665_p6, %p3659_p3 }
  0x12   :  { %3669 = shalt.err (!%p3666_p7)
}
  0x13   :  { %45 = dma.hbm_to_vmem [thread:$0]  %s6072_s5, 16, %s43_s14, [#allocation5]  }
  0x14   :  { %s3670_s30 = scalar_lea.hbm %s6075_s8, 128 }
  0x15   :  { %p3671_p8 = scmp.ne.s32.totalorder %s6075_s8, %s3670_s30  ;;  %p3674_p9 = scmp.lt.u32.totalorder %s3670_s30, %s6075_s8 }
  0x17   :  { %p3676_p10 = pnand %p3674_p9, %p3671_p8 }
  0x19   :  { %3679 = shalt.err (!%p3676_p10)
}
  0x1a   :  { %s3680_s17 = scalar_lea.vmem %s3827_s16, 128  ;;  %p3685_p12 = scmp.lt.s32.totalorder %s3827_s16, %s3827_s16 }
  0x1b   :  { %p3681_p11 = scmp.ne.s32.totalorder %s3827_s16, %s3680_s17  ;;  %p3686_p13 = scmp.lt.s32.totalorder %s3680_s17, %s3680_s17 }
  0x1d   :  { %p3687_p0 = por %p3686_p13, %p3685_p12 }
  0x1f   :  { %p3688_p1 = pnand %p3687_p0, %p3681_p11 }
  0x21   :  { %3691 = shalt.err (!%p3688_p1)
}
  0x22   :  { %s3766_s5 = smov 64   ;;  %s3767_s14 = smov 4  }
  0x23   :  { %69 = dma.hbm_to_vmem [thread:$0]  %s6075_s8, 128, %s3827_s16, [#allocation8], %s3766_s5, %s3766_s5, %s3767_s14  }
  0x24   :  { %s3768_s20 = smov [#allocation2]   ;;  %s3769_s22 = smov [#allocation6]  }
  0x25   :  { %s30_s21 = sshll.u32 %s3768_s20, 4  ;;  %s54_s23 = sshll.u32 %s3769_s22, 4  ;;  %s31_s21 = int_to_ptr.vmem [resolvable:$true] %s30_s21  ;;  %s55_s23 = int_to_ptr.vmem [resolvable:$true] %s54_s23 }
  0x26   :  { %s3692_s26 = scalar_lea.hbm %s6070_s3, 16 }
  0x27   :  { %p3693_p2 = scmp.ne.s32.totalorder %s6070_s3, %s3692_s26  ;;  %p3696_p3 = scmp.lt.u32.totalorder %s3692_s26, %s6070_s3 }
  0x29   :  { %p3698_p4 = pnand %p3696_p3, %p3693_p2 }
  0x2b   :  { %3701 = shalt.err (!%p3698_p4)
}
  0x2c   :  { %s3702_s8 = scalar_lea.vmem %s31_s21, 16  ;;  %s3706_s16 = scalar_lea.vmem %s31_s21, 32 }
  0x2d   :  { %p3703_p5 = scmp.ne.s32.totalorder %s31_s21, %s3702_s8  ;;  %p3707_p6 = scmp.lt.s32.totalorder %s31_s21, %s31_s21 }
  0x2e   :  { %p3708_p7 = scmp.lt.s32.totalorder %s3706_s16, %s3702_s8 }
  0x30   :  { %p3709_p8 = por %p3708_p7, %p3707_p6 }
  0x32   :  { %p3710_p9 = pnand %p3709_p8, %p3703_p5 }
  0x34   :  { %3713 = shalt.err (!%p3710_p9)
}
  0x35   :  { %33 = dma.hbm_to_vmem [thread:$0]  %s6070_s3, 16, %s31_s21, [#allocation3]  }
  0x36   :  { %s3714_s17 = scalar_lea.hbm %s6074_s7, 16 }
  0x37   :  { %p3715_p10 = scmp.ne.s32.totalorder %s6074_s7, %s3714_s17  ;;  %p3718_p11 = scmp.lt.u32.totalorder %s3714_s17, %s6074_s7 }
  0x39   :  { %p3720_p12 = pnand %p3718_p11, %p3715_p10 }
  0x3b   :  { %3723 = shalt.err (!%p3720_p12)
}
  0x3c   :  { %s3724_s20 = scalar_lea.vmem %s55_s23, 16  ;;  %s3728_s22 = scalar_lea.vmem %s55_s23, 32 }
  0x3d   :  { %p3725_p13 = scmp.ne.s32.totalorder %s55_s23, %s3724_s20  ;;  %p3729_p0 = scmp.lt.s32.totalorder %s55_s23, %s55_s23 }
  0x3e   :  { %p3730_p1 = scmp.lt.s32.totalorder %s3728_s22, %s3724_s20 }
  0x40   :  { %p3731_p2 = por %p3730_p1, %p3729_p0 }
  0x42   :  { %p3732_p3 = pnand %p3731_p2, %p3725_p13 }
  0x44   :  { %3735 = shalt.err (!%p3732_p3)
}
  0x45   :  { %57 = dma.hbm_to_vmem [thread:$0]  %s6074_s7, 16, %s55_s23, [#allocation5]  }
  0x46   :  { %s3770_s24 = smov [#allocation9]   ;;  %s3736_s28 = scalar_lea.hbm %s6076_s9, 16 }
  0x47   :  { %s76_s25 = sshll.u32 %s3770_s24, 4  ;;  %p3737_p4 = scmp.ne.s32.totalorder %s6076_s9, %s3736_s28  ;;  %s77_s25 = int_to_ptr.vmem [resolvable:$true] %s76_s25 }
  0x48   :  { %p3740_p5 = scmp.lt.u32.totalorder %s3736_s28, %s6076_s9 }
  0x4a   :  { %p3742_p6 = pnand %p3740_p5, %p3737_p4 }
  0x4c   :  { %3745 = shalt.err (!%p3742_p6)
}
  0x4d   :  { %s3746_s11 = scalar_lea.vmem %s77_s25, 16  ;;  %s3750_s7 = scalar_lea.vmem %s77_s25, 32 }
  0x4e   :  { %p3747_p7 = scmp.ne.s32.totalorder %s77_s25, %s3746_s11  ;;  %p3751_p8 = scmp.lt.s32.totalorder %s77_s25, %s77_s25 }
  0x4f   :  { %p3752_p9 = scmp.lt.s32.totalorder %s3750_s7, %s3746_s11 }
  0x51   :  { %p3753_p10 = por %p3752_p9, %p3751_p8 }
  0x53   :  { %p3754_p11 = pnand %p3753_p10, %p3747_p7 }
  0x55   :  { %3757 = shalt.err (!%p3754_p11)
}
  0x56   :  { %79 = dma.hbm_to_vmem [thread:$0]  %s6076_s9, 16, %s77_s25, [#allocation8]  }
  0x57   :  { %3758 = dma.done.wait [#allocation3], 16  }
  0x58   :  { %3759 = vsyncadd [#allocation3], 4294967280 }
  0x59   :  { %3760 = dma.done.wait [#allocation5], 32  }
  0x5a   :  { %3761 = vsyncadd [#allocation5], 4294967264 }
  0x5b   :  { %3762 = dma.done.wait [#allocation8], 144  }
  0x5c   :  { %3763 = vsyncadd [#allocation8], 4294967152  ;;  %v3354_v0 = vld [vmem:[%s6069_s2] sm:$0xff]   ;;  %v3355_v1 = vld [vmem:[%s6069_s2 + $0x8] sm:$0xff]   ;;  %vm167_vm0 = vcmask 261120   ;;  %vm969_vm1 = vcmask 130048  }
  0x5d   :  { %3108 = vmatprep.subr.bf16.mxu0 %v3354_v0  ;;  %v96_v2 = vld [vmem:[%s6067_s0] sm:$0xff]  ;;  %v97_v3 = vld [vmem:[%s6067_s0 + $0x8] sm:$0xff]  ;;  %v98_v5 = vld [vmem:[%s6067_s0 + $0x10] sm:$0xff] }
  0x5e   :  { %3109 = vmatpush3.bf16.msra.mxu0 %v3354_v0  ;;  %v3906_v4 = vpack.c.bf16 %v97_v3, %v96_v2  ;;  %v99_v6 = vld [vmem:[%s6067_s0 + $0x18] sm:$0xff]  ;;  %v100_v7 = vld [vmem:[%s6067_s0 + $0x20] sm:$0xff]  ;;  %v101_v8 = vld [vmem:[%s6067_s0 + $0x28] sm:$0xff] }
  0x5f   :  { %3110 = vmatprep.subr.bf16.mxu0 %v3355_v1  ;;  %v3924_v9 = vpack.c.bf16 %v99_v6, %v98_v5  ;;  %v3926_v10 = vpack.c.bf16 %v101_v8, %v100_v7  ;;  %v102_v11 = vld [vmem:[%s6067_s0 + $0x30] sm:$0xff]  ;;  %v103_v12 = vld [vmem:[%s6067_s0 + $0x38] sm:$0xff]  ;;  %v104_v13 = vld [vmem:[%s6067_s0 + $0x40] sm:$0xff] }
  0x60   :  { %3112 = vmatprep.mubr.msk.bf16.mxu0 %vm167_vm0, %v3906_v4  ;;  %3148 = vmatprep.mubr.msk.bf16.mxu1 %vm167_vm0, %v3906_v4  ;;  %v105_v14 = vld [vmem:[%s6067_s0 + $0x48] sm:$0xff]  ;;  %v3356_v15 = vld [vmem:[%s6071_s4] sm:$0xff]   ;;  %v3947_v16 = vpack.c.bf16 %v103_v12, %v102_v11  ;;  %v106_v19 = vld [vmem:[%s6067_s0 + $0x50] sm:$0xff] }
  0x61   :  { %v3357_v17 = vld [vmem:[%s6071_s4 + $0x8] sm:$0xff]   ;;  %v3952_v18 = vpack.c.bf16 %v105_v14, %v104_v13  ;;  %3144 = vmatprep.subr.bf16.mxu1 %v3356_v15  ;;  %v107_v20 = vld [vmem:[%s6067_s0 + $0x58] sm:$0xff]  ;;  %v108_v21 = vld [vmem:[%s6067_s0 + $0x60] sm:$0xff] }
  0x62   :  { %3111 = vmatpush3.bf16.msra.mxu0 %v3355_v1  ;;  %3145 = vmatpush3.bf16.msra.mxu1 %v3356_v15  ;;  %v109_v22 = vld [vmem:[%s6067_s0 + $0x68] sm:$0xff]  ;;  %v3970_v23 = vpack.c.bf16 %v107_v20, %v106_v19  ;;  %v110_v25 = vld [vmem:[%s6067_s0 + $0x70] sm:$0xff]  ;;  %v111_v26 = vld [vmem:[%s6067_s0 + $0x78] sm:$0xff] }
  0x63   :  { %3146 = vmatprep.subr.bf16.mxu1 %v3357_v17  ;;  %v3972_v24 = vpack.c.bf16 %v109_v22, %v108_v21  ;;  %v112_v27 = vld [vmem:[%s6067_s0 + $0x80] sm:$0xff]  ;;  %v113_v28 = vld [vmem:[%s6067_s0 + $0x88] sm:$0xff]  ;;  %v3994_v29 = vpack.c.bf16 %v111_v26, %v110_v25  ;;  %v114_v31 = vld [vmem:[%s6067_s0 + $0x90] sm:$0xff] }
  0x64   :  { %v3996_v30 = vpack.c.bf16 %v113_v28, %v112_v27  ;;  %v115_v32 = vld [vmem:[%s6067_s0 + $0x98] sm:$0xff]  ;;  %v116_v33 = vld [vmem:[%s6067_s0 + $0xa0] sm:$0xff]  ;;  %v117_v34 = vld [vmem:[%s6067_s0 + $0xa8] sm:$0xff] }
  0x65   :  { %3113 = vmatmul.mubr.msk.bf16.vlgmr.msra.gmra.mrb[0].mxu0 %vm167_vm0, %v3924_v9  ;;  %v4018_v35 = vpack.c.bf16 %v115_v32, %v114_v31  ;;  %v4020_v36 = vpack.c.bf16 %v117_v34, %v116_v33  ;;  %v118_v37 = vld [vmem:[%s6067_s0 + $0xb0] sm:$0xff]  ;;  %v119_v38 = vld [vmem:[%s6067_s0 + $0xb8] sm:$0xff]  ;;  %v120_v39 = vld [vmem:[%s6067_s0 + $0xc0] sm:$0xff] }
  0x66   :  { %3116 = vmatprep.mubr.msk.bf16.mxu0 %vm167_vm0, %v3926_v10  ;;  %3147 = vmatpush3.bf16.msra.mxu1 %v3357_v17  ;;  %v121_v40 = vld [vmem:[%s6067_s0 + $0xc8] sm:$0xff]  ;;  %v4042_v41 = vpack.c.bf16 %v119_v38, %v118_v37  ;;  %v122_v43 = vld [vmem:[%s6067_s0 + $0xd0] sm:$0xff]  ;;  %v123_v44 = vld [vmem:[%s6067_s0 + $0xd8] sm:$0xff] }
  0x67   :  { %v4044_v42 = vpack.c.bf16 %v121_v40, %v120_v39  ;;  %v124_v45 = vld [vmem:[%s6067_s0 + $0xe0] sm:$0xff]  ;;  %v125_v46 = vld [vmem:[%s6067_s0 + $0xe8] sm:$0xff]  ;;  %v4066_v47 = vpack.c.bf16 %v123_v44, %v122_v43  ;;  %v126_v49 = vld [vmem:[%s6067_s0 + $0xf0] sm:$0xff] }
  0x68   :  { %v4068_v48 = vpack.c.bf16 %v125_v46, %v124_v45  ;;  %v127_v50 = vld [vmem:[%s6067_s0 + $0xf8] sm:$0xff]  ;;  %v4100_v53 = vld [vmem:[#allocation2] ss:$0 sm:$0xff]  ;;  %v4130_v7 = vld [vmem:[#allocation4] ss:$0 sm:$0xff] }
  0x69   :  { %3149 = vmatmul.mubr.msk.bf16.vlgmr.msra.gmra.mrb[0].mxu1 %vm167_vm0, %v3924_v9  ;;  %6116 = vst [vmem:[#allocation13_spill] sm:$0xff] %v4044_v42  ;;  %6117 = vst [vmem:[#allocation14_spill] sm:$0xff] %v4066_v47  ;;  %v4084_v51 = vpack.c.bf16 %v127_v50, %v126_v49 }
  0x6a   :  { %3152 = vmatprep.mubr.msk.bf16.mxu1 %vm167_vm0, %v3926_v10  ;;  %6118 = vst [vmem:[#allocation15_spill] sm:$0xff] %v4068_v48  ;;  %vm4201_vm2 = vmpackc.low %vm969_vm1, %vm969_vm1 }
  0x6b   :  { %6119 = vst [vmem:[#allocation16_spill] sm:$0xff] %v4084_v51 }
  0x6d   :  { %3117 = vmatmul.mubr.msk.bf16.gmra.mrb[4].mxu0 %vm167_vm0, %v3947_v16 }
  0x6e   :  { %3120 = vmatprep.mubr.msk.bf16.mxu0 %vm167_vm0, %v3952_v18 }
  0x71   :  { %3153 = vmatmul.mubr.msk.bf16.gmra.mrb[4].mxu1 %vm167_vm0, %v3947_v16 }
  0x72   :  { %3156 = vmatprep.mubr.msk.bf16.mxu1 %vm167_vm0, %v3952_v18 }
  0x75   :  { %3121 = vmatmul.mubr.msk.bf16.gmra.mrb[8].mxu0 %vm167_vm0, %v3970_v23 }
  0x76   :  { %3124 = vmatprep.mubr.msk.bf16.mxu0 %vm167_vm0, %v3972_v24 }
  0x79   :  { %3157 = vmatmul.mubr.msk.bf16.gmra.mrb[8].mxu1 %vm167_vm0, %v3970_v23 }
  0x7a   :  { %3160 = vmatprep.mubr.msk.bf16.mxu1 %vm167_vm0, %v3972_v24 }
  0x7d   :  { %3125 = vmatmul.mubr.msk.bf16.gmra.mrb[12].mxu0 %vm167_vm0, %v3994_v29 }
  0x7e   :  { %3128 = vmatprep.mubr.msk.bf16.mxu0 %vm167_vm0, %v3996_v30 }
  0x81   :  { %3161 = vmatmul.mubr.msk.bf16.gmra.mrb[12].mxu1 %vm167_vm0, %v3994_v29 }
  0x82   :  { %3164 = vmatprep.mubr.msk.bf16.mxu1 %vm167_vm0, %v3996_v30 }
  0x85   :  { %3129 = vmatmul.mubr.msk.bf16.gmra.mrb[16].mxu0 %vm167_vm0, %v4018_v35 }
  0x86   :  { %3132 = vmatprep.mubr.msk.bf16.mxu0 %vm167_vm0, %v4020_v36 }
  0x89   :  { %3165 = vmatmul.mubr.msk.bf16.gmra.mrb[16].mxu1 %vm167_vm0, %v4018_v35 }
  0x8a   :  { %3168 = vmatprep.mubr.msk.bf16.mxu1 %vm167_vm0, %v4020_v36 }
  0x8d   :  { %3133 = vmatmul.mubr.msk.bf16.gmra.mrb[20].mxu0 %vm167_vm0, %v4042_v41 }
  0x8e   :  { %3136 = vmatprep.mubr.msk.bf16.mxu0 %vm167_vm0, %v4044_v42 }
  0x91   :  { %3169 = vmatmul.mubr.msk.bf16.gmra.mrb[20].mxu1 %vm167_vm0, %v4042_v41 }
  0x92   :  { %3172 = vmatprep.mubr.msk.bf16.mxu1 %vm167_vm0, %v4044_v42 }
  0x95   :  { %3137 = vmatmul.mubr.msk.bf16.gmra.mrb[24].mxu0 %vm167_vm0, %v4066_v47 }
  0x96   :  { %3140 = vmatprep.mubr.msk.bf16.mxu0 %vm167_vm0, %v4068_v48 }
  0x99   :  { %3173 = vmatmul.mubr.msk.bf16.gmra.mrb[24].mxu1 %vm167_vm0, %v4066_v47 }
  0x9a   :  { %3176 = vmatprep.mubr.msk.bf16.mxu1 %vm167_vm0, %v4068_v48 }
  0x9d   :  { %3141 = vmatmul.mubr.msk.bf16.gmra.mrb[28].mxu0 %vm167_vm0, %v4084_v51 }
  0x9e   :  { %3184 = vmatprep.mubr.msk.bf16.mxu0 %vm167_vm0, %v3906_v4 }
  0xa1   :  { %3177 = vmatmul.mubr.msk.bf16.gmra.mrb[28].mxu1 %vm167_vm0, %v4084_v51 }
 0x138   :  { %v3114_v52 = vpop.f32.mrb[0].mxu0 }
 0x139   :  { %v250_v54 = vpop.f32.mrb[1].mxu0  ;;  %v4103_v56 = vadd.f32 %v3114_v52, %v4100_v53 }
 0x13a   :  { %v3115_v55 = vpop.f32.mrb[2].mxu0  ;;  %v4109_v59 = vadd.f32 %v4100_v53, %v250_v54 }
 0x13b   :  { %v4106_v57 = vadd.f32 %v3115_v55, %v4100_v53  ;;  %v253_v58 = vpop.f32.mrb[3].mxu0 }
 0x13c   :  { %v4112_v60 = vadd.f32 %v4100_v53, %v253_v58  ;;  %v4134_v11 = vpop.f32.mrb[0].mxu1 }
 0x13d   :  { %v3259_v61 = vpack.c.bf16 %v4106_v57, %v4103_v56  ;;  %v434_v13 = vpop.f32.mrb[1].mxu1 }
 0x13e   :  { %v3253_v62 = vpack.c.bf16 %v4112_v60, %v4109_v59  ;;  %v435_v14 = vadd.f32 %v4130_v7, %v434_v13  ;;  %v4139_v15 = vpop.f32.mrb[2].mxu1 }
 0x13f   :  { %v4141_v19 = vpop.f32.mrb[3].mxu1 }
 0x140   :  { %v3118_v63 = vpop.f32.mrb[4].mxu0  ;;  %v4143_v21 = vmul.f32 0.25, %v435_v14 }
 0x141   :  { %v266_v0 = vpop.f32.mrb[5].mxu0  ;;  %v4119_v2 = vadd.f32 %v3118_v63, %v4100_v53 }
 0x142   :  { %v3119_v1 = vpop.f32.mrb[6].mxu0  ;;  %v4125_v5 = vadd.f32 %v4100_v53, %v266_v0  ;;  %3027 = vmatprep.mubr.msk.f32.mxu1 %vm969_vm1, %v4143_v21 }
 0x143   :  { %v4122_v3 = vadd.f32 %v3119_v1, %v4100_v53  ;;  %v269_v4 = vpop.f32.mrb[7].mxu0 }
 0x144   :  { %v4128_v6 = vadd.f32 %v4100_v53, %v269_v4  ;;  %v4161_v33 = vpop.f32.mrb[4].mxu1 }
 0x145   :  { %v4165_v37 = vpop.f32.mrb[5].mxu1 }
 0x146   :  { %v4167_v38 = vpop.f32.mrb[6].mxu1 }
 0x147   :  { %v4169_v40 = vpop.f32.mrb[7].mxu1 }
 0x148   :  { %v3122_v17 = vpop.f32.mrb[8].mxu0 }
 0x149   :  { %v282_v20 = vpop.f32.mrb[9].mxu0  ;;  %v4146_v25 = vadd.f32 %v3122_v17, %v4100_v53 }
 0x14a   :  { %v3123_v22 = vpop.f32.mrb[10].mxu0  ;;  %v4154_v28 = vadd.f32 %v4100_v53, %v282_v20 }
 0x14b   :  { %v4149_v26 = vadd.f32 %v3123_v22, %v4100_v53  ;;  %v285_v27 = vpop.f32.mrb[11].mxu0 }
 0x14c   :  { %v4157_v31 = vadd.f32 %v4100_v53, %v285_v27  ;;  %v4185_v55 = vpop.f32.mrb[8].mxu1 }
 0x14d   :  { %v4189_v63 = vpop.f32.mrb[9].mxu1 }
 0x14e   :  { %v4191_v0 = vpop.f32.mrb[10].mxu1 }
 0x14f   :  { %v4193_v4 = vpop.f32.mrb[11].mxu1 }
 0x150   :  { %v3126_v39 = vpop.f32.mrb[12].mxu0 }
 0x151   :  { %v298_v43 = vpop.f32.mrb[13].mxu0  ;;  %v4172_v45 = vadd.f32 %v3126_v39, %v4100_v53 }
 0x152   :  { %v3127_v44 = vpop.f32.mrb[14].mxu0  ;;  %v4178_v50 = vadd.f32 %v4100_v53, %v298_v43 }
 0x153   :  { %v4175_v46 = vadd.f32 %v3127_v44, %v4100_v53  ;;  %v301_v49 = vpop.f32.mrb[15].mxu0 }
 0x154   :  { %v4181_v52 = vadd.f32 %v4100_v53, %v301_v49  ;;  %v4205_v49 = vpop.f32.mrb[12].mxu1 }
 0x155   :  { %v4207_v58 = vpop.f32.mrb[13].mxu1 }
 0x158   :  { %v3130_v1 = vpop.f32.mrb[16].mxu0 }
 0x159   :  { %v314_v13 = vpop.f32.mrb[17].mxu0  ;;  %v323_v17 = vadd.f32 %v3130_v1, %v4100_v53  ;;  %v4209_v1 = vpop.f32.mrb[14].mxu1 }
 0x15a   :  { %v3131_v14 = vpop.f32.mrb[18].mxu0  ;;  %v315_v27 = vadd.f32 %v4100_v53, %v314_v13 }
 0x15b   :  { %v326_v20 = vadd.f32 %v3131_v14, %v4100_v53  ;;  %v317_v22 = vpop.f32.mrb[19].mxu0  ;;  %v4213_v14 = vpop.f32.mrb[15].mxu1 }
 0x15c   :  { %v318_v39 = vadd.f32 %v4100_v53, %v317_v22  ;;  %v4226_v8 = vpop.f32.mrb[16].mxu1 }
 0x15d   :  { %v3256_v43 = vpack.c.bf16 %v326_v20, %v323_v17  ;;  %v4228_v60 = vpop.f32.mrb[17].mxu1 }
 0x15e   :  { %v3250_v54 = vpack.c.bf16 %v318_v39, %v315_v27 }
 0x160   :  { %3252 = vmatprep.subr.msk.bf16.mxu1 %vm4201_vm2, %v3250_v54  ;;  %v3134_v13 = vpop.f32.mrb[20].mxu0 }
 0x161   :  { %3255 = vmatpush3.bf16.xpose.msk.msra.mxu1 %vm4201_vm2, %v3253_v62  ;;  %v339_v17 = vadd.f32 %v3134_v13, %v4100_v53  ;;  %v330_v20 = vpop.f32.mrb[21].mxu0  ;;  %v4230_v62 = vpop.f32.mrb[18].mxu1 }
 0x162   :  { %3258 = vmatprep.subr.msk.bf16.mxu1 %vm4201_vm2, %v3256_v43  ;;  %v331_v22 = vadd.f32 %v4100_v53, %v330_v20  ;;  %v3135_v27 = vpop.f32.mrb[22].mxu0  ;;  %v4232_v12 = vpop.f32.mrb[19].mxu1 }
 0x163   :  { %v342_v54 = vadd.f32 %v3135_v27, %v4100_v53  ;;  %v333_v39 = vpop.f32.mrb[23].mxu0 }
 0x164   :  { %v334_v32 = vadd.f32 %v4100_v53, %v333_v39  ;;  %v4245_v51 = vpop.f32.mrb[20].mxu1 }
 0x165   :  { %v3268_v34 = vpack.c.bf16 %v342_v54, %v339_v17  ;;  %v4247_v57 = vpop.f32.mrb[21].mxu1 }
 0x166   :  { %v3262_v59 = vpack.c.bf16 %v334_v32, %v331_v22 }
 0x168   :  { %v3138_v13 = vpop.f32.mrb[24].mxu0 }
 0x169   :  { %3261 = vmatpush3.bf16.xpose.msk.msra.mxu1 %vm4201_vm2, %v3259_v61  ;;  %v355_v43 = vadd.f32 %v3138_v13, %v4100_v53  ;;  %v346_v20 = vpop.f32.mrb[25].mxu0  ;;  %v4249_v61 = vpop.f32.mrb[22].mxu1 }
 0x16a   :  { %3264 = vmatprep.subr.msk.bf16.mxu1 %vm4201_vm2, %v3262_v59  ;;  %v347_v32 = vadd.f32 %v4100_v53, %v346_v20  ;;  %v3139_v17 = vpop.f32.mrb[26].mxu0  ;;  %v4251_v48 = vpop.f32.mrb[23].mxu1  ;;  %v6122_v59 = vpack.c.bf16 %v4128_v6, %v4125_v5 }
 0x16b   :  { %v358_v22 = vadd.f32 %v3139_v17, %v4100_v53  ;;  %v349_v27 = vpop.f32.mrb[27].mxu0 }
 0x16c   :  { %v350_v54 = vadd.f32 %v4100_v53, %v349_v27  ;;  %v4264_v42 = vpop.f32.mrb[24].mxu1 }
 0x16d   :  { %v3280_v39 = vpack.c.bf16 %v358_v22, %v355_v43  ;;  %v4266_v6 = vpop.f32.mrb[25].mxu1 }
 0x16e   :  { %v3274_v56 = vpack.c.bf16 %v350_v54, %v347_v32 }
 0x170   :  { %v3142_v13 = vpop.f32.mrb[28].mxu0 }
 0x171   :  { %3267 = vmatpush3.bf16.xpose.msk.msra.mxu1 %vm4201_vm2, %v6122_v59  ;;  %v371_v20 = vadd.f32 %v3142_v13, %v4100_v53  ;;  %v362_v17 = vpop.f32.mrb[29].mxu0  ;;  %v4268_v59 = vpop.f32.mrb[26].mxu1  ;;  %v6123_v13 = vpack.c.bf16 %v4122_v3, %v4119_v2 }
 0x172   :  { %3270 = vmatprep.subr.msk.bf16.mxu1 %vm4201_vm2, %v3268_v34  ;;  %v363_v43 = vadd.f32 %v4100_v53, %v362_v17  ;;  %v3143_v32 = vpop.f32.mrb[30].mxu0  ;;  %v4275_v34 = vpop.f32.mrb[27].mxu1  ;;  %v6125_v17 = vpack.c.bf16 %v4149_v26, %v4146_v25  ;;  %v6127_v25 = vpack.c.bf16 %v4175_v46, %v4172_v45  ;;  %v438_v26 = vadd.f32 %v4130_v7, %v4141_v19 }
 0x173   :  { %v374_v22 = vadd.f32 %v3143_v32, %v4100_v53  ;;  %v365_v27 = vpop.f32.mrb[31].mxu0  ;;  %v446_v45 = vadd.f32 %v4139_v15, %v4130_v7  ;;  %v451_v19 = vadd.f32 %v4130_v7, %v4165_v37  ;;  %v459_v15 = vadd.f32 %v4161_v33, %v4130_v7 }
 0x174   :  { %v366_v54 = vadd.f32 %v4100_v53, %v365_v27  ;;  %v6124_v53 = vpack.c.bf16 %v4157_v31, %v4154_v28  ;;  %v6126_v28 = vpack.c.bf16 %v4181_v52, %v4178_v50  ;;  %v3358_v31 = vld [vmem:[%s6073_s6] sm:$0xff]   ;;  %v443_v50 = vadd.f32 %v4134_v11, %v4130_v7 }
 0x175   :  { %v3292_v47 = vpack.c.bf16 %v374_v22, %v371_v20  ;;  %v4286_v20 = vpop.f32.mrb[28].mxu1  ;;  %3180 = vmatprep.subr.bf16.mxu0 %v3358_v31  ;;  %v746_v52 = vmul.f32 0.25, %v438_v26  ;;  %v748_v46 = vmul.f32 0.25, %v446_v45  ;;  %v749_v11 = vmul.f32 0.25, %v451_v19 }
 0x176   :  { %v3286_v5 = vpack.c.bf16 %v366_v54, %v363_v43  ;;  %v4288_v2 = vpop.f32.mrb[29].mxu1  ;;  %3181 = vmatpush3.bf16.msra.mxu0 %v3358_v31  ;;  %v751_v37 = vmul.f32 0.25, %v459_v15  ;;  %v470_v32 = vadd.f32 %v4130_v7, %v4193_v4  ;;  %v478_v27 = vadd.f32 %v4191_v0, %v4130_v7 }
 0x177   :  { %v4290_v3 = vpop.f32.mrb[30].mxu1  ;;  %v483_v4 = vadd.f32 %v4130_v7, %v4207_v58  ;;  %v491_v0 = vadd.f32 %v4205_v49, %v4130_v7  ;;  %v510_v26 = vadd.f32 %v4230_v62, %v4130_v7  ;;  %v523_v62 = vadd.f32 %v4245_v51, %v4130_v7 }
 0x178   :  { %v754_v22 = vmul.f32 0.25, %v470_v32  ;;  %v756_v54 = vmul.f32 0.25, %v478_v27  ;;  %v534_v19 = vadd.f32 %v4130_v7, %v4275_v34 }
 0x179   :  { %3273 = vmatpush3.bf16.xpose.msk.msra.mxu1 %vm4201_vm2, %v6123_v13  ;;  %v759_v58 = vmul.f32 0.25, %v491_v0  ;;  %v764_v31 = vmul.f32 0.25, %v510_v26 }
 0x17a   :  { %3276 = vmatprep.subr.msk.bf16.mxu1 %vm4201_vm2, %v3274_v56  ;;  %v4297_v56 = vpop.f32.mrb[31].mxu1 }
 0x181   :  { %3279 = vmatpush3.bf16.xpose.msk.msra.mxu1 %vm4201_vm2, %v6124_v53  ;;  %v494_v53 = vadd.f32 %v4209_v1, %v4130_v7  ;;  %v507_v1 = vadd.f32 %v4226_v8, %v4130_v7 }
 0x182   :  { %3282 = vmatprep.subr.msk.bf16.mxu1 %vm4201_vm2, %v3280_v39  ;;  %v462_v39 = vadd.f32 %v4167_v38, %v4130_v7  ;;  %v475_v38 = vadd.f32 %v4185_v55, %v4130_v7  ;;  %v757_v55 = vmul.f32 0.25, %v483_v4 }
 0x184   :  { %v752_v43 = vmul.f32 0.25, %v462_v39 }
 0x189   :  { %3285 = vmatpush3.bf16.xpose.msk.msra.mxu1 %vm4201_vm2, %v6125_v17  ;;  %v760_v17 = vmul.f32 0.25, %v494_v53 }
 0x18a   :  { %3288 = vmatprep.subr.msk.bf16.mxu1 %vm4201_vm2, %v3286_v5  ;;  %v486_v5 = vadd.f32 %v4130_v7, %v4213_v14  ;;  %v499_v14 = vadd.f32 %v4130_v7, %v4228_v60  ;;  %v763_v60 = vmul.f32 0.25, %v507_v1 }
 0x18c   :  { %v758_v13 = vmul.f32 0.25, %v486_v5  ;;  %v761_v49 = vmul.f32 0.25, %v499_v14  ;;  %v784_v5 = vld [vmem:[%s6068_s1 + $0x38] sm:$0xff] }
 0x18d   :  { %v2802_v1 = vadd.f32 -1.0, %v784_v5 }
 0x191   :  { %3291 = vmatpush3.bf16.xpose.msk.msra.mxu1 %vm4201_vm2, %v6126_v28  ;;  %v502_v28 = vadd.f32 %v4130_v7, %v4232_v12  ;;  %v515_v12 = vadd.f32 %v4130_v7, %v4247_v57  ;;  %v767_v57 = vmul.f32 0.25, %v523_v62 }
 0x192   :  { %3294 = vmatprep.subr.msk.bf16.mxu1 %vm4201_vm2, %v3292_v47  ;;  %v747_v47 = vmul.f32 0.25, %v443_v50  ;;  %v518_v50 = vadd.f32 %v4130_v7, %v4251_v48  ;;  %v531_v48 = vadd.f32 %v4130_v7, %v4266_v6  ;;  %v539_v6 = vadd.f32 %v4264_v42, %v4130_v7 }
 0x193   :  { %v765_v8 = vmul.f32 0.25, %v515_v12  ;;  %v547_v42 = vadd.f32 %v4130_v7, %v4288_v2  ;;  %v558_v2 = vadd.f32 %v4290_v3, %v4130_v7  ;;  %v780_v3 = vld [vmem:[%s6068_s1 + $0x18] sm:$0xff] }
 0x194   :  { %v769_v51 = vmul.f32 0.25, %v531_v48  ;;  %v771_v34 = vmul.f32 0.25, %v539_v6  ;;  %v2798_v39 = vadd.f32 -1.0, %v780_v3  ;;  %v787_v48 = vld [vmem:[%s6068_s1 + $0x50] sm:$0xff] }
 0x195   :  { %v773_v15 = vmul.f32 0.25, %v547_v42 }
 0x196   :  { %v908_v4 = vmul.f32 1e+30, %v2798_v39 }
 0x199   :  { %3297 = vmatpush3.bf16.xpose.msk.msra.mxu1 %vm4201_vm2, %v6127_v25  ;;  %v762_v25 = vmul.f32 0.25, %v502_v28 }
 0x1a0   :  { %3028 = vmatmul.mubr.msk.f32.vlgmr.msra.gmra.mrb[32].mxu1 %vm969_vm1, %v4143_v21  ;;  %v454_v21 = vadd.f32 %v4130_v7, %v4169_v40  ;;  %v467_v40 = vadd.f32 %v4130_v7, %v4189_v63  ;;  %v755_v63 = vmul.f32 0.25, %v475_v38 }
 0x1a1   :  { %3029 = vmatprep.mubr.msk.f32.mxu1 %vm969_vm1, %v746_v52 }
 0x1a2   :  { %v750_v44 = vmul.f32 0.25, %v454_v21  ;;  %v753_v33 = vmul.f32 0.25, %v467_v40  ;;  %v781_v40 = vld [vmem:[%s6068_s1 + $0x20] sm:$0xff] }
 0x1a4   :  { %3030 = vmatmul.mubr.msk.f32.gmra.mrb[34].mxu1 %vm969_vm1, %v746_v52  ;;  %v766_v52 = vmul.f32 0.25, %v518_v50 }
 0x1a5   :  { %3031 = vmatprep.mubr.msk.f32.mxu1 %vm969_vm1, %v747_v47 }
 0x1a8   :  { %3032 = vmatmul.mubr.msk.f32.gmra.mrb[36].mxu1 %vm969_vm1, %v747_v47  ;;  %v526_v47 = vadd.f32 %v4249_v61, %v4130_v7  ;;  %v3359_v61 = vld [vmem:[%s6073_s6 + $0x8] sm:$0xff]  }
 0x1a9   :  { %3033 = vmatprep.mubr.msk.f32.mxu1 %vm969_vm1, %v748_v46  ;;  %3182 = vmatprep.subr.bf16.mxu0 %v3359_v61 }
 0x1aa   :  { %v768_v45 = vmul.f32 0.25, %v526_v47  ;;  %3183 = vmatpush3.bf16.msra.mxu0 %v3359_v61 }
 0x1ac   :  { %3034 = vmatmul.mubr.msk.f32.gmra.mrb[38].mxu1 %vm969_vm1, %v748_v46  ;;  %v770_v46 = vmul.f32 0.25, %v534_v19 }
 0x1ad   :  { %3035 = vmatprep.mubr.msk.f32.mxu1 %vm969_vm1, %v749_v11  ;;  %3185 = vmatmul.mubr.msk.bf16.vlgmr.msra.gmra.mrb[32].mxu0 %vm167_vm0, %v3924_v9  ;;  %v550_v9 = vadd.f32 %v4130_v7, %v4297_v56 }
 0x1ae   :  { %3188 = vmatprep.mubr.msk.bf16.mxu0 %vm167_vm0, %v3926_v10  ;;  %v555_v10 = vadd.f32 %v4286_v20, %v4130_v7  ;;  %v4490_v20 = vld [vmem:[%s6068_s1 + $0x10] sm:$0xff] }
 0x1b0   :  { %3036 = vmatmul.mubr.msk.f32.gmra.mrb[40].mxu1 %vm969_vm1, %v749_v11  ;;  %v542_v11 = vadd.f32 %v4268_v59, %v4130_v7  ;;  %v774_v59 = vmul.f32 0.25, %v550_v9  ;;  %v790_v9 = vld [vmem:[%s6068_s1 + $0x68] sm:$0xff] }
 0x1b1   :  { %3037 = vmatprep.mubr.msk.f32.mxu1 %vm969_vm1, %v750_v44 }
 0x1b2   :  { %v772_v21 = vmul.f32 0.25, %v542_v11 }
 0x1b4   :  { %3038 = vmatmul.mubr.msk.f32.gmra.mrb[42].mxu1 %vm969_vm1, %v750_v44  ;;  %v2797_v44 = vadd.f32 -1.0, %v4490_v20 }
 0x1b5   :  { %3039 = vmatprep.mubr.msk.f32.mxu1 %vm969_vm1, %v751_v37  ;;  %3189 = vmatmul.mubr.msk.bf16.gmra.mrb[36].mxu0 %vm167_vm0, %v3947_v16  ;;  %v775_v16 = vmul.f32 0.25, %v555_v10 }
 0x1b6   :  { %3192 = vmatprep.mubr.msk.bf16.mxu0 %vm167_vm0, %v3952_v18  ;;  %v776_v18 = vmul.f32 0.25, %v558_v2 }
 0x1b8   :  { %3040 = vmatmul.mubr.msk.f32.gmra.mrb[44].mxu1 %vm969_vm1, %v751_v37 }
 0x1b9   :  { %3041 = vmatprep.mubr.msk.f32.mxu1 %vm969_vm1, %v752_v43 }
 0x1bc   :  { %3042 = vmatmul.mubr.msk.f32.gmra.mrb[46].mxu1 %vm969_vm1, %v752_v43  ;;  %v782_v43 = vld [vmem:[%s6068_s1 + $0x28] sm:$0xff] }
 0x1bd   :  { %3043 = vmatprep.mubr.msk.f32.mxu1 %vm969_vm1, %v753_v33  ;;  %3193 = vmatmul.mubr.msk.bf16.gmra.mrb[40].mxu0 %vm167_vm0, %v3970_v23  ;;  %v6128_v23 = vld [vmem:[#allocation13_spill] sm:$0xff] }
 0x1be   :  { %3196 = vmatprep.mubr.msk.bf16.mxu0 %vm167_vm0, %v3972_v24  ;;  %v6129_v24 = vld [vmem:[#allocation14_spill] sm:$0xff] }
 0x1c0   :  { %3044 = vmatmul.mubr.msk.f32.gmra.mrb[48].mxu1 %vm969_vm1, %v753_v33 }
 0x1c1   :  { %3045 = vmatprep.mubr.msk.f32.mxu1 %vm969_vm1, %v754_v22 }
 0x1c4   :  { %3046 = vmatmul.mubr.msk.f32.gmra.mrb[50].mxu1 %vm969_vm1, %v754_v22  ;;  %v907_v22 = vmul.f32 1e+30, %v2797_v44 }
 0x1c5   :  { %3047 = vmatprep.mubr.msk.f32.mxu1 %vm969_vm1, %v755_v63  ;;  %3197 = vmatmul.mubr.msk.bf16.gmra.mrb[44].mxu0 %vm167_vm0, %v3994_v29  ;;  %v6130_v29 = vld [vmem:[#allocation15_spill] sm:$0xff] }
 0x1c6   :  { %3200 = vmatprep.mubr.msk.bf16.mxu0 %vm167_vm0, %v3996_v30  ;;  %v6131_v30 = vld [vmem:[#allocation16_spill] sm:$0xff] }
 0x1c8   :  { %3048 = vmatmul.mubr.msk.f32.gmra.mrb[52].mxu1 %vm969_vm1, %v755_v63  ;;  %v2799_v63 = vadd.f32 -1.0, %v781_v40 }
 0x1c9   :  { %3049 = vmatprep.mubr.msk.f32.mxu1 %vm969_vm1, %v756_v54 }
 0x1ca   :  { %v909_v14 = vmul.f32 1e+30, %v2799_v63  ;;  %v794_v63 = vld [vmem:[%s6068_s1 + $0x88] sm:$0xff] }
 0x1cc   :  { %3050 = vmatmul.mubr.msk.f32.gmra.mrb[54].mxu1 %vm969_vm1, %v756_v54  ;;  %v2800_v54 = vadd.f32 -1.0, %v782_v43 }
 0x1cd   :  { %3051 = vmatprep.mubr.msk.f32.mxu1 %vm969_vm1, %v757_v55  ;;  %3201 = vmatmul.mubr.msk.bf16.gmra.mrb[48].mxu0 %vm167_vm0, %v4018_v35  ;;  %v4478_v35 = vld [vmem:[%s6068_s1] sm:$0xff] }
 0x1ce   :  { %3204 = vmatprep.mubr.msk.bf16.mxu0 %vm167_vm0, %v4020_v36  ;;  %v4483_v36 = vld [vmem:[%s6068_s1 + $0x8] sm:$0xff]  ;;  %v910_v28 = vmul.f32 1e+30, %v2800_v54 }
 0x1cf   :  { %v2796_v7 = vadd.f32 -1.0, %v4483_v36 }
 0x1d0   :  { %3052 = vmatmul.mubr.msk.f32.gmra.mrb[56].mxu1 %vm969_vm1, %v757_v55  ;;  %v783_v55 = vld [vmem:[%s6068_s1 + $0x30] sm:$0xff] }
 0x1d1   :  { %3053 = vmatprep.mubr.msk.f32.mxu1 %vm969_vm1, %v758_v13  ;;  %v906_v37 = vmul.f32 1e+30, %v2796_v7  ;;  %v792_v7 = vld [vmem:[%s6068_s1 + $0x78] sm:$0xff] }
 0x1d4   :  { %3054 = vmatmul.mubr.msk.f32.gmra.mrb[58].mxu1 %vm969_vm1, %v758_v13 }
 0x1d5   :  { %3055 = vmatprep.mubr.msk.f32.mxu1 %vm969_vm1, %v759_v58  ;;  %3205 = vmatmul.mubr.msk.bf16.gmra.mrb[52].mxu0 %vm167_vm0, %v4042_v41  ;;  %v2795_v41 = vadd.f32 -1.0, %v4478_v35 }
 0x1d6   :  { %3208 = vmatprep.mubr.msk.bf16.mxu0 %vm167_vm0, %v6128_v23 }
 0x1d7   :  { %v905_v56 = vmul.f32 1e+30, %v2795_v41  ;;  %v791_v41 = vld [vmem:[%s6068_s1 + $0x70] sm:$0xff] }
 0x1d8   :  { %3056 = vmatmul.mubr.msk.f32.gmra.mrb[60].mxu1 %vm969_vm1, %v759_v58  ;;  %v2809_v40 = vadd.f32 -1.0, %v791_v41 }
 0x1d9   :  { %3057 = vmatprep.mubr.msk.f32.mxu1 %vm969_vm1, %v760_v17 }
 0x1dc   :  { %3058 = vmatmul.mubr.msk.f32.gmra.mrb[62].mxu1 %vm969_vm1, %v760_v17  ;;  %v2801_v17 = vadd.f32 -1.0, %v783_v55 }
 0x1dd   :  { %3059 = vmatprep.mubr.msk.f32.mxu1 %vm969_vm1, %v761_v49  ;;  %3209 = vmatmul.mubr.msk.bf16.gmra.mrb[56].mxu0 %vm167_vm0, %v6129_v24 }
 0x1de   :  { %3212 = vmatprep.mubr.msk.bf16.mxu0 %vm167_vm0, %v6130_v29  ;;  %v911_v50 = vmul.f32 1e+30, %v2801_v17  ;;  %v2812_v17 = vadd.f32 -1.0, %v794_v63 }
 0x1e0   :  { %3060 = vmatmul.mubr.msk.f32.gmra.mrb[64].mxu1 %vm969_vm1, %v761_v49 }
 0x1e1   :  { %3061 = vmatprep.mubr.msk.f32.mxu1 %vm969_vm1, %v762_v25 }
 0x1e4   :  { %3062 = vmatmul.mubr.msk.f32.gmra.mrb[66].mxu1 %vm969_vm1, %v762_v25  ;;  %v785_v25 = vld [vmem:[%s6068_s1 + $0x40] sm:$0xff] }
 0x1e5   :  { %3063 = vmatprep.mubr.msk.f32.mxu1 %vm969_vm1, %v763_v60  ;;  %3213 = vmatmul.mubr.msk.bf16.gmra.mrb[60].mxu0 %vm167_vm0, %v6131_v30  ;;  %v2803_v62 = vadd.f32 -1.0, %v785_v25  ;;  %v2808_v30 = vadd.f32 -1.0, %v790_v9 }
 0x1e8   :  { %3064 = vmatmul.mubr.msk.f32.gmra.mrb[68].mxu1 %vm969_vm1, %v763_v60  ;;  %v786_v60 = vld [vmem:[%s6068_s1 + $0x48] sm:$0xff] }
 0x1e9   :  { %3065 = vmatprep.mubr.msk.f32.mxu1 %vm969_vm1, %v764_v31  ;;  %v2804_v47 = vadd.f32 -1.0, %v786_v60 }
 0x1eb   :  { %v914_v42 = vmul.f32 1e+30, %v2804_v47 }
 0x1ec   :  { %3066 = vmatmul.mubr.msk.f32.gmra.mrb[70].mxu1 %vm969_vm1, %v764_v31 }
 0x1ed   :  { %3067 = vmatprep.mubr.msk.f32.mxu1 %vm969_vm1, %v765_v8 }
 0x1f0   :  { %3068 = vmatmul.mubr.msk.f32.gmra.mrb[72].mxu1 %vm969_vm1, %v765_v8 }
 0x1f1   :  { %3069 = vmatprep.mubr.msk.f32.mxu1 %vm969_vm1, %v766_v52 }
 0x1f4   :  { %3070 = vmatmul.mubr.msk.f32.gmra.mrb[74].mxu1 %vm969_vm1, %v766_v52 }
 0x1f5   :  { %3071 = vmatprep.mubr.msk.f32.mxu1 %vm969_vm1, %v767_v57 }
 0x1f8   :  { %3072 = vmatmul.mubr.msk.f32.gmra.mrb[76].mxu1 %vm969_vm1, %v767_v57  ;;  %v912_v57 = vmul.f32 1e+30, %v2802_v1  ;;  %v796_v1 = vld [vmem:[%s6068_s1 + $0x98] sm:$0xff] }
 0x1f9   :  { %3073 = vmatprep.mubr.msk.f32.mxu1 %vm969_vm1, %v768_v45  ;;  %v2814_v47 = vadd.f32 -1.0, %v796_v1 }
 0x1fc   :  { %3074 = vmatmul.mubr.msk.f32.gmra.mrb[78].mxu1 %vm969_vm1, %v768_v45  ;;  %v788_v45 = vld [vmem:[%s6068_s1 + $0x58] sm:$0xff] }
 0x1fd   :  { %3075 = vmatprep.mubr.msk.f32.mxu1 %vm969_vm1, %v769_v51 }
 0x200   :  { %3076 = vmatmul.mubr.msk.f32.gmra.mrb[80].mxu1 %vm969_vm1, %v769_v51 }
 0x201   :  { %3077 = vmatprep.mubr.msk.f32.mxu1 %vm969_vm1, %v770_v46 }
 0x204   :  { %3078 = vmatmul.mubr.msk.f32.gmra.mrb[82].mxu1 %vm969_vm1, %v770_v46  ;;  %v913_v46 = vmul.f32 1e+30, %v2803_v62 }
 0x205   :  { %3079 = vmatprep.mubr.msk.f32.mxu1 %vm969_vm1, %v771_v34 }
 0x208   :  { %3080 = vmatmul.mubr.msk.f32.gmra.mrb[84].mxu1 %vm969_vm1, %v771_v34  ;;  %v2805_v34 = vadd.f32 -1.0, %v787_v48  ;;  %v797_v48 = vld [vmem:[%s6068_s1 + $0xa0] sm:$0xff] }
 0x209   :  { %3081 = vmatprep.mubr.msk.f32.mxu1 %vm969_vm1, %v772_v21 }
 0x20c   :  { %3082 = vmatmul.mubr.msk.f32.gmra.mrb[86].mxu1 %vm969_vm1, %v772_v21  ;;  %v2806_v21 = vadd.f32 -1.0, %v788_v45  ;;  %v798_v45 = vld [vmem:[%s6068_s1 + $0xa8] sm:$0xff] }
 0x20d   :  { %3083 = vmatprep.mubr.msk.f32.mxu1 %vm969_vm1, %v773_v15  ;;  %v2816_v9 = vadd.f32 -1.0, %v798_v45 }
 0x20e   :  { %v916_v29 = vmul.f32 1e+30, %v2806_v21 }
 0x210   :  { %3084 = vmatmul.mubr.msk.f32.gmra.mrb[88].mxu1 %vm969_vm1, %v773_v15  ;;  %v789_v15 = vld [vmem:[%s6068_s1 + $0x60] sm:$0xff] }
 0x211   :  { %3085 = vmatprep.mubr.msk.f32.mxu1 %vm969_vm1, %v774_v59  ;;  %v2807_v23 = vadd.f32 -1.0, %v789_v15  ;;  %v924_v15 = vmul.f32 1e+30, %v2814_v47  ;;  %v805_v47 = vld [vmem:[%s6068_s1 + $0xe0] sm:$0xff] }
 0x213   :  { %v917_v39 = vmul.f32 1e+30, %v2807_v23 }
 0x214   :  { %3086 = vmatmul.mubr.msk.f32.gmra.mrb[90].mxu1 %vm969_vm1, %v774_v59 }
 0x215   :  { %3087 = vmatprep.mubr.msk.f32.mxu1 %vm969_vm1, %v775_v16 }
 0x218   :  { %3088 = vmatmul.mubr.msk.f32.gmra.mrb[92].mxu1 %vm969_vm1, %v775_v16 }
 0x219   :  { %3089 = vmatprep.mubr.msk.f32.mxu1 %vm969_vm1, %v776_v18 }
 0x21c   :  { %3090 = vmatmul.mubr.msk.f32.gmra.mrb[94].mxu1 %vm969_vm1, %v776_v18  ;;  %v915_v18 = vmul.f32 1e+30, %v2805_v34 }
 0x273   :  { %v1228_v33 = vpop.f32.mrb[32].mxu1 }
 0x274   :  { %v4502_v32 = vadd.f32 %v1228_v33, %v905_v56  ;;  %v1230_v38 = vpop.f32.mrb[33].mxu1  ;;  %v918_v33 = vmul.f32 1e+30, %v2808_v30 }
 0x275   :  { %v4504_v27 = vadd.f32 %v1230_v38, %v906_v37  ;;  %v2810_v38 = vadd.f32 -1.0, %v792_v7 }
 0x277   :  { %v1234_v0 = vpop.f32.mrb[34].mxu1  ;;  %v1419_v13 = vmax.f32 %v4502_v32, %v4504_v27 }
 0x278   :  { %v4514_v58 = vadd.f32 %v1234_v0, %v907_v22  ;;  %v1236_v53 = vpop.f32.mrb[35].mxu1  ;;  %v793_v22 = vld [vmem:[%s6068_s1 + $0x80] sm:$0xff]  ;;  %v919_v0 = vmul.f32 1e+30, %v2809_v40 }
 0x279   :  { %v4516_v49 = vadd.f32 %v1236_v53, %v908_v4  ;;  %1420 = vmax.xlane.f32.xlu0 %v1419_v13  ;;  %v2811_v13 = vadd.f32 -1.0, %v793_v22 }
 0x27b   :  { %v1240_v26 = vpop.f32.mrb[36].mxu1  ;;  %v1422_v12 = vmax.f32 %v4514_v58, %v4516_v49 }
 0x27c   :  { %v4526_v31 = vadd.f32 %v1240_v26, %v909_v14  ;;  %v1242_v8 = vpop.f32.mrb[37].mxu1  ;;  %v920_v14 = vmul.f32 1e+30, %v2810_v38 }
 0x27d   :  { %v4528_v52 = vadd.f32 %v1242_v8, %v910_v28  ;;  %1423 = vmax.xlane.f32.xlu0 %v1422_v12  ;;  %v795_v28 = vld [vmem:[%s6068_s1 + $0x90] sm:$0xff]  ;;  %v921_v8 = vmul.f32 1e+30, %v2811_v13 }
 0x27e   :  { %v803_v13 = vld [vmem:[%s6068_s1 + $0xd0] sm:$0xff] }
 0x27f   :  { %v1246_v51 = vpop.f32.mrb[38].mxu1  ;;  %v1425_v19 = vmax.f32 %v4526_v31, %v4528_v52 }
 0x280   :  { %v4538_v61 = vadd.f32 %v1246_v51, %v911_v50  ;;  %v1248_v6 = vpop.f32.mrb[39].mxu1  ;;  %v2813_v50 = vadd.f32 -1.0, %v795_v28 }
 0x281   :  { %v4540_v11 = vadd.f32 %v1248_v6, %v912_v57  ;;  %1426 = vmax.xlane.f32.xlu1 %v1425_v19  ;;  %v922_v57 = vmul.f32 1e+30, %v2812_v17 }
 0x282   :  { %v923_v34 = vmul.f32 1e+30, %v2813_v50 }
 0x283   :  { %v1252_v10 = vpop.f32.mrb[40].mxu1  ;;  %v1428_v59 = vmax.f32 %v4538_v61, %v4540_v11 }
 0x284   :  { %v4550_v16 = vadd.f32 %v1252_v10, %v913_v46  ;;  %v1254_v2 = vpop.f32.mrb[41].mxu1  ;;  %v799_v10 = vld [vmem:[%s6068_s1 + $0xb0] sm:$0xff] }
 0x285   :  { %v4552_v24 = vadd.f32 %v1254_v2, %v914_v42  ;;  %1429 = vmax.xlane.f32.xlu1 %v1428_v59  ;;  %v2815_v42 = vadd.f32 -1.0, %v797_v48  ;;  %v800_v59 = vld [vmem:[%s6068_s1 + $0xb8] sm:$0xff]  ;;  %v2817_v41 = vadd.f32 -1.0, %v799_v10  ;;  %v806_v48 = vld [vmem:[%s6068_s1 + $0xe8] sm:$0xff] }
 0x286   :  { %v2824_v10 = vadd.f32 -1.0, %v806_v48 }
 0x287   :  { %v1258_v3 = vpop.f32.mrb[42].mxu1  ;;  %v1431_v56 = vmax.f32 %v4550_v16, %v4552_v24  ;;  %v925_v30 = vmul.f32 1e+30, %v2815_v42  ;;  %v927_v63 = vmul.f32 1e+30, %v2817_v41  ;;  %v2823_v42 = vadd.f32 -1.0, %v805_v47 }
 0x288   :  { %v4562_v44 = vadd.f32 %v1258_v3, %v915_v18  ;;  %v1260_v37 = vpop.f32.mrb[43].mxu1  ;;  %v926_v3 = vmul.f32 1e+30, %v2816_v9 }
 0x289   :  { %v4564_v43 = vadd.f32 %v1260_v37, %v916_v29  ;;  %1432 = vmax.xlane.f32.xlu0 %v1431_v56  ;;  %v2818_v56 = vadd.f32 -1.0, %v800_v59  ;;  %v801_v37 = vld [vmem:[%s6068_s1 + $0xc0] sm:$0xff]  ;;  %v807_v59 = vld [vmem:[%s6068_s1 + $0xf0] sm:$0xff] }
 0x28b   :  { %v1264_v4 = vpop.f32.mrb[44].mxu1  ;;  %v1434_v54 = vmax.f32 %v4562_v44, %v4564_v43 }
 0x28c   :  { %v4574_v55 = vadd.f32 %v1264_v4, %v917_v39  ;;  %v1266_v5 = vpop.f32.mrb[45].mxu1  ;;  %v802_v39 = vld [vmem:[%s6068_s1 + $0xc8] sm:$0xff]  ;;  %v2819_v4 = vadd.f32 -1.0, %v801_v37 }
 0x28d   :  { %v4576_v53 = vadd.f32 %v1266_v5, %v918_v33  ;;  %1435 = vmax.xlane.f32.xlu1 %v1434_v54  ;;  %v928_v5 = vmul.f32 1e+30, %v2818_v56  ;;  %v2825_v56 = vadd.f32 -1.0, %v807_v59 }
 0x28f   :  { %v1270_v25 = vpop.f32.mrb[46].mxu1  ;;  %v1437_v60 = vmax.f32 %v4574_v55, %v4576_v53 }
 0x290   :  { %v4586_v26 = vadd.f32 %v1270_v25, %v919_v0  ;;  %v1272_v12 = vpop.f32.mrb[47].mxu1  ;;  %v2820_v0 = vadd.f32 -1.0, %v802_v39  ;;  %v934_v39 = vmul.f32 1e+30, %v2824_v10  ;;  %v814_v10 = vld [vmem:[%s6068_s1 + $0x128] sm:$0xff] }
 0x291   :  { %v4588_v62 = vadd.f32 %v1272_v12, %v920_v14  ;;  %1438 = vmax.xlane.f32.xlu0 %v1437_v60  ;;  %v804_v14 = vld [vmem:[%s6068_s1 + $0xd8] sm:$0xff]  ;;  %v929_v60 = vmul.f32 1e+30, %v2819_v4  ;;  %v2821_v12 = vadd.f32 -1.0, %v803_v13  ;;  %v935_v13 = vmul.f32 1e+30, %v2825_v56 }
 0x292   :  { %v930_v50 = vmul.f32 1e+30, %v2820_v0 }
 0x293   :  { %v1276_v51 = vpop.f32.mrb[48].mxu1  ;;  %v1440_v19 = vmax.f32 %v4586_v26, %v4588_v62 }
 0x294   :  { %v4598_v6 = vadd.f32 %v1276_v51, %v921_v8  ;;  %v1278_v46 = vpop.f32.mrb[49].mxu1 }
 0x295   :  { %v4600_v21 = vadd.f32 %v1278_v46, %v922_v57  ;;  %1441 = vmax.xlane.f32.xlu1 %v1440_v19  ;;  %v2822_v57 = vadd.f32 -1.0, %v804_v14 }
 0x297   :  { %v1282_v2 = vpop.f32.mrb[50].mxu1  ;;  %v1443_v18 = vmax.f32 %v4598_v6, %v4600_v21  ;;  %v932_v9 = vmul.f32 1e+30, %v2822_v57 }
 0x298   :  { %v4610_v23 = vadd.f32 %v1282_v2, %v923_v34  ;;  %v1284_v29 = vpop.f32.mrb[51].mxu1  ;;  %v931_v34 = vmul.f32 1e+30, %v2821_v12  ;;  %v808_v2 = vld [vmem:[%s6068_s1 + $0xf8] sm:$0xff] }
 0x299   :  { %v4612_v7 = vadd.f32 %v1284_v29, %v924_v15  ;;  %1444 = vmax.xlane.f32.xlu0 %v1443_v18  ;;  %v812_v12 = vld [vmem:[%s6068_s1 + $0x118] sm:$0xff] }
 0x29b   :  { %v1288_v40 = vpop.f32.mrb[52].mxu1  ;;  %v1446_v33 = vmax.f32 %v4610_v23, %v4612_v7 }
 0x29c   :  { %v4622_v38 = vadd.f32 %v1288_v40, %v925_v30  ;;  %v1290_v22 = vpop.f32.mrb[53].mxu1  ;;  %v2826_v40 = vadd.f32 -1.0, %v808_v2 }
 0x29d   :  { %v4624_v54 = vadd.f32 %v1290_v22, %v926_v3  ;;  %1447 = vmax.xlane.f32.xlu1 %v1446_v33  ;;  %v933_v3 = vmul.f32 1e+30, %v2823_v42  ;;  %v809_v33 = vld [vmem:[%s6068_s1 + $0x100] sm:$0xff]  ;;  %v810_v22 = vld [vmem:[%s6068_s1 + $0x108] sm:$0xff]  ;;  %v2830_v42 = vadd.f32 -1.0, %v812_v12 }
 0x29e   :  { %v2827_v14 = vadd.f32 -1.0, %v809_v33  ;;  %v815_v33 = vld [vmem:[%s6068_s1 + $0x130] sm:$0xff] }
 0x29f   :  { %v1294_v17 = vpop.f32.mrb[54].mxu1  ;;  %v1449_v28 = vmax.f32 %v4622_v38, %v4624_v54 }
 0x2a0   :  { %v4634_v1 = vadd.f32 %v1294_v17, %v927_v63  ;;  %v1296_v25 = vpop.f32.mrb[55].mxu1 }
 0x2a1   :  { %v4636_v8 = vadd.f32 %v1296_v25, %v928_v5  ;;  %1450 = vmax.xlane.f32.xlu0 %v1449_v28  ;;  %v936_v28 = vmul.f32 1e+30, %v2826_v40  ;;  %v2828_v25 = vadd.f32 -1.0, %v810_v22  ;;  %v2832_v40 = vadd.f32 -1.0, %v814_v10  ;;  %v816_v22 = vld [vmem:[%s6068_s1 + $0x138] sm:$0xff] }
 0x2a2   :  { %v2834_v12 = vadd.f32 -1.0, %v816_v22 }
 0x2a3   :  { %v1300_v45 = vpop.f32.mrb[56].mxu1  ;;  %v1452_v51 = vmax.f32 %v4634_v1, %v4636_v8 }
 0x2a4   :  { %v4646_v19 = vadd.f32 %v1300_v45, %v929_v60  ;;  %v1302_v46 = vpop.f32.mrb[57].mxu1  ;;  %v811_v60 = vld [vmem:[%s6068_s1 + $0x110] sm:$0xff]  ;;  %v937_v45 = vmul.f32 1e+30, %v2827_v14 }
 0x2a5   :  { %v4648_v15 = vadd.f32 %v1302_v46, %v930_v50  ;;  %1453 = vmax.xlane.f32.xlu1 %v1452_v51  ;;  %v2829_v51 = vadd.f32 -1.0, %v811_v60  ;;  %v942_v60 = vmul.f32 1e+30, %v2832_v40 }
 0x2a7   :  { %v1306_v18 = vpop.f32.mrb[58].mxu1  ;;  %v1455_v29 = vmax.f32 %v4646_v19, %v4648_v15 }
 0x2a8   :  { %v4658_v30 = vadd.f32 %v1306_v18, %v931_v34  ;;  %v1308_v41 = vpop.f32.mrb[59].mxu1  ;;  %v938_v34 = vmul.f32 1e+30, %v2828_v25 }
 0x2a9   :  { %v4660_v37 = vadd.f32 %v1308_v41, %v932_v9  ;;  %1456 = vmax.xlane.f32.xlu0 %v1455_v29  ;;  %v813_v9 = vld [vmem:[%s6068_s1 + $0x120] sm:$0xff]  ;;  %v939_v41 = vmul.f32 1e+30, %v2829_v51 }
 0x2ab   :  { %v1312_v63 = vpop.f32.mrb[60].mxu1  ;;  %v1458_v4 = vmax.f32 %v4658_v30, %v4660_v37 }
 0x2ac   :  { %v4670_v5 = vadd.f32 %v1312_v63, %v933_v3  ;;  %v1314_v0 = vpop.f32.mrb[61].mxu1  ;;  %v2831_v3 = vadd.f32 -1.0, %v813_v9 }
 0x2ad   :  { %v4672_v17 = vadd.f32 %v1314_v0, %v934_v39  ;;  %1459 = vmax.xlane.f32.xlu1 %v1458_v4  ;;  %v940_v39 = vmul.f32 1e+30, %v2830_v42 }
 0x2ae   :  { %v941_v14 = vmul.f32 1e+30, %v2831_v3 }
 0x2af   :  { %v1318_v50 = vpop.f32.mrb[62].mxu1  ;;  %v1461_v57 = vmax.f32 %v4670_v5, %v4672_v17 }
 0x2b0   :  { %v4682_v47 = vadd.f32 %v1318_v50, %v935_v13  ;;  %v1320_v48 = vpop.f32.mrb[63].mxu1  ;;  %v817_v50 = vld [vmem:[%s6068_s1 + $0x140] sm:$0xff] }
 0x2b1   :  { %v4684_v46 = vadd.f32 %v1320_v48, %v936_v28  ;;  %1462 = vmax.xlane.f32.xlu0 %v1461_v57  ;;  %v2833_v28 = vadd.f32 -1.0, %v815_v33  ;;  %v818_v57 = vld [vmem:[%s6068_s1 + $0x148] sm:$0xff]  ;;  %v2835_v9 = vadd.f32 -1.0, %v817_v50 }
 0x2b3   :  { %v1324_v59 = vpop.f32.mrb[64].mxu1  ;;  %v1464_v2 = vmax.f32 %v4682_v47, %v4684_v46  ;;  %v943_v42 = vmul.f32 1e+30, %v2833_v28  ;;  %v945_v22 = vmul.f32 1e+30, %v2835_v9  ;;  %v821_v28 = vld [vmem:[%s6068_s1 + $0x160] sm:$0xff] }
 0x2b4   :  { %v4694_v18 = vadd.f32 %v1324_v59, %v937_v45  ;;  %v1326_v29 = vpop.f32.mrb[65].mxu1  ;;  %v944_v59 = vmul.f32 1e+30, %v2834_v12 }
 0x2b5   :  { %v4696_v56 = vadd.f32 %v1326_v29, %v938_v34  ;;  %1465 = vmax.xlane.f32.xlu1 %v1464_v2  ;;  %v2836_v2 = vadd.f32 -1.0, %v818_v57  ;;  %v819_v29 = vld [vmem:[%s6068_s1 + $0x150] sm:$0xff] }
 0x2b7   :  { %v1330_v63 = vpop.f32.mrb[66].mxu1  ;;  %v1467_v4 = vmax.f32 %v4694_v18, %v4696_v56 }
 0x2b8   :  { %v4706_v0 = vadd.f32 %v1330_v63, %v939_v41  ;;  %v1332_v13 = vpop.f32.mrb[67].mxu1  ;;  %v820_v41 = vld [vmem:[%s6068_s1 + $0x158] sm:$0xff]  ;;  %v2837_v63 = vadd.f32 -1.0, %v819_v29 }
 0x2b9   :  { %v4708_v25 = vadd.f32 %v1332_v13, %v940_v39  ;;  %1468 = vmax.xlane.f32.xlu0 %v1467_v4  ;;  %v946_v13 = vmul.f32 1e+30, %v2836_v2  ;;  %v823_v2 = vld [vmem:[%s6068_s1 + $0x170] sm:$0xff]  ;;  %v824_v29 = vld [vmem:[%s6068_s1 + $0x178] sm:$0xff] }
 0x2bb   :  { %v1336_v48 = vpop.f32.mrb[68].mxu1  ;;  %v1470_v45 = vmax.f32 %v4706_v0, %v4708_v25 }
 0x2bc   :  { %v4718_v51 = vadd.f32 %v1336_v48, %v941_v14  ;;  %v1338_v34 = vpop.f32.mrb[69].mxu1  ;;  %v2838_v14 = vadd.f32 -1.0, %v820_v41 }
 0x2bd   :  { %v4720_v10 = vadd.f32 %v1338_v34, %v942_v60  ;;  %1471 = vmax.xlane.f32.xlu1 %v1470_v45  ;;  %v822_v60 = vld [vmem:[%s6068_s1 + $0x168] sm:$0xff]  ;;  %v947_v45 = vmul.f32 1e+30, %v2837_v63  ;;  %v2839_v34 = vadd.f32 -1.0, %v821_v28  ;;  %v2841_v63 = vadd.f32 -1.0, %v823_v2 }
 0x2be   :  { %v948_v9 = vmul.f32 1e+30, %v2838_v14  ;;  %v2842_v28 = vadd.f32 -1.0, %v824_v29 }
 0x2bf   :  { %6132 = vst [vmem:[#allocation13_spill] sm:$0xff] %v4720_v10  ;;  %v1342_v3 = vpop.f32.mrb[70].mxu1  ;;  %v1473_v39 = vmax.f32 %v4718_v51, %v4720_v10 }
 0x2c0   :  { %v4730_v40 = vadd.f32 %v1342_v3, %v943_v42  ;;  %v1344_v33 = vpop.f32.mrb[71].mxu1 }
 0x2c1   :  { %v4732_v4 = vadd.f32 %v1344_v33, %v944_v59  ;;  %1474 = vmax.xlane.f32.xlu0 %v1473_v39  ;;  %v2840_v59 = vadd.f32 -1.0, %v822_v60  ;;  %v825_v60 = vld [vmem:[%s6068_s1 + $0x180] sm:$0xff] }
 0x2c2   :  { %6133 = vst [vmem:[#allocation14_spill] sm:$0xff] %v4730_v40  ;;  %v2843_v2 = vadd.f32 -1.0, %v825_v60 }
 0x2c3   :  { %6134 = vst [vmem:[#allocation15_spill] sm:$0xff] %v4732_v4  ;;  %v1348_v12 = vpop.f32.mrb[72].mxu1  ;;  %v1476_v50 = vmax.f32 %v4730_v40, %v4732_v4  ;;  %v950_v14 = vmul.f32 1e+30, %v2840_v59  ;;  %v952_v59 = vmul.f32 1e+30, %v2842_v28 }
 0x2c4   :  { %v4742_v57 = vadd.f32 %v1348_v12, %v945_v22  ;;  %v1350_v48 = vpop.f32.mrb[73].mxu1  ;;  %v949_v22 = vmul.f32 1e+30, %v2839_v34  ;;  %v826_v12 = vld [vmem:[%s6068_s1 + $0x188] sm:$0xff] }
 0x2c5   :  { %v4744_v42 = vadd.f32 %v1350_v48, %v946_v13  ;;  %1477 = vmax.xlane.f32.xlu1 %v1476_v50  ;;  %v2844_v29 = vadd.f32 -1.0, %v826_v12 }
 0x2c6   :  { %6135 = vst [vmem:[#allocation16_spill] sm:$0xff] %v4742_v57 }
 0x2c7   :  { %6136 = vst [vmem:[#allocation17_spill] sm:$0xff] %v4744_v42  ;;  %v1354_v41 = vpop.f32.mrb[74].mxu1  ;;  %v1479_v3 = vmax.f32 %v4742_v57, %v4744_v42  ;;  %v954_v28 = vmul.f32 1e+30, %v2844_v29 }
 0x2c8   :  { %v4754_v39 = vadd.f32 %v1354_v41, %v947_v45  ;;  %v1356_v33 = vpop.f32.mrb[75].mxu1 }
 0x2c9   :  { %v4756_v13 = vadd.f32 %v1356_v33, %v948_v9  ;;  %1480 = vmax.xlane.f32.xlu0 %v1479_v3  ;;  %v951_v9 = vmul.f32 1e+30, %v2841_v63  ;;  %v827_v3 = vld [vmem:[%s6068_s1 + $0x190] sm:$0xff]  ;;  %v828_v33 = vld [vmem:[%s6068_s1 + $0x198] sm:$0xff] }
 0x2ca   :  { %6137 = vst [vmem:[#allocation18_spill] sm:$0xff] %v4754_v39  ;;  %v2845_v60 = vadd.f32 -1.0, %v827_v3  ;;  %v2846_v12 = vadd.f32 -1.0, %v828_v33 }
 0x2cb   :  { %6138 = vst [vmem:[#allocation19_spill] sm:$0xff] %v4756_v13  ;;  %v1360_v50 = vpop.f32.mrb[76].mxu1  ;;  %v1482_v48 = vmax.f32 %v4754_v39, %v4756_v13  ;;  %v830_v13 = vld [vmem:[%s6068_s1 + $0x1a8] sm:$0xff] }
 0x2cc   :  { %v4766_v45 = vadd.f32 %v1360_v50, %v949_v22  ;;  %v1362_v34 = vpop.f32.mrb[77].mxu1  ;;  %v956_v29 = vmul.f32 1e+30, %v2846_v12  ;;  %v2848_v33 = vadd.f32 -1.0, %v830_v13 }
 0x2cd   :  { %v4768_v41 = vadd.f32 %v1362_v34, %v950_v14  ;;  %1483 = vmax.xlane.f32.xlu1 %v1482_v48  ;;  %v953_v14 = vmul.f32 1e+30, %v2843_v2  ;;  %v829_v34 = vld [vmem:[%s6068_s1 + $0x1a0] sm:$0xff] }
 0x2ce   :  { %6139 = vst [vmem:[#allocation20_spill] sm:$0xff] %v4766_v45  ;;  %v2847_v3 = vadd.f32 -1.0, %v829_v34  ;;  %v958_v13 = vmul.f32 1e+30, %v2848_v33 }
 0x2cf   :  { %6140 = vst [vmem:[#allocation21_spill] sm:$0xff] %v4768_v41  ;;  %v1366_v42 = vpop.f32.mrb[78].mxu1  ;;  %v1485_v22 = vmax.f32 %v4766_v45, %v4768_v41  ;;  %v832_v41 = vld [vmem:[%s6068_s1 + $0x1b8] sm:$0xff] }
 0x2d0   :  { %v4778_v50 = vadd.f32 %v1366_v42, %v951_v9  ;;  %v1368_v63 = vpop.f32.mrb[79].mxu1  ;;  %v2850_v12 = vadd.f32 -1.0, %v832_v41 }
 0x2d1   :  { %v4780_v48 = vadd.f32 %v1368_v63, %v952_v59  ;;  %1486 = vmax.xlane.f32.xlu0 %v1485_v22  ;;  %v955_v59 = vmul.f32 1e+30, %v2845_v60  ;;  %v831_v63 = vld [vmem:[%s6068_s1 + $0x1b0] sm:$0xff] }
 0x2d2   :  { %6141 = vst [vmem:[#allocation22_spill] sm:$0xff] %v4778_v50  ;;  %v2849_v34 = vadd.f32 -1.0, %v831_v63  ;;  %v960_v41 = vmul.f32 1e+30, %v2850_v12 }
 0x2d3   :  { %6142 = vst [vmem:[#allocation23_spill] sm:$0xff] %v4780_v48  ;;  %v1372_v39 = vpop.f32.mrb[80].mxu1  ;;  %v1488_v42 = vmax.f32 %v4778_v50, %v4780_v48  ;;  %v834_v48 = vld [vmem:[%s6068_s1 + $0x1c8] sm:$0xff] }
 0x2d4   :  { %v4790_v9 = vadd.f32 %v1372_v39, %v953_v14  ;;  %v1374_v2 = vpop.f32.mrb[81].mxu1  ;;  %v2852_v33 = vadd.f32 -1.0, %v834_v48 }
 0x2d5   :  { %v4792_v22 = vadd.f32 %v1374_v2, %v954_v28  ;;  %1489 = vmax.xlane.f32.xlu0 %v1488_v42  ;;  %v957_v28 = vmul.f32 1e+30, %v2847_v3  ;;  %v833_v2 = vld [vmem:[%s6068_s1 + $0x1c0] sm:$0xff] }
 0x2d6   :  { %6143 = vst [vmem:[#allocation24_spill] sm:$0xff] %v4790_v9  ;;  %v2851_v63 = vadd.f32 -1.0, %v833_v2  ;;  %v962_v48 = vmul.f32 1e+30, %v2852_v33 }
 0x2d7   :  { %6144 = vst [vmem:[#allocation25_spill] sm:$0xff] %v4792_v22  ;;  %v1378_v45 = vpop.f32.mrb[82].mxu1  ;;  %v1491_v39 = vmax.f32 %v4790_v9, %v4792_v22  ;;  %v836_v22 = vld [vmem:[%s6068_s1 + $0x1d8] sm:$0xff] }
 0x2d8   :  { %v4802_v14 = vadd.f32 %v1378_v45, %v955_v59  ;;  %v1380_v60 = vpop.f32.mrb[83].mxu1  ;;  %v2854_v12 = vadd.f32 -1.0, %v836_v22  ;;  %v839_v22 = vld [vmem:[%s6068_s1 + $0x1f0] sm:$0xff] }
 0x2d9   :  { %v4804_v42 = vadd.f32 %v1380_v60, %v956_v29  ;;  %1492 = vmax.xlane.f32.xlu0 %v1491_v39  ;;  %v959_v29 = vmul.f32 1e+30, %v2849_v34  ;;  %v835_v60 = vld [vmem:[%s6068_s1 + $0x1d0] sm:$0xff] }
 0x2da   :  { %6145 = vst [vmem:[#allocation26_spill] sm:$0xff] %v4802_v14  ;;  %v2853_v2 = vadd.f32 -1.0, %v835_v60 }
 0x2db   :  { %6146 = vst [vmem:[#allocation27_spill] sm:$0xff] %v4804_v42  ;;  %v1384_v50 = vpop.f32.mrb[84].mxu1  ;;  %v1494_v45 = vmax.f32 %v4802_v14, %v4804_v42  ;;  %v838_v42 = vld [vmem:[%s6068_s1 + $0x1e8] sm:$0xff] }
 0x2dc   :  { %v4814_v59 = vadd.f32 %v1384_v50, %v957_v28  ;;  %v1386_v3 = vpop.f32.mrb[85].mxu1 }
 0x2dd   :  { %v4816_v39 = vadd.f32 %v1386_v3, %v958_v13  ;;  %1495 = vmax.xlane.f32.xlu0 %v1494_v45  ;;  %v961_v13 = vmul.f32 1e+30, %v2851_v63  ;;  %v837_v3 = vld [vmem:[%s6068_s1 + $0x1e0] sm:$0xff] }
 0x2de   :  { %6147 = vst [vmem:[#allocation28_spill] sm:$0xff] %v4814_v59  ;;  %v2855_v60 = vadd.f32 -1.0, %v837_v3 }
 0x2df   :  { %6148 = vst [vmem:[#allocation29_spill] sm:$0xff] %v4816_v39  ;;  %v1390_v9 = vpop.f32.mrb[86].mxu1  ;;  %v1497_v50 = vmax.f32 %v4814_v59, %v4816_v39  ;;  %v840_v39 = vld [vmem:[%s6068_s1 + $0x1f8] sm:$0xff] }
 0x2e0   :  { %v4826_v28 = vadd.f32 %v1390_v9, %v959_v29  ;;  %v1392_v34 = vpop.f32.mrb[87].mxu1 }
 0x2e1   :  { %v4828_v45 = vadd.f32 %v1392_v34, %v960_v41  ;;  %1498 = vmax.xlane.f32.xlu0 %v1497_v50  ;;  %v963_v41 = vmul.f32 1e+30, %v2853_v2  ;;  %v964_v50 = vmul.f32 1e+30, %v2854_v12  ;;  %v2856_v34 = vadd.f32 -1.0, %v838_v42  ;;  %v3186_v12 = vpop.f32.mrb[32].mxu0 }
 0x2e2   :  { %6149 = vst [vmem:[#allocation30_spill] sm:$0xff] %v4826_v28  ;;  %v618_v42 = vpop.f32.mrb[33].mxu0 }
 0x2e3   :  { %6150 = vst [vmem:[#allocation31_spill] sm:$0xff] %v4828_v45  ;;  %v1396_v14 = vpop.f32.mrb[88].mxu1  ;;  %v1500_v9 = vmax.f32 %v4826_v28, %v4828_v45  ;;  %v965_v45 = vmul.f32 1e+30, %v2855_v60  ;;  %v2858_v28 = vadd.f32 -1.0, %v840_v39  ;;  %v3187_v40 = vpop.f32.mrb[34].mxu0 }
 0x2e4   :  { %v4838_v29 = vadd.f32 %v1396_v14, %v961_v13  ;;  %v1398_v63 = vpop.f32.mrb[89].mxu1  ;;  %v2857_v13 = vadd.f32 -1.0, %v839_v22  ;;  %v621_v60 = vpop.f32.mrb[35].mxu0 }
 0x2e5   :  { %v4843_v33 = vadd.f32 %v1398_v63, %v962_v48  ;;  %1501 = vmax.xlane.f32.xlu0 %v1500_v9  ;;  %v966_v48 = vmul.f32 1e+30, %v2856_v34 }
 0x2e6   :  { %v967_v4 = vmul.f32 1e+30, %v2857_v13 }
 0x2e7   :  { %v1402_v59 = vpop.f32.mrb[90].mxu1  ;;  %v1503_v14 = vmax.f32 %v4838_v29, %v4843_v33 }
 0x2e8   :  { %v4850_v2 = vadd.f32 %v1402_v59, %v963_v41  ;;  %v1404_v3 = vpop.f32.mrb[91].mxu1  ;;  %v968_v59 = vmul.f32 1e+30, %v2858_v28  ;;  %v4858_v41 = vld [vmem:[#allocation6] ss:$0 sm:$0xff] }
 0x2e9   :  { %v4852_v57 = vadd.f32 %v1404_v3, %v964_v50  ;;  %1504 = vmax.xlane.f32.xlu0 %v1503_v14  ;;  %v627_v50 = vadd.f32 %v3186_v12, %v4858_v41  ;;  %v619_v34 = vadd.f32 %v4858_v41, %v618_v42  ;;  %v630_v14 = vadd.f32 %v3187_v40, %v4858_v41  ;;  %v3190_v12 = vpop.f32.mrb[36].mxu0 }
 0x2ea   :  { %6151 = vst [vmem:[#allocation32_spill] sm:$0xff] %v4850_v2  ;;  %v622_v3 = vadd.f32 %v4858_v41, %v621_v60  ;;  %v634_v40 = vpop.f32.mrb[37].mxu0 }
 0x2eb   :  { %6152 = vst [vmem:[#allocation33_spill] sm:$0xff] %v4852_v57  ;;  %v1408_v9 = vpop.f32.mrb[92].mxu1  ;;  %v1506_v63 = vmax.f32 %v4850_v2, %v4852_v57  ;;  %v635_v60 = vadd.f32 %v4858_v41, %v634_v40 }
 0x2ec   :  { %v4856_v10 = vadd.f32 %v1408_v9, %v965_v45  ;;  %v1410_v22 = vpop.f32.mrb[93].mxu1  ;;  %v3302_v9 = vpack.c.bf16 %v630_v14, %v627_v50  ;;  %v3299_v2 = vpack.c.bf16 %v622_v3, %v619_v34 }
 0x2ed   :  { %v4860_v39 = vadd.f32 %v1410_v22, %v966_v48  ;;  %1507 = vmax.xlane.f32.xlu0 %v1506_v63  ;;  %v3771_v48 = vmov 0.0|0.0   ;;  %v3191_v22 = vpop.f32.mrb[38].mxu0 }
 0x2ee   :  { %3298 = vmatprep.subr.bf16.mxu0 %v3771_v48  ;;  %v646_v50 = vadd.f32 %v3191_v22, %v4858_v41  ;;  %v637_v34 = vpop.f32.mrb[39].mxu0 }
 0x2ef   :  { %v1414_v13 = vpop.f32.mrb[94].mxu1  ;;  %v1509_v45 = vmax.f32 %v4856_v10, %v4860_v39  ;;  %3300 = vmatpush1.bf16.msra.mxu0 %v3299_v2  ;;  %v3194_v14 = vpop.f32.mrb[40].mxu0 }
 0x2f0   :  { %v4868_v28 = vadd.f32 %v1414_v13, %v967_v4  ;;  %v1416_v57 = vpop.f32.mrb[95].mxu1  ;;  %3301 = vmatprep.subr.bf16.mxu0 %v3771_v48  ;;  %v643_v4 = vadd.f32 %v3190_v12, %v4858_v41  ;;  %v650_v3 = vpop.f32.mrb[41].mxu0 }
 0x2f1   :  { %v4871_v63 = vadd.f32 %v1416_v57, %v968_v59  ;;  %1510 = vmax.xlane.f32.xlu0 %v1509_v45  ;;  %v638_v57 = vadd.f32 %v4858_v41, %v637_v34  ;;  %v3195_v13 = vpop.f32.mrb[42].mxu0  ;;  %v659_v45 = vadd.f32 %v3194_v14, %v4858_v41  ;;  %v651_v12 = vadd.f32 %v4858_v41, %v650_v3 }
 0x2f2   :  { %6153 = vst [vmem:[#allocation34_spill] sm:$0xff] %v4868_v28  ;;  %v3308_v59 = vpack.c.bf16 %v646_v50, %v643_v4  ;;  %v662_v40 = vadd.f32 %v3195_v13, %v4858_v41 }
 0x2f3   :  { %6154 = vst [vmem:[#allocation35_spill] sm:$0xff] %v4871_v63  ;;  %v1512_v42 = vmax.f32 %v4868_v28, %v4871_v63  ;;  %3303 = vmatpush1.bf16.msra.mxu0 %v3302_v9  ;;  %v3305_v2 = vpack.c.bf16 %v638_v57, %v635_v60 }
 0x2f4   :  { %3304 = vmatprep.subr.bf16.mxu0 %v3771_v48  ;;  %v3314_v4 = vpack.c.bf16 %v662_v40, %v659_v45 }
 0x2f5   :  { %1513 = vmax.xlane.f32.xlu0 %v1512_v42  ;;  %v653_v42 = vpop.f32.mrb[43].mxu0 }
 0x2f6   :  { %v654_v22 = vadd.f32 %v4858_v41, %v653_v42  ;;  %v3198_v60 = vpop.f32.mrb[44].mxu0 }
 0x2f7   :  { %3306 = vmatpush1.bf16.msra.mxu0 %v3305_v2  ;;  %v666_v50 = vpop.f32.mrb[45].mxu0  ;;  %v675_v57 = vadd.f32 %v3198_v60, %v4858_v41 }
 0x2f8   :  { %3307 = vmatprep.subr.bf16.mxu0 %v3771_v48  ;;  %v3311_v9 = vpack.c.bf16 %v654_v22, %v651_v12  ;;  %v3199_v34 = vpop.f32.mrb[46].mxu0  ;;  %v667_v2 = vadd.f32 %v4858_v41, %v666_v50 }
 0x2f9   :  { %v678_v14 = vadd.f32 %v3199_v34, %v4858_v41  ;;  %v669_v3 = vpop.f32.mrb[47].mxu0 }
 0x2fa   :  { %v670_v13 = vadd.f32 %v4858_v41, %v669_v3  ;;  %v3202_v22 = vpop.f32.mrb[48].mxu0 }
 0x2fb   :  { %3309 = vmatpush1.bf16.msra.mxu0 %v3308_v59  ;;  %v3320_v59 = vpack.c.bf16 %v678_v14, %v675_v57  ;;  %v691_v50 = vadd.f32 %v3202_v22, %v4858_v41  ;;  %v682_v63 = vpop.f32.mrb[49].mxu0 }
 0x2fc   :  { %3310 = vmatprep.subr.bf16.mxu0 %v3771_v48  ;;  %v3317_v42 = vpack.c.bf16 %v670_v13, %v667_v2  ;;  %v683_v3 = vadd.f32 %v4858_v41, %v682_v63  ;;  %v3203_v28 = vpop.f32.mrb[50].mxu0 }
 0x2fd   :  { %v685_v57 = vpop.f32.mrb[51].mxu0 }
 0x2fe   :  { %v686_v2 = vadd.f32 %v4858_v41, %v685_v57 }
 0x2ff   :  { %3312 = vmatpush1.bf16.msra.mxu0 %v3311_v9 }
 0x300   :  { %3313 = vmatprep.subr.bf16.mxu0 %v3771_v48 }
 0x303   :  { %3315 = vmatpush1.bf16.msra.mxu0 %v3314_v4 }
 0x304   :  { %3316 = vmatprep.subr.bf16.mxu0 %v3771_v48 }
 0x306   :  { %v1421_v45 = vpop.xlane.xlu0 %1420 }
 0x307   :  { %v1515_v12 = vsub.f32 %v4502_v32, %v1421_v45  ;;  %v1516_v40 = vsub.f32 %v4504_v27, %v1421_v45  ;;  %3318 = vmatpush1.bf16.msra.mxu0 %v3317_v42  ;;  %v694_v27 = vadd.f32 %v3203_v28, %v4858_v41 }
 0x308   :  { %3319 = vmatprep.subr.bf16.mxu0 %v3771_v48 }
 0x309   :  { %v1579_v9 = vmul.f32 1.442695, %v1515_v12  ;;  %v1581_v60 = vmul.f32 1.442695, %v1516_v40  ;;  %v3326_v45 = vpack.c.bf16 %v694_v27, %v691_v50  ;;  %v3323_v40 = vpack.c.bf16 %v686_v2, %v683_v3 }
 0x30a   :  { %v1424_v34 = vpop.xlane.xlu0 %1423 }
 0x30b   :  { %3361 = vpow2.f32 %v1579_v9  ;;  %v1517_v4 = vsub.f32 %v4514_v58, %v1424_v34  ;;  %v1518_v32 = vsub.f32 %v4516_v49, %v1424_v34  ;;  %3321 = vmatpush1.bf16.msra.mxu0 %v3320_v59  ;;  %v3206_v49 = vpop.f32.mrb[52].mxu0 }
 0x30c   :  { %3363 = vpow2.f32 %v1581_v60  ;;  %3322 = vmatprep.subr.bf16.mxu0 %v3771_v48  ;;  %v4906_v28 = vadd.f32 %v3206_v49, %v4858_v41  ;;  %v698_v42 = vpop.f32.mrb[53].mxu0 }
 0x30d   :  { %v1583_v14 = vmul.f32 1.442695, %v1517_v4  ;;  %v1585_v13 = vmul.f32 1.442695, %v1518_v32  ;;  %v3207_v60 = vpop.f32.mrb[54].mxu0  ;;  %v699_v59 = vadd.f32 %v4858_v41, %v698_v42 }
 0x30e   :  { %v1427_v12 = vpop.xlane.xlu1 %1426  ;;  %v710_v34 = vadd.f32 %v3207_v60, %v4858_v41  ;;  %v701_v3 = vpop.f32.mrb[55].mxu0 }
 0x30f   :  { %3365 = vpow2.f32 %v1583_v14  ;;  %v1519_v63 = vsub.f32 %v4526_v31, %v1427_v12  ;;  %v1520_v58 = vsub.f32 %v4528_v52, %v1427_v12  ;;  %3324 = vmatpush1.bf16.msra.mxu0 %v3323_v40  ;;  %v702_v32 = vadd.f32 %v4858_v41, %v701_v3 }
 0x310   :  { %3367 = vpow2.f32 %v1585_v13  ;;  %3325 = vmatprep.subr.bf16.mxu0 %v3771_v48  ;;  %v3332_v4 = vpack.c.bf16 %v710_v34, %v4906_v28 }
 0x311   :  { %v1587_v22 = vmul.f32 1.442695, %v1519_v63  ;;  %v1589_v9 = vmul.f32 1.442695, %v1520_v58  ;;  %v3329_v40 = vpack.c.bf16 %v702_v32, %v699_v59  ;;  %v3210_v58 = vpop.f32.mrb[56].mxu0 }
 0x312   :  { %v1430_v50 = vpop.xlane.xlu1 %1429  ;;  %v4925_v49 = vadd.f32 %v3210_v58, %v4858_v41  ;;  %v714_v28 = vpop.f32.mrb[57].mxu0  ;;  %v3556_v58 = vld [vmem:[%s6068_s1 + $0x20] sm:$0xff] }
 0x313   :  { %3369 = vpow2.f32 %v1587_v22  ;;  %v1521_v31 = vsub.f32 %v4538_v61, %v1430_v50  ;;  %v1522_v52 = vsub.f32 %v4540_v11, %v1430_v50  ;;  %3327 = vmatpush1.bf16.msra.mxu0 %v3326_v45  ;;  %v715_v60 = vadd.f32 %v4858_v41, %v714_v28 }
 0x314   :  { %3371 = vpow2.f32 %v1589_v9  ;;  %3328 = vmatprep.subr.bf16.mxu0 %v3771_v48 }
 0x315   :  { %v3362_v27 = vpop.eup %3361  ;;  %v1591_v57 = vmul.f32 1.442695, %v1521_v31  ;;  %v1593_v2 = vmul.f32 1.442695, %v1522_v52  ;;  %v3555_v52 = vld [vmem:[%s6068_s1 + $0x18] sm:$0xff] }
 0x316   :  { %v3364_v14 = vpop.eup %3363  ;;  %v1433_v13 = vpop.xlane.xlu0 %1432  ;;  %v4916_v12 = vmul.f32 %v3362_v27, %v4478_v35 }
 0x317   :  { %3373 = vpow2.f32 %v1591_v57  ;;  %v1523_v61 = vsub.f32 %v4550_v16, %v1433_v13  ;;  %v1524_v11 = vsub.f32 %v4552_v24, %v1433_v13  ;;  %v4921_v63 = vmul.f32 %v3364_v14, %v4483_v36  ;;  %v3211_v16 = vpop.f32.mrb[58].mxu0  ;;  %3330 = vmatpush1.bf16.msra.mxu0 %v3329_v40 }
 0x318   :  { %3375 = vpow2.f32 %v1593_v2  ;;  %v4934_v50 = vadd.f32 %v3211_v16, %v4858_v41  ;;  %v717_v59 = vpop.f32.mrb[59].mxu0  ;;  %3331 = vmatprep.subr.bf16.mxu0 %v3771_v48 }
 0x319   :  { %v3366_v35 = vpop.eup %3365  ;;  %v1595_v42 = vmul.f32 1.442695, %v1523_v61  ;;  %v1597_v22 = vmul.f32 1.442695, %v1524_v11  ;;  %v1771_v45 = vadd.f32 %v4921_v63, %v4916_v12  ;;  %v718_v27 = vadd.f32 %v4858_v41, %v717_v59 }
 0x31a   :  { %v3368_v9 = vpop.eup %3367  ;;  %v1436_v24 = vpop.xlane.xlu1 %1435  ;;  %v4930_v36 = vmul.f32 %v3366_v35, %v4490_v20  ;;  %v3338_v32 = vpack.c.bf16 %v4934_v50, %v4925_v49 }
 0x31b   :  { %3377 = vpow2.f32 %v1595_v42  ;;  %v1525_v34 = vsub.f32 %v4562_v44, %v1436_v24  ;;  %v1526_v31 = vsub.f32 %v4564_v43, %v1436_v24  ;;  %1772 = vadd.xlane.f32.xlu1 %v1771_v45  ;;  %v4941_v3 = vmul.f32 %v3555_v52, %v3368_v9  ;;  %v3214_v20 = vpop.f32.mrb[60].mxu0  ;;  %3333 = vmatpush1.bf16.msra.mxu0 %v3332_v4  ;;  %v3557_v9 = vld [vmem:[%s6068_s1 + $0x28] sm:$0xff]  ;;  %v3558_v52 = vld [vmem:[%s6068_s1 + $0x30] sm:$0xff] }
 0x31c   :  { %3379 = vpow2.f32 %v1597_v22  ;;  %v4948_v44 = vadd.f32 %v3214_v20, %v4858_v41  ;;  %v730_v43 = vpop.f32.mrb[61].mxu0  ;;  %v3335_v28 = vpack.c.bf16 %v718_v27, %v715_v60  ;;  %3334 = vmatprep.subr.bf16.mxu0 %v3771_v48 }
 0x31d   :  { %v3370_v57 = vpop.eup %3369  ;;  %v1599_v2 = vmul.f32 1.442695, %v1525_v34  ;;  %v1601_v14 = vmul.f32 1.442695, %v1526_v31  ;;  %v1774_v13 = vadd.f32 %v4941_v3, %v4930_v36  ;;  %v3215_v40 = vpop.f32.mrb[62].mxu0  ;;  %v731_v35 = vadd.f32 %v4858_v41, %v730_v43  ;;  %v3559_v43 = vld [vmem:[%s6068_s1 + $0x38] sm:$0xff] }
 0x31e   :  { %v3372_v61 = vpop.eup %3371  ;;  %v1439_v11 = vpop.xlane.xlu0 %1438  ;;  %v4955_v49 = vmul.f32 %v3556_v58, %v3370_v57  ;;  %v4959_v42 = vadd.f32 %v3215_v40, %v4858_v41 }
 0x31f   :  { %v733_v22 = vpop.f32.mrb[63].mxu0  ;;  %3381 = vpow2.f32 %v1599_v2  ;;  %1775 = vadd.xlane.f32.xlu1 %v1774_v13  ;;  %v1527_v45 = vsub.f32 %v4574_v55, %v1439_v11  ;;  %v1528_v16 = vsub.f32 %v4576_v53, %v1439_v11  ;;  %v4966_v24 = vmul.f32 %v3557_v9, %v3372_v61  ;;  %3336 = vmatpush1.bf16.msra.mxu0 %v3335_v28 }
 0x320   :  { %3383 = vpow2.f32 %v1601_v14  ;;  %v3344_v4 = vpack.c.bf16 %v4959_v42, %v4948_v44  ;;  %v734_v60 = vadd.f32 %v4858_v41, %v733_v22  ;;  %3337 = vmatprep.subr.bf16.mxu0 %v3771_v48 }
 0x321   :  { %v3374_v50 = vpop.eup %3373  ;;  %v1603_v59 = vmul.f32 1.442695, %v1527_v45  ;;  %v1605_v34 = vmul.f32 1.442695, %v1528_v16  ;;  %v1777_v55 = vadd.f32 %v4966_v24, %v4955_v49 }
 0x322   :  { %v3376_v53 = vpop.eup %3375  ;;  %v1442_v31 = vpop.xlane.xlu1 %1441  ;;  %v4977_v20 = vmul.f32 %v3558_v52, %v3374_v50  ;;  %v3341_v27 = vpack.c.bf16 %v734_v60, %v731_v35  ;;  %v3561_v35 = vld [vmem:[%s6068_s1 + $0x48] sm:$0xff] }
 0x323   :  { %3385 = vpow2.f32 %v1603_v59  ;;  %v1529_v44 = vsub.f32 %v4586_v26, %v1442_v31  ;;  %v1530_v41 = vsub.f32 %v4588_v62, %v1442_v31  ;;  %1778 = vadd.xlane.f32.xlu1 %v1777_v55  ;;  %v4984_v57 = vmul.f32 %v3559_v43, %v3376_v53  ;;  %v3560_v62 = vld [vmem:[%s6068_s1 + $0x40] sm:$0xff]  ;;  %3339 = vmatpush1.bf16.msra.mxu0 %v3338_v32 }
 0x324   :  { %3387 = vpow2.f32 %v1605_v34  ;;  %3340 = vmatprep.subr.bf16.mxu0 %v3771_v48  ;;  %v3563_v34 = vld [vmem:[%s6068_s1 + $0x58] sm:$0xff] }
 0x325   :  { %v3378_v2 = vpop.eup %3377  ;;  %v1607_v14 = vmul.f32 1.442695, %v1529_v44  ;;  %v1609_v13 = vmul.f32 1.442695, %v1530_v41  ;;  %v1780_v40 = vadd.f32 %v4984_v57, %v4977_v20 }
 0x326   :  { %v3380_v61 = vpop.eup %3379  ;;  %v1445_v26 = vpop.xlane.xlu0 %1444  ;;  %v4992_v11 = vmul.f32 %v3560_v62, %v3378_v2  ;;  %v3565_v2 = vld [vmem:[%s6068_s1 + $0x68] sm:$0xff] }
 0x327   :  { %3389 = vpow2.f32 %v1607_v14  ;;  %1781 = vadd.xlane.f32.xlu1 %v1780_v40  ;;  %v1531_v58 = vsub.f32 %v4598_v6, %v1445_v26  ;;  %v1532_v28 = vsub.f32 %v4600_v21, %v1445_v26  ;;  %v4999_v42 = vmul.f32 %v3561_v35, %v3380_v61  ;;  %v3562_v6 = vld [vmem:[%s6068_s1 + $0x50] sm:$0xff]  ;;  %3342 = vmatpush1.bf16.msra.mxu0 %v3341_v27  ;;  %v3567_v35 = vld [vmem:[%s6068_s1 + $0x78] sm:$0xff] }
 0x328   :  { %3391 = vpow2.f32 %v1609_v13  ;;  %3343 = vmatprep.subr.bf16.mxu0 %v3771_v48 }
 0x329   :  { %v3382_v22 = vpop.eup %3381  ;;  %v1611_v45 = vmul.f32 1.442695, %v1531_v58  ;;  %v1613_v16 = vmul.f32 1.442695, %v1532_v28  ;;  %v1783_v32 = vadd.f32 %v4999_v42, %v4992_v11 }
 0x32a   :  { %v3384_v9 = vpop.eup %3383  ;;  %v1448_v60 = vpop.xlane.xlu1 %1447  ;;  %v5007_v21 = vmul.f32 %v3562_v6, %v3382_v22 }
 0x32b   :  { %3393 = vpow2.f32 %v1611_v45  ;;  %v1533_v50 = vsub.f32 %v4610_v23, %v1448_v60  ;;  %v1534_v59 = vsub.f32 %v4612_v7, %v1448_v60  ;;  %1784 = vadd.xlane.f32.xlu1 %v1783_v32  ;;  %v5014_v55 = vmul.f32 %v3563_v34, %v3384_v9  ;;  %v3564_v7 = vld [vmem:[%s6068_s1 + $0x60] sm:$0xff]  ;;  %3345 = vmatpush1.bf16.msra.mxu0 %v3344_v4  ;;  %v3569_v34 = vld [vmem:[%s6068_s1 + $0x88] sm:$0xff] }
 0x32c   :  { %3395 = vpow2.f32 %v1613_v16 }
 0x32d   :  { %v3386_v53 = vpop.eup %3385  ;;  %v1615_v31 = vmul.f32 1.442695, %v1533_v50  ;;  %v1617_v52 = vmul.f32 1.442695, %v1534_v59  ;;  %v1786_v27 = vadd.f32 %v5014_v55, %v5007_v21 }
 0x32e   :  { %v3388_v44 = vpop.eup %3387  ;;  %v1451_v23 = vpop.xlane.xlu0 %1450  ;;  %v5022_v41 = vmul.f32 %v3564_v7, %v3386_v53 }
 0x32f   :  { %3397 = vpow2.f32 %v1615_v31  ;;  %1787 = vadd.xlane.f32.xlu1 %v1786_v27  ;;  %v1535_v48 = vsub.f32 %v4622_v38, %v1451_v23  ;;  %v1536_v43 = vsub.f32 %v4624_v54, %v1451_v23  ;;  %v5029_v14 = vmul.f32 %v3565_v2, %v3388_v44  ;;  %v3566_v38 = vld [vmem:[%s6068_s1 + $0x70] sm:$0xff]  ;;  %v3571_v2 = vld [vmem:[%s6068_s1 + $0x98] sm:$0xff] }
 0x330   :  { %3399 = vpow2.f32 %v1617_v52 }
 0x331   :  { %v3390_v13 = vpop.eup %3389  ;;  %v1619_v40 = vmul.f32 1.442695, %v1535_v48  ;;  %v1621_v61 = vmul.f32 1.442695, %v1536_v43  ;;  %v1789_v26 = vadd.f32 %v5029_v14, %v5022_v41 }
 0x332   :  { %v3392_v4 = vpop.eup %3391  ;;  %v1454_v62 = vpop.xlane.xlu1 %1453  ;;  %v5036_v54 = vmul.f32 %v3566_v38, %v3390_v13 }
 0x333   :  { %3401 = vpow2.f32 %v1619_v40  ;;  %v1537_v58 = vsub.f32 %v4634_v1, %v1454_v62  ;;  %v1538_v28 = vsub.f32 %v4636_v8, %v1454_v62  ;;  %1790 = vadd.xlane.f32.xlu1 %v1789_v26  ;;  %v5043_v22 = vmul.f32 %v3567_v35, %v3392_v4  ;;  %v3568_v1 = vld [vmem:[%s6068_s1 + $0x80] sm:$0xff]  ;;  %v3573_v35 = vld [vmem:[%s6068_s1 + $0xa8] sm:$0xff] }
 0x334   :  { %3403 = vpow2.f32 %v1621_v61 }
 0x335   :  { %v3394_v45 = vpop.eup %3393  ;;  %v1623_v16 = vmul.f32 1.442695, %v1537_v58  ;;  %v1625_v32 = vmul.f32 1.442695, %v1538_v28  ;;  %v1792_v9 = vadd.f32 %v5043_v22, %v5036_v54 }
 0x336   :  { %v3396_v60 = vpop.eup %3395  ;;  %v1457_v6 = vpop.xlane.xlu0 %1456  ;;  %v5050_v8 = vmul.f32 %v3568_v1, %v3394_v45 }
 0x337   :  { %3405 = vpow2.f32 %v1623_v16  ;;  %1793 = vadd.xlane.f32.xlu1 %v1792_v9  ;;  %v1539_v50 = vsub.f32 %v4646_v19, %v1457_v6  ;;  %v1540_v59 = vsub.f32 %v4648_v15, %v1457_v6  ;;  %v5057_v53 = vmul.f32 %v3569_v34, %v3396_v60  ;;  %v3570_v19 = vld [vmem:[%s6068_s1 + $0x90] sm:$0xff]  ;;  %v3575_v34 = vld [vmem:[%s6068_s1 + $0xb8] sm:$0xff] }
 0x338   :  { %3407 = vpow2.f32 %v1625_v32 }
 0x339   :  { %v3398_v31 = vpop.eup %3397  ;;  %v1627_v52 = vmul.f32 1.442695, %v1539_v50  ;;  %v1629_v27 = vmul.f32 1.442695, %v1540_v59  ;;  %v1795_v44 = vadd.f32 %v5057_v53, %v5050_v8 }
 0x33a   :  { %v3400_v23 = vpop.eup %3399  ;;  %v1460_v7 = vpop.xlane.xlu1 %1459  ;;  %v5064_v15 = vmul.f32 %v3570_v19, %v3398_v31 }
 0x33b   :  { %3409 = vpow2.f32 %v1627_v52  ;;  %v1541_v48 = vsub.f32 %v4658_v30, %v1460_v7  ;;  %v1542_v43 = vsub.f32 %v4660_v37, %v1460_v7  ;;  %1796 = vadd.xlane.f32.xlu1 %v1795_v44  ;;  %v5071_v13 = vmul.f32 %v3571_v2, %v3400_v23  ;;  %v3572_v30 = vld [vmem:[%s6068_s1 + $0xa0] sm:$0xff]  ;;  %v3577_v2 = vld [vmem:[%s6068_s1 + $0xc8] sm:$0xff] }
 0x33c   :  { %3411 = vpow2.f32 %v1629_v27 }
 0x33d   :  { %v3402_v40 = vpop.eup %3401  ;;  %v1631_v61 = vmul.f32 1.442695, %v1541_v48  ;;  %v1633_v26 = vmul.f32 1.442695, %v1542_v43  ;;  %v1798_v4 = vadd.f32 %v5071_v13, %v5064_v15 }
 0x33e   :  { %v3404_v62 = vpop.eup %3403  ;;  %v1463_v38 = vpop.xlane.xlu0 %1462  ;;  %v5078_v37 = vmul.f32 %v3572_v30, %v3402_v40 }
 0x33f   :  { %3413 = vpow2.f32 %v1631_v61  ;;  %1799 = vadd.xlane.f32.xlu1 %v1798_v4  ;;  %v1543_v58 = vsub.f32 %v4670_v5, %v1463_v38  ;;  %v1544_v28 = vsub.f32 %v4672_v17, %v1463_v38  ;;  %v5085_v45 = vmul.f32 %v3573_v35, %v3404_v62  ;;  %v3574_v5 = vld [vmem:[%s6068_s1 + $0xb0] sm:$0xff]  ;;  %v3579_v35 = vld [vmem:[%s6068_s1 + $0xd8] sm:$0xff] }
 0x340   :  { %3415 = vpow2.f32 %v1633_v26 }
 0x341   :  { %v3406_v16 = vpop.eup %3405  ;;  %v1635_v32 = vmul.f32 1.442695, %v1543_v58  ;;  %v1637_v9 = vmul.f32 1.442695, %v1544_v28  ;;  %v1801_v60 = vadd.f32 %v5085_v45, %v5078_v37 }
 0x342   :  { %v3408_v6 = vpop.eup %3407  ;;  %v1466_v1 = vpop.xlane.xlu1 %1465  ;;  %v5092_v17 = vmul.f32 %v3574_v5, %v3406_v16 }
 0x343   :  { %3417 = vpow2.f32 %v1635_v32  ;;  %v1545_v50 = vsub.f32 %v4682_v47, %v1466_v1  ;;  %v1546_v59 = vsub.f32 %v4684_v46, %v1466_v1  ;;  %1802 = vadd.xlane.f32.xlu0 %v1801_v60  ;;  %v5099_v31 = vmul.f32 %v3575_v34, %v3408_v6  ;;  %v3576_v47 = vld [vmem:[%s6068_s1 + $0xc0] sm:$0xff] }
 0x344   :  { %3419 = vpow2.f32 %v1637_v9 }
 0x345   :  { %v3410_v52 = vpop.eup %3409  ;;  %v1639_v27 = vmul.f32 1.442695, %v1545_v50  ;;  %v1641_v44 = vmul.f32 1.442695, %v1546_v59  ;;  %v1804_v23 = vadd.f32 %v5099_v31, %v5092_v17  ;;  %v6155_v59 = vld [vmem:[#allocation13_spill] sm:$0xff] }
 0x346   :  { %v3412_v7 = vpop.eup %3411  ;;  %v1469_v19 = vpop.xlane.xlu0 %1468  ;;  %v5106_v46 = vmul.f32 %v3576_v47, %v3410_v52  ;;  %v3581_v52 = vld [vmem:[%s6068_s1 + $0xe8] sm:$0xff] }
 0x347   :  { %3421 = vpow2.f32 %v1639_v27  ;;  %1805 = vadd.xlane.f32.xlu1 %v1804_v23  ;;  %v1547_v48 = vsub.f32 %v4694_v18, %v1469_v19  ;;  %v1548_v43 = vsub.f32 %v4696_v56, %v1469_v19  ;;  %v5113_v40 = vmul.f32 %v3577_v2, %v3412_v7  ;;  %v3578_v18 = vld [vmem:[%s6068_s1 + $0xd0] sm:$0xff]  ;;  %v6156_v2 = vld [vmem:[#allocation14_spill] sm:$0xff] }
 0x348   :  { %3423 = vpow2.f32 %v1641_v44 }
 0x349   :  { %v3414_v61 = vpop.eup %3413  ;;  %v1643_v26 = vmul.f32 1.442695, %v1547_v48  ;;  %v1645_v4 = vmul.f32 1.442695, %v1548_v43  ;;  %v1807_v62 = vadd.f32 %v5113_v40, %v5106_v46 }
 0x34a   :  { %v3416_v38 = vpop.eup %3415  ;;  %v1472_v30 = vpop.xlane.xlu1 %1471  ;;  %v5120_v56 = vmul.f32 %v3578_v18, %v3414_v61 }
 0x34b   :  { %3425 = vpow2.f32 %v1643_v26  ;;  %v1549_v58 = vsub.f32 %v4706_v0, %v1472_v30  ;;  %v1550_v28 = vsub.f32 %v4708_v25, %v1472_v30  ;;  %1808 = vadd.xlane.f32.xlu0 %v1807_v62  ;;  %v5127_v16 = vmul.f32 %v3579_v35, %v3416_v38  ;;  %v3580_v0 = vld [vmem:[%s6068_s1 + $0xe0] sm:$0xff]  ;;  %v3583_v62 = vld [vmem:[%s6068_s1 + $0xf8] sm:$0xff] }
 0x34c   :  { %3427 = vpow2.f32 %v1645_v4  ;;  %v6157_v26 = vld [vmem:[#allocation15_spill] sm:$0xff] }
 0x34d   :  { %v3418_v32 = vpop.eup %3417  ;;  %v1647_v9 = vmul.f32 1.442695, %v1549_v58  ;;  %v1649_v60 = vmul.f32 1.442695, %v1550_v28  ;;  %v1810_v6 = vadd.f32 %v5127_v16, %v5120_v56 }
 0x34e   :  { %v3420_v1 = vpop.eup %3419  ;;  %v1475_v5 = vpop.xlane.xlu0 %1474  ;;  %v5134_v25 = vmul.f32 %v3580_v0, %v3418_v32 }
 0x34f   :  { %3429 = vpow2.f32 %v1647_v9  ;;  %1811 = vadd.xlane.f32.xlu1 %v1810_v6  ;;  %v1551_v50 = vsub.f32 %v4718_v51, %v1475_v5  ;;  %v1552_v34 = vsub.f32 %v6155_v59, %v1475_v5  ;;  %v5141_v27 = vmul.f32 %v3581_v52, %v3420_v1  ;;  %v3582_v51 = vld [vmem:[%s6068_s1 + $0xf0] sm:$0xff]  ;;  %v3584_v9 = vld [vmem:[%s6068_s1 + $0x100] sm:$0xff]  ;;  %v6158_v6 = vld [vmem:[#allocation16_spill] sm:$0xff] }
 0x350   :  { %3431 = vpow2.f32 %v1649_v60  ;;  %v6159_v5 = vld [vmem:[#allocation17_spill] sm:$0xff] }
 0x351   :  { %v3422_v44 = vpop.eup %3421  ;;  %v1651_v23 = vmul.f32 1.442695, %v1551_v50  ;;  %v1653_v7 = vmul.f32 1.442695, %v1552_v34  ;;  %v1813_v19 = vadd.f32 %v5141_v27, %v5134_v25  ;;  %v3585_v50 = vld [vmem:[%s6068_s1 + $0x108] sm:$0xff] }
 0x352   :  { %v3424_v47 = vpop.eup %3423  ;;  %v1478_v48 = vpop.xlane.xlu1 %1477  ;;  %v5148_v43 = vmul.f32 %v3582_v51, %v3422_v44  ;;  %v6160_v51 = vld [vmem:[#allocation18_spill] sm:$0xff] }
 0x353   :  { %3433 = vpow2.f32 %v1651_v23  ;;  %v1553_v61 = vsub.f32 %v6156_v2, %v1478_v48  ;;  %v1554_v4 = vsub.f32 %v6157_v26, %v1478_v48  ;;  %1814 = vadd.xlane.f32.xlu0 %v1813_v19  ;;  %v5155_v38 = vmul.f32 %v3583_v62, %v3424_v47  ;;  %v3586_v47 = vld [vmem:[%s6068_s1 + $0x110] sm:$0xff] }
 0x354   :  { %3435 = vpow2.f32 %v1653_v7 }
 0x355   :  { %v3426_v30 = vpop.eup %3425  ;;  %v1655_v18 = vmul.f32 1.442695, %v1553_v61  ;;  %v1657_v58 = vmul.f32 1.442695, %v1554_v4  ;;  %v1816_v28 = vadd.f32 %v5155_v38, %v5148_v43  ;;  %v6161_v61 = vld [vmem:[#allocation19_spill] sm:$0xff]  ;;  %v3587_v4 = vld [vmem:[%s6068_s1 + $0x118] sm:$0xff] }
 0x356   :  { %v3428_v35 = vpop.eup %3427  ;;  %v1481_v32 = vpop.xlane.xlu0 %1480  ;;  %v5162_v60 = vmul.f32 %v3584_v9, %v3426_v30  ;;  %v3588_v9 = vld [vmem:[%s6068_s1 + $0x120] sm:$0xff] }
 0x357   :  { %3437 = vpow2.f32 %v1655_v18  ;;  %1817 = vadd.xlane.f32.xlu1 %v1816_v28  ;;  %v1555_v1 = vsub.f32 %v6158_v6, %v1481_v32  ;;  %v1556_v0 = vsub.f32 %v6159_v5, %v1481_v32  ;;  %v5169_v59 = vmul.f32 %v3585_v50, %v3428_v35 }
 0x358   :  { %3439 = vpow2.f32 %v1657_v58 }
 0x359   :  { %v3430_v34 = vpop.eup %3429  ;;  %v1659_v52 = vmul.f32 1.442695, %v1555_v1  ;;  %v1661_v44 = vmul.f32 1.442695, %v1556_v0  ;;  %v1819_v23 = vadd.f32 %v5169_v59, %v5162_v60  ;;  %v6162_v1 = vld [vmem:[#allocation20_spill] sm:$0xff]  ;;  %v6163_v0 = vld [vmem:[#allocation21_spill] sm:$0xff] }
 0x35a   :  { %v3432_v7 = vpop.eup %3431  ;;  %v1484_v19 = vpop.xlane.xlu1 %1483  ;;  %v5176_v48 = vmul.f32 %v3586_v47, %v3430_v34  ;;  %v3589_v34 = vld [vmem:[%s6068_s1 + $0x128] sm:$0xff] }
 0x35b   :  { %3441 = vpow2.f32 %v1659_v52  ;;  %v1557_v2 = vsub.f32 %v6160_v51, %v1484_v19  ;;  %v1558_v26 = vsub.f32 %v6161_v61, %v1484_v19  ;;  %1820 = vadd.xlane.f32.xlu0 %v1819_v23  ;;  %v5183_v62 = vmul.f32 %v3587_v4, %v3432_v7 }
 0x35c   :  { %3443 = vpow2.f32 %v1661_v44 }
 0x35d   :  { %v3434_v30 = vpop.eup %3433  ;;  %v1663_v18 = vmul.f32 1.442695, %v1557_v2  ;;  %v1665_v58 = vmul.f32 1.442695, %v1558_v26  ;;  %v1822_v28 = vadd.f32 %v5183_v62, %v5176_v48  ;;  %v3590_v2 = vld [vmem:[%s6068_s1 + $0x130] sm:$0xff]  ;;  %v6164_v26 = vld [vmem:[#allocation22_spill] sm:$0xff] }
 0x35e   :  { %v3436_v35 = vpop.eup %3435  ;;  %v1487_v32 = vpop.xlane.xlu0 %1486  ;;  %v5190_v6 = vmul.f32 %v3588_v9, %v3434_v30  ;;  %v6165_v30 = vld [vmem:[#allocation23_spill] sm:$0xff] }
 0x35f   :  { %3445 = vpow2.f32 %v1663_v18  ;;  %1823 = vadd.xlane.f32.xlu1 %v1822_v28  ;;  %v1559_v5 = vsub.f32 %v6162_v1, %v1487_v32  ;;  %v1560_v50 = vsub.f32 %v6163_v0, %v1487_v32  ;;  %v5197_v52 = vmul.f32 %v3589_v34, %v3436_v35 }
 0x360   :  { %3447 = vpow2.f32 %v1665_v58  ;;  %v3591_v58 = vld [vmem:[%s6068_s1 + $0x138] sm:$0xff] }
 0x361   :  { %v3438_v44 = vpop.eup %3437  ;;  %v1667_v23 = vmul.f32 1.442695, %v1559_v5  ;;  %v1669_v7 = vmul.f32 1.442695, %v1560_v50  ;;  %v1825_v19 = vadd.f32 %v5197_v52, %v5190_v6  ;;  %v3592_v50 = vld [vmem:[%s6068_s1 + $0x140] sm:$0xff] }
 0x362   :  { %v3440_v47 = vpop.eup %3439  ;;  %v1490_v51 = vpop.xlane.xlu0 %1489  ;;  %v5204_v61 = vmul.f32 %v3590_v2, %v3438_v44  ;;  %v6166_v44 = vld [vmem:[#allocation24_spill] sm:$0xff] }
 0x363   :  { %3449 = vpow2.f32 %v1667_v23  ;;  %1826 = vadd.xlane.f32.xlu0 %v1825_v19  ;;  %v1561_v4 = vsub.f32 %v6164_v26, %v1490_v51  ;;  %v1562_v18 = vsub.f32 %v6165_v30, %v1490_v51  ;;  %v5211_v28 = vmul.f32 %v3591_v58, %v3440_v47  ;;  %v6167_v19 = vld [vmem:[#allocation25_spill] sm:$0xff]  ;;  %v3593_v47 = vld [vmem:[%s6068_s1 + $0x148] sm:$0xff] }
 0x364   :  { %3451 = vpow2.f32 %v1669_v7 }
 0x365   :  { %v3442_v35 = vpop.eup %3441  ;;  %v1671_v32 = vmul.f32 1.442695, %v1561_v4  ;;  %v1673_v9 = vmul.f32 1.442695, %v1562_v18  ;;  %v1828_v1 = vadd.f32 %v5211_v28, %v5204_v61 }
 0x366   :  { %v3444_v5 = vpop.eup %3443  ;;  %v1493_v0 = vpop.xlane.xlu0 %1492  ;;  %v5218_v34 = vmul.f32 %v3592_v50, %v3442_v35  ;;  %v3594_v35 = vld [vmem:[%s6068_s1 + $0x150] sm:$0xff]  ;;  %v3595_v50 = vld [vmem:[%s6068_s1 + $0x158] sm:$0xff] }
 0x367   :  { %3453 = vpow2.f32 %v1671_v32  ;;  %1829 = vadd.xlane.f32.xlu1 %v1828_v1  ;;  %v1563_v23 = vsub.f32 %v6166_v44, %v1493_v0  ;;  %v1564_v7 = vsub.f32 %v6167_v19, %v1493_v0  ;;  %v5225_v51 = vmul.f32 %v3593_v47, %v3444_v5  ;;  %v6169_v1 = vld [vmem:[#allocation26_spill] sm:$0xff]  ;;  %v6170_v0 = vld [vmem:[#allocation27_spill] sm:$0xff] }
 0x368   :  { %3455 = vpow2.f32 %v1673_v9 }
 0x369   :  { %v3446_v2 = vpop.eup %3445  ;;  %v1675_v26 = vmul.f32 1.442695, %v1563_v23  ;;  %v1677_v4 = vmul.f32 1.442695, %v1564_v7  ;;  %v1831_v30 = vadd.f32 %v5225_v51, %v5218_v34 }
 0x36a   :  { %v3448_v18 = vpop.eup %3447  ;;  %v1496_v58 = vpop.xlane.xlu0 %1495  ;;  %v5232_v32 = vmul.f32 %v3594_v35, %v3446_v2  ;;  %v6172_v35 = vld [vmem:[#allocation28_spill] sm:$0xff] }
 0x36b   :  { %3457 = vpow2.f32 %v1675_v26  ;;  %1832 = vadd.xlane.f32.xlu0 %v1831_v30  ;;  %v1565_v5 = vsub.f32 %v6169_v1, %v1496_v58  ;;  %v1566_v9 = vsub.f32 %v6170_v0, %v1496_v58  ;;  %v5239_v44 = vmul.f32 %v3595_v50, %v3448_v18  ;;  %v3596_v30 = vld [vmem:[%s6068_s1 + $0x160] sm:$0xff]  ;;  %v6173_v1 = vld [vmem:[#allocation29_spill] sm:$0xff] }
 0x36c   :  { %6168 = vst [vmem:[#allocation13_spill] sm:$0xff] %v5232_v32  ;;  %3459 = vpow2.f32 %v1677_v4 }
 0x36d   :  { %v3450_v23 = vpop.eup %3449  ;;  %v1679_v19 = vmul.f32 1.442695, %v1565_v5  ;;  %v1681_v7 = vmul.f32 1.442695, %v1566_v9  ;;  %v1834_v47 = vadd.f32 %v5239_v44, %v5232_v32  ;;  %v3597_v5 = vld [vmem:[%s6068_s1 + $0x168] sm:$0xff] }
 0x36e   :  { %v3452_v2 = vpop.eup %3451  ;;  %v1499_v26 = vpop.xlane.xlu0 %1498  ;;  %v5246_v58 = vmul.f32 %v3596_v30, %v3450_v23 }
 0x36f   :  { %3461 = vpow2.f32 %v1679_v19  ;;  %1835 = vadd.xlane.f32.xlu1 %v1834_v47  ;;  %v1567_v18 = vsub.f32 %v6172_v35, %v1499_v26  ;;  %v1568_v4 = vsub.f32 %v6173_v1, %v1499_v26  ;;  %v5253_v0 = vmul.f32 %v3597_v5, %v3452_v2  ;;  %v3598_v47 = vld [vmem:[%s6068_s1 + $0x170] sm:$0xff]  ;;  %v6175_v35 = vld [vmem:[#allocation30_spill] sm:$0xff]  ;;  %v6176_v1 = vld [vmem:[#allocation31_spill] sm:$0xff] }
 0x370   :  { %6171 = vst [vmem:[#allocation14_spill] sm:$0xff] %v5246_v58  ;;  %3463 = vpow2.f32 %v1681_v7 }
 0x371   :  { %6174 = vst [vmem:[#allocation15_spill] sm:$0xff] %v5253_v0  ;;  %v3454_v9 = vpop.eup %3453  ;;  %v1683_v50 = vmul.f32 1.442695, %v1567_v18  ;;  %v1685_v32 = vmul.f32 1.442695, %v1568_v4  ;;  %v1837_v23 = vadd.f32 %v5253_v0, %v5246_v58  ;;  %v3599_v18 = vld [vmem:[%s6068_s1 + $0x178] sm:$0xff] }
 0x372   :  { %v3456_v30 = vpop.eup %3455  ;;  %v1502_v19 = vpop.xlane.xlu0 %1501  ;;  %v5260_v26 = vmul.f32 %v3598_v47, %v3454_v9 }
 0x373   :  { %3465 = vpow2.f32 %v1683_v50  ;;  %1838 = vadd.xlane.f32.xlu0 %v1837_v23  ;;  %v1569_v2 = vsub.f32 %v6175_v35, %v1502_v19  ;;  %v1570_v7 = vsub.f32 %v6176_v1, %v1502_v19  ;;  %v5267_v4 = vmul.f32 %v3599_v18, %v3456_v30  ;;  %v3600_v23 = vld [vmem:[%s6068_s1 + $0x180] sm:$0xff]  ;;  %v3601_v35 = vld [vmem:[%s6068_s1 + $0x188] sm:$0xff] }
 0x374   :  { %3467 = vpow2.f32 %v1685_v32 }
 0x375   :  { %v3458_v5 = vpop.eup %3457  ;;  %v1687_v58 = vmul.f32 1.442695, %v1569_v2  ;;  %v1689_v0 = vmul.f32 1.442695, %v1570_v7  ;;  %v1840_v9 = vadd.f32 %v5267_v4, %v5260_v26 }
 0x376   :  { %v3460_v47 = vpop.eup %3459  ;;  %v1505_v50 = vpop.xlane.xlu0 %1504  ;;  %v5274_v19 = vmul.f32 %v3600_v23, %v3458_v5 }
 0x377   :  { %3469 = vpow2.f32 %v1687_v58  ;;  %1841 = vadd.xlane.f32.xlu1 %v1840_v9  ;;  %v1571_v30 = vsub.f32 %v4838_v29, %v1505_v50  ;;  %v1572_v32 = vsub.f32 %v4843_v33, %v1505_v50  ;;  %v5281_v2 = vmul.f32 %v3601_v35, %v3460_v47  ;;  %v3602_v29 = vld [vmem:[%s6068_s1 + $0x190] sm:$0xff]  ;;  %v6179_v9 = vld [vmem:[#allocation32_spill] sm:$0xff] }
 0x378   :  { %6177 = vst [vmem:[#allocation16_spill] sm:$0xff] %v5274_v19  ;;  %3471 = vpow2.f32 %v1689_v0  ;;  %v6180_v50 = vld [vmem:[#allocation33_spill] sm:$0xff] }
 0x379   :  { %6178 = vst [vmem:[#allocation17_spill] sm:$0xff] %v5281_v2  ;;  %v3462_v1 = vpop.eup %3461  ;;  %v1691_v7 = vmul.f32 1.442695, %v1571_v30  ;;  %v1693_v18 = vmul.f32 1.442695, %v1572_v32  ;;  %v1843_v5 = vadd.f32 %v5281_v2, %v5274_v19  ;;  %v3603_v30 = vld [vmem:[%s6068_s1 + $0x198] sm:$0xff] }
 0x37a   :  { %v3464_v23 = vpop.eup %3463  ;;  %v1508_v58 = vpop.xlane.xlu0 %1507  ;;  %v5288_v33 = vmul.f32 %v3602_v29, %v3462_v1 }
 0x37b   :  { %3473 = vpow2.f32 %v1691_v7  ;;  %1844 = vadd.xlane.f32.xlu0 %v1843_v5  ;;  %v1573_v47 = vsub.f32 %v6179_v9, %v1508_v58  ;;  %v1574_v0 = vsub.f32 %v6180_v50, %v1508_v58  ;;  %v5295_v32 = vmul.f32 %v3603_v30, %v3464_v23  ;;  %v3604_v5 = vld [vmem:[%s6068_s1 + $0x1a0] sm:$0xff]  ;;  %v3605_v9 = vld [vmem:[%s6068_s1 + $0x1a8] sm:$0xff] }
 0x37c   :  { %3475 = vpow2.f32 %v1693_v18 }
 0x37d   :  { %v3466_v35 = vpop.eup %3465  ;;  %v1695_v19 = vmul.f32 1.442695, %v1573_v47  ;;  %v1697_v2 = vmul.f32 1.442695, %v1574_v0  ;;  %v1846_v1 = vadd.f32 %v5295_v32, %v5288_v33 }
 0x37e   :  { %v3468_v29 = vpop.eup %3467  ;;  %v1511_v7 = vpop.xlane.xlu0 %1510  ;;  %v5302_v58 = vmul.f32 %v3604_v5, %v3466_v35 }
 0x37f   :  { %3477 = vpow2.f32 %v1695_v19  ;;  %1847 = vadd.xlane.f32.xlu1 %v1846_v1  ;;  %v1575_v23 = vsub.f32 %v4856_v10, %v1511_v7  ;;  %v1576_v18 = vsub.f32 %v4860_v39, %v1511_v7  ;;  %v5309_v47 = vmul.f32 %v3605_v9, %v3468_v29  ;;  %v3606_v10 = vld [vmem:[%s6068_s1 + $0x1b0] sm:$0xff]  ;;  %v6183_v1 = vld [vmem:[#allocation34_spill] sm:$0xff]  ;;  %v6184_v7 = vld [vmem:[#allocation35_spill] sm:$0xff] }
 0x380   :  { %6181 = vst [vmem:[#allocation18_spill] sm:$0xff] %v5302_v58  ;;  %3479 = vpow2.f32 %v1697_v2 }
 0x381   :  { %6182 = vst [vmem:[#allocation19_spill] sm:$0xff] %v5309_v47  ;;  %v3470_v50 = vpop.eup %3469  ;;  %v1699_v0 = vmul.f32 1.442695, %v1575_v23  ;;  %v1701_v30 = vmul.f32 1.442695, %v1576_v18  ;;  %v1849_v35 = vadd.f32 %v5309_v47, %v5302_v58  ;;  %v3607_v23 = vld [vmem:[%s6068_s1 + $0x1b8] sm:$0xff] }
 0x382   :  { %v3472_v5 = vpop.eup %3471  ;;  %v1514_v19 = vpop.xlane.xlu0 %1513  ;;  %v5316_v39 = vmul.f32 %v3606_v10, %v3470_v50 }
 0x383   :  { %3481 = vpow2.f32 %v1699_v0  ;;  %1850 = vadd.xlane.f32.xlu0 %v1849_v35  ;;  %v1577_v29 = vsub.f32 %v6183_v1, %v1514_v19  ;;  %v1578_v2 = vsub.f32 %v6184_v7, %v1514_v19  ;;  %v5323_v18 = vmul.f32 %v3607_v23, %v3472_v5  ;;  %v3608_v0 = vld [vmem:[%s6068_s1 + $0x1c0] sm:$0xff]  ;;  %v3609_v5 = vld [vmem:[%s6068_s1 + $0x1c8] sm:$0xff]  ;;  %v3610_v7 = vld [vmem:[%s6068_s1 + $0x1d0] sm:$0xff] }
 0x384   :  { %3483 = vpow2.f32 %v1701_v30 }
 0x385   :  { %v3474_v9 = vpop.eup %3473  ;;  %v1703_v58 = vmul.f32 1.442695, %v1577_v29  ;;  %v1705_v47 = vmul.f32 1.442695, %v1578_v2  ;;  %v1852_v50 = vadd.f32 %v5323_v18, %v5316_v39 }
 0x386   :  { %v3476_v10 = vpop.eup %3475  ;;  %v5330_v35 = vmul.f32 %v3608_v0, %v3474_v9 }
 0x387   :  { %3485 = vpow2.f32 %v1703_v58  ;;  %1853 = vadd.xlane.f32.xlu1 %v1852_v50  ;;  %v5335_v30 = vmul.f32 %v3609_v5, %v3476_v10  ;;  %v3611_v58 = vld [vmem:[%s6068_s1 + $0x1d8] sm:$0xff]  ;;  %v3612_v10 = vld [vmem:[%s6068_s1 + $0x1e0] sm:$0xff]  ;;  %v3613_v5 = vld [vmem:[%s6068_s1 + $0x1e8] sm:$0xff] }
 0x388   :  { %3487 = vpow2.f32 %v1705_v47 }
 0x389   :  { %v3478_v19 = vpop.eup %3477  ;;  %v1855_v1 = vadd.f32 %v5335_v30, %v5330_v35 }
 0x38a   :  { %v3480_v29 = vpop.eup %3479  ;;  %v5342_v2 = vmul.f32 %v3610_v7, %v3478_v19 }
 0x38b   :  { %1856 = vadd.xlane.f32.xlu0 %v1855_v1  ;;  %v5347_v23 = vmul.f32 %v3611_v58, %v3480_v29  ;;  %v3614_v58 = vld [vmem:[%s6068_s1 + $0x1f0] sm:$0xff] }
 0x38c   :  { %6185 = vst [vmem:[#allocation20_spill] sm:$0xff] %v5342_v2 }
 0x38d   :  { %6186 = vst [vmem:[#allocation21_spill] sm:$0xff] %v5347_v23  ;;  %v3482_v9 = vpop.eup %3481  ;;  %v1858_v47 = vadd.f32 %v5347_v23, %v5342_v2 }
 0x38e   :  { %v3484_v50 = vpop.eup %3483  ;;  %v5354_v0 = vmul.f32 %v3612_v10, %v3482_v9  ;;  %v3615_v9 = vld [vmem:[%s6068_s1 + $0x1f8] sm:$0xff] }
 0x38f   :  { %1859 = vadd.xlane.f32.xlu1 %v1858_v47  ;;  %v5359_v19 = vmul.f32 %v3613_v5, %v3484_v50 }
 0x390   :  { %6187 = vst [vmem:[#allocation22_spill] sm:$0xff] %v5354_v0 }
 0x391   :  { %6188 = vst [vmem:[#allocation23_spill] sm:$0xff] %v5359_v19  ;;  %v3486_v1 = vpop.eup %3485  ;;  %v1861_v29 = vadd.f32 %v5359_v19, %v5354_v0 }
 0x392   :  { %v3488_v7 = vpop.eup %3487  ;;  %v5366_v2 = vmul.f32 %v3614_v58, %v3486_v1  ;;  %v3360_v1 = vld [vmem:[#allocation7] sm:$0xff]  }
 0x393   :  { %1862 = vadd.xlane.f32.xlu0 %v1861_v29  ;;  %v5371_v47 = vmul.f32 %v3615_v9, %v3488_v7  ;;  %3216 = vmatprep.subr.bf16.mxu1 %v3360_v1 }
 0x394   :  { %3217 = vmatpush3.bf16.msra.mxu1 %v3360_v1 }
 0x395   :  { %v1864_v50 = vadd.f32 %v5371_v47, %v5366_v2 }
 0x397   :  { %1865 = vadd.xlane.f32.xlu1 %v1864_v50 }
 0x3a8   :  { %v1773_v10 = vpop.xlane.xlu1 %1772 }
 0x3a9   :  { %3489 = vrcp.f32 %v1773_v10 }
 0x3ac   :  { %v1776_v5 = vpop.xlane.xlu1 %1775 }
 0x3ad   :  { %3491 = vrcp.f32 %v1776_v5 }
 0x3b0   :  { %v1779_v0 = vpop.xlane.xlu1 %1778 }
 0x3b1   :  { %3493 = vrcp.f32 %v1779_v0 }
 0x3b3   :  { %v3490_v19 = vpop.eup %3489 }
 0x3b4   :  { %v1899_v29 = vmul.f32 %v3490_v19, %v4916_v12  ;;  %v1782_v58 = vpop.xlane.xlu1 %1781  ;;  %v1900_v23 = vmul.f32 %v3490_v19, %v4921_v63 }
 0x3b5   :  { %3495 = vrcp.f32 %v1782_v58 }
 0x3b6   :  { %2027 = vmatprep.mubr.f32.mxu0 %v1900_v23 }
 0x3b7   :  { %v3492_v7 = vpop.eup %3491  ;;  %2028 = vmatmul.mubr.f32.vlgmr.msra.gmra.mrb[64].mxu0 %v1899_v29 }
 0x3b8   :  { %v1785_v9 = vpop.xlane.xlu1 %1784  ;;  %v1902_v50 = vmul.f32 %v3492_v7, %v4941_v3  ;;  %v1901_v10 = vmul.f32 %v3492_v7, %v4930_v36 }
 0x3b9   :  { %3497 = vrcp.f32 %v1785_v9 }
 0x3ba   :  { %2032 = vmatprep.mubr.f32.mxu0 %v1902_v50 }
 0x3bb   :  { %v3494_v0 = vpop.eup %3493  ;;  %2033 = vmatmul.mubr.f32.gmra.mrb[66].mxu0 %v1901_v10 }
 0x3bc   :  { %v1788_v5 = vpop.xlane.xlu1 %1787  ;;  %v1904_v12 = vmul.f32 %v3494_v0, %v4966_v24  ;;  %v1903_v63 = vmul.f32 %v3494_v0, %v4955_v49 }
 0x3bd   :  { %3499 = vrcp.f32 %v1788_v5 }
 0x3be   :  { %2037 = vmatprep.mubr.f32.mxu0 %v1904_v12 }
 0x3bf   :  { %v3496_v23 = vpop.eup %3495  ;;  %2038 = vmatmul.mubr.f32.gmra.mrb[68].mxu0 %v1903_v63 }
 0x3c0   :  { %v1791_v19 = vpop.xlane.xlu1 %1790  ;;  %v1906_v1 = vmul.f32 %v3496_v23, %v4984_v57  ;;  %v1905_v3 = vmul.f32 %v3496_v23, %v4977_v20 }
 0x3c1   :  { %3501 = vrcp.f32 %v1791_v19 }
 0x3c2   :  { %2042 = vmatprep.mubr.f32.mxu0 %v1906_v1 }
 0x3c3   :  { %v3498_v36 = vpop.eup %3497  ;;  %2043 = vmatmul.mubr.f32.gmra.mrb[70].mxu0 %v1905_v3 }
 0x3c4   :  { %v1794_v29 = vpop.xlane.xlu1 %1793  ;;  %v1908_v58 = vmul.f32 %v3498_v36, %v4999_v42  ;;  %v1907_v24 = vmul.f32 %v3498_v36, %v4992_v11 }
 0x3c5   :  { %3503 = vrcp.f32 %v1794_v29 }
 0x3c6   :  { %2047 = vmatprep.mubr.f32.mxu0 %v1908_v58 }
 0x3c7   :  { %v3500_v49 = vpop.eup %3499  ;;  %2048 = vmatmul.mubr.f32.gmra.mrb[72].mxu0 %v1907_v24 }
 0x3c8   :  { %v1797_v7 = vpop.xlane.xlu1 %1796  ;;  %v1910_v9 = vmul.f32 %v3500_v49, %v5014_v55  ;;  %v1909_v57 = vmul.f32 %v3500_v49, %v5007_v21 }
 0x3c9   :  { %3505 = vrcp.f32 %v1797_v7 }
 0x3ca   :  { %2052 = vmatprep.mubr.f32.mxu0 %v1910_v9 }
 0x3cb   :  { %v3502_v20 = vpop.eup %3501  ;;  %2053 = vmatmul.mubr.f32.gmra.mrb[74].mxu0 %v1909_v57 }
 0x3cc   :  { %v1800_v50 = vpop.xlane.xlu1 %1799  ;;  %v1912_v10 = vmul.f32 %v3502_v20, %v5029_v14  ;;  %v1911_v42 = vmul.f32 %v3502_v20, %v5022_v41 }
 0x3cd   :  { %3507 = vrcp.f32 %v1800_v50 }
 0x3ce   :  { %2057 = vmatprep.mubr.f32.mxu0 %v1912_v10 }
 0x3cf   :  { %v3504_v11 = vpop.eup %3503  ;;  %2058 = vmatmul.mubr.f32.gmra.mrb[76].mxu0 %v1911_v42 }
 0x3d0   :  { %v1803_v0 = vpop.xlane.xlu0 %1802  ;;  %v1914_v5 = vmul.f32 %v3504_v11, %v5043_v22  ;;  %v1913_v55 = vmul.f32 %v3504_v11, %v5036_v54 }
 0x3d1   :  { %3509 = vrcp.f32 %v1803_v0 }
 0x3d2   :  { %2062 = vmatprep.mubr.f32.mxu0 %v1914_v5 }
 0x3d3   :  { %v3506_v21 = vpop.eup %3505  ;;  %2063 = vmatmul.mubr.f32.gmra.mrb[78].mxu0 %v1913_v55 }
 0x3d4   :  { %v1806_v12 = vpop.xlane.xlu1 %1805  ;;  %v1916_v63 = vmul.f32 %v3506_v21, %v5057_v53  ;;  %v1915_v14 = vmul.f32 %v3506_v21, %v5050_v8 }
 0x3d5   :  { %3511 = vrcp.f32 %v1806_v12 }
 0x3d6   :  { %2067 = vmatprep.mubr.f32.mxu0 %v1916_v63 }
 0x3d7   :  { %v3508_v41 = vpop.eup %3507  ;;  %2068 = vmatmul.mubr.f32.gmra.mrb[80].mxu0 %v1915_v14 }
 0x3d8   :  { %v1809_v23 = vpop.xlane.xlu0 %1808  ;;  %v1918_v19 = vmul.f32 %v3508_v41, %v5071_v13  ;;  %v1917_v22 = vmul.f32 %v3508_v41, %v5064_v15 }
 0x3d9   :  { %3513 = vrcp.f32 %v1809_v23 }
 0x3da   :  { %2072 = vmatprep.mubr.f32.mxu0 %v1918_v19  ;;  %v6189_v19 = vld [vmem:[#allocation13_spill] sm:$0xff] }
 0x3db   :  { %v3510_v54 = vpop.eup %3509  ;;  %2073 = vmatmul.mubr.f32.gmra.mrb[82].mxu0 %v1917_v22 }
 0x3dc   :  { %v1812_v1 = vpop.xlane.xlu1 %1811  ;;  %v1920_v3 = vmul.f32 %v3510_v54, %v5085_v45  ;;  %v1919_v53 = vmul.f32 %v3510_v54, %v5078_v37  ;;  %v6190_v54 = vld [vmem:[#allocation15_spill] sm:$0xff] }
 0x3dd   :  { %3515 = vrcp.f32 %v1812_v1 }
 0x3de   :  { %2077 = vmatprep.mubr.f32.mxu0 %v1920_v3  ;;  %v6191_v3 = vld [vmem:[#allocation14_spill] sm:$0xff] }
 0x3df   :  { %v3512_v8 = vpop.eup %3511  ;;  %2078 = vmatmul.mubr.f32.gmra.mrb[84].mxu0 %v1919_v53 }
 0x3e0   :  { %v1815_v36 = vpop.xlane.xlu0 %1814  ;;  %v1922_v29 = vmul.f32 %v3512_v8, %v5099_v31  ;;  %v1921_v13 = vmul.f32 %v3512_v8, %v5092_v17 }
 0x3e1   :  { %3517 = vrcp.f32 %v1815_v36 }
 0x3e2   :  { %2082 = vmatprep.mubr.f32.mxu0 %v1922_v29 }
 0x3e3   :  { %v3514_v15 = vpop.eup %3513  ;;  %2083 = vmatmul.mubr.f32.gmra.mrb[86].mxu0 %v1921_v13  ;;  %v6192_v13 = vld [vmem:[#allocation17_spill] sm:$0xff] }
 0x3e4   :  { %v1818_v58 = vpop.xlane.xlu1 %1817  ;;  %v1924_v24 = vmul.f32 %v3514_v15, %v5113_v40  ;;  %v1923_v45 = vmul.f32 %v3514_v15, %v5106_v46 }
 0x3e5   :  { %3519 = vrcp.f32 %v1818_v58  ;;  %v6193_v58 = vld [vmem:[#allocation16_spill] sm:$0xff] }
 0x3e6   :  { %2087 = vmatprep.mubr.f32.mxu0 %v1924_v24 }
 0x3e7   :  { %v3516_v37 = vpop.eup %3515  ;;  %2088 = vmatmul.mubr.f32.gmra.mrb[88].mxu0 %v1923_v45 }
 0x3e8   :  { %v1821_v49 = vpop.xlane.xlu0 %1820  ;;  %v1926_v7 = vmul.f32 %v3516_v37, %v5127_v16  ;;  %v1925_v31 = vmul.f32 %v3516_v37, %v5120_v56 }
 0x3e9   :  { %3521 = vrcp.f32 %v1821_v49 }
 0x3ea   :  { %2092 = vmatprep.mubr.f32.mxu0 %v1926_v7 }
 0x3eb   :  { %v3518_v17 = vpop.eup %3517  ;;  %2093 = vmatmul.mubr.f32.gmra.mrb[90].mxu0 %v1925_v31  ;;  %v6194_v31 = vld [vmem:[#allocation19_spill] sm:$0xff] }
 0x3ec   :  { %v1824_v9 = vpop.xlane.xlu1 %1823  ;;  %v1928_v57 = vmul.f32 %v3518_v17, %v5141_v27  ;;  %v1927_v40 = vmul.f32 %v3518_v17, %v5134_v25 }
 0x3ed   :  { %3523 = vrcp.f32 %v1824_v9  ;;  %v6195_v9 = vld [vmem:[#allocation18_spill] sm:$0xff] }
 0x3ee   :  { %2097 = vmatprep.mubr.f32.mxu0 %v1928_v57 }
 0x3ef   :  { %v3520_v46 = vpop.eup %3519  ;;  %2098 = vmatmul.mubr.f32.gmra.mrb[92].mxu0 %v1927_v40 }
 0x3f0   :  { %v1827_v20 = vpop.xlane.xlu0 %1826  ;;  %v1930_v50 = vmul.f32 %v3520_v46, %v5155_v38  ;;  %v1929_v16 = vmul.f32 %v3520_v46, %v5148_v43 }
 0x3f1   :  { %3525 = vrcp.f32 %v1827_v20 }
 0x3f2   :  { %2102 = vmatprep.mubr.f32.mxu0 %v1930_v50 }
 0x3f3   :  { %v3522_v56 = vpop.eup %3521  ;;  %2103 = vmatmul.mubr.f32.gmra.mrb[94].mxu0 %v1929_v16 }
 0x3f4   :  { %v1830_v10 = vpop.xlane.xlu1 %1829  ;;  %v1932_v42 = vmul.f32 %v3522_v56, %v5169_v59  ;;  %v1931_v27 = vmul.f32 %v3522_v56, %v5162_v60 }
 0x3f5   :  { %3527 = vrcp.f32 %v1830_v10 }
 0x3f6   :  { %2107 = vmatprep.mubr.f32.mxu0 %v1932_v42  ;;  %v6196_v42 = vld [vmem:[#allocation21_spill] sm:$0xff] }
 0x3f7   :  { %v3524_v25 = vpop.eup %3523  ;;  %2108 = vmatmul.mubr.f32.gmra.mrb[96].mxu0 %v1931_v27 }
 0x3f8   :  { %v1833_v11 = vpop.xlane.xlu0 %1832  ;;  %v1934_v0 = vmul.f32 %v3524_v25, %v5183_v62  ;;  %v1933_v38 = vmul.f32 %v3524_v25, %v5176_v48  ;;  %v6197_v25 = vld [vmem:[#allocation20_spill] sm:$0xff] }
 0x3f9   :  { %3529 = vrcp.f32 %v1833_v11 }
 0x3fa   :  { %2112 = vmatprep.mubr.f32.mxu0 %v1934_v0 }
 0x3fb   :  { %v3526_v43 = vpop.eup %3525  ;;  %2113 = vmatmul.mubr.f32.gmra.mrb[98].mxu0 %v1933_v38  ;;  %v6199_v38 = vld [vmem:[#allocation22_spill] sm:$0xff] }
 0x3fc   :  { %v1836_v5 = vpop.xlane.xlu1 %1835  ;;  %v1936_v55 = vmul.f32 %v3526_v43, %v5197_v52  ;;  %v1935_v59 = vmul.f32 %v3526_v43, %v5190_v6 }
 0x3fd   :  { %3531 = vrcp.f32 %v1836_v5 }
 0x3fe   :  { %2117 = vmatprep.mubr.f32.mxu0 %v1936_v55 }
 0x3ff   :  { %v3528_v60 = vpop.eup %3527  ;;  %2118 = vmatmul.mubr.f32.gmra.mrb[100].mxu0 %v1935_v59 }
 0x400   :  { %v1839_v21 = vpop.xlane.xlu0 %1838  ;;  %v1938_v12 = vmul.f32 %v3528_v60, %v5211_v28  ;;  %v1937_v62 = vmul.f32 %v3528_v60, %v5204_v61 }
 0x401   :  { %3533 = vrcp.f32 %v1839_v21 }
 0x402   :  { %2122 = vmatprep.mubr.f32.mxu0 %v1938_v12 }
 0x403   :  { %v3530_v48 = vpop.eup %3529  ;;  %2123 = vmatmul.mubr.f32.gmra.mrb[102].mxu0 %v1937_v62 }
 0x404   :  { %v1842_v63 = vpop.xlane.xlu1 %1841  ;;  %v1940_v14 = vmul.f32 %v3530_v48, %v5225_v51  ;;  %v1939_v52 = vmul.f32 %v3530_v48, %v5218_v34 }
 0x405   :  { %3535 = vrcp.f32 %v1842_v63 }
 0x406   :  { %2127 = vmatprep.mubr.f32.mxu0 %v1940_v14 }
 0x407   :  { %v3532_v6 = vpop.eup %3531  ;;  %2128 = vmatmul.mubr.f32.gmra.mrb[104].mxu0 %v1939_v52 }
 0x408   :  { %v1845_v41 = vpop.xlane.xlu0 %1844  ;;  %v1942_v23 = vmul.f32 %v3532_v6, %v5239_v44  ;;  %v1941_v28 = vmul.f32 %v3532_v6, %v6189_v19 }
 0x409   :  { %3537 = vrcp.f32 %v1845_v41 }
 0x40a   :  { %2132 = vmatprep.mubr.f32.mxu0 %v1942_v23 }
 0x40b   :  { %v3534_v61 = vpop.eup %3533  ;;  %2133 = vmatmul.mubr.f32.gmra.mrb[106].mxu0 %v1941_v28 }
 0x40c   :  { %v1848_v22 = vpop.xlane.xlu1 %1847  ;;  %v1944_v1 = vmul.f32 %v3534_v61, %v6190_v54  ;;  %v1943_v51 = vmul.f32 %v3534_v61, %v6191_v3 }
 0x40d   :  { %3539 = vrcp.f32 %v1848_v22 }
 0x40e   :  { %2137 = vmatprep.mubr.f32.mxu0 %v1944_v1 }
 0x40f   :  { %v3536_v34 = vpop.eup %3535  ;;  %2138 = vmatmul.mubr.f32.gmra.mrb[108].mxu0 %v1943_v51 }
 0x410   :  { %v1851_v53 = vpop.xlane.xlu0 %1850  ;;  %v1946_v8 = vmul.f32 %v3536_v34, %v5267_v4  ;;  %v1945_v44 = vmul.f32 %v3536_v34, %v5260_v26 }
 0x411   :  { %3541 = vrcp.f32 %v1851_v53 }
 0x412   :  { %2142 = vmatprep.mubr.f32.mxu0 %v1946_v8 }
 0x413   :  { %v3538_v36 = vpop.eup %3537  ;;  %2143 = vmatmul.mubr.f32.gmra.mrb[110].mxu0 %v1945_v44 }
 0x414   :  { %v1854_v29 = vpop.xlane.xlu1 %1853  ;;  %v1948_v15 = vmul.f32 %v3538_v36, %v6192_v13  ;;  %v1947_v24 = vmul.f32 %v3538_v36, %v6193_v58 }
 0x415   :  { %3543 = vrcp.f32 %v1854_v29 }
 0x416   :  { %2147 = vmatprep.mubr.f32.mxu0 %v1948_v15 }
 0x417   :  { %v3540_v45 = vpop.eup %3539  ;;  %2148 = vmatmul.mubr.f32.gmra.mrb[112].mxu0 %v1947_v24 }
 0x418   :  { %v1857_v37 = vpop.xlane.xlu0 %1856  ;;  %v1950_v49 = vmul.f32 %v3540_v45, %v5295_v32  ;;  %v1949_v4 = vmul.f32 %v3540_v45, %v5288_v33 }
 0x419   :  { %3545 = vrcp.f32 %v1857_v37 }
 0x41a   :  { %2152 = vmatprep.mubr.f32.mxu0 %v1950_v49 }
 0x41b   :  { %v3542_v26 = vpop.eup %3541  ;;  %2153 = vmatmul.mubr.f32.gmra.mrb[114].mxu0 %v1949_v4 }
 0x41c   :  { %v1860_v7 = vpop.xlane.xlu1 %1859  ;;  %v1952_v17 = vmul.f32 %v3542_v26, %v6194_v31  ;;  %v1951_v57 = vmul.f32 %v3542_v26, %v6195_v9 }
 0x41d   :  { %3547 = vrcp.f32 %v1860_v7 }
 0x41e   :  { %2157 = vmatprep.mubr.f32.mxu0 %v1952_v17 }
 0x41f   :  { %v3544_v40 = vpop.eup %3543  ;;  %2158 = vmatmul.mubr.f32.gmra.mrb[116].mxu0 %v1951_v57 }
 0x420   :  { %v1863_v46 = vpop.xlane.xlu0 %1862  ;;  %v1954_v20 = vmul.f32 %v3544_v40, %v5323_v18  ;;  %v1953_v32 = vmul.f32 %v3544_v40, %v5316_v39  ;;  %v6198_v39 = vld [vmem:[#allocation23_spill] sm:$0xff] }
 0x421   :  { %3549 = vrcp.f32 %v1863_v46 }
 0x422   :  { %2162 = vmatprep.mubr.f32.mxu0 %v1954_v20 }
 0x423   :  { %v3546_v33 = vpop.eup %3545  ;;  %2163 = vmatmul.mubr.f32.gmra.mrb[118].mxu0 %v1953_v32 }
 0x424   :  { %v1866_v50 = vpop.xlane.xlu1 %1865  ;;  %v1956_v16 = vmul.f32 %v3546_v33, %v5335_v30  ;;  %v1955_v56 = vmul.f32 %v3546_v33, %v5330_v35 }
 0x425   :  { %3551 = vrcp.f32 %v1866_v50 }
 0x426   :  { %2167 = vmatprep.mubr.f32.mxu0 %v1956_v16 }
 0x427   :  { %v3548_v10 = vpop.eup %3547  ;;  %2168 = vmatmul.mubr.f32.gmra.mrb[120].mxu0 %v1955_v56 }
 0x428   :  { %v1958_v27 = vmul.f32 %v3548_v10, %v6196_v42  ;;  %v1957_v11 = vmul.f32 %v3548_v10, %v6197_v25 }
 0x42a   :  { %2172 = vmatprep.mubr.f32.mxu0 %v1958_v27 }
 0x42b   :  { %v3550_v18 = vpop.eup %3549  ;;  %2173 = vmatmul.mubr.f32.gmra.mrb[122].mxu0 %v1957_v11 }
 0x42c   :  { %v1960_v0 = vmul.f32 %v3550_v18, %v6198_v39  ;;  %v1959_v43 = vmul.f32 %v3550_v18, %v6199_v38 }
 0x42e   :  { %2177 = vmatprep.mubr.f32.mxu0 %v1960_v0 }
 0x42f   :  { %v3552_v5 = vpop.eup %3551  ;;  %2178 = vmatmul.mubr.f32.gmra.mrb[124].mxu0 %v1959_v43 }
 0x430   :  { %v1962_v35 = vmul.f32 %v3552_v5, %v5371_v47  ;;  %v1961_v30 = vmul.f32 %v3552_v5, %v5366_v2 }
 0x432   :  { %2182 = vmatprep.mubr.f32.mxu0 %v1962_v35 }
 0x433   :  { %2183 = vmatmul.mubr.f32.gmra.mrb[126].mxu0 %v1961_v30 }
 0x48a   :  { %v2029_v55 = vpop.f32.mrb[64].mxu0 }
 0x48b   :  { %v2031_v59 = vpop.f32.mrb[65].mxu0 }
 0x48e   :  { %v2034_v60 = vpop.f32.mrb[66].mxu0 }
 0x48f   :  { %v2188_v21 = vpack.c.bf16 %v2034_v60, %v2029_v55  ;;  %v2036_v12 = vpop.f32.mrb[67].mxu0 }
 0x491   :  { %3218 = vmatprep.mubr.msk.bf16.mxu1 %vm969_vm1, %v2188_v21 }
 0x492   :  { %v2039_v62 = vpop.f32.mrb[68].mxu0 }
 0x493   :  { %v2041_v48 = vpop.f32.mrb[69].mxu0 }
 0x496   :  { %v2044_v63 = vpop.f32.mrb[70].mxu0 }
 0x497   :  { %v2189_v14 = vpack.c.bf16 %v2044_v63, %v2039_v62  ;;  %v2046_v52 = vpop.f32.mrb[71].mxu0 }
 0x499   :  { %3219 = vmatmul.mubr.msk.bf16.vlgmr.msra.gmra.mrb[96].mxu1 %vm969_vm1, %v2189_v14 }
 0x49a   :  { %v2049_v6 = vpop.f32.mrb[72].mxu0 }
 0x49b   :  { %v2051_v47 = vpop.f32.mrb[73].mxu0 }
 0x49e   :  { %v2054_v41 = vpop.f32.mrb[74].mxu0 }
 0x49f   :  { %v2190_v2 = vpack.c.bf16 %v2054_v41, %v2049_v6  ;;  %v2056_v23 = vpop.f32.mrb[75].mxu0 }
 0x4a1   :  { %3222 = vmatprep.mubr.msk.bf16.mxu1 %vm969_vm1, %v2190_v2 }
 0x4a2   :  { %v2059_v19 = vpop.f32.mrb[76].mxu0 }
 0x4a3   :  { %v2061_v28 = vpop.f32.mrb[77].mxu0 }
 0x4a6   :  { %v2064_v61 = vpop.f32.mrb[78].mxu0 }
 0x4a7   :  { %v2191_v22 = vpack.c.bf16 %v2064_v61, %v2059_v19  ;;  %v2066_v54 = vpop.f32.mrb[79].mxu0 }
 0x4a9   :  { %3223 = vmatmul.mubr.msk.bf16.gmra.mrb[100].mxu1 %vm969_vm1, %v2191_v22 }
 0x4aa   :  { %v2069_v1 = vpop.f32.mrb[80].mxu0 }
 0x4ab   :  { %v2071_v3 = vpop.f32.mrb[81].mxu0 }
 0x4ae   :  { %v2074_v51 = vpop.f32.mrb[82].mxu0 }
 0x4af   :  { %v2192_v34 = vpack.c.bf16 %v2074_v51, %v2069_v1  ;;  %v2076_v53 = vpop.f32.mrb[83].mxu0  ;;  %v5455_v1 = vld [vmem:[#allocation9] ss:$0 sm:$0xff] }
 0x4b1   :  { %3226 = vmatprep.mubr.msk.bf16.mxu1 %vm969_vm1, %v2192_v34  ;;  %v3616_v34 = vld [vmem:[%s6067_s0 + $0x8] sm:$0xff] }
 0x4b2   :  { %v2079_v8 = vpop.f32.mrb[84].mxu0 }
 0x4b3   :  { %v2081_v44 = vpop.f32.mrb[85].mxu0 }
 0x4b4   :  { %v3617_v44 = vld [vmem:[%s6067_s0] sm:$0xff] }
 0x4b6   :  { %v2084_v36 = vpop.f32.mrb[86].mxu0 }
 0x4b7   :  { %v2193_v29 = vpack.c.bf16 %v2084_v36, %v2079_v8  ;;  %v2086_v13 = vpop.f32.mrb[87].mxu0 }
 0x4b9   :  { %3227 = vmatmul.mubr.msk.bf16.gmra.mrb[104].mxu1 %vm969_vm1, %v2193_v29 }
 0x4ba   :  { %v2089_v15 = vpop.f32.mrb[88].mxu0 }
 0x4bb   :  { %v2091_v58 = vpop.f32.mrb[89].mxu0 }
 0x4be   :  { %v2094_v24 = vpop.f32.mrb[90].mxu0 }
 0x4bf   :  { %v2194_v45 = vpack.c.bf16 %v2094_v24, %v2089_v15  ;;  %v2096_v37 = vpop.f32.mrb[91].mxu0 }
 0x4c1   :  { %3230 = vmatprep.mubr.msk.bf16.mxu1 %vm969_vm1, %v2194_v45  ;;  %v3618_v45 = vld [vmem:[%s6067_s0 + $0x10] sm:$0xff] }
 0x4c2   :  { %v2099_v49 = vpop.f32.mrb[92].mxu0 }
 0x4c3   :  { %v2101_v4 = vpop.f32.mrb[93].mxu0 }
 0x4c6   :  { %v2104_v26 = vpop.f32.mrb[94].mxu0 }
 0x4c7   :  { %v2195_v7 = vpack.c.bf16 %v2104_v26, %v2099_v49  ;;  %v2106_v31 = vpop.f32.mrb[95].mxu0 }
 0x4c9   :  { %3231 = vmatmul.mubr.msk.bf16.gmra.mrb[108].mxu1 %vm969_vm1, %v2195_v7 }
 0x4ca   :  { %v2109_v17 = vpop.f32.mrb[96].mxu0 }
 0x4cb   :  { %v2111_v9 = vpop.f32.mrb[97].mxu0 }
 0x4ce   :  { %v2114_v57 = vpop.f32.mrb[98].mxu0 }
 0x4cf   :  { %v2196_v40 = vpack.c.bf16 %v2114_v57, %v2109_v17  ;;  %v2116_v46 = vpop.f32.mrb[99].mxu0  ;;  %v3619_v17 = vld [vmem:[%s6067_s0 + $0x18] sm:$0xff]  ;;  %v3620_v57 = vld [vmem:[%s6067_s0 + $0x20] sm:$0xff] }
 0x4d1   :  { %3234 = vmatprep.mubr.msk.bf16.mxu1 %vm969_vm1, %v2196_v40 }
 0x4d2   :  { %v2119_v20 = vpop.f32.mrb[100].mxu0 }
 0x4d3   :  { %v2121_v32 = vpop.f32.mrb[101].mxu0 }
 0x4d6   :  { %v2124_v33 = vpop.f32.mrb[102].mxu0 }
 0x4d7   :  { %v2197_v50 = vpack.c.bf16 %v2124_v33, %v2119_v20  ;;  %v2126_v16 = vpop.f32.mrb[103].mxu0 }
 0x4d9   :  { %3235 = vmatmul.mubr.msk.bf16.gmra.mrb[112].mxu1 %vm969_vm1, %v2197_v50  ;;  %v3621_v50 = vld [vmem:[%s6067_s0 + $0x28] sm:$0xff] }
 0x4da   :  { %v2129_v56 = vpop.f32.mrb[104].mxu0 }
 0x4db   :  { %v2131_v10 = vpop.f32.mrb[105].mxu0 }
 0x4de   :  { %v2134_v42 = vpop.f32.mrb[106].mxu0 }
 0x4df   :  { %v2198_v27 = vpack.c.bf16 %v2134_v42, %v2129_v56  ;;  %v2136_v25 = vpop.f32.mrb[107].mxu0 }
 0x4e1   :  { %3238 = vmatprep.mubr.msk.bf16.mxu1 %vm969_vm1, %v2198_v27 }
 0x4e2   :  { %v2139_v11 = vpop.f32.mrb[108].mxu0 }
 0x4e3   :  { %v2141_v18 = vpop.f32.mrb[109].mxu0 }
 0x4e4   :  { %v3622_v18 = vld [vmem:[%s6067_s0 + $0x30] sm:$0xff] }
 0x4e6   :  { %v2144_v39 = vpop.f32.mrb[110].mxu0 }
 0x4e7   :  { %v2199_v0 = vpack.c.bf16 %v2144_v39, %v2139_v11  ;;  %v2146_v38 = vpop.f32.mrb[111].mxu0 }
 0x4e9   :  { %3239 = vmatmul.mubr.msk.bf16.gmra.mrb[116].mxu1 %vm969_vm1, %v2199_v0 }
 0x4ea   :  { %v2149_v43 = vpop.f32.mrb[112].mxu0 }
 0x4eb   :  { %v2151_v5 = vpop.f32.mrb[113].mxu0 }
 0x4ee   :  { %v2154_v35 = vpop.f32.mrb[114].mxu0 }
 0x4ef   :  { %v2200_v30 = vpack.c.bf16 %v2154_v35, %v2149_v43  ;;  %v2156_v55 = vpop.f32.mrb[115].mxu0 }
 0x4f0   :  { %v3623_v55 = vld [vmem:[%s6067_s0 + $0x38] sm:$0xff] }
 0x4f1   :  { %3242 = vmatprep.mubr.msk.bf16.mxu1 %vm969_vm1, %v2200_v30 }
 0x4f2   :  { %v2159_v59 = vpop.f32.mrb[116].mxu0 }
 0x4f3   :  { %v2161_v60 = vpop.f32.mrb[117].mxu0 }
 0x4f4   :  { %v3624_v60 = vld [vmem:[%s6067_s0 + $0x40] sm:$0xff] }
 0x4f6   :  { %v2164_v21 = vpop.f32.mrb[118].mxu0 }
 0x4f7   :  { %v2201_v12 = vpack.c.bf16 %v2164_v21, %v2159_v59  ;;  %v2166_v62 = vpop.f32.mrb[119].mxu0 }
 0x4f9   :  { %3243 = vmatmul.mubr.msk.bf16.gmra.mrb[120].mxu1 %vm969_vm1, %v2201_v12 }
 0x4fa   :  { %v2169_v48 = vpop.f32.mrb[120].mxu0 }
 0x4fb   :  { %v2171_v63 = vpop.f32.mrb[121].mxu0 }
 0x4fe   :  { %v2174_v14 = vpop.f32.mrb[122].mxu0 }
 0x4ff   :  { %v2202_v52 = vpack.c.bf16 %v2174_v14, %v2169_v48  ;;  %v2176_v6 = vpop.f32.mrb[123].mxu0  ;;  %v3625_v14 = vld [vmem:[%s6067_s0 + $0x48] sm:$0xff] }
 0x501   :  { %3246 = vmatprep.mubr.msk.bf16.mxu1 %vm969_vm1, %v2202_v52 }
 0x502   :  { %v2179_v47 = vpop.f32.mrb[124].mxu0 }
 0x503   :  { %v2181_v41 = vpop.f32.mrb[125].mxu0 }
 0x506   :  { %v2184_v2 = vpop.f32.mrb[126].mxu0 }
 0x507   :  { %v2203_v23 = vpack.c.bf16 %v2184_v2, %v2179_v47  ;;  %v2186_v19 = vpop.f32.mrb[127].mxu0 }
 0x509   :  { %3247 = vmatmul.mubr.msk.bf16.gmra.mrb[124].mxu1 %vm969_vm1, %v2203_v23  ;;  %v3626_v23 = vld [vmem:[%s6067_s0 + $0x50] sm:$0xff] }
 0x56c   :  { %v3220_v28 = vpop.f32.mrb[96].mxu1 }
 0x56d   :  { %v2301_v61 = vpop.f32.mrb[97].mxu1  ;;  %v2310_v8 = vadd.f32 %v3220_v28, %v5455_v1 }
 0x56e   :  { %v3221_v22 = vpop.f32.mrb[98].mxu1  ;;  %v2302_v51 = vadd.f32 %v5455_v1, %v2301_v61 }
 0x56f   :  { %v2304_v54 = vpop.f32.mrb[99].mxu1  ;;  %v5475_v37 = vadd.f32 %v3618_v45, %v2310_v8  ;;  %v2313_v4 = vadd.f32 %v3221_v22, %v5455_v1 }
 0x570   :  { %v2305_v3 = vadd.f32 %v5455_v1, %v2304_v54  ;;  %v5468_v36 = vadd.f32 %v3617_v44, %v2302_v51  ;;  %v3627_v44 = vld [vmem:[%s6067_s0 + $0x58] sm:$0xff] }
 0x571   :  { %v2463_v31 = vsel %vm167_vm0, %v5475_v37, 0.0  ;;  %v5486_v9 = vadd.f32 %v3619_v17, %v2313_v4  ;;  %v3629_v4 = vld [vmem:[%s6067_s0 + $0x68] sm:$0xff] }
 0x572   :  { %v5462_v53 = vadd.f32 %v3616_v34, %v2305_v3  ;;  %v2460_v49 = vsel %vm167_vm0, %v5468_v36, 0.0 }
 0x573   :  { %v2465_v32 = vsel %vm167_vm0, %v5486_v9, 0.0 }
 0x574   :  { %v2461_v15 = vsel %vm167_vm0, %v5462_v53, 0.0 }
 0x575   :  { %v2462_v7 = vadd.f32 %v2461_v15, %v2460_v49 }
 0x577   :  { %v2464_v20 = vadd.f32 %v2463_v31, %v2462_v7 }
 0x579   :  { %v2466_v56 = vadd.f32 %v2465_v32, %v2464_v20 }
 0x57c   :  { %v3224_v29 = vpop.f32.mrb[100].mxu1 }
 0x57d   :  { %v2317_v13 = vpop.f32.mrb[101].mxu1  ;;  %v2326_v10 = vadd.f32 %v3224_v29, %v5455_v1 }
 0x57e   :  { %v3225_v58 = vpop.f32.mrb[102].mxu1  ;;  %v2318_v26 = vadd.f32 %v5455_v1, %v2317_v13  ;;  %v3628_v13 = vld [vmem:[%s6067_s0 + $0x60] sm:$0xff] }
 0x57f   :  { %v2320_v24 = vpop.f32.mrb[103].mxu1  ;;  %v5509_v39 = vadd.f32 %v3622_v18, %v2326_v10  ;;  %v2329_v0 = vadd.f32 %v3225_v58, %v5455_v1 }
 0x580   :  { %v5491_v40 = vadd.f32 %v3620_v57, %v2318_v26  ;;  %v2321_v46 = vadd.f32 %v5455_v1, %v2320_v24 }
 0x581   :  { %v2471_v30 = vsel %vm167_vm0, %v5509_v39, 0.0  ;;  %v5518_v59 = vadd.f32 %v3623_v55, %v2329_v0  ;;  %v3633_v55 = vld [vmem:[%s6067_s0 + $0x88] sm:$0xff] }
 0x582   :  { %v2467_v33 = vsel %vm167_vm0, %v5491_v40, 0.0  ;;  %v5501_v16 = vadd.f32 %v3621_v50, %v2321_v46  ;;  %v3630_v46 = vld [vmem:[%s6067_s0 + $0x70] sm:$0xff] }
 0x583   :  { %v2468_v42 = vadd.f32 %v2467_v33, %v2466_v56  ;;  %v2473_v48 = vsel %vm167_vm0, %v5518_v59, 0.0 }
 0x584   :  { %v2469_v27 = vsel %vm167_vm0, %v5501_v16, 0.0 }
 0x585   :  { %v2470_v5 = vadd.f32 %v2469_v27, %v2468_v42  ;;  %v3631_v42 = vld [vmem:[%s6067_s0 + $0x78] sm:$0xff] }
 0x587   :  { %v2472_v62 = vadd.f32 %v2471_v30, %v2470_v5 }
 0x589   :  { %v2474_v6 = vadd.f32 %v2473_v48, %v2472_v62 }
 0x58c   :  { %v3228_v25 = vpop.f32.mrb[104].mxu1 }
 0x58d   :  { %v2333_v11 = vpop.f32.mrb[105].mxu1  ;;  %v2342_v47 = vadd.f32 %v3228_v25, %v5455_v1 }
 0x58e   :  { %v2334_v38 = vadd.f32 %v5455_v1, %v2333_v11  ;;  %v3229_v43 = vpop.f32.mrb[106].mxu1 }
 0x58f   :  { %v2336_v35 = vpop.f32.mrb[107].mxu1  ;;  %v5541_v19 = vadd.f32 %v3626_v23, %v2342_v47  ;;  %v2345_v28 = vadd.f32 %v3229_v43, %v5455_v1  ;;  %v3635_v23 = vld [vmem:[%s6067_s0 + $0x98] sm:$0xff] }
 0x590   :  { %v5523_v21 = vadd.f32 %v3624_v60, %v2334_v38  ;;  %v2337_v12 = vadd.f32 %v5455_v1, %v2336_v35  ;;  %v3632_v38 = vld [vmem:[%s6067_s0 + $0x80] sm:$0xff] }
 0x591   :  { %v2479_v8 = vsel %vm167_vm0, %v5541_v19, 0.0  ;;  %v5550_v29 = vadd.f32 %v3627_v44, %v2345_v28 }
 0x592   :  { %v2475_v63 = vsel %vm167_vm0, %v5523_v21, 0.0  ;;  %v5533_v52 = vadd.f32 %v3625_v14, %v2337_v12  ;;  %v3634_v14 = vld [vmem:[%s6067_s0 + $0x90] sm:$0xff] }
 0x593   :  { %v2476_v41 = vadd.f32 %v2475_v63, %v2474_v6  ;;  %v2481_v45 = vsel %vm167_vm0, %v5550_v29, 0.0 }
 0x594   :  { %v2477_v2 = vsel %vm167_vm0, %v5533_v52, 0.0 }
 0x595   :  { %v2478_v22 = vadd.f32 %v2477_v2, %v2476_v41 }
 0x597   :  { %v2480_v24 = vadd.f32 %v2479_v8, %v2478_v22 }
 0x599   :  { %v2482_v7 = vadd.f32 %v2481_v45, %v2480_v24 }
 0x59c   :  { %v3232_v61 = vpop.f32.mrb[108].mxu1 }
 0x59d   :  { %v2349_v54 = vpop.f32.mrb[109].mxu1  ;;  %v2358_v31 = vadd.f32 %v3232_v61, %v5455_v1 }
 0x59e   :  { %v2350_v3 = vadd.f32 %v5455_v1, %v2349_v54  ;;  %v3233_v51 = vpop.f32.mrb[110].mxu1 }
 0x59f   :  { %v2352_v34 = vpop.f32.mrb[111].mxu1  ;;  %v5573_v20 = vadd.f32 %v3630_v46, %v2358_v31  ;;  %v2361_v32 = vadd.f32 %v3233_v51, %v5455_v1 }
 0x5a0   :  { %v5555_v15 = vadd.f32 %v3628_v13, %v2350_v3  ;;  %v2353_v58 = vadd.f32 %v5455_v1, %v2352_v34  ;;  %v3636_v13 = vld [vmem:[%s6067_s0 + $0xa0] sm:$0xff] }
 0x5a1   :  { %v2487_v10 = vsel %vm167_vm0, %v5573_v20, 0.0  ;;  %v5581_v27 = vadd.f32 %v3631_v42, %v2361_v32  ;;  %v3639_v32 = vld [vmem:[%s6067_s0 + $0xb8] sm:$0xff] }
 0x5a2   :  { %v2483_v49 = vsel %vm167_vm0, %v5555_v15, 0.0  ;;  %v5565_v26 = vadd.f32 %v3629_v4, %v2353_v58  ;;  %v3637_v4 = vld [vmem:[%s6067_s0 + $0xb0] sm:$0xff] }
 0x5a3   :  { %v2484_v17 = vadd.f32 %v2483_v49, %v2482_v7  ;;  %v2489_v35 = vsel %vm167_vm0, %v5581_v27, 0.0 }
 0x5a4   :  { %v2485_v57 = vsel %vm167_vm0, %v5565_v26, 0.0 }
 0x5a5   :  { %v2486_v33 = vadd.f32 %v2485_v57, %v2484_v17  ;;  %v3638_v17 = vld [vmem:[%s6067_s0 + $0xa8] sm:$0xff] }
 0x5a7   :  { %v2488_v18 = vadd.f32 %v2487_v10, %v2486_v33 }
 0x5a9   :  { %v2490_v12 = vadd.f32 %v2489_v35, %v2488_v18 }
 0x5ac   :  { %v3236_v50 = vpop.f32.mrb[112].mxu1 }
 0x5ad   :  { %v2365_v56 = vpop.f32.mrb[113].mxu1  ;;  %v2374_v62 = vadd.f32 %v3236_v50, %v5455_v1 }
 0x5ae   :  { %v2366_v25 = vadd.f32 %v5455_v1, %v2365_v56  ;;  %v3237_v11 = vpop.f32.mrb[114].mxu1 }
 0x5af   :  { %v2368_v0 = vpop.f32.mrb[115].mxu1  ;;  %v5605_v6 = vadd.f32 %v3634_v14, %v2374_v62  ;;  %v2377_v47 = vadd.f32 %v3237_v11, %v5455_v1 }
 0x5b0   :  { %v5587_v43 = vadd.f32 %v3632_v38, %v2366_v25  ;;  %v2369_v5 = vadd.f32 %v5455_v1, %v2368_v0 }
 0x5b1   :  { %v2495_v2 = vsel %vm167_vm0, %v5605_v6, 0.0  ;;  %v5613_v28 = vadd.f32 %v3635_v23, %v2377_v47 }
 0x5b2   :  { %v2491_v30 = vsel %vm167_vm0, %v5587_v43, 0.0  ;;  %v5597_v60 = vadd.f32 %v3633_v55, %v2369_v5  ;;  %v3640_v55 = vld [vmem:[%s6067_s0 + $0xc0] sm:$0xff] }
 0x5b3   :  { %v2492_v48 = vadd.f32 %v2491_v30, %v2490_v12  ;;  %v2497_v44 = vsel %vm167_vm0, %v5613_v28, 0.0 }
 0x5b4   :  { %v2493_v63 = vsel %vm167_vm0, %v5597_v60, 0.0 }
 0x5b5   :  { %v2494_v41 = vadd.f32 %v2493_v63, %v2492_v48  ;;  %v3641_v63 = vld [vmem:[%s6067_s0 + $0xd0] sm:$0xff] }
 0x5b7   :  { %v2496_v22 = vadd.f32 %v2495_v2, %v2494_v41  ;;  %v3642_v41 = vld [vmem:[%s6067_s0 + $0xc8] sm:$0xff] }
 0x5b9   :  { %v2498_v49 = vadd.f32 %v2497_v44, %v2496_v22 }
 0x5bc   :  { %v3240_v61 = vpop.f32.mrb[116].mxu1 }
 0x5bd   :  { %v2381_v54 = vpop.f32.mrb[117].mxu1  ;;  %v2390_v3 = vadd.f32 %v3240_v61, %v5455_v1  ;;  %v3643_v61 = vld [vmem:[%s6067_s0 + $0xd8] sm:$0xff] }
 0x5be   :  { %v2382_v51 = vadd.f32 %v5455_v1, %v2381_v54  ;;  %v3241_v34 = vpop.f32.mrb[118].mxu1 }
 0x5bf   :  { %v2384_v8 = vpop.f32.mrb[119].mxu1  ;;  %v2393_v24 = vadd.f32 %v3241_v34, %v5455_v1  ;;  %v5629_v7 = vadd.f32 %v3637_v4, %v2390_v3 }
 0x5c0   :  { %v5622_v58 = vadd.f32 %v3636_v13, %v2382_v51  ;;  %v2385_v45 = vadd.f32 %v5455_v1, %v2384_v8 }
 0x5c1   :  { %v5641_v33 = vadd.f32 %v3639_v32, %v2393_v24  ;;  %v2503_v10 = vsel %vm167_vm0, %v5629_v7, 0.0 }
 0x5c2   :  { %v2499_v31 = vsel %vm167_vm0, %v5622_v58, 0.0  ;;  %v5636_v57 = vadd.f32 %v3638_v17, %v2385_v45  ;;  %v3644_v17 = vld [vmem:[%s6067_s0 + $0xe0] sm:$0xff] }
 0x5c3   :  { %v2500_v46 = vadd.f32 %v2499_v31, %v2498_v49  ;;  %v2505_v25 = vsel %vm167_vm0, %v5641_v33, 0.0 }
 0x5c4   :  { %v2501_v50 = vsel %vm167_vm0, %v5636_v57, 0.0 }
 0x5c5   :  { %v2502_v56 = vadd.f32 %v2501_v50, %v2500_v46 }
 0x5c7   :  { %v2504_v42 = vadd.f32 %v2503_v10, %v2502_v56  ;;  %v3645_v56 = vld [vmem:[%s6067_s0 + $0xf0] sm:$0xff] }
 0x5c9   :  { %v2506_v11 = vadd.f32 %v2505_v25, %v2504_v42  ;;  %v3646_v25 = vld [vmem:[%s6067_s0 + $0xe8] sm:$0xff] }
 0x5cc   :  { %v3244_v18 = vpop.f32.mrb[120].mxu1 }
 0x5cd   :  { %v2397_v0 = vpop.f32.mrb[121].mxu1  ;;  %v2406_v38 = vadd.f32 %v3244_v18, %v5455_v1 }
 0x5ce   :  { %v2398_v5 = vadd.f32 %v5455_v1, %v2397_v0  ;;  %v3245_v35 = vpop.f32.mrb[122].mxu1  ;;  %v3647_v0 = vld [vmem:[%s6067_s0 + $0xf8] sm:$0xff] }
 0x5cf   :  { %v2400_v30 = vpop.f32.mrb[123].mxu1  ;;  %v2409_v62 = vadd.f32 %v3245_v35, %v5455_v1  ;;  %v2454_v14 = vadd.f32 %v3641_v63, %v2406_v38 }
 0x5d0   :  { %v2452_v12 = vadd.f32 %v3640_v55, %v2398_v5  ;;  %v2401_v48 = vadd.f32 %v5455_v1, %v2400_v30 }
 0x5d1   :  { %v2455_v22 = vadd.f32 %v3643_v61, %v2409_v62  ;;  %v2511_v51 = vsel %vm167_vm0, %v2454_v14, 0.0 }
 0x5d2   :  { %v2507_v47 = vsel %vm167_vm0, %v2452_v12, 0.0  ;;  %v2453_v2 = vadd.f32 %v3642_v41, %v2401_v48 }
 0x5d3   :  { %v2508_v23 = vadd.f32 %v2507_v47, %v2506_v11  ;;  %v2513_v8 = vsel %vm167_vm0, %v2455_v22, 0.0 }
 0x5d4   :  { %v2509_v54 = vsel %vm167_vm0, %v2453_v2, 0.0 }
 0x5d5   :  { %v2510_v3 = vadd.f32 %v2509_v54, %v2508_v23 }
 0x5d7   :  { %v2512_v34 = vadd.f32 %v2511_v51, %v2510_v3 }
 0x5d9   :  { %v2514_v44 = vadd.f32 %v2513_v8, %v2512_v34 }
 0x5dc   :  { %v3248_v13 = vpop.f32.mrb[124].mxu1 }
 0x5dd   :  { %v2413_v24 = vpop.f32.mrb[125].mxu1  ;;  %v2422_v45 = vadd.f32 %v3248_v13, %v5455_v1 }
 0x5de   :  { %v2414_v49 = vadd.f32 %v5455_v1, %v2413_v24  ;;  %v3249_v4 = vpop.f32.mrb[126].mxu1 }
 0x5df   :  { %v2416_v31 = vpop.f32.mrb[127].mxu1  ;;  %v2425_v32 = vadd.f32 %v3249_v4, %v5455_v1  ;;  %v2458_v10 = vadd.f32 %v3645_v56, %v2422_v45 }
 0x5e0   :  { %v2456_v46 = vadd.f32 %v3644_v17, %v2414_v49  ;;  %v2417_v50 = vadd.f32 %v5455_v1, %v2416_v31 }
 0x5e1   :  { %v2459_v38 = vadd.f32 %v3647_v0, %v2425_v32  ;;  %v2519_v35 = vsel %vm167_vm0, %v2458_v10, 0.0 }
 0x5e2   :  { %v2515_v42 = vsel %vm167_vm0, %v2456_v46, 0.0  ;;  %v2457_v11 = vadd.f32 %v3646_v25, %v2417_v50 }
 0x5e3   :  { %v2516_v18 = vadd.f32 %v2515_v42, %v2514_v44  ;;  %v2521_v55 = vsel %vm167_vm0, %v2459_v38, 0.0 }
 0x5e4   :  { %v2517_v1 = vsel %vm167_vm0, %v2457_v11, 0.0 }
 0x5e5   :  { %v2518_v5 = vadd.f32 %v2517_v1, %v2516_v18 }
 0x5e7   :  { %v2520_v30 = vadd.f32 %v2519_v35, %v2518_v5 }
 0x5e9   :  { %v2522_v62 = vadd.f32 %v2521_v55, %v2520_v30 }
 0x5eb   :  { %v2523_v48 = vrot.slane %v2522_v62, 4 }
 0x5ed   :  { %v2524_v63 = vadd.f32 %v2523_v48, %v2522_v62 }
 0x5ef   :  { %v2525_v47 = vrot.slane %v2524_v63, 2 }
 0x5f1   :  { %v2526_v41 = vadd.f32 %v2525_v47, %v2524_v63 }
 0x5f3   :  { %v2527_v23 = vrot.slane %v2526_v41, 1 }
 0x5f5   :  { %v2528_v61 = vadd.f32 %v2527_v23, %v2526_v41 }
 0x5f7   :  { %v5689_v54 = vmul.f32 0.00390625, %v2528_v61 }
 0x5f9   :  { %v5693_v3 = vsub.f32 %v5622_v58, %v5689_v54  ;;  %v5697_v51 = vsub.f32 %v5636_v57, %v5689_v54  ;;  %v5701_v34 = vsub.f32 %v5629_v7, %v5689_v54  ;;  %v5705_v8 = vsub.f32 %v5641_v33, %v5689_v54 }
 0x5fa   :  { %v5708_v44 = vsub.f32 %v2452_v12, %v5689_v54  ;;  %v5711_v13 = vsub.f32 %v2453_v2, %v5689_v54  ;;  %v5714_v58 = vsub.f32 %v2454_v14, %v5689_v54  ;;  %v5717_v57 = vsub.f32 %v2455_v22, %v5689_v54 }
 0x5fb   :  { %v5720_v24 = vsub.f32 %v2456_v46, %v5689_v54  ;;  %v5723_v7 = vsub.f32 %v2457_v11, %v5689_v54  ;;  %v5726_v33 = vsub.f32 %v2458_v10, %v5689_v54  ;;  %v5729_v12 = vsub.f32 %v2459_v38, %v5689_v54 }
 0x5fc   :  { %v5733_v2 = vsub.f32 %v5468_v36, %v5689_v54  ;;  %v5737_v14 = vsub.f32 %v5462_v53, %v5689_v54  ;;  %v5741_v22 = vsub.f32 %v5475_v37, %v5689_v54  ;;  %v5745_v45 = vsub.f32 %v5486_v9, %v5689_v54 }
 0x5fd   :  { %v5753_v36 = vsub.f32 %v5491_v40, %v5689_v54  ;;  %v5759_v37 = vsub.f32 %v5501_v16, %v5689_v54  ;;  %v5767_v32 = vsub.f32 %v5509_v39, %v5689_v54  ;;  %v5774_v16 = vsub.f32 %v5518_v59, %v5689_v54 }
 0x5fe   :  { %v2563_v49 = vmul.f32 %v5733_v2, %v5733_v2  ;;  %v2564_v4 = vmul.f32 %v5737_v14, %v5737_v14  ;;  %v2565_v53 = vmul.f32 %v5741_v22, %v5741_v22  ;;  %v2566_v9 = vmul.f32 %v5745_v45, %v5745_v45 }
 0x5ff   :  { %v2567_v40 = vmul.f32 %v5753_v36, %v5753_v36  ;;  %v2568_v10 = vmul.f32 %v5759_v37, %v5759_v37  ;;  %v5781_v39 = vsub.f32 %v5523_v21, %v5689_v54  ;;  %v2569_v11 = vmul.f32 %v5767_v32, %v5767_v32 }
 0x600   :  { %v2595_v31 = vsel %vm167_vm0, %v2563_v49, 0.0  ;;  %v2596_v17 = vsel %vm167_vm0, %v2564_v4, 0.0  ;;  %v2598_v50 = vsel %vm167_vm0, %v2565_v53, 0.0  ;;  %v2600_v42 = vsel %vm167_vm0, %v2566_v9, 0.0 }
 0x601   :  { %v2597_v46 = vadd.f32 %v2596_v17, %v2595_v31  ;;  %v2602_v18 = vsel %vm167_vm0, %v2567_v40, 0.0  ;;  %v5788_v59 = vsub.f32 %v5533_v52, %v5689_v54  ;;  %v2570_v38 = vmul.f32 %v5774_v16, %v5774_v16 }
 0x602   :  { %v2604_v1 = vsel %vm167_vm0, %v2568_v10, 0.0  ;;  %v5795_v21 = vsub.f32 %v5541_v19, %v5689_v54  ;;  %v2571_v35 = vmul.f32 %v5781_v39, %v5781_v39  ;;  %v2606_v30 = vsel %vm167_vm0, %v2569_v11, 0.0 }
 0x603   :  { %v2599_v56 = vadd.f32 %v2598_v50, %v2597_v46  ;;  %v5802_v52 = vsub.f32 %v5550_v29, %v5689_v54  ;;  %v2572_v62 = vmul.f32 %v5788_v59, %v5788_v59  ;;  %v2608_v48 = vsel %vm167_vm0, %v2570_v38, 0.0 }
 0x604   :  { %v5809_v19 = vsub.f32 %v5555_v15, %v5689_v54  ;;  %v2573_v47 = vmul.f32 %v5795_v21, %v5795_v21  ;;  %v2610_v41 = vsel %vm167_vm0, %v2571_v35, 0.0  ;;  %v5816_v29 = vsub.f32 %v5565_v26, %v5689_v54 }
 0x605   :  { %v2601_v25 = vadd.f32 %v2600_v42, %v2599_v56  ;;  %v2574_v61 = vmul.f32 %v5802_v52, %v5802_v52  ;;  %v2612_v49 = vsel %vm167_vm0, %v2572_v62, 0.0  ;;  %v5823_v15 = vsub.f32 %v5573_v20, %v5689_v54 }
 0x606   :  { %v2575_v53 = vmul.f32 %v5809_v19, %v5809_v19  ;;  %v2614_v9 = vsel %vm167_vm0, %v2573_v47, 0.0  ;;  %v5830_v26 = vsub.f32 %v5581_v27, %v5689_v54  ;;  %v2576_v17 = vmul.f32 %v5816_v29, %v5816_v29 }
 0x607   :  { %v2603_v0 = vadd.f32 %v2602_v18, %v2601_v25  ;;  %v2616_v46 = vsel %vm167_vm0, %v2574_v61, 0.0  ;;  %v5837_v20 = vsub.f32 %v5587_v43, %v5689_v54  ;;  %v2577_v50 = vmul.f32 %v5823_v15, %v5823_v15 }
 0x608   :  { %v2618_v56 = vsel %vm167_vm0, %v2575_v53, 0.0  ;;  %v5844_v27 = vsub.f32 %v5597_v60, %v5689_v54  ;;  %v2578_v42 = vmul.f32 %v5830_v26, %v5830_v26  ;;  %v2620_v25 = vsel %vm167_vm0, %v2576_v17, 0.0 }
 0x609   :  { %v2605_v5 = vadd.f32 %v2604_v1, %v2603_v0  ;;  %v5851_v43 = vsub.f32 %v5605_v6, %v5689_v54  ;;  %v2579_v18 = vmul.f32 %v5837_v20, %v5837_v20  ;;  %v2622_v0 = vsel %vm167_vm0, %v2577_v50, 0.0 }
 0x60a   :  { %v5858_v60 = vsub.f32 %v5613_v28, %v5689_v54  ;;  %v2580_v1 = vmul.f32 %v5844_v27, %v5844_v27  ;;  %v2583_v28 = vmul.f32 %v5693_v3, %v5693_v3 }
 0x60b   :  { %v2607_v55 = vadd.f32 %v2606_v30, %v2605_v5  ;;  %v2624_v5 = vsel %vm167_vm0, %v2578_v42, 0.0  ;;  %v2581_v6 = vmul.f32 %v5851_v43, %v5851_v43  ;;  %v2626_v30 = vsel %vm167_vm0, %v2579_v18, 0.0 }
 0x60c   :  { %v2582_v62 = vmul.f32 %v5858_v60, %v5858_v60 }
 0x60d   :  { %v2609_v63 = vadd.f32 %v2608_v48, %v2607_v55  ;;  %v2628_v48 = vsel %vm167_vm0, %v2580_v1, 0.0  ;;  %v2630_v54 = vsel %vm167_vm0, %v2581_v6, 0.0 }
 0x60f   :  { %v2611_v23 = vadd.f32 %v2610_v41, %v2609_v63  ;;  %v2584_v41 = vmul.f32 %v5697_v51, %v5697_v51 }
 0x611   :  { %v2613_v4 = vadd.f32 %v2612_v49, %v2611_v23  ;;  %v2632_v23 = vsel %vm167_vm0, %v2582_v62, 0.0  ;;  %v2585_v49 = vmul.f32 %v5701_v34, %v5701_v34 }
 0x613   :  { %v2615_v31 = vadd.f32 %v2614_v9, %v2613_v4  ;;  %v2634_v4 = vsel %vm167_vm0, %v2583_v28, 0.0  ;;  %v2586_v9 = vmul.f32 %v5705_v8, %v5705_v8 }
 0x615   :  { %v2617_v40 = vadd.f32 %v2616_v46, %v2615_v31  ;;  %v2636_v31 = vsel %vm167_vm0, %v2584_v41, 0.0  ;;  %v2587_v46 = vmul.f32 %v5708_v44, %v5708_v44 }
 0x617   :  { %v2619_v10 = vadd.f32 %v2618_v56, %v2617_v40  ;;  %v2638_v40 = vsel %vm167_vm0, %v2585_v49, 0.0  ;;  %v2588_v56 = vmul.f32 %v5711_v13, %v5711_v13 }
 0x619   :  { %v2621_v11 = vadd.f32 %v2620_v25, %v2619_v10  ;;  %v2640_v10 = vsel %vm167_vm0, %v2586_v9, 0.0  ;;  %v2589_v25 = vmul.f32 %v5714_v58, %v5714_v58 }
 0x61b   :  { %v2623_v38 = vadd.f32 %v2622_v0, %v2621_v11  ;;  %v2642_v11 = vsel %vm167_vm0, %v2587_v46, 0.0  ;;  %v2590_v0 = vmul.f32 %v5717_v57, %v5717_v57 }
 0x61d   :  { %v2625_v35 = vadd.f32 %v2624_v5, %v2623_v38  ;;  %v2644_v38 = vsel %vm167_vm0, %v2588_v56, 0.0  ;;  %v2591_v5 = vmul.f32 %v5720_v24, %v5720_v24 }
 0x61f   :  { %v2627_v55 = vadd.f32 %v2626_v30, %v2625_v35  ;;  %v2646_v35 = vsel %vm167_vm0, %v2589_v25, 0.0  ;;  %v2592_v30 = vmul.f32 %v5723_v7, %v5723_v7 }
 0x621   :  { %v2629_v63 = vadd.f32 %v2628_v48, %v2627_v55  ;;  %v2648_v55 = vsel %vm167_vm0, %v2590_v0, 0.0  ;;  %v2593_v48 = vmul.f32 %v5726_v33, %v5726_v33 }
 0x623   :  { %v2631_v47 = vadd.f32 %v2630_v54, %v2629_v63  ;;  %v2650_v63 = vsel %vm167_vm0, %v2591_v5, 0.0  ;;  %v2594_v54 = vmul.f32 %v5729_v12, %v5729_v12 }
 0x625   :  { %v2633_v61 = vadd.f32 %v2632_v23, %v2631_v47  ;;  %v2652_v47 = vsel %vm167_vm0, %v2592_v30, 0.0  ;;  %v2654_v23 = vsel %vm167_vm0, %v2593_v48, 0.0  ;;  %v2656_v49 = vsel %vm167_vm0, %v2594_v54, 0.0 }
 0x627   :  { %v2635_v53 = vadd.f32 %v2634_v4, %v2633_v61 }
 0x629   :  { %v2637_v17 = vadd.f32 %v2636_v31, %v2635_v53 }
 0x62b   :  { %v2639_v50 = vadd.f32 %v2638_v40, %v2637_v17 }
 0x62d   :  { %v2641_v42 = vadd.f32 %v2640_v10, %v2639_v50 }
 0x62f   :  { %v2643_v18 = vadd.f32 %v2642_v11, %v2641_v42 }
 0x631   :  { %v2645_v1 = vadd.f32 %v2644_v38, %v2643_v18 }
 0x633   :  { %v2647_v6 = vadd.f32 %v2646_v35, %v2645_v1 }
 0x635   :  { %v2649_v62 = vadd.f32 %v2648_v55, %v2647_v6 }
 0x637   :  { %v2651_v28 = vadd.f32 %v2650_v63, %v2649_v62 }
 0x639   :  { %v2653_v41 = vadd.f32 %v2652_v47, %v2651_v28 }
 0x63b   :  { %v2655_v61 = vadd.f32 %v2654_v23, %v2653_v41 }
 0x63d   :  { %v2657_v4 = vadd.f32 %v2656_v49, %v2655_v61 }
 0x63f   :  { %v2658_v53 = vrot.slane %v2657_v4, 4 }
 0x641   :  { %v2659_v9 = vadd.f32 %v2658_v53, %v2657_v4 }
 0x643   :  { %v2660_v31 = vrot.slane %v2659_v9, 2 }
 0x645   :  { %v2661_v17 = vadd.f32 %v2660_v31, %v2659_v9 }
 0x647   :  { %v2662_v46 = vrot.slane %v2661_v17, 1 }
 0x649   :  { %v2663_v40 = vadd.f32 %v2662_v46, %v2661_v17 }
 0x64b   :  { %v2664_v50 = vmul.f32 0.00390625, %v2663_v40 }
 0x64d   :  { %v2665_v56 = vadd.f32 1e-05, %v2664_v50 }
 0x64f   :  { %3553 = vrsqrt.f32 %v2665_v56 }
 0x659   :  { %v3554_v10 = vpop.eup %3553 }
 0x65a   :  { %v2667_v42 = vmul.f32 %v3554_v10, %v5733_v2  ;;  %v2668_v25 = vmul.f32 %v3554_v10, %v5737_v14  ;;  %v2669_v11 = vmul.f32 %v3554_v10, %v5741_v22  ;;  %v2670_v18 = vmul.f32 %v3554_v10, %v5745_v45 }
 0x65b   :  { %v2671_v0 = vmul.f32 %v3554_v10, %v5753_v36  ;;  %v2672_v38 = vmul.f32 %v3554_v10, %v5759_v37  ;;  %v2673_v1 = vmul.f32 %v3554_v10, %v5767_v32  ;;  %v2674_v5 = vmul.f32 %v3554_v10, %v5774_v16 }
 0x65c   :  { %v2675_v35 = vmul.f32 %v3554_v10, %v5781_v39  ;;  %v2676_v6 = vmul.f32 %v3554_v10, %v5788_v59  ;;  %v2677_v2 = vmul.f32 %v3554_v10, %v5795_v21  ;;  %v2678_v14 = vmul.f32 %v3554_v10, %v5802_v52  ;;  %2699 = vst.msk [vmem:[%s6077_s10] sm:$0xff] %vm167_vm0, %v2667_v42 }
 0x65d   :  { %2700 = vst.msk [vmem:[%s6077_s10 + $0x8] sm:$0xff] %vm167_vm0, %v2668_v25  ;;  %2701 = vst.msk [vmem:[%s6077_s10 + $0x10] sm:$0xff] %vm167_vm0, %v2669_v11  ;;  %v2679_v22 = vmul.f32 %v3554_v10, %v5809_v19  ;;  %v2680_v45 = vmul.f32 %v3554_v10, %v5816_v29  ;;  %v2681_v36 = vmul.f32 %v3554_v10, %v5823_v15 }
 0x65e   :  { %2702 = vst.msk [vmem:[%s6077_s10 + $0x18] sm:$0xff] %vm167_vm0, %v2670_v18  ;;  %v2682_v37 = vmul.f32 %v3554_v10, %v5830_v26  ;;  %2703 = vst.msk [vmem:[%s6077_s10 + $0x20] sm:$0xff] %vm167_vm0, %v2671_v0  ;;  %v2683_v32 = vmul.f32 %v3554_v10, %v5837_v20  ;;  %v2684_v16 = vmul.f32 %v3554_v10, %v5844_v27 }
 0x65f   :  { %2704 = vst.msk [vmem:[%s6077_s10 + $0x28] sm:$0xff] %vm167_vm0, %v2672_v38  ;;  %2705 = vst.msk [vmem:[%s6077_s10 + $0x30] sm:$0xff] %vm167_vm0, %v2673_v1  ;;  %v2685_v39 = vmul.f32 %v3554_v10, %v5851_v43  ;;  %v2686_v59 = vmul.f32 %v3554_v10, %v5858_v60  ;;  %v2687_v21 = vmul.f32 %v3554_v10, %v5693_v3 }
 0x660   :  { %2706 = vst.msk [vmem:[%s6077_s10 + $0x38] sm:$0xff] %vm167_vm0, %v2674_v5  ;;  %2707 = vst.msk [vmem:[%s6077_s10 + $0x40] sm:$0xff] %vm167_vm0, %v2675_v35  ;;  %v2688_v52 = vmul.f32 %v3554_v10, %v5697_v51  ;;  %v2689_v19 = vmul.f32 %v3554_v10, %v5701_v34  ;;  %v2690_v29 = vmul.f32 %v3554_v10, %v5705_v8 }
 0x661   :  { %2708 = vst.msk [vmem:[%s6077_s10 + $0x48] sm:$0xff] %vm167_vm0, %v2676_v6  ;;  %2709 = vst.msk [vmem:[%s6077_s10 + $0x50] sm:$0xff] %vm167_vm0, %v2677_v2  ;;  %v2691_v3 = vmul.f32 %v3554_v10, %v5708_v44  ;;  %v2692_v51 = vmul.f32 %v3554_v10, %v5711_v13  ;;  %v2693_v34 = vmul.f32 %v3554_v10, %v5714_v58 }
 0x662   :  { %2710 = vst.msk [vmem:[%s6077_s10 + $0x58] sm:$0xff] %vm167_vm0, %v2678_v14  ;;  %2711 = vst.msk [vmem:[%s6077_s10 + $0x60] sm:$0xff] %vm167_vm0, %v2679_v22  ;;  %v2694_v8 = vmul.f32 %v3554_v10, %v5717_v57  ;;  %v2695_v44 = vmul.f32 %v3554_v10, %v5720_v24  ;;  %v2696_v13 = vmul.f32 %v3554_v10, %v5723_v7 }
 0x663   :  { %2712 = vst.msk [vmem:[%s6077_s10 + $0x68] sm:$0xff] %vm167_vm0, %v2680_v45  ;;  %2713 = vst.msk [vmem:[%s6077_s10 + $0x70] sm:$0xff] %vm167_vm0, %v2681_v36  ;;  %v2697_v58 = vmul.f32 %v3554_v10, %v5726_v33  ;;  %v2698_v57 = vmul.f32 %v3554_v10, %v5729_v12 }
 0x664   :  { %2714 = vst.msk [vmem:[%s6077_s10 + $0x78] sm:$0xff] %vm167_vm0, %v2682_v37  ;;  %2715 = vst.msk [vmem:[%s6077_s10 + $0x80] sm:$0xff] %vm167_vm0, %v2683_v32 }
 0x665   :  { %2716 = vst.msk [vmem:[%s6077_s10 + $0x88] sm:$0xff] %vm167_vm0, %v2684_v16  ;;  %2717 = vst.msk [vmem:[%s6077_s10 + $0x90] sm:$0xff] %vm167_vm0, %v2685_v39 }
 0x666   :  { %2718 = vst.msk [vmem:[%s6077_s10 + $0x98] sm:$0xff] %vm167_vm0, %v2686_v59  ;;  %2719 = vst.msk [vmem:[%s6077_s10 + $0xa0] sm:$0xff] %vm167_vm0, %v2687_v21 }
 0x667   :  { %2720 = vst.msk [vmem:[%s6077_s10 + $0xa8] sm:$0xff] %vm167_vm0, %v2688_v52  ;;  %2721 = vst.msk [vmem:[%s6077_s10 + $0xb0] sm:$0xff] %vm167_vm0, %v2689_v19 }
 0x668   :  { %2722 = vst.msk [vmem:[%s6077_s10 + $0xb8] sm:$0xff] %vm167_vm0, %v2690_v29  ;;  %2723 = vst.msk [vmem:[%s6077_s10 + $0xc0] sm:$0xff] %vm167_vm0, %v2691_v3 }
 0x669   :  { %2724 = vst.msk [vmem:[%s6077_s10 + $0xc8] sm:$0xff] %vm167_vm0, %v2692_v51  ;;  %2725 = vst.msk [vmem:[%s6077_s10 + $0xd0] sm:$0xff] %vm167_vm0, %v2693_v34 }
 0x66a   :  { %2726 = vst.msk [vmem:[%s6077_s10 + $0xd8] sm:$0xff] %vm167_vm0, %v2694_v8  ;;  %2727 = vst.msk [vmem:[%s6077_s10 + $0xe0] sm:$0xff] %vm167_vm0, %v2695_v44 }
 0x66b   :  { %2728 = vst.msk [vmem:[%s6077_s10 + $0xe8] sm:$0xff] %vm167_vm0, %v2696_v13  ;;  %2729 = vst.msk [vmem:[%s6077_s10 + $0xf0] sm:$0xff] %vm167_vm0, %v2697_v58 }
 0x66c   :  { %2730 = vst.msk [vmem:[%s6077_s10 + $0xf8] sm:$0xff] %vm167_vm0, %v2698_v57 }
 0x66d   :  { %2735 = vsyncpa [#allocation3], 1 }
 0x66e   :  { %2736 = vsyncpa [#allocation5], 1 }
 0x66f   :  { %2737 = vsyncpa [#allocation8], 1 }

// kernel: feat_extractor.14
= control target key start
LH: loop header
LB: loop body
LE: loop exit
PB: predicated region body
PF: predicated region fallthrough
CT: control target
= control target key end

     0   :  { %8 = vsyncpa [#allocation4], 0  ;;  %s399_s0 = inlined_call_operand.vmem [shape: bf16[32,128], index: 0, kind: input, shape index: {}]   ;;  %s400_s1 = inlined_call_operand.hbm [shape: bf16[128,128], index: 1, kind: input, shape index: {}]   ;;  %s401_s2 = inlined_call_operand.hbm [shape: f32[1,128], index: 2, kind: input, shape index: {}]   ;;  %s402_s3 = inlined_call_operand.vmem [shape: f32[32,128], index: 3, kind: output, shape index: {}]  }
   0x1   :  { %9 = vsyncpa [#allocation6], 0  ;;  %s333_s12 = smov [#allocation3]   ;;  %s285_s16 = scalar_lea.hbm %s400_s1, 1024 }
   0x2   :  { %s17_s13 = sshll.u32 %s333_s12, 4  ;;  %p286_p0 = scmp.ne.s32.totalorder %s400_s1, %s285_s16  ;;  %s18_s13 = int_to_ptr.vmem [resolvable:$true] %s17_s13 }
   0x3   :  { %p289_p1 = scmp.lt.u32.totalorder %s285_s16, %s400_s1 }
   0x5   :  { %p291_p2 = pnand %p289_p1, %p286_p0 }
   0x7   :  { %294 = shalt.err (!%p291_p2)
}
   0x8   :  { %s295_s21 = scalar_lea.vmem %s18_s13, 1024  ;;  %p300_p4 = scmp.lt.s32.totalorder %s18_s13, %s18_s13 }
   0x9   :  { %p296_p3 = scmp.ne.s32.totalorder %s18_s13, %s295_s21  ;;  %p301_p5 = scmp.lt.s32.totalorder %s295_s21, %s295_s21 }
   0xb   :  { %p302_p6 = por %p301_p5, %p300_p4 }
   0xd   :  { %p303_p7 = pnand %p302_p6, %p296_p3 }
   0xf   :  { %306 = shalt.err (!%p303_p7)
}
  0x10   :  { %s334_s22 = smov 64   ;;  %s335_s23 = smov 4  }
  0x11   :  { %23 = dma.hbm_to_vmem [thread:$0]  %s400_s1, 1024, %s18_s13, [#allocation4], %s334_s22, %s334_s22, %s335_s23  }
  0x12   :  { %s336_s26 = smov [#allocation5]   ;;  %s307_s30 = scalar_lea.hbm %s401_s2, 16 }
  0x13   :  { %s30_s27 = sshll.u32 %s336_s26, 4  ;;  %p308_p8 = scmp.ne.s32.totalorder %s401_s2, %s307_s30  ;;  %s31_s27 = int_to_ptr.vmem [resolvable:$true] %s30_s27 }
  0x14   :  { %p311_p9 = scmp.lt.u32.totalorder %s307_s30, %s401_s2 }
  0x16   :  { %p313_p10 = pnand %p311_p9, %p308_p8 }
  0x18   :  { %316 = shalt.err (!%p313_p10)
}
  0x19   :  { %s317_s8 = scalar_lea.vmem %s31_s27, 16  ;;  %s321_s1 = scalar_lea.vmem %s31_s27, 32 }
  0x1a   :  { %p318_p11 = scmp.ne.s32.totalorder %s31_s27, %s317_s8  ;;  %p322_p12 = scmp.lt.s32.totalorder %s31_s27, %s31_s27 }
  0x1b   :  { %p323_p13 = scmp.lt.s32.totalorder %s321_s1, %s317_s8 }
  0x1d   :  { %p324_p0 = por %p323_p13, %p322_p12 }
  0x1f   :  { %p325_p1 = pnand %p324_p0, %p318_p11 }
  0x21   :  { %328 = shalt.err (!%p325_p1)
}
  0x22   :  { %33 = dma.hbm_to_vmem [thread:$0]  %s401_s2, 16, %s31_s27, [#allocation6]  }
  0x23   :  { %329 = dma.done.wait [#allocation4], 1024  }
  0x24   :  { %330 = vsyncadd [#allocation4], 4294966272 }
  0x25   :  { %331 = dma.done.wait [#allocation6], 16  }
  0x26   :  { %332 = vsyncadd [#allocation6], 4294967280  ;;  %v275_v0 = vld [vmem:[#allocation3] sm:$0xff]   ;;  %v276_v1 = vld [vmem:[#allocation3 + $0x8] sm:$0xff]  }
  0x27   :  { %251 = vmatprep.subr.bf16.mxu0 %v275_v0  ;;  %v277_v2 = vld [vmem:[#allocation3 + $0x10] sm:$0xff]   ;;  %v278_v3 = vld [vmem:[#allocation3 + $0x18] sm:$0xff]   ;;  %v283_v4 = vld [vmem:[%s399_s0] sm:$0xff]  }
  0x28   :  { %252 = vmatpush3.bf16.msra.mxu0 %v275_v0  ;;  %267 = vmatprep.mubr.bf16.mxu0 %v283_v4  ;;  %v279_v5 = vld [vmem:[#allocation3 + $0x20] sm:$0xff]   ;;  %v280_v6 = vld [vmem:[#allocation3 + $0x28] sm:$0xff]   ;;  %v281_v7 = vld [vmem:[#allocation3 + $0x30] sm:$0xff]  }
  0x29   :  { %253 = vmatprep.subr.bf16.mxu0 %v276_v1  ;;  %v282_v8 = vld [vmem:[#allocation3 + $0x38] sm:$0xff]   ;;  %v284_v9 = vld [vmem:[%s399_s0 + $0x8] sm:$0xff]   ;;  %v240_v10 = vld [vmem:[#allocation5] ss:$0 sm:$0xff] }
  0x2c   :  { %254 = vmatpush3.bf16.msra.mxu0 %v276_v1 }
  0x2d   :  { %255 = vmatprep.subr.bf16.mxu0 %v277_v2 }
  0x30   :  { %256 = vmatpush3.bf16.msra.mxu0 %v277_v2 }
  0x31   :  { %257 = vmatprep.subr.bf16.mxu0 %v278_v3 }
  0x34   :  { %258 = vmatpush3.bf16.msra.mxu0 %v278_v3 }
  0x35   :  { %259 = vmatprep.subr.bf16.mxu0 %v279_v5 }
  0x38   :  { %260 = vmatpush3.bf16.msra.mxu0 %v279_v5 }
  0x39   :  { %261 = vmatprep.subr.bf16.mxu0 %v280_v6 }
  0x3c   :  { %262 = vmatpush3.bf16.msra.mxu0 %v280_v6 }
  0x3d   :  { %263 = vmatprep.subr.bf16.mxu0 %v281_v7 }
  0x40   :  { %264 = vmatpush3.bf16.msra.mxu0 %v281_v7 }
  0x41   :  { %265 = vmatprep.subr.bf16.mxu0 %v282_v8 }
  0x44   :  { %266 = vmatpush3.bf16.msra.mxu0 %v282_v8 }
  0x47   :  { %268 = vmatmul.mubr.bf16.vlgmr.msra.gmra.mrb[0].mxu0 %v284_v9 }
 0x11a   :  { %v269_v11 = vpop.f32.mrb[0].mxu0 }
 0x11b   :  { %v206_v12 = vadd.f32 %v269_v11, %v240_v10  ;;  %v167_v13 = vpop.f32.mrb[1].mxu0 }
 0x11c   :  { %v204_v14 = vadd.f32 %v240_v10, %v167_v13  ;;  %v270_v15 = vpop.f32.mrb[2].mxu0 }
 0x11d   :  { %vm210_vm0 = vcmp.ge.f32.partialorder %v206_v12, 0.0  ;;  %v214_v16 = vmul.f32 0.1, %v206_v12  ;;  %v207_v17 = vadd.f32 %v270_v15, %v240_v10  ;;  %v170_v18 = vpop.f32.mrb[3].mxu0 }
 0x11e   :  { %vm208_vm1 = vcmp.ge.f32.partialorder %v204_v14, 0.0  ;;  %v212_v19 = vmul.f32 0.1, %v204_v14  ;;  %v205_v20 = vadd.f32 %v240_v10, %v170_v18 }
 0x11f   :  { %v218_v21 = vsel %vm210_vm0, %v206_v12, %v214_v16  ;;  %vm211_vm2 = vcmp.ge.f32.partialorder %v207_v17, 0.0  ;;  %v215_v22 = vmul.f32 0.1, %v207_v17 }
 0x120   :  { %222 = vst [vmem:[%s402_s3 + $0x10] sm:$0xff] %v218_v21  ;;  %v216_v23 = vsel %vm208_vm1, %v204_v14, %v212_v19  ;;  %vm209_vm3 = vcmp.ge.f32.partialorder %v205_v20, 0.0  ;;  %v213_v24 = vmul.f32 0.1, %v205_v20 }
 0x121   :  { %220 = vst [vmem:[%s402_s3] sm:$0xff] %v216_v23  ;;  %v219_v25 = vsel %vm211_vm2, %v207_v17, %v215_v22 }
 0x122   :  { %223 = vst [vmem:[%s402_s3 + $0x18] sm:$0xff] %v219_v25  ;;  %v217_v26 = vsel %vm209_vm3, %v205_v20, %v213_v24 }
 0x123   :  { %221 = vst [vmem:[%s402_s3 + $0x8] sm:$0xff] %v217_v26 }
 0x124   :  { %228 = vsyncpa [#allocation4], 1 }
 0x125   :  { %229 = vsyncpa [#allocation6], 1 }

// kernel: feat_extractor.12
= control target key start
LH: loop header
LB: loop body
LE: loop exit
PB: predicated region body
PF: predicated region fallthrough
CT: control target
= control target key end

     0   :  { %8 = vsyncpa [#allocation4], 0  ;;  %s1248_s0 = inlined_call_operand.vmem [shape: bf16[32,896], index: 0, kind: input, shape index: {}]   ;;  %s1249_s1 = inlined_call_operand.hbm [shape: bf16[896,128], index: 1, kind: input, shape index: {}]   ;;  %s1250_s2 = inlined_call_operand.hbm [shape: f32[1,128], index: 2, kind: input, shape index: {}]   ;;  %s1251_s3 = inlined_call_operand.vmem [shape: f32[32,128], index: 3, kind: output, shape index: {}]  }
   0x1   :  { %9 = vsyncpa [#allocation6], 0  ;;  %s1146_s12 = smov [#allocation3]   ;;  %s1098_s16 = scalar_lea.hbm %s1249_s1, 7168 }
   0x2   :  { %s17_s13 = sshll.u32 %s1146_s12, 4  ;;  %p1099_p0 = scmp.ne.s32.totalorder %s1249_s1, %s1098_s16  ;;  %s18_s13 = int_to_ptr.vmem [resolvable:$true] %s17_s13 }
   0x3   :  { %p1102_p1 = scmp.lt.u32.totalorder %s1098_s16, %s1249_s1 }
   0x5   :  { %p1104_p2 = pnand %p1102_p1, %p1099_p0 }
   0x7   :  { %1107 = shalt.err (!%p1104_p2)
}
   0x8   :  { %s1108_s21 = scalar_lea.vmem %s18_s13, 7168  ;;  %p1113_p4 = scmp.lt.s32.totalorder %s18_s13, %s18_s13 }
   0x9   :  { %p1109_p3 = scmp.ne.s32.totalorder %s18_s13, %s1108_s21  ;;  %p1114_p5 = scmp.lt.s32.totalorder %s1108_s21, %s1108_s21 }
   0xb   :  { %p1115_p6 = por %p1114_p5, %p1113_p4 }
   0xd   :  { %p1116_p7 = pnand %p1115_p6, %p1109_p3 }
   0xf   :  { %1119 = shalt.err (!%p1116_p7)
}
  0x10   :  { %s1147_s22 = smov 64   ;;  %s1148_s23 = smov 4  }
  0x11   :  { %23 = dma.hbm_to_vmem [thread:$0]  %s1249_s1, 7168, %s18_s13, [#allocation4], %s1147_s22, %s1147_s22, %s1148_s23  }
  0x12   :  { %s1149_s26 = smov [#allocation5]   ;;  %s1120_s30 = scalar_lea.hbm %s1250_s2, 16 }
  0x13   :  { %s30_s27 = sshll.u32 %s1149_s26, 4  ;;  %p1121_p8 = scmp.ne.s32.totalorder %s1250_s2, %s1120_s30  ;;  %s31_s27 = int_to_ptr.vmem [resolvable:$true] %s30_s27 }
  0x14   :  { %p1124_p9 = scmp.lt.u32.totalorder %s1120_s30, %s1250_s2 }
  0x16   :  { %p1126_p10 = pnand %p1124_p9, %p1121_p8 }
  0x18   :  { %1129 = shalt.err (!%p1126_p10)
}
  0x19   :  { %s1130_s8 = scalar_lea.vmem %s31_s27, 16  ;;  %s1134_s1 = scalar_lea.vmem %s31_s27, 32 }
  0x1a   :  { %p1131_p11 = scmp.ne.s32.totalorder %s31_s27, %s1130_s8  ;;  %p1135_p12 = scmp.lt.s32.totalorder %s31_s27, %s31_s27 }
  0x1b   :  { %p1136_p13 = scmp.lt.s32.totalorder %s1134_s1, %s1130_s8 }
  0x1d   :  { %p1137_p0 = por %p1136_p13, %p1135_p12 }
  0x1f   :  { %p1138_p1 = pnand %p1137_p0, %p1131_p11 }
  0x21   :  { %1141 = shalt.err (!%p1138_p1)
}
  0x22   :  { %33 = dma.hbm_to_vmem [thread:$0]  %s1250_s2, 16, %s31_s27, [#allocation6]  }
  0x23   :  { %1142 = dma.done.wait [#allocation4], 7168  }
  0x24   :  { %1143 = vsyncadd [#allocation4], 4294960128 }
  0x25   :  { %1144 = dma.done.wait [#allocation6], 16  }
  0x26   :  { %1145 = vsyncadd [#allocation6], 4294967280  ;;  %v1022_v0 = vld [vmem:[#allocation3 + $0x40] sm:$0xff]   ;;  %v1026_v4 = vld [vmem:[#allocation3 + $0x48] sm:$0xff]  }
  0x27   :  { %v1023_v1 = vld [vmem:[#allocation3 + $0xc0] sm:$0xff]   ;;  %904 = vmatprep.subr.bf16.mxu0 %v1022_v0  ;;  %v1027_v5 = vld [vmem:[#allocation3 + $0xc8] sm:$0xff]   ;;  %v1030_v8 = vld [vmem:[#allocation3 + $0x50] sm:$0xff]  }
  0x28   :  { %v1024_v2 = vld [vmem:[#allocation3] sm:$0xff]   ;;  %932 = vmatprep.subr.bf16.mxu1 %v1023_v1  ;;  %v1028_v6 = vld [vmem:[#allocation3 + $0x8] sm:$0xff]   ;;  %v1031_v9 = vld [vmem:[#allocation3 + $0xd0] sm:$0xff]  }
  0x29   :  { %v1025_v3 = vld [vmem:[#allocation3 + $0x80] sm:$0xff]   ;;  %905 = vmatpush3.bf16.msra.mxu0 %v1024_v2  ;;  %v1029_v7 = vld [vmem:[#allocation3 + $0x88] sm:$0xff]   ;;  %v1032_v10 = vld [vmem:[#allocation3 + $0x10] sm:$0xff]  }
  0x2a   :  { %933 = vmatpush3.bf16.msra.mxu1 %v1025_v3  ;;  %906 = vmatprep.subr.bf16.mxu0 %v1026_v4  ;;  %v1033_v11 = vld [vmem:[#allocation3 + $0x90] sm:$0xff]   ;;  %v1034_v12 = vld [vmem:[#allocation3 + $0x58] sm:$0xff]   ;;  %v1038_v16 = vld [vmem:[#allocation3 + $0x60] sm:$0xff]  }
  0x2b   :  { %934 = vmatprep.subr.bf16.mxu1 %v1027_v5  ;;  %v1035_v13 = vld [vmem:[#allocation3 + $0xd8] sm:$0xff]   ;;  %v1039_v17 = vld [vmem:[#allocation3 + $0xe0] sm:$0xff]   ;;  %v1042_v20 = vld [vmem:[#allocation3 + $0x68] sm:$0xff]  }
  0x2c   :  { %v1036_v14 = vld [vmem:[#allocation3 + $0x18] sm:$0xff]   ;;  %v1040_v18 = vld [vmem:[#allocation3 + $0x20] sm:$0xff]   ;;  %v1043_v21 = vld [vmem:[#allocation3 + $0xe8] sm:$0xff]  }
  0x2d   :  { %907 = vmatpush3.bf16.msra.mxu0 %v1028_v6  ;;  %v1037_v15 = vld [vmem:[#allocation3 + $0x98] sm:$0xff]   ;;  %v1041_v19 = vld [vmem:[#allocation3 + $0xa0] sm:$0xff]   ;;  %v1044_v22 = vld [vmem:[#allocation3 + $0x28] sm:$0xff]  }
  0x2e   :  { %935 = vmatpush3.bf16.msra.mxu1 %v1029_v7  ;;  %908 = vmatprep.subr.bf16.mxu0 %v1030_v8  ;;  %v1045_v23 = vld [vmem:[#allocation3 + $0xa8] sm:$0xff]   ;;  %v1046_v24 = vld [vmem:[#allocation3 + $0x70] sm:$0xff]   ;;  %v1050_v28 = vld [vmem:[#allocation3 + $0x78] sm:$0xff]  }
  0x2f   :  { %936 = vmatprep.subr.bf16.mxu1 %v1031_v9  ;;  %v1047_v25 = vld [vmem:[#allocation3 + $0xf0] sm:$0xff]   ;;  %v1051_v29 = vld [vmem:[#allocation3 + $0xf8] sm:$0xff]   ;;  %v1056_v33 = vld [vmem:[%s1248_s0 + $0x4] ss:$28 sps:$4 sm:$0xff]  }
  0x30   :  { %v1048_v26 = vld [vmem:[#allocation3 + $0x30] sm:$0xff]   ;;  %v1052_v30 = vld [vmem:[#allocation3 + $0x38] sm:$0xff]   ;;  %v1057_v34 = vld [vmem:[%s1248_s0 + $0x8] ss:$28 sps:$4 sm:$0xff]   ;;  %621 = vmatprep.mubr.bf16.mxu0 %v1056_v33 }
  0x31   :  { %909 = vmatpush3.bf16.msra.mxu0 %v1032_v10  ;;  %v1049_v27 = vld [vmem:[#allocation3 + $0xb0] sm:$0xff]   ;;  %v1053_v31 = vld [vmem:[#allocation3 + $0xb8] sm:$0xff]   ;;  %v1059_v35 = vld [vmem:[%s1248_s0 + $0xc] ss:$28 sps:$4 sm:$0xff]  }
  0x32   :  { %937 = vmatpush3.bf16.msra.mxu1 %v1033_v11  ;;  %910 = vmatprep.subr.bf16.mxu0 %v1034_v12  ;;  %v1054_v32 = vld [vmem:[%s1248_s0] ss:$28 sps:$4 sm:$0xff]   ;;  %v1062_v38 = vld [vmem:[#allocation3 + $0x148] sm:$0xff]   ;;  %v1065_v41 = vld [vmem:[#allocation3 + $0x150] sm:$0xff]  }
  0x33   :  { %938 = vmatprep.subr.bf16.mxu1 %v1035_v13  ;;  %v1060_v36 = vld [vmem:[#allocation3 + $0x140] sm:$0xff]   ;;  %670 = vmatprep.mubr.bf16.mxu1 %v1059_v35  ;;  %v1064_v40 = vld [vmem:[#allocation3 + $0x108] sm:$0xff]   ;;  %v1067_v43 = vld [vmem:[#allocation3 + $0x110] sm:$0xff]  }
  0x34   :  { %v1061_v37 = vld [vmem:[#allocation3 + $0x100] sm:$0xff]   ;;  %v1066_v42 = vld [vmem:[#allocation3 + $0x188] sm:$0xff]   ;;  %v1068_v44 = vld [vmem:[#allocation3 + $0x158] sm:$0xff]  }
  0x35   :  { %911 = vmatpush3.bf16.msra.mxu0 %v1036_v14  ;;  %v1063_v39 = vld [vmem:[#allocation3 + $0x180] sm:$0xff]   ;;  %v1069_v45 = vld [vmem:[#allocation3 + $0x190] sm:$0xff]   ;;  %v1070_v46 = vld [vmem:[#allocation3 + $0x118] sm:$0xff]  }
  0x36   :  { %939 = vmatpush3.bf16.msra.mxu1 %v1037_v15  ;;  %912 = vmatprep.subr.bf16.mxu0 %v1038_v16  ;;  %v1071_v47 = vld [vmem:[#allocation3 + $0x160] sm:$0xff]   ;;  %v1072_v48 = vld [vmem:[#allocation3 + $0x198] sm:$0xff]   ;;  %v1078_v52 = vld [vmem:[#allocation3 + $0x168] sm:$0xff]  }
  0x37   :  { %940 = vmatprep.subr.bf16.mxu1 %v1039_v17  ;;  %v1073_v49 = vld [vmem:[#allocation3 + $0x120] sm:$0xff]   ;;  %v1074_v50 = vld [vmem:[%s1248_s0 + $0x3c] ss:$28 sps:$4 sm:$0xff]   ;;  %v1082_v56 = vld [vmem:[#allocation3 + $0x128] sm:$0xff]  }
  0x38   :  { %v1076_v51 = vld [vmem:[%s1248_s0 + $0x44] ss:$28 sps:$4 sm:$0xff]   ;;  %v1080_v54 = vld [vmem:[%s1248_s0 + $0x38] ss:$28 sps:$4 sm:$0xff]   ;;  %v1084_v58 = vld [vmem:[#allocation3 + $0x1a8] sm:$0xff]  }
  0x39   :  { %913 = vmatpush3.bf16.msra.mxu0 %v1040_v18  ;;  %v1079_v53 = vld [vmem:[#allocation3 + $0x1a0] sm:$0xff]   ;;  %v1083_v57 = vld [vmem:[#allocation3 + $0x170] sm:$0xff]   ;;  %v1086_v60 = vld [vmem:[#allocation3 + $0x178] sm:$0xff]  }
  0x3a   :  { %941 = vmatpush3.bf16.msra.mxu1 %v1041_v19  ;;  %914 = vmatprep.subr.bf16.mxu0 %v1042_v20  ;;  %v1081_v55 = vld [vmem:[%s1248_s0 + $0x40] ss:$28 sps:$4 sm:$0xff]   ;;  %v1085_v59 = vld [vmem:[#allocation3 + $0x130] sm:$0xff]   ;;  %v1095_v3 = vld [vmem:[%s1248_s0 + $0x4c] ss:$28 sps:$4 sm:$0xff]  }
  0x3b   :  { %942 = vmatprep.subr.bf16.mxu1 %v1043_v21  ;;  %v1087_v61 = vld [vmem:[#allocation3 + $0x1b0] sm:$0xff]   ;;  %v1088_v62 = vld [vmem:[#allocation3 + $0x138] sm:$0xff]   ;;  %v1097_v5 = vld [vmem:[%s1248_s0 + $0x48] ss:$28 sps:$4 sm:$0xff]  }
  0x3c   :  { %v1091_v63 = vld [vmem:[%s1248_s0 + $0x14] ss:$28 sps:$4 sm:$0xff]   ;;  %v1092_v0 = vld [vmem:[#allocation3 + $0x1b8] sm:$0xff]  }
  0x3d   :  { %915 = vmatpush3.bf16.msra.mxu0 %v1044_v22  ;;  %v1093_v1 = vld [vmem:[%s1248_s0 + $0x18] ss:$28 sps:$4 sm:$0xff]   ;;  %v1089_v2 = vld [vmem:[%s1248_s0 + $0x10] ss:$28 sps:$4 sm:$0xff]  }
  0x3e   :  { %943 = vmatpush3.bf16.msra.mxu1 %v1045_v23  ;;  %916 = vmatprep.subr.bf16.mxu0 %v1046_v24  ;;  %v1094_v4 = vld [vmem:[%s1248_s0 + $0x50] ss:$28 sps:$4 sm:$0xff]  }
  0x3f   :  { %944 = vmatprep.subr.bf16.mxu1 %v1047_v25 }
  0x41   :  { %917 = vmatpush3.bf16.msra.mxu0 %v1048_v26 }
  0x42   :  { %945 = vmatpush3.bf16.msra.mxu1 %v1049_v27  ;;  %918 = vmatprep.subr.bf16.mxu0 %v1050_v28 }
  0x43   :  { %946 = vmatprep.subr.bf16.mxu1 %v1051_v29 }
  0x45   :  { %919 = vmatpush3.bf16.msra.mxu0 %v1052_v30 }
  0x46   :  { %947 = vmatpush3.bf16.msra.mxu1 %v1053_v31  ;;  %960 = vmatprep.subr.bf16.mxu0 %v1060_v36 }
  0x47   :  { %998 = vmatprep.subr.bf16.mxu1 %v1063_v39 }
  0x48   :  { %622 = vmatmul.mubr.bf16.vlgmr.msra.gmra.mrb[0].mxu0 %v1054_v32 }
  0x49   :  { %671 = vmatmul.mubr.bf16.vlgmr.msra.gmra.mrb[0].mxu1 %v1057_v34  ;;  %961 = vmatpush3.bf16.msra.mxu0 %v1061_v37 }
  0x4a   :  { %962 = vmatprep.subr.bf16.mxu0 %v1062_v38  ;;  %999 = vmatpush3.bf16.msra.mxu1 %v1063_v39 }
  0x4b   :  { %1000 = vmatprep.subr.bf16.mxu1 %v1066_v42  ;;  %629 = vmatprep.mubr.bf16.mxu0 %v1074_v50 }
  0x4c   :  { %678 = vmatprep.mubr.bf16.mxu1 %v1076_v51 }
  0x4d   :  { %963 = vmatpush3.bf16.msra.mxu0 %v1064_v40 }
  0x4e   :  { %964 = vmatprep.subr.bf16.mxu0 %v1065_v41  ;;  %1001 = vmatpush3.bf16.msra.mxu1 %v1066_v42 }
  0x4f   :  { %1002 = vmatprep.subr.bf16.mxu1 %v1069_v45 }
  0x50   :  { %630 = vmatmul.mubr.bf16.gmra.mrb[4].mxu0 %v1080_v54 }
  0x51   :  { %965 = vmatpush3.bf16.msra.mxu0 %v1067_v43  ;;  %679 = vmatmul.mubr.bf16.gmra.mrb[4].mxu1 %v1081_v55  ;;  %v903_v43 = vld [vmem:[#allocation5] ss:$0 sm:$0xff] }
  0x52   :  { %966 = vmatprep.subr.bf16.mxu0 %v1068_v44  ;;  %1003 = vmatpush3.bf16.msra.mxu1 %v1069_v45 }
  0x53   :  { %1004 = vmatprep.subr.bf16.mxu1 %v1072_v48  ;;  %719 = vmatprep.mubr.bf16.mxu0 %v1091_v63 }
  0x54   :  { %1014 = vmatprep.mubr.bf16.mxu1 %v1093_v1 }
  0x55   :  { %967 = vmatpush3.bf16.msra.mxu0 %v1070_v46 }
  0x56   :  { %968 = vmatprep.subr.bf16.mxu0 %v1071_v47  ;;  %1005 = vmatpush3.bf16.msra.mxu1 %v1072_v48 }
  0x57   :  { %1006 = vmatprep.subr.bf16.mxu1 %v1079_v53 }
  0x59   :  { %969 = vmatpush3.bf16.msra.mxu0 %v1073_v49 }
  0x5a   :  { %970 = vmatprep.subr.bf16.mxu0 %v1078_v52  ;;  %1007 = vmatpush3.bf16.msra.mxu1 %v1079_v53 }
  0x5b   :  { %1008 = vmatprep.subr.bf16.mxu1 %v1084_v58 }
  0x5d   :  { %971 = vmatpush3.bf16.msra.mxu0 %v1082_v56 }
  0x5e   :  { %972 = vmatprep.subr.bf16.mxu0 %v1083_v57  ;;  %1009 = vmatpush3.bf16.msra.mxu1 %v1084_v58 }
  0x5f   :  { %1010 = vmatprep.subr.bf16.mxu1 %v1087_v61 }
  0x61   :  { %973 = vmatpush3.bf16.msra.mxu0 %v1085_v59 }
  0x62   :  { %974 = vmatprep.subr.bf16.mxu0 %v1086_v60  ;;  %1011 = vmatpush3.bf16.msra.mxu1 %v1087_v61 }
  0x63   :  { %1012 = vmatprep.subr.bf16.mxu1 %v1092_v0 }
  0x65   :  { %975 = vmatpush3.bf16.msra.mxu0 %v1088_v62 }
  0x66   :  { %1013 = vmatpush3.bf16.msra.mxu1 %v1092_v0 }
  0x68   :  { %720 = vmatmul.mubr.bf16.vlgmr.msra.gmra.mrb[8].mxu0 %v1089_v2 }
  0x69   :  { %727 = vmatprep.mubr.bf16.mxu0 %v1095_v3  ;;  %1015 = vmatmul.mubr.bf16.vlgmr.msra.gmra.mrb[8].mxu1 %v1094_v4 }
  0x70   :  { %728 = vmatmul.mubr.bf16.gmra.mrb[12].mxu0 %v1097_v5 }
 0x11b   :  { %v920_v6 = vpop.f32.mrb[0].mxu0 }
 0x11c   :  { %v948_v7 = vpop.f32.mrb[0].mxu1  ;;  %v921_v8 = vpop.f32.mrb[1].mxu0 }
 0x11d   :  { %v922_v9 = vadd.f32 %v921_v8, %v920_v6  ;;  %v949_v10 = vpop.f32.mrb[1].mxu1  ;;  %v923_v11 = vpop.f32.mrb[2].mxu0 }
 0x11e   :  { %v950_v12 = vadd.f32 %v949_v10, %v948_v7  ;;  %v951_v13 = vpop.f32.mrb[2].mxu1  ;;  %v924_v14 = vpop.f32.mrb[3].mxu0 }
 0x11f   :  { %v925_v15 = vadd.f32 %v924_v14, %v923_v11  ;;  %v952_v16 = vpop.f32.mrb[3].mxu1 }
 0x120   :  { %v673_v17 = vadd.f32 %v950_v12, %v922_v9  ;;  %v953_v18 = vadd.f32 %v952_v16, %v951_v13 }
 0x122   :  { %v676_v19 = vadd.f32 %v953_v18, %v925_v15 }
 0x123   :  { %v926_v20 = vpop.f32.mrb[4].mxu0 }
 0x124   :  { %v954_v21 = vpop.f32.mrb[4].mxu1  ;;  %v927_v22 = vpop.f32.mrb[5].mxu0 }
 0x125   :  { %v928_v23 = vadd.f32 %v927_v22, %v926_v20  ;;  %v955_v24 = vpop.f32.mrb[5].mxu1  ;;  %v929_v25 = vpop.f32.mrb[6].mxu0 }
 0x126   :  { %v956_v26 = vadd.f32 %v955_v24, %v954_v21  ;;  %v957_v27 = vpop.f32.mrb[6].mxu1  ;;  %v930_v28 = vpop.f32.mrb[7].mxu0 }
 0x127   :  { %v931_v29 = vadd.f32 %v930_v28, %v929_v25  ;;  %v958_v30 = vpop.f32.mrb[7].mxu1 }
 0x128   :  { %v681_v31 = vadd.f32 %v956_v26, %v928_v23  ;;  %v959_v32 = vadd.f32 %v958_v30, %v957_v27 }
 0x12a   :  { %v684_v33 = vadd.f32 %v959_v32, %v931_v29 }
 0x13b   :  { %v976_v34 = vpop.f32.mrb[8].mxu0 }
 0x13c   :  { %v977_v35 = vpop.f32.mrb[9].mxu0  ;;  %v1016_v39 = vpop.f32.mrb[8].mxu1 }
 0x13d   :  { %v978_v36 = vadd.f32 %v977_v35, %v976_v34  ;;  %v979_v37 = vpop.f32.mrb[10].mxu0  ;;  %v770_v42 = vpop.f32.mrb[9].mxu1 }
 0x13e   :  { %v980_v38 = vpop.f32.mrb[11].mxu0  ;;  %v1017_v44 = vpop.f32.mrb[10].mxu1 }
 0x13f   :  { %v981_v40 = vadd.f32 %v980_v38, %v979_v37  ;;  %v722_v41 = vadd.f32 %v978_v36, %v673_v17  ;;  %v773_v47 = vpop.f32.mrb[11].mxu1 }
 0x141   :  { %v771_v45 = vadd.f32 %v770_v42, %v722_v41  ;;  %v725_v46 = vadd.f32 %v981_v40, %v676_v19 }
 0x143   :  { %v807_v48 = vadd.f32 %v903_v43, %v771_v45  ;;  %v774_v49 = vadd.f32 %v773_v47, %v725_v46  ;;  %v982_v50 = vpop.f32.mrb[12].mxu0 }
 0x144   :  { %v983_v51 = vpop.f32.mrb[13].mxu0 }
 0x145   :  { %vm811_vm0 = vcmp.ge.f32.partialorder %v807_v48, 0.0  ;;  %v815_v52 = vmul.f32 0.1, %v807_v48  ;;  %v808_v53 = vadd.f32 %v903_v43, %v774_v49  ;;  %v984_v54 = vadd.f32 %v983_v51, %v982_v50  ;;  %v985_v55 = vpop.f32.mrb[14].mxu0 }
 0x146   :  { %v986_v56 = vpop.f32.mrb[15].mxu0 }
 0x147   :  { %v819_v57 = vsel %vm811_vm0, %v807_v48, %v815_v52  ;;  %vm812_vm1 = vcmp.ge.f32.partialorder %v808_v53, 0.0  ;;  %v816_v58 = vmul.f32 0.1, %v808_v53  ;;  %v730_v59 = vadd.f32 %v984_v54, %v681_v31 }
 0x148   :  { %823 = vst [vmem:[%s1251_s3] sm:$0xff] %v819_v57  ;;  %v987_v60 = vadd.f32 %v986_v56, %v985_v55 }
 0x149   :  { %v820_v61 = vsel %vm812_vm1, %v808_v53, %v816_v58  ;;  %v779_v62 = vadd.f32 %v1016_v39, %v730_v59 }
 0x14a   :  { %824 = vst [vmem:[%s1251_s3 + $0x8] sm:$0xff] %v820_v61  ;;  %v733_v63 = vadd.f32 %v987_v60, %v684_v33 }
 0x14b   :  { %v809_v0 = vadd.f32 %v903_v43, %v779_v62 }
 0x14c   :  { %v782_v1 = vadd.f32 %v1017_v44, %v733_v63 }
 0x14d   :  { %vm813_vm2 = vcmp.ge.f32.partialorder %v809_v0, 0.0  ;;  %v817_v2 = vmul.f32 0.1, %v809_v0 }
 0x14e   :  { %v810_v3 = vadd.f32 %v903_v43, %v782_v1 }
 0x14f   :  { %v821_v4 = vsel %vm813_vm2, %v809_v0, %v817_v2 }
 0x150   :  { %825 = vst [vmem:[%s1251_s3 + $0x10] sm:$0xff] %v821_v4  ;;  %vm814_vm3 = vcmp.ge.f32.partialorder %v810_v3, 0.0  ;;  %v818_v5 = vmul.f32 0.1, %v810_v3 }
 0x152   :  { %v822_v6 = vsel %vm814_vm3, %v810_v3, %v818_v5 }
 0x153   :  { %826 = vst [vmem:[%s1251_s3 + $0x18] sm:$0xff] %v822_v6 }
 0x154   :  { %831 = vsyncpa [#allocation4], 1 }
 0x155   :  { %832 = vsyncpa [#allocation6], 1 }

// kernel: feat_extractor.13
= control target key start
LH: loop header
LB: loop body
LE: loop exit
PB: predicated region body
PF: predicated region fallthrough
CT: control target
= control target key end

     0   :  { %s975_s12 = smov 0   ;;  %s977_s13 = smov 0   ;;  %s1091_s0 = inlined_call_operand.vmem [shape: bf16[32,1152], index: 0, kind: input, shape index: {}]   ;;  %s1092_s1 = inlined_call_operand.vmem [shape: bf16[1152,128], index: 1, kind: input, shape index: {}]   ;;  %s1093_s2 = inlined_call_operand.vmem [shape: f32[1,128], index: 2, kind: input, shape index: {}]   ;;  %s1094_s3 = inlined_call_operand.vmem [shape: f32[32,128], index: 3, kind: output, shape index: {}]  }
   0x1   :  { %s979_s14 = smov 0   ;;  %s981_s15 = smov 0  }
   0x2   :  { %s983_s16 = smov 0  }
   0x3 LB: > { %s22_s17 = sadd.s32 1, %s948_s15  ;;  %p41_p1 = scmp.ne.s32.totalorder %s940_s13, %s936_s12  ;;  %s952_s16 = sphi %s983_s16, %s13_s16   ;;  %s948_s15 = sphi %s981_s15, %s1098_s15   ;;  %s944_s14 = sphi %s979_s14, %s1097_s14   ;;  %s940_s13 = sphi %s977_s13, %s1096_s13   ;;  %s936_s12 = sphi %s975_s12, %s1095_s12  }
   0x4   : > { %p23_p0 = scmp.ge.s32.totalorder %s22_s17, 3  ;;  %p42_p2 = scmp.eq.s32.totalorder %s952_s16, 0 }
   0x5   : > { %s34_s19 = sadd.s32 1, %s940_s13  ;;  %p731_p5 = scmp.ge.s32.totalorder %s952_s16, 3 }
   0x6   : > { %s1100_s17 = smov (%p23_p0, %s22_s17), 0  ;;  %p43_p3 = por %p42_p2, %p41_p1 }
   0x7   : > { %s30_s18 = ssub.s32 %s948_s15, %s1100_s17  ;;  %143 = sbr.rel (%p731_p5) target bundleno = 23 (0x17), region = 20 }
   0x8   : > { %p32_p4 = scmp.eq.s32.totalorder %s30_s18, 0 }
   0xa   : > { %s1010_s20 = scalar_select %p32_p4, %s940_s13, %s34_s19  }
   0xe   : > { %146 = sbr.rel (!%p43_p3) target bundleno = 23 (0x17), region = 24  ;;  %s148_s21 = sand.u32 (%p43_p3), 1, %s940_s13  }
   0xf   : > { %s780_s22 = smul.u32 (%p43_p3), 12, %s948_s15 }
  0x10   : > { %s839_s23 = smul.u32 (%p43_p3), 48, %s148_s21 }
  0x11   : > { %s156_s26 = scalar_lea.vmem (%p43_p3), %s1091_s0, %s780_s22 }
  0x12   : > { %v171_v0 = vld [vmem:[%s156_s26] sm:$0xff] (%p43_p3)  ;;  %v175_v2 = vld [vmem:[%s156_s26 + $0x48] sm:$0xff] (%p43_p3)  ;;  %s150_s27 = scalar_lea.vmem (%p43_p3), [#allocation3], %s839_s23  ;;  %v737_v6 = vld [vmem:[%s156_s26 + $0x50] sm:$0xf] (%p43_p3) }
  0x13   : > { %v173_v1 = vld [vmem:[%s156_s26 + $0x24] sm:$0xff] (%p43_p3)  ;;  %172 = vst [vmem:[%s150_s27] sm:$0xff] (%p43_p3), %v171_v0  ;;  %176 = vst [vmem:[%s150_s27 + $0x18] sm:$0xff] (%p43_p3), %v175_v2  ;;  %v177_v3 = vld [vmem:[%s156_s26 + $0x6c] sm:$0xff] (%p43_p3) }
  0x14   : > { %174 = vst [vmem:[%s150_s27 + $0xc] sm:$0xff] (%p43_p3), %v173_v1  ;;  %v733_v4 = vld [vmem:[%s156_s26 + $0x8] sm:$0xf] (%p43_p3)  ;;  %v735_v5 = vld [vmem:[%s156_s26 + $0x2c] sm:$0xf] (%p43_p3)  ;;  %178 = vst [vmem:[%s150_s27 + $0x24] sm:$0xff] (%p43_p3), %v177_v3 }
  0x15   : > { %734 = vst [vmem:[%s150_s27 + $0x8] sm:$0xf] %v733_v4  ;;  %736 = vst [vmem:[%s150_s27 + $0x14] sm:$0xf] %v735_v5  ;;  %v739_v7 = vld [vmem:[%s156_s26 + $0x74] sm:$0xf] }
  0x16   : > { %738 = vst [vmem:[%s150_s27 + $0x20] sm:$0xf] %v737_v6  ;;  %740 = vst [vmem:[%s150_s27 + $0x2c] sm:$0xf] %v739_v7 }
  0x17 PF: > { %p741_p6 = scmp.ge.s32.totalorder %s952_s16, 1  ;;  %p207_p7 = scmp.lt.s32.totalorder %s952_s16, 4 }
  0x19   : > { %p208_p8 = pnand %p741_p6, %p207_p7 }
  0x1a   : > { %s214_s28 = sand.u32 (!%p208_p8), 1, %s936_s12   ;;  %s244_s29 = smul.u32 (!%p208_p8), 48, %s944_s14 }
  0x1b   : > { %211 = sbr.rel (%p208_p8) target bundleno = 317 (0x13d), region = 54  ;;  %p743_p10 = scmp.ne.s32.totalorder (!%p208_p8), %s944_s14, 0 }
  0x1c   : > { %s840_s30 = smul.u32 (!%p208_p8), 48, %s214_s28  ;;  %p245_p9 = scmp.lt.s32.totalorder (!%p208_p8), %s244_s29, 143 }
  0x1e   : > { %s1027_s8 = scalar_lea.vmem (!%p208_p8), [#allocation3], %s840_s30 }
  0x22   : > { %s1102_s29 = smov (!%p245_p9, %s244_s29), 143  ;;  %260 = sbr.rel (%p743_p10) target bundleno = 41 (0x29), region = 62 }
  0x23   : > { %s742_s4 = sshll.u32 %s1102_s29, 2  ;;  %v954_v8 = vmov (!%p743_p10), 0.0  }
  0x24   : > { %s1025_s7 = scalar_lea.vmem %s1092_s1, %s742_s4  ;;  %261 = vst [vmem:[#allocation2] sm:$0xff] (!%p743_p10), %v954_v8  ;;  %262 = vst [vmem:[#allocation2 + $0x8] sm:$0xff] (!%p743_p10), %v954_v8 }
  0x25   : > { %263 = vst [vmem:[#allocation2 + $0x10] sm:$0xff] (!%p743_p10), %v954_v8  ;;  %264 = vst [vmem:[#allocation2 + $0x18] sm:$0xff] (!%p743_p10), %v954_v8 }
  0x29 PF: > { %v882_v9 = vld [vmem:[%s1025_s7 + $0x40] sm:$0xff]   ;;  %v885_v12 = vld [vmem:[%s1025_s7 + $0x48] sm:$0xff]   ;;  %v888_v15 = vld [vmem:[%s1025_s7 + $0x50] sm:$0xff]   ;;  %p774_p11 = scmp.ne.s32.totalorder %s944_s14, 2 }
  0x2a   : > { %v883_v10 = vld [vmem:[%s1025_s7] sm:$0xff]   ;;  %781 = vmatprep.subr.bf16.mxu0 %v882_v9  ;;  %v886_v13 = vld [vmem:[%s1025_s7 + $0x8] sm:$0xff]   ;;  %v889_v16 = vld [vmem:[%s1025_s7 + $0x10] sm:$0xff]  }
  0x2b   : > { %v884_v11 = vld [vmem:[%s1025_s7 + $0x80] sm:$0xff]   ;;  %782 = vmatpush3.bf16.msra.mxu0 %v883_v10  ;;  %v887_v14 = vld [vmem:[%s1025_s7 + $0x88] sm:$0xff]   ;;  %v890_v17 = vld [vmem:[%s1025_s7 + $0x90] sm:$0xff]  }
  0x2c   : > { %819 = vmatprep.subr.bf16.mxu1 %v884_v11  ;;  %783 = vmatprep.subr.bf16.mxu0 %v885_v12  ;;  %v891_v18 = vld [vmem:[%s1025_s7 + $0x58] sm:$0xff]   ;;  %v894_v21 = vld [vmem:[%s1025_s7 + $0x60] sm:$0xff]   ;;  %v897_v24 = vld [vmem:[%s1025_s7 + $0x68] sm:$0xff]  }
  0x2d   : > { %820 = vmatpush3.bf16.msra.mxu1 %v884_v11  ;;  %v892_v19 = vld [vmem:[%s1025_s7 + $0x18] sm:$0xff]   ;;  %v896_v22 = vld [vmem:[%s1025_s7 + $0xa0] sm:$0xff]   ;;  %v899_v25 = vld [vmem:[%s1025_s7 + $0xa8] sm:$0xff]  }
  0x2e   : > { %821 = vmatprep.subr.bf16.mxu1 %v887_v14  ;;  %v893_v20 = vld [vmem:[%s1025_s7 + $0x98] sm:$0xff]   ;;  %v895_v23 = vld [vmem:[%s1025_s7 + $0x20] sm:$0xff]   ;;  %v898_v26 = vld [vmem:[%s1025_s7 + $0x28] sm:$0xff]  }
  0x2f   : > { %784 = vmatpush3.bf16.msra.mxu0 %v886_v13  ;;  %v900_v27 = vld [vmem:[%s1025_s7 + $0x70] sm:$0xff]   ;;  %v903_v30 = vld [vmem:[%s1025_s7 + $0x78] sm:$0xff]   ;;  %v265_v45 = vld [vmem:[#allocation2] sm:$0xff] }
  0x30   : > { %785 = vmatprep.subr.bf16.mxu0 %v888_v15  ;;  %v901_v28 = vld [vmem:[%s1025_s7 + $0x30] sm:$0xff]   ;;  %v905_v31 = vld [vmem:[%s1025_s7 + $0xb8] sm:$0xff]   ;;  %v266_v50 = vld [vmem:[#allocation2 + $0x8] sm:$0xff] }
  0x31   : > { %822 = vmatpush3.bf16.msra.mxu1 %v887_v14  ;;  %v902_v29 = vld [vmem:[%s1025_s7 + $0xb0] sm:$0xff]   ;;  %v904_v34 = vld [vmem:[%s1025_s7 + $0x38] sm:$0xff]   ;;  %v775_v4 = vld [vmem:[%s1093_s2] ss:$0 sm:$0xff] (!%p774_p11) }
  0x32   : > { %823 = vmatprep.subr.bf16.mxu1 %v890_v17  ;;  %v908_v32 = vld [vmem:[%s1027_s8 + $0x4] ss:$12 sps:$4 sm:$0xff]   ;;  %v909_v33 = vld [vmem:[%s1027_s8 + $0x8] ss:$12 sps:$4 sm:$0xff]   ;;  %v906_v35 = vld [vmem:[%s1027_s8] ss:$12 sps:$4 sm:$0xff]  }
  0x33   : > { %786 = vmatpush3.bf16.msra.mxu0 %v889_v16  ;;  %533 = vmatprep.mubr.bf16.mxu0 %v908_v32  ;;  %v911_v36 = vld [vmem:[%s1027_s8 + $0x1c] ss:$12 sps:$4 sm:$0xff]   ;;  %v910_v37 = vld [vmem:[%s1027_s8 + $0x20] ss:$12 sps:$4 sm:$0xff]   ;;  %v913_v38 = vld [vmem:[%s1027_s8 + $0x18] ss:$12 sps:$4 sm:$0xff]  }
  0x34   : > { %787 = vmatprep.subr.bf16.mxu0 %v891_v18  ;;  %835 = vmatprep.mubr.bf16.mxu1 %v909_v33  ;;  %v267_v59 = vld [vmem:[#allocation2 + $0x10] sm:$0xff]  ;;  %v268_v63 = vld [vmem:[#allocation2 + $0x18] sm:$0xff] }
  0x35   : > { %824 = vmatpush3.bf16.msra.mxu1 %v890_v17 }
  0x36   : > { %825 = vmatprep.subr.bf16.mxu1 %v893_v20 }
  0x37   : > { %788 = vmatpush3.bf16.msra.mxu0 %v892_v19 }
  0x38   : > { %789 = vmatprep.subr.bf16.mxu0 %v894_v21 }
  0x39   : > { %826 = vmatpush3.bf16.msra.mxu1 %v893_v20 }
  0x3a   : > { %827 = vmatprep.subr.bf16.mxu1 %v896_v22 }
  0x3b   : > { %790 = vmatpush3.bf16.msra.mxu0 %v895_v23 }
  0x3c   : > { %791 = vmatprep.subr.bf16.mxu0 %v897_v24 }
  0x3d   : > { %828 = vmatpush3.bf16.msra.mxu1 %v896_v22 }
  0x3e   : > { %829 = vmatprep.subr.bf16.mxu1 %v899_v25 }
  0x3f   : > { %792 = vmatpush3.bf16.msra.mxu0 %v898_v26 }
  0x40   : > { %793 = vmatprep.subr.bf16.mxu0 %v900_v27 }
  0x41   : > { %830 = vmatpush3.bf16.msra.mxu1 %v899_v25 }
  0x42   : > { %831 = vmatprep.subr.bf16.mxu1 %v902_v29 }
  0x43   : > { %794 = vmatpush3.bf16.msra.mxu0 %v901_v28 }
  0x44   : > { %795 = vmatprep.subr.bf16.mxu0 %v903_v30 }
  0x45   : > { %832 = vmatpush3.bf16.msra.mxu1 %v902_v29 }
  0x46   : > { %833 = vmatprep.subr.bf16.mxu1 %v905_v31 }
  0x47   : > { %796 = vmatpush3.bf16.msra.mxu0 %v904_v34 }
  0x49   : > { %834 = vmatpush3.bf16.msra.mxu1 %v905_v31 }
  0x4a   : > { %534 = vmatmul.mubr.bf16.vlgmr.msra.gmra.mrb[0].mxu0 %v906_v35 }
  0x4b   : > { %541 = vmatprep.mubr.bf16.mxu0 %v911_v36 }
  0x4c   : > { %836 = vmatmul.mubr.bf16.vlgmr.msra.gmra.mrb[0].mxu1 %v910_v37 }
  0x52   : > { %542 = vmatmul.mubr.bf16.gmra.mrb[4].mxu0 %v913_v38 }
 0x11d   : > { %v797_v39 = vpop.f32.mrb[0].mxu0 }
 0x11e   : > { %v798_v40 = vpop.f32.mrb[1].mxu0 }
 0x11f   : > { %v799_v41 = vadd.f32 %v798_v40, %v797_v39  ;;  %v800_v42 = vpop.f32.mrb[2].mxu0  ;;  %v837_v43 = vpop.f32.mrb[0].mxu1 }
 0x120   : > { %v801_v44 = vpop.f32.mrb[3].mxu0  ;;  %v584_v46 = vpop.f32.mrb[1].mxu1 }
 0x121   : > { %v802_v47 = vadd.f32 %v801_v44, %v800_v42  ;;  %v585_v48 = vadd.f32 %v799_v41, %v584_v46  ;;  %v838_v49 = vpop.f32.mrb[2].mxu1 }
 0x122   : > { %v587_v51 = vpop.f32.mrb[3].mxu1 }
 0x123   : > { %v599_v52 = vadd.f32 %v585_v48, %v265_v45  ;;  %v588_v53 = vadd.f32 %v802_v47, %v587_v51 }
 0x125   : > { %603 = vst [vmem:[#allocation2] sm:$0xff] %v599_v52  ;;  %v600_v54 = vadd.f32 %v588_v53, %v266_v50  ;;  %v803_v55 = vpop.f32.mrb[4].mxu0 }
 0x126   : > { %v804_v56 = vpop.f32.mrb[5].mxu0 }
 0x127   : > { %604 = vst [vmem:[#allocation2 + $0x8] sm:$0xff] %v600_v54  ;;  %v805_v57 = vadd.f32 %v804_v56, %v803_v55  ;;  %v806_v58 = vpop.f32.mrb[6].mxu0 }
 0x128   : > { %v807_v60 = vpop.f32.mrb[7].mxu0 }
 0x129   : > { %v593_v61 = vadd.f32 %v837_v43, %v805_v57  ;;  %v808_v62 = vadd.f32 %v807_v60, %v806_v58  ;;  %610 = sbr.rel (%p774_p11) target bundleno = 317 (0x13d), region = 66 }
 0x12b   : > { %v601_v0 = vadd.f32 %v593_v61, %v267_v59  ;;  %v596_v1 = vadd.f32 %v838_v49, %v808_v62 }
 0x12c   : > { %v611_v3 = vld [vmem:[#allocation2] sm:$0xff] (!%p774_p11) }
 0x12d   : > { %605 = vst [vmem:[#allocation2 + $0x10] sm:$0xff] %v601_v0  ;;  %v602_v2 = vadd.f32 %v596_v1, %v268_v63  ;;  %v622_v6 = vadd.f32 (!%p774_p11), %v775_v4, %v611_v3 }
 0x12e   : > { %v612_v5 = vld [vmem:[#allocation2 + $0x8] sm:$0xff] (!%p774_p11) }
 0x12f   : > { %606 = vst [vmem:[#allocation2 + $0x18] sm:$0xff] %v602_v2  ;;  %v623_v7 = vadd.f32 (!%p774_p11), %v775_v4, %v612_v5  ;;  %vm626_vm0 = vcmp.ge.f32.partialorder (!%p774_p11), %v622_v6, 0.0  ;;  %v630_v12 = vmul.f32 (!%p774_p11), 0.1, %v622_v6 }
 0x131   : > { %vm627_vm1 = vcmp.ge.f32.partialorder %v623_v7, 0.0  ;;  %v631_v13 = vmul.f32 0.1, %v623_v7  ;;  %v634_v16 = vsel %vm626_vm0, %v622_v6, %v630_v12 }
 0x132   : > { %638 = vst [vmem:[%s1094_s3] sm:$0xff] %v634_v16 }
 0x133   : > { %v635_v17 = vsel %vm627_vm1, %v623_v7, %v631_v13 }
 0x134   : > { %v613_v8 = vld [vmem:[#allocation2 + $0x10] sm:$0xff]  ;;  %639 = vst [vmem:[%s1094_s3 + $0x8] sm:$0xff] %v635_v17 }
 0x135   : > { %v624_v10 = vadd.f32 %v775_v4, %v613_v8 }
 0x136   : > { %v614_v9 = vld [vmem:[#allocation2 + $0x18] sm:$0xff] }
 0x137   : > { %v625_v11 = vadd.f32 %v775_v4, %v614_v9  ;;  %vm628_vm2 = vcmp.ge.f32.partialorder %v624_v10, 0.0  ;;  %v632_v14 = vmul.f32 0.1, %v624_v10 }
 0x139   : > { %vm629_vm3 = vcmp.ge.f32.partialorder %v625_v11, 0.0  ;;  %v633_v15 = vmul.f32 0.1, %v625_v11  ;;  %v636_v18 = vsel %vm628_vm2, %v624_v10, %v632_v14 }
 0x13a   : > { %640 = vst [vmem:[%s1094_s3 + $0x10] sm:$0xff] %v636_v18 }
 0x13b   : > { %v637_v19 = vsel %vm629_vm3, %v625_v11, %v633_v15 }
 0x13c   : > { %641 = vst [vmem:[%s1094_s3 + $0x18] sm:$0xff] %v637_v19 }
 0x13d PF: > { %s13_s16 = sadd.s32 1, %s952_s16   ;;  %s1095_s12 = smov %s940_s13 }
 0x13e   : > { %p10_p12 = scmp.ge.s32.totalorder %s13_s16, 5   ;;  %s1096_s13 = smov %s1010_s20 }
 0x13f   : > { %s1097_s14 = smov %s948_s15  ;;  %s1098_s15 = smov %s1100_s17 }
 0x140   :  { %12 = sbr.rel (!%p10_p12) target bundleno = 3 (0x3), region = 110 }

// kernel: feat_extractor.16
= control target key start
LH: loop header
LB: loop body
LE: loop exit
PB: predicated region body
PF: predicated region fallthrough
CT: control target
= control target key end

     0   :  { %v332_v36 = vlaneseq  ;;  %s663_s1 = inlined_call_operand.vmem [shape: bf16[256,256], index: 1, kind: input, shape index: {}]   ;;  %s664_s0 = inlined_call_operand.vmem [shape: bf16[32,256], index: 0, kind: input, shape index: {}]   ;;  %s665_s2 = inlined_call_operand.vmem [shape: f32[1,256], index: 2, kind: input, shape index: {}]   ;;  %s666_s3 = inlined_call_operand.vmem [shape: f32[32,256], index: 3, kind: output, shape index: {}]  }
   0x1   :  { %v454_v0 = vld [vmem:[%s663_s1 + $0x4] ss:$8 sps:$4 sm:$0xff]   ;;  %v456_v1 = vld [vmem:[%s663_s1] ss:$8 sps:$4 sm:$0xff]   ;;  %v457_v2 = vld [vmem:[%s663_s1 + $0x14] ss:$8 sps:$4 sm:$0xff]  }
   0x2   :  { %250 = vmatprep.subr.bf16.mxu0 %v454_v0  ;;  %422 = vmatprep.subr.bf16.mxu1 %v454_v0  ;;  %v459_v3 = vld [vmem:[%s663_s1 + $0x10] ss:$8 sps:$4 sm:$0xff]   ;;  %v460_v4 = vld [vmem:[%s663_s1 + $0x24] ss:$8 sps:$4 sm:$0xff]   ;;  %v462_v5 = vld [vmem:[%s663_s1 + $0x20] ss:$8 sps:$4 sm:$0xff]  }
   0x3   :  { %251 = vmatpush1.bf16.msra.mxu0 %v456_v1  ;;  %438 = vmatpush1.bf16.msra.mxu1 %v456_v1  ;;  %v463_v6 = vld [vmem:[%s663_s1 + $0x34] ss:$8 sps:$4 sm:$0xff]   ;;  %v465_v7 = vld [vmem:[%s663_s1 + $0x30] ss:$8 sps:$4 sm:$0xff]   ;;  %v466_v8 = vld [vmem:[%s663_s1 + $0x44] ss:$8 sps:$4 sm:$0xff]  }
   0x4   :  { %252 = vmatprep.subr.bf16.mxu0 %v457_v2  ;;  %423 = vmatprep.subr.bf16.mxu1 %v457_v2  ;;  %v468_v9 = vld [vmem:[%s663_s1 + $0x40] ss:$8 sps:$4 sm:$0xff]   ;;  %v469_v10 = vld [vmem:[%s663_s1 + $0x54] ss:$8 sps:$4 sm:$0xff]   ;;  %v471_v11 = vld [vmem:[%s663_s1 + $0x50] ss:$8 sps:$4 sm:$0xff]  }
   0x5   :  { %v472_v12 = vld [vmem:[%s663_s1 + $0x64] ss:$8 sps:$4 sm:$0xff]   ;;  %v474_v14 = vld [vmem:[%s663_s1 + $0x60] ss:$8 sps:$4 sm:$0xff]   ;;  %v507_v15 = vld [vmem:[%s664_s0 + $0x14] ss:$8 sps:$4 sm:$0xff]  }
   0x6   :  { %v504_v13 = vld [vmem:[%s664_s0 + $0x4] ss:$8 sps:$4 sm:$0xff]   ;;  %v475_v16 = vld [vmem:[%s663_s1 + $0x74] ss:$8 sps:$4 sm:$0xff]   ;;  %292 = vmatprep.mubr.bf16.mxu1 %v507_v15  ;;  %v477_v17 = vld [vmem:[%s663_s1 + $0x70] ss:$8 sps:$4 sm:$0xff]  }
   0x7   :  { %253 = vmatpush1.bf16.msra.mxu0 %v459_v3  ;;  %439 = vmatpush1.bf16.msra.mxu1 %v459_v3  ;;  %v478_v18 = vld [vmem:[%s663_s1 + $0x84] ss:$8 sps:$4 sm:$0xff]   ;;  %v480_v19 = vld [vmem:[%s663_s1 + $0x80] ss:$8 sps:$4 sm:$0xff]   ;;  %v481_v20 = vld [vmem:[%s663_s1 + $0x94] ss:$8 sps:$4 sm:$0xff]  }
   0x8   :  { %254 = vmatprep.subr.bf16.mxu0 %v460_v4  ;;  %424 = vmatprep.subr.bf16.mxu1 %v460_v4  ;;  %v483_v21 = vld [vmem:[%s663_s1 + $0x90] ss:$8 sps:$4 sm:$0xff]   ;;  %v484_v22 = vld [vmem:[%s663_s1 + $0xa4] ss:$8 sps:$4 sm:$0xff]   ;;  %v486_v23 = vld [vmem:[%s663_s1 + $0xa0] ss:$8 sps:$4 sm:$0xff]  }
   0x9   :  { %282 = vmatprep.mubr.bf16.mxu0 %v504_v13  ;;  %v487_v24 = vld [vmem:[%s663_s1 + $0xb4] ss:$8 sps:$4 sm:$0xff]   ;;  %v489_v25 = vld [vmem:[%s663_s1 + $0xb0] ss:$8 sps:$4 sm:$0xff]   ;;  %v490_v26 = vld [vmem:[%s663_s1 + $0xc4] ss:$8 sps:$4 sm:$0xff]  }
   0xa   :  { %v492_v27 = vld [vmem:[%s663_s1 + $0xc0] ss:$8 sps:$4 sm:$0xff]   ;;  %v493_v28 = vld [vmem:[%s663_s1 + $0xd4] ss:$8 sps:$4 sm:$0xff]   ;;  %v495_v29 = vld [vmem:[%s663_s1 + $0xd0] ss:$8 sps:$4 sm:$0xff]  }
   0xb   :  { %255 = vmatpush1.bf16.msra.mxu0 %v462_v5  ;;  %440 = vmatpush1.bf16.msra.mxu1 %v462_v5  ;;  %v496_v30 = vld [vmem:[%s663_s1 + $0xe4] ss:$8 sps:$4 sm:$0xff]   ;;  %v498_v31 = vld [vmem:[%s663_s1 + $0xe0] ss:$8 sps:$4 sm:$0xff]   ;;  %v499_v32 = vld [vmem:[%s663_s1 + $0xf4] ss:$8 sps:$4 sm:$0xff]  }
   0xc   :  { %256 = vmatprep.subr.bf16.mxu0 %v463_v6  ;;  %425 = vmatprep.subr.bf16.mxu1 %v463_v6  ;;  %v501_v33 = vld [vmem:[%s663_s1 + $0xf0] ss:$8 sps:$4 sm:$0xff]   ;;  %v502_v34 = vld [vmem:[%s664_s0] ss:$8 sps:$4 sm:$0xff]   ;;  %v333_v37 = vshrl.u32 %v332_v36, 7 }
   0xd   :  { %v505_v35 = vld [vmem:[%s664_s0 + $0x10] ss:$8 sps:$4 sm:$0xff]   ;;  %v330_v39 = vld [vmem:[%s665_s2] sm:$0x3] }
   0xe   :  { %v334_v38 = vsub.s32 0, %v333_v37  ;;  %v338_v40 = vsub.s32 1, %v333_v37 }
   0xf   :  { %257 = vmatpush1.bf16.msra.mxu0 %v465_v7  ;;  %441 = vmatpush1.bf16.msra.mxu1 %v465_v7 }
  0x10   :  { %258 = vmatprep.subr.bf16.mxu0 %v466_v8  ;;  %426 = vmatprep.subr.bf16.mxu1 %v466_v8  ;;  %v335_v41 = vrot.slane %v330_v39, %v334_v38  ;;  %v339_v42 = vrot.slane %v330_v39, %v338_v40 }
  0x13   :  { %259 = vmatpush1.bf16.msra.mxu0 %v468_v9  ;;  %442 = vmatpush1.bf16.msra.mxu1 %v468_v9 }
  0x14   :  { %260 = vmatprep.subr.bf16.mxu0 %v469_v10  ;;  %427 = vmatprep.subr.bf16.mxu1 %v469_v10 }
  0x17   :  { %261 = vmatpush1.bf16.msra.mxu0 %v471_v11  ;;  %443 = vmatpush1.bf16.msra.mxu1 %v471_v11 }
  0x18   :  { %262 = vmatprep.subr.bf16.mxu0 %v472_v12  ;;  %428 = vmatprep.subr.bf16.mxu1 %v472_v12 }
  0x1b   :  { %263 = vmatpush1.bf16.msra.mxu0 %v474_v14  ;;  %444 = vmatpush1.bf16.msra.mxu1 %v474_v14 }
  0x1c   :  { %264 = vmatprep.subr.bf16.mxu0 %v475_v16  ;;  %429 = vmatprep.subr.bf16.mxu1 %v475_v16 }
  0x1f   :  { %265 = vmatpush1.bf16.msra.mxu0 %v477_v17  ;;  %445 = vmatpush1.bf16.msra.mxu1 %v477_v17 }
  0x20   :  { %266 = vmatprep.subr.bf16.mxu0 %v478_v18  ;;  %430 = vmatprep.subr.bf16.mxu1 %v478_v18 }
  0x23   :  { %267 = vmatpush1.bf16.msra.mxu0 %v480_v19  ;;  %446 = vmatpush1.bf16.msra.mxu1 %v480_v19 }
  0x24   :  { %268 = vmatprep.subr.bf16.mxu0 %v481_v20  ;;  %431 = vmatprep.subr.bf16.mxu1 %v481_v20 }
  0x27   :  { %269 = vmatpush1.bf16.msra.mxu0 %v483_v21  ;;  %447 = vmatpush1.bf16.msra.mxu1 %v483_v21 }
  0x28   :  { %270 = vmatprep.subr.bf16.mxu0 %v484_v22  ;;  %432 = vmatprep.subr.bf16.mxu1 %v484_v22 }
  0x2b   :  { %271 = vmatpush1.bf16.msra.mxu0 %v486_v23  ;;  %448 = vmatpush1.bf16.msra.mxu1 %v486_v23 }
  0x2c   :  { %272 = vmatprep.subr.bf16.mxu0 %v487_v24  ;;  %433 = vmatprep.subr.bf16.mxu1 %v487_v24 }
  0x2f   :  { %273 = vmatpush1.bf16.msra.mxu0 %v489_v25  ;;  %449 = vmatpush1.bf16.msra.mxu1 %v489_v25 }
  0x30   :  { %274 = vmatprep.subr.bf16.mxu0 %v490_v26  ;;  %434 = vmatprep.subr.bf16.mxu1 %v490_v26 }
  0x33   :  { %275 = vmatpush1.bf16.msra.mxu0 %v492_v27  ;;  %450 = vmatpush1.bf16.msra.mxu1 %v492_v27 }
  0x34   :  { %276 = vmatprep.subr.bf16.mxu0 %v493_v28  ;;  %435 = vmatprep.subr.bf16.mxu1 %v493_v28 }
  0x37   :  { %277 = vmatpush1.bf16.msra.mxu0 %v495_v29  ;;  %451 = vmatpush1.bf16.msra.mxu1 %v495_v29 }
  0x38   :  { %278 = vmatprep.subr.bf16.mxu0 %v496_v30  ;;  %436 = vmatprep.subr.bf16.mxu1 %v496_v30 }
  0x3b   :  { %279 = vmatpush1.bf16.msra.mxu0 %v498_v31  ;;  %452 = vmatpush1.bf16.msra.mxu1 %v498_v31 }
  0x3c   :  { %280 = vmatprep.subr.bf16.mxu0 %v499_v32  ;;  %437 = vmatprep.subr.bf16.mxu1 %v499_v32 }
  0x3f   :  { %281 = vmatpush1.bf16.msra.mxu0 %v501_v33  ;;  %453 = vmatpush1.bf16.msra.mxu1 %v501_v33 }
  0x42   :  { %283 = vmatmul.mubr.bf16.vlgmr.msra.gmra.mrb[0].mxu0 %v502_v34  ;;  %293 = vmatmul.mubr.bf16.vlgmr.msra.gmra.mrb[0].mxu1 %v505_v35 }
 0x115   :  { %v284_v43 = vpop.f32.mrb[0].mxu0  ;;  %v294_v44 = vpop.f32.mrb[0].mxu1 }
 0x116   :  { %v342_v45 = vadd.f32 %v335_v41, %v284_v43  ;;  %v346_v46 = vadd.f32 %v335_v41, %v294_v44  ;;  %v286_v47 = vpop.f32.mrb[1].mxu0  ;;  %v296_v48 = vpop.f32.mrb[1].mxu1 }
 0x117   :  { %v343_v49 = vadd.f32 %v339_v42, %v286_v47  ;;  %v347_v50 = vadd.f32 %v339_v42, %v296_v48  ;;  %v288_v51 = vpop.f32.mrb[2].mxu0  ;;  %v298_v52 = vpop.f32.mrb[2].mxu1 }
 0x118   :  { %vm350_vm0 = vcmp.ge.f32.partialorder %v342_v45, 0.0  ;;  %v358_v53 = vmul.f32 0.1, %v342_v45  ;;  %vm354_vm1 = vcmp.ge.f32.partialorder %v346_v46, 0.0  ;;  %v362_v54 = vmul.f32 0.1, %v346_v46 }
 0x119   :  { %vm351_vm2 = vcmp.ge.f32.partialorder %v343_v49, 0.0  ;;  %v359_v55 = vmul.f32 0.1, %v343_v49  ;;  %vm355_vm3 = vcmp.ge.f32.partialorder %v347_v50, 0.0  ;;  %v363_v56 = vmul.f32 0.1, %v347_v50 }
 0x11a   :  { %v366_v57 = vsel %vm350_vm0, %v342_v45, %v358_v53  ;;  %v370_v58 = vsel %vm354_vm1, %v346_v46, %v362_v54  ;;  %v344_v59 = vadd.f32 %v335_v41, %v288_v51  ;;  %v348_v60 = vadd.f32 %v335_v41, %v298_v52  ;;  %v290_v61 = vpop.f32.mrb[3].mxu0  ;;  %v300_v62 = vpop.f32.mrb[3].mxu1 }
 0x11b   :  { %374 = vst [vmem:[%s666_s3] sm:$0xff] %v366_v57  ;;  %378 = vst [vmem:[%s666_s3 + $0x20] sm:$0xff] %v370_v58  ;;  %v367_v63 = vsel %vm351_vm2, %v343_v49, %v359_v55  ;;  %v371_v0 = vsel %vm355_vm3, %v347_v50, %v363_v56  ;;  %v345_v1 = vadd.f32 %v339_v42, %v290_v61 }
 0x11c   :  { %v349_v2 = vadd.f32 %v339_v42, %v300_v62  ;;  %375 = vst [vmem:[%s666_s3 + $0x8] sm:$0xff] %v367_v63  ;;  %379 = vst [vmem:[%s666_s3 + $0x28] sm:$0xff] %v371_v0  ;;  %vm352_vm4 = vcmp.ge.f32.partialorder %v344_v59, 0.0  ;;  %v360_v3 = vmul.f32 0.1, %v344_v59  ;;  %vm356_vm5 = vcmp.ge.f32.partialorder %v348_v60, 0.0 }
 0x11d   :  { %v364_v4 = vmul.f32 0.1, %v348_v60  ;;  %vm353_vm6 = vcmp.ge.f32.partialorder %v345_v1, 0.0  ;;  %v361_v5 = vmul.f32 0.1, %v345_v1 }
 0x11e   :  { %vm357_vm7 = vcmp.ge.f32.partialorder %v349_v2, 0.0  ;;  %v365_v6 = vmul.f32 0.1, %v349_v2  ;;  %v368_v7 = vsel %vm352_vm4, %v344_v59, %v360_v3 }
 0x11f   :  { %v372_v8 = vsel %vm356_vm5, %v348_v60, %v364_v4  ;;  %376 = vst [vmem:[%s666_s3 + $0x10] sm:$0xff] %v368_v7  ;;  %v369_v9 = vsel %vm353_vm6, %v345_v1, %v361_v5 }
 0x120   :  { %380 = vst [vmem:[%s666_s3 + $0x30] sm:$0xff] %v372_v8  ;;  %v373_v10 = vsel %vm357_vm7, %v349_v2, %v365_v6  ;;  %377 = vst [vmem:[%s666_s3 + $0x18] sm:$0xff] %v369_v9 }
 0x121   :  { %381 = vst [vmem:[%s666_s3 + $0x38] sm:$0xff] %v373_v10 }

// kernel: feat_extractor.15
= control target key start
LH: loop header
LB: loop body
LE: loop exit
PB: predicated region body
PF: predicated region fallthrough
CT: control target
= control target key end

     0   :  { %vm701_vm0 = vcmask 261120   ;;  %s1775_s2 = inlined_call_operand.vmem [shape: bf16[256,128], index: 2, kind: input, shape index: {}]   ;;  %s1776_s4 = inlined_call_operand.vmem [shape: bf16[256,128], index: 4, kind: input, shape index: {}]   ;;  %s1777_s0 = inlined_call_operand.vmem [shape: f32[32,256], index: 0, kind: input, shape index: {}]   ;;  %s1778_s6 = inlined_call_operand.vmem [shape: bf16[256,128], index: 6, kind: input, shape index: {}]   ;;  %s1779_s3 = inlined_call_operand.vmem [shape: f32[1,128], index: 3, kind: input, shape index: {}]   ;;  %s1780_s5 = inlined_call_operand.vmem [shape: f32[1,128], index: 5, kind: input, shape index: {}]   ;;  %s1781_s7 = inlined_call_operand.vmem [shape: f32[1,128], index: 7, kind: input, shape index: {}]   ;;  %s1782_s1 = inlined_call_operand.vmem [shape: f32[32,32], index: 1, kind: input, shape index: {}]   ;;  %s1783_s8 = inlined_call_operand.vmem [shape: bf16[128,256], index: 8, kind: input, shape index: {}]   ;;  %s1784_s9 = inlined_call_operand.vmem [shape: f32[1,256], index: 9, kind: input, shape index: {}]   ;;  %s1785_s10 = inlined_call_operand.vmem [shape: f32[32,256], index: 10, kind: output, shape index: {}]  }
   0x1   :  { %v1319_v0 = vld [vmem:[%s1775_s2 + $0x40] sm:$0xff]   ;;  %v1321_v2 = vld [vmem:[%s1775_s2 + $0x48] sm:$0xff]   ;;  %v1323_v4 = vld [vmem:[%s1775_s2 + $0x50] sm:$0xff]  }
   0x2   :  { %v1320_v1 = vld [vmem:[%s1775_s2] sm:$0xff]   ;;  %1174 = vmatprep.subr.bf16.mxu0 %v1319_v0  ;;  %v1322_v3 = vld [vmem:[%s1775_s2 + $0x8] sm:$0xff]   ;;  %v1324_v5 = vld [vmem:[%s1775_s2 + $0x10] sm:$0xff]  }
   0x3   :  { %1175 = vmatpush3.bf16.msra.mxu0 %v1320_v1  ;;  %v1326_v6 = vld [vmem:[%s1776_s4 + $0x40] sm:$0xff]   ;;  %v1325_v7 = vld [vmem:[%s1775_s2 + $0x58] sm:$0xff]   ;;  %v1330_v10 = vld [vmem:[%s1776_s4 + $0x48] sm:$0xff]  }
   0x4   :  { %1176 = vmatprep.subr.bf16.mxu0 %v1321_v2  ;;  %1202 = vmatprep.subr.bf16.mxu1 %v1326_v6  ;;  %v1328_v8 = vld [vmem:[%s1776_s4] sm:$0xff]   ;;  %v1327_v9 = vld [vmem:[%s1775_s2 + $0x18] sm:$0xff]   ;;  %v1332_v12 = vld [vmem:[%s1776_s4 + $0x8] sm:$0xff]  }
   0x5   :  { %1203 = vmatpush3.bf16.msra.mxu1 %v1328_v8  ;;  %v1329_v11 = vld [vmem:[%s1775_s2 + $0x60] sm:$0xff]   ;;  %v1334_v14 = vld [vmem:[%s1776_s4 + $0x50] sm:$0xff]   ;;  %v1333_v15 = vld [vmem:[%s1775_s2 + $0x68] sm:$0xff]  }
   0x6   :  { %1204 = vmatprep.subr.bf16.mxu1 %v1330_v10  ;;  %v1331_v13 = vld [vmem:[%s1775_s2 + $0x20] sm:$0xff]   ;;  %v1336_v16 = vld [vmem:[%s1776_s4 + $0x10] sm:$0xff]   ;;  %v1335_v17 = vld [vmem:[%s1775_s2 + $0x28] sm:$0xff]  }
   0x7   :  { %1177 = vmatpush3.bf16.msra.mxu0 %v1322_v3  ;;  %v1338_v18 = vld [vmem:[%s1776_s4 + $0x58] sm:$0xff]   ;;  %v1337_v19 = vld [vmem:[%s1775_s2 + $0x70] sm:$0xff]   ;;  %v1342_v22 = vld [vmem:[%s1776_s4 + $0x60] sm:$0xff]  }
   0x8   :  { %1178 = vmatprep.subr.bf16.mxu0 %v1323_v4  ;;  %v1340_v20 = vld [vmem:[%s1776_s4 + $0x18] sm:$0xff]   ;;  %v1339_v21 = vld [vmem:[%s1775_s2 + $0x30] sm:$0xff]   ;;  %v1344_v25 = vld [vmem:[%s1776_s4 + $0x20] sm:$0xff]  }
   0x9   :  { %1205 = vmatpush3.bf16.msra.mxu1 %v1332_v12  ;;  %v1341_v23 = vld [vmem:[%s1775_s2 + $0x78] sm:$0xff]   ;;  %v1548_v26 = vld [vmem:[%s1777_s0 + $0x8] sm:$0xff]  ;;  %v1558_v28 = vld [vmem:[%s1777_s0] sm:$0xff] }
   0xa   :  { %1206 = vmatprep.subr.bf16.mxu1 %v1334_v14  ;;  %v1343_v24 = vld [vmem:[%s1775_s2 + $0x38] sm:$0xff]   ;;  %v1565_v30 = vld [vmem:[%s1777_s0 + $0x10] sm:$0xff]  ;;  %v1345_v31 = vld [vmem:[%s1776_s4 + $0x68] sm:$0xff]  }
   0xb   :  { %1179 = vmatpush3.bf16.msra.mxu0 %v1324_v5  ;;  %v1553_v27 = vld [vmem:[%s1777_s0 + $0x18] sm:$0xff]  ;;  %v1346_v32 = vld [vmem:[%s1776_s4 + $0x28] sm:$0xff]   ;;  %v44_v33 = vpack.c.bf16 %v1565_v30, %v1558_v28  ;;  %v1347_v34 = vld [vmem:[%s1776_s4 + $0x70] sm:$0xff]  }
   0xc   :  { %1180 = vmatprep.subr.bf16.mxu0 %v1325_v7  ;;  %v45_v29 = vpack.c.bf16 %v1553_v27, %v1548_v26  ;;  %v1348_v35 = vld [vmem:[%s1776_s4 + $0x30] sm:$0xff]   ;;  %v1584_v36 = vld [vmem:[%s1777_s0 + $0x28] sm:$0xff]  ;;  %v1589_v37 = vld [vmem:[%s1777_s0 + $0x38] sm:$0xff] }
   0xd   :  { %1207 = vmatpush3.bf16.msra.mxu1 %v1336_v16  ;;  %v47_v38 = vpack.c.bf16 %v1589_v37, %v1584_v36  ;;  %v1596_v39 = vld [vmem:[%s1777_s0 + $0x20] sm:$0xff]  ;;  %v1601_v40 = vld [vmem:[%s1777_s0 + $0x30] sm:$0xff]  ;;  %v1349_v41 = vld [vmem:[%s1776_s4 + $0x78] sm:$0xff]  }
   0xe   :  { %1208 = vmatprep.subr.bf16.mxu1 %v1338_v18  ;;  %215 = vmatprep.mubr.bf16.mxu0 %v45_v29  ;;  %v1350_v42 = vld [vmem:[%s1776_s4 + $0x38] sm:$0xff]   ;;  %v1351_v43 = vld [vmem:[%s1778_s6 + $0x40] sm:$0xff]   ;;  %v1353_v45 = vld [vmem:[%s1778_s6 + $0x48] sm:$0xff]   ;;  %v46_v46 = vpack.c.bf16 %v1601_v40, %v1596_v39 }
   0xf   :  { %1181 = vmatpush3.bf16.msra.mxu0 %v1327_v9  ;;  %399 = vmatprep.mubr.bf16.mxu1 %v45_v29  ;;  %v1352_v44 = vld [vmem:[%s1778_s6] sm:$0xff]   ;;  %v1354_v47 = vld [vmem:[%s1778_s6 + $0x8] sm:$0xff]   ;;  %v1355_v48 = vld [vmem:[%s1778_s6 + $0x50] sm:$0xff]  }
  0x10   :  { %1182 = vmatprep.subr.bf16.mxu0 %v1329_v11  ;;  %v1356_v49 = vld [vmem:[%s1778_s6 + $0x10] sm:$0xff]   ;;  %v1357_v50 = vld [vmem:[%s1778_s6 + $0x58] sm:$0xff]   ;;  %v1359_v52 = vld [vmem:[%s1778_s6 + $0x60] sm:$0xff]  }
  0x11   :  { %1209 = vmatpush3.bf16.msra.mxu1 %v1340_v20  ;;  %v1358_v51 = vld [vmem:[%s1778_s6 + $0x18] sm:$0xff]   ;;  %v1360_v53 = vld [vmem:[%s1778_s6 + $0x20] sm:$0xff]   ;;  %v1361_v54 = vld [vmem:[%s1778_s6 + $0x68] sm:$0xff]  }
  0x12   :  { %1210 = vmatprep.subr.bf16.mxu1 %v1342_v22  ;;  %v1362_v55 = vld [vmem:[%s1778_s6 + $0x28] sm:$0xff]   ;;  %v1363_v56 = vld [vmem:[%s1778_s6 + $0x70] sm:$0xff]   ;;  %v1365_v58 = vld [vmem:[%s1778_s6 + $0x78] sm:$0xff]  }
  0x13   :  { %1183 = vmatpush3.bf16.msra.mxu0 %v1331_v13  ;;  %v1364_v57 = vld [vmem:[%s1778_s6 + $0x30] sm:$0xff]   ;;  %v1366_v59 = vld [vmem:[%s1778_s6 + $0x38] sm:$0xff]   ;;  %v1099_v0 = vld [vmem:[%s1779_s3] ss:$0 sm:$0xff] }
  0x14   :  { %1184 = vmatprep.subr.bf16.mxu0 %v1333_v15  ;;  %v1116_v9 = vld [vmem:[%s1780_s5] ss:$0 sm:$0xff] }
  0x15   :  { %1211 = vmatpush3.bf16.msra.mxu1 %v1344_v25 }
  0x16   :  { %1212 = vmatprep.subr.bf16.mxu1 %v1345_v31 }
  0x17   :  { %1185 = vmatpush3.bf16.msra.mxu0 %v1335_v17 }
  0x18   :  { %1186 = vmatprep.subr.bf16.mxu0 %v1337_v19 }
  0x19   :  { %1213 = vmatpush3.bf16.msra.mxu1 %v1346_v32 }
  0x1a   :  { %1214 = vmatprep.subr.bf16.mxu1 %v1347_v34 }
  0x1b   :  { %1187 = vmatpush3.bf16.msra.mxu0 %v1339_v21 }
  0x1c   :  { %1188 = vmatprep.subr.bf16.mxu0 %v1341_v23 }
  0x1d   :  { %1215 = vmatpush3.bf16.msra.mxu1 %v1348_v35 }
  0x1e   :  { %1216 = vmatprep.subr.bf16.mxu1 %v1349_v41 }
  0x1f   :  { %1189 = vmatpush3.bf16.msra.mxu0 %v1343_v24 }
  0x20   :  { %1230 = vmatprep.subr.bf16.mxu0 %v1351_v43 }
  0x21   :  { %1217 = vmatpush3.bf16.msra.mxu1 %v1350_v42 }
  0x22   :  { %216 = vmatmul.mubr.bf16.vlgmr.msra.gmra.mrb[0].mxu0 %v44_v33 }
  0x23   :  { %223 = vmatprep.mubr.bf16.mxu0 %v47_v38  ;;  %1231 = vmatpush3.bf16.msra.mxu0 %v1352_v44 }
  0x24   :  { %1232 = vmatprep.subr.bf16.mxu0 %v1353_v45  ;;  %400 = vmatmul.mubr.bf16.vlgmr.msra.gmra.mrb[0].mxu1 %v44_v33  ;;  %v1133_v45 = vld [vmem:[%s1781_s7] ss:$0 sm:$0xff] }
  0x25   :  { %407 = vmatprep.mubr.bf16.mxu1 %v47_v38 }
  0x27   :  { %1233 = vmatpush3.bf16.msra.mxu0 %v1354_v47 }
  0x28   :  { %1234 = vmatprep.subr.bf16.mxu0 %v1355_v48 }
  0x2a   :  { %224 = vmatmul.mubr.bf16.gmra.mrb[4].mxu0 %v46_v46 }
  0x2b   :  { %583 = vmatprep.mubr.bf16.mxu0 %v45_v29  ;;  %1235 = vmatpush3.bf16.msra.mxu0 %v1356_v49 }
  0x2c   :  { %1236 = vmatprep.subr.bf16.mxu0 %v1357_v50  ;;  %408 = vmatmul.mubr.bf16.gmra.mrb[4].mxu1 %v46_v46 }
  0x2f   :  { %1237 = vmatpush3.bf16.msra.mxu0 %v1358_v51 }
  0x30   :  { %1238 = vmatprep.subr.bf16.mxu0 %v1359_v52 }
  0x33   :  { %1239 = vmatpush3.bf16.msra.mxu0 %v1360_v53 }
  0x34   :  { %1240 = vmatprep.subr.bf16.mxu0 %v1361_v54 }
  0x37   :  { %1241 = vmatpush3.bf16.msra.mxu0 %v1362_v55 }
  0x38   :  { %1242 = vmatprep.subr.bf16.mxu0 %v1363_v56 }
  0x3b   :  { %1243 = vmatpush3.bf16.msra.mxu0 %v1364_v57 }
  0x3c   :  { %1244 = vmatprep.subr.bf16.mxu0 %v1365_v58 }
  0x3f   :  { %1245 = vmatpush3.bf16.msra.mxu0 %v1366_v59 }
  0x42   :  { %584 = vmatmul.mubr.bf16.vlgmr.msra.gmra.mrb[8].mxu0 %v44_v33 }
  0x43   :  { %591 = vmatprep.mubr.bf16.mxu0 %v47_v38 }
  0x4a   :  { %592 = vmatmul.mubr.bf16.gmra.mrb[12].mxu0 %v46_v46 }
  0xf5   :  { %v1190_v60 = vpop.f32.mrb[0].mxu0 }
  0xf6   :  { %v1191_v61 = vpop.f32.mrb[1].mxu0 }
  0xf7   :  { %v1192_v62 = vadd.f32 %v1191_v61, %v1190_v60  ;;  %v1193_v63 = vpop.f32.mrb[2].mxu0  ;;  %v1218_v7 = vpop.f32.mrb[0].mxu1 }
  0xf8   :  { %v1194_v1 = vpop.f32.mrb[3].mxu0  ;;  %v1219_v10 = vpop.f32.mrb[1].mxu1 }
  0xf9   :  { %v1195_v2 = vadd.f32 %v1194_v1, %v1193_v63  ;;  %v218_v3 = vadd.f32 %v1192_v62, %v1099_v0  ;;  %v1220_v13 = vadd.f32 %v1219_v10, %v1218_v7  ;;  %v1221_v14 = vpop.f32.mrb[2].mxu1  ;;  %v604_v63 = vld [vmem:[%s1782_s1] sm:$0xff] }
  0xfa   :  { %v1222_v16 = vpop.f32.mrb[3].mxu1  ;;  %v1150_v1 = vadd.f32 -1.0, %v604_v63 }
  0xfb   :  { %v221_v4 = vadd.f32 %v1195_v2, %v1099_v0  ;;  %v402_v18 = vadd.f32 %v1220_v13, %v1116_v9  ;;  %v1223_v19 = vadd.f32 %v1222_v16, %v1221_v14  ;;  %v606_v2 = vld [vmem:[%s1782_s1 + $0x10] sm:$0xff] }
  0xfd   :  { %v1196_v5 = vpop.f32.mrb[4].mxu0  ;;  %v1302_v6 = vpack.c.bf16 %v221_v4, %v218_v3  ;;  %v600_v22 = vmul.f32 0.088388346, %v402_v18  ;;  %v405_v33 = vadd.f32 %v1223_v19, %v1116_v9  ;;  %v607_v4 = vld [vmem:[%s1782_s1 + $0x18] sm:$0xff] }
  0xfe   :  { %v1197_v8 = vpop.f32.mrb[5].mxu0 }
  0xff   :  { %v1198_v11 = vadd.f32 %v1197_v8, %v1196_v5  ;;  %v1199_v12 = vpop.f32.mrb[6].mxu0  ;;  %1303 = vmatprep.subr.bf16.mxu0 %v1302_v6  ;;  %v1224_v24 = vpop.f32.mrb[4].mxu1  ;;  %1282 = vmatprep.mubr.f32.mxu0 %v600_v22  ;;  %v601_v42 = vmul.f32 0.088388346, %v405_v33  ;;  %v612_v5 = vmul.f32 1e+30, %v1150_v1 }
 0x100   :  { %v1200_v15 = vpop.f32.mrb[7].mxu0  ;;  %1305 = vmatpush3.bf16.xpose.msra.mxu0 %v1302_v6  ;;  %v1225_v25 = vpop.f32.mrb[5].mxu1  ;;  %v1152_v6 = vadd.f32 -1.0, %v606_v2  ;;  %v1367_v1 = vld [vmem:[%s1783_s8] ss:$8 sps:$4 sm:$0xff]  }
 0x101   :  { %v1201_v17 = vadd.f32 %v1200_v15, %v1199_v12  ;;  %v226_v20 = vadd.f32 %v1198_v11, %v1099_v0  ;;  %v1226_v29 = vadd.f32 %v1225_v25, %v1224_v24  ;;  %v1227_v31 = vpop.f32.mrb[6].mxu1 }
 0x102   :  { %v1228_v32 = vpop.f32.mrb[7].mxu1  ;;  %v614_v12 = vmul.f32 1e+30, %v1152_v6 }
 0x103   :  { %v229_v21 = vadd.f32 %v1201_v17, %v1099_v0  ;;  %v410_v34 = vadd.f32 %v1226_v29, %v1116_v9  ;;  %v1229_v35 = vadd.f32 %v1228_v32, %v1227_v31  ;;  %v605_v0 = vld [vmem:[%s1782_s1 + $0x8] sm:$0xff] }
 0x104   :  { %v1151_v3 = vadd.f32 -1.0, %v605_v0 }
 0x105   :  { %v1306_v23 = vpack.c.bf16 %v229_v21, %v226_v20  ;;  %v413_v38 = vadd.f32 %v1229_v35, %v1116_v9  ;;  %v602_v41 = vmul.f32 0.088388346, %v410_v34  ;;  %v1153_v9 = vadd.f32 -1.0, %v607_v4 }
 0x106   :  { %v613_v7 = vmul.f32 1e+30, %v1151_v3  ;;  %v1372_v3 = vld [vmem:[%s1783_s8 + $0x14] ss:$8 sps:$4 sm:$0xff]  }
 0x107   :  { %1307 = vmatprep.subr.bf16.mxu0 %v1306_v23  ;;  %v603_v43 = vmul.f32 0.088388346, %v413_v38  ;;  %v615_v14 = vmul.f32 1e+30, %v1153_v9  ;;  %v1378_v9 = vld [vmem:[%s1783_s8 + $0x34] ss:$8 sps:$4 sm:$0xff]  }
 0x108   :  { %1309 = vmatpush3.bf16.xpose.msra.mxu0 %v1306_v23 }
 0x10f   :  { %1283 = vmatmul.mubr.f32.vlgmr.msra.gmra.mrb[16].mxu0 %v601_v42 }
 0x110   :  { %1285 = vmatprep.mubr.f32.mxu0 %v602_v41 }
 0x113   :  { %1286 = vmatmul.mubr.f32.gmra.mrb[18].mxu0 %v603_v43 }
 0x115   :  { %v1246_v44 = vpop.f32.mrb[8].mxu0 }
 0x116   :  { %v1247_v46 = vpop.f32.mrb[9].mxu0 }
 0x117   :  { %v1248_v47 = vadd.f32 %v1247_v46, %v1246_v44  ;;  %v1249_v48 = vpop.f32.mrb[10].mxu0 }
 0x118   :  { %v1250_v49 = vpop.f32.mrb[11].mxu0 }
 0x119   :  { %v586_v50 = vadd.f32 %v1248_v47, %v1133_v45  ;;  %v1251_v51 = vadd.f32 %v1250_v49, %v1249_v48 }
 0x11b   :  { %v589_v52 = vadd.f32 %v1251_v51, %v1133_v45 }
 0x11d   :  { %v1252_v53 = vpop.f32.mrb[12].mxu0  ;;  %v1310_v54 = vpack.c.bf16 %v589_v52, %v586_v50 }
 0x11e   :  { %v1253_v55 = vpop.f32.mrb[13].mxu0 }
 0x11f   :  { %v1254_v56 = vadd.f32 %v1253_v55, %v1252_v53  ;;  %v1255_v57 = vpop.f32.mrb[14].mxu0  ;;  %1311 = vmatprep.subr.bf16.mxu1 %v1310_v54  ;;  %v1369_v55 = vld [vmem:[%s1783_s8 + $0x4] ss:$8 sps:$4 sm:$0xff]  }
 0x120   :  { %v1256_v58 = vpop.f32.mrb[15].mxu0  ;;  %1313 = vmatpush3.bf16.msra.mxu1 %v1310_v54 }
 0x121   :  { %v594_v59 = vadd.f32 %v1254_v56, %v1133_v45  ;;  %v1257_v60 = vadd.f32 %v1256_v58, %v1255_v57 }
 0x123   :  { %v597_v61 = vadd.f32 %v1257_v60, %v1133_v45 }
 0x125   :  { %v1314_v62 = vpack.c.bf16 %v597_v61, %v594_v59 }
 0x127   :  { %1315 = vmatprep.subr.bf16.mxu1 %v1314_v62 }
 0x128   :  { %1317 = vmatpush3.bf16.msra.mxu1 %v1314_v62 }
 0x129   :  { %957 = vmatprep.subr.bf16.mxu1 %v1369_v55 }
 0x1e2   :  { %v1284_v8 = vpop.f32.mrb[16].mxu0 }
 0x1e3   :  { %v682_v10 = vpop.f32.mrb[17].mxu0  ;;  %v688_v13 = vadd.f32 %v1284_v8, %v613_v7  ;;  %v1375_v7 = vld [vmem:[%s1783_s8 + $0x24] ss:$8 sps:$4 sm:$0xff]   ;;  %v1373_v8 = vld [vmem:[%s1783_s8 + $0x20] ss:$8 sps:$4 sm:$0xff]  }
 0x1e4   :  { %v683_v11 = vadd.f32 %v682_v10, %v612_v5  ;;  %v1370_v5 = vld [vmem:[%s1783_s8 + $0x10] ss:$8 sps:$4 sm:$0xff]  }
 0x1e5   :  { %v705_v21 = vsel %vm701_vm0, %v688_v13, -inf  ;;  %v1376_v10 = vld [vmem:[%s1783_s8 + $0x30] ss:$8 sps:$4 sm:$0xff]  }
 0x1e6   :  { %v1287_v15 = vpop.f32.mrb[18].mxu0  ;;  %v702_v16 = vsel %vm701_vm0, %v683_v11, -inf }
 0x1e7   :  { %v692_v17 = vpop.f32.mrb[19].mxu0  ;;  %703 = vmax.xlane.f32.xlu0 %v702_v16  ;;  %v698_v19 = vadd.f32 %v1287_v15, %v615_v14  ;;  %v1382_v14 = vld [vmem:[%s1783_s8 + $0x50] ss:$8 sps:$4 sm:$0xff]   ;;  %v1387_v15 = vld [vmem:[%s1783_s8 + $0x64] ss:$8 sps:$4 sm:$0xff]  }
 0x1e8   :  { %v693_v18 = vadd.f32 %v692_v17, %v614_v12  ;;  %v1379_v12 = vld [vmem:[%s1783_s8 + $0x40] ss:$8 sps:$4 sm:$0xff]   ;;  %v1390_v17 = vld [vmem:[%s1783_s8 + $0x74] ss:$8 sps:$4 sm:$0xff]  }
 0x1e9   :  { %v711_v22 = vsel %vm701_vm0, %v698_v19, -inf  ;;  %v1385_v16 = vld [vmem:[%s1783_s8 + $0x60] ss:$8 sps:$4 sm:$0xff]  }
 0x1ea   :  { %v708_v20 = vsel %vm701_vm0, %v693_v18, -inf }
 0x1eb   :  { %709 = vmax.xlane.f32.xlu1 %v708_v20  ;;  %706 = vmax.xlane.f32.xlu0 %v705_v21 }
 0x1ef   :  { %712 = vmax.xlane.f32.xlu1 %v711_v22 }
 0x274   :  { %v704_v23 = vpop.xlane.xlu0 %703 }
 0x275   :  { %v714_v24 = vsub.f32 %v683_v11, %v704_v23  ;;  %v1381_v11 = vld [vmem:[%s1783_s8 + $0x44] ss:$8 sps:$4 sm:$0xff]  }
 0x277   :  { %v718_v25 = vmul.f32 1.442695, %v714_v24 }
 0x278   :  { %v710_v29 = vpop.xlane.xlu1 %709  ;;  %v707_v31 = vpop.xlane.xlu0 %706 }
 0x279   :  { %1391 = vpow2.f32 %v718_v25  ;;  %v716_v32 = vsub.f32 %v693_v18, %v710_v29  ;;  %v715_v33 = vsub.f32 %v688_v13, %v707_v31  ;;  %v1384_v13 = vld [vmem:[%s1783_s8 + $0x54] ss:$8 sps:$4 sm:$0xff]   ;;  %v1388_v18 = vld [vmem:[%s1783_s8 + $0x70] ss:$8 sps:$4 sm:$0xff]   ;;  %v867_v29 = vlaneseq }
 0x27b   :  { %v722_v34 = vmul.f32 1.442695, %v716_v32  ;;  %v720_v35 = vmul.f32 1.442695, %v715_v33  ;;  %v868_v31 = vshrl.u32 %v867_v29, 7 }
 0x27c   :  { %v713_v38 = vpop.xlane.xlu1 %712  ;;  %v865_v33 = vld [vmem:[%s1784_s9] sm:$0x3] }
 0x27d   :  { %1393 = vpow2.f32 %v722_v34  ;;  %v717_v41 = vsub.f32 %v698_v19, %v713_v38  ;;  %v1411_v19 = vmov 0   ;;  %v869_v32 = vsub.s32 0, %v868_v31 }
 0x27e   :  { %1395 = vpow2.f32 %v720_v35  ;;  %v873_v34 = vsub.s32 1, %v868_v31 }
 0x27f   :  { %v724_v42 = vmul.f32 1.442695, %v717_v41  ;;  %v870_v35 = vrot.slane %v865_v33, %v869_v32 }
 0x280   :  { %v874_v38 = vrot.slane %v865_v33, %v873_v34 }
 0x281   :  { %1397 = vpow2.f32 %v724_v42 }
 0x283   :  { %v1392_v43 = vpop.eup %1391 }
 0x284   :  { %v726_v44 = vmul.f32 %v1392_v43, %v604_v63 }
 0x286   :  { %v730_v45 = vsel %vm701_vm0, %v726_v44, 0.0 }
 0x287   :  { %v1394_v46 = vpop.eup %1393  ;;  %731 = vadd.xlane.f32.xlu0 %v730_v45 }
 0x288   :  { %v1396_v47 = vpop.eup %1395  ;;  %v728_v48 = vmul.f32 %v1394_v46, %v606_v2 }
 0x289   :  { %v727_v49 = vmul.f32 %v1396_v47, %v605_v0 }
 0x28a   :  { %v736_v50 = vsel %vm701_vm0, %v728_v48, 0.0 }
 0x28b   :  { %v1398_v51 = vpop.eup %1397  ;;  %737 = vadd.xlane.f32.xlu0 %v736_v50  ;;  %v733_v52 = vsel %vm701_vm0, %v727_v49, 0.0 }
 0x28c   :  { %734 = vadd.xlane.f32.xlu1 %v733_v52  ;;  %v729_v53 = vmul.f32 %v1398_v51, %v607_v4 }
 0x28e   :  { %v739_v54 = vsel %vm701_vm0, %v729_v53, 0.0 }
 0x290   :  { %740 = vadd.xlane.f32.xlu1 %v739_v54 }
 0x314   :  { %v732_v56 = vpop.xlane.xlu0 %731 }
 0x315   :  { %1399 = vrcp.f32 %v732_v56 }
 0x318   :  { %v738_v57 = vpop.xlane.xlu0 %737 }
 0x319   :  { %v735_v58 = vpop.xlane.xlu1 %734  ;;  %1401 = vrcp.f32 %v738_v57 }
 0x31a   :  { %1403 = vrcp.f32 %v735_v58 }
 0x31d   :  { %v741_v59 = vpop.xlane.xlu1 %740 }
 0x31e   :  { %1405 = vrcp.f32 %v741_v59 }
 0x31f   :  { %v1400_v60 = vpop.eup %1399 }
 0x320   :  { %v746_v61 = vmul.f32 %v1400_v60, %v726_v44 }
 0x322   :  { %1296 = vmatprep.mubr.msk.f32.mxu1 %vm701_vm0, %v746_v61 }
 0x323   :  { %v1402_v62 = vpop.eup %1401 }
 0x324   :  { %v1404_v63 = vpop.eup %1403  ;;  %v748_v0 = vmul.f32 %v1402_v62, %v728_v48 }
 0x325   :  { %v747_v2 = vmul.f32 %v1404_v63, %v727_v49 }
 0x327   :  { %1297 = vmatmul.mubr.msk.f32.vlgmr.msra.gmra.mrb[8].mxu1 %vm701_vm0, %v747_v2 }
 0x328   :  { %v1406_v4 = vpop.eup %1405  ;;  %1299 = vmatprep.mubr.msk.f32.mxu1 %vm701_vm0, %v748_v0  ;;  %958 = vmatpush1.bf16.msra.mxu1 %v1367_v1 }
 0x329   :  { %v749_v6 = vmul.f32 %v1406_v4, %v729_v53  ;;  %959 = vmatprep.subr.bf16.mxu1 %v1372_v3 }
 0x32b   :  { %1300 = vmatmul.mubr.msk.f32.gmra.mrb[10].mxu1 %vm701_vm0, %v749_v6 }
 0x32c   :  { %960 = vmatpush1.bf16.msra.mxu1 %v1370_v5  ;;  %989 = vmatprep.mubr.bf16.mxu1 %v1411_v19 }
 0x32d   :  { %961 = vmatprep.subr.bf16.mxu1 %v1375_v7 }
 0x330   :  { %962 = vmatpush1.bf16.msra.mxu1 %v1373_v8 }
 0x331   :  { %963 = vmatprep.subr.bf16.mxu1 %v1378_v9 }
 0x334   :  { %964 = vmatpush1.bf16.msra.mxu1 %v1376_v10 }
 0x335   :  { %965 = vmatprep.subr.bf16.mxu1 %v1381_v11 }
 0x338   :  { %966 = vmatpush1.bf16.msra.mxu1 %v1379_v12 }
 0x339   :  { %967 = vmatprep.subr.bf16.mxu1 %v1384_v13 }
 0x33c   :  { %968 = vmatpush1.bf16.msra.mxu1 %v1382_v14 }
 0x33d   :  { %969 = vmatprep.subr.bf16.mxu1 %v1387_v15 }
 0x340   :  { %970 = vmatpush1.bf16.msra.mxu1 %v1385_v16 }
 0x341   :  { %971 = vmatprep.subr.bf16.mxu1 %v1390_v17 }
 0x344   :  { %972 = vmatpush1.bf16.msra.mxu1 %v1388_v18 }
 0x3fa   :  { %v1298_v20 = vpop.f32.mrb[8].mxu1 }
 0x3fb   :  { %v828_v21 = vpop.f32.mrb[9].mxu1 }
 0x3fc   :  { %v847_v22 = vpack.c.bf16 %v1298_v20, %v828_v21 }
 0x3fe   :  { %v1301_v23 = vpop.f32.mrb[10].mxu1  ;;  %990 = vmatmul.mubr.bf16.vlgmr.msra.gmra.mrb[12].mxu1 %v847_v22 }
 0x3ff   :  { %v838_v24 = vpop.f32.mrb[11].mxu1  ;;  %999 = vmatprep.mubr.bf16.mxu1 %v1411_v19 }
 0x400   :  { %v848_v25 = vpack.c.bf16 %v1301_v23, %v838_v24 }
 0x406   :  { %1000 = vmatmul.mubr.bf16.gmra.mrb[16].mxu1 %v848_v25 }
 0x4d1   :  { %v991_v41 = vpop.f32.mrb[12].mxu1 }
 0x4d2   :  { %v992_v42 = vadd.f32 %v991_v41, %v870_v35  ;;  %v993_v43 = vpop.f32.mrb[13].mxu1 }
 0x4d3   :  { %v994_v44 = vadd.f32 %v993_v43, %v874_v38  ;;  %v995_v45 = vpop.f32.mrb[14].mxu1 }
 0x4d4   :  { %v996_v46 = vadd.f32 %v995_v45, %v870_v35  ;;  %v997_v47 = vpop.f32.mrb[15].mxu1  ;;  %v1010_v49 = vadd.f32 %v992_v42, %v1558_v28 }
 0x4d5   :  { %v998_v48 = vadd.f32 %v997_v47, %v874_v38  ;;  %v1011_v51 = vadd.f32 %v994_v44, %v1548_v26 }
 0x4d6   :  { %v1012_v50 = vadd.f32 %v996_v46, %v1565_v30 }
 0x4d7   :  { %v1013_v52 = vadd.f32 %v998_v48, %v1553_v27 }
 0x4d8   :  { %v1018_v53 = vadd.f32 %v1012_v50, %v1010_v49 }
 0x4d9   :  { %v1027_v54 = vadd.f32 %v1013_v52, %v1011_v51  ;;  %v1001_v55 = vpop.f32.mrb[16].mxu1 }
 0x4da   :  { %v1002_v56 = vadd.f32 %v1001_v55, %v870_v35  ;;  %v1003_v57 = vpop.f32.mrb[17].mxu1 }
 0x4db   :  { %v1004_v58 = vadd.f32 %v1003_v57, %v874_v38  ;;  %v1005_v59 = vpop.f32.mrb[18].mxu1 }
 0x4dc   :  { %v1014_v60 = vadd.f32 %v1002_v56, %v1596_v39  ;;  %v1006_v61 = vadd.f32 %v1005_v59, %v870_v35  ;;  %v1007_v62 = vpop.f32.mrb[19].mxu1 }
 0x4dd   :  { %v1015_v63 = vadd.f32 %v1004_v58, %v1584_v36  ;;  %v1008_v28 = vadd.f32 %v1007_v62, %v874_v38 }
 0x4de   :  { %v1019_v0 = vadd.f32 %v1018_v53, %v1014_v60  ;;  %v1016_v30 = vadd.f32 %v1006_v61, %v1601_v40 }
 0x4df   :  { %v1028_v26 = vadd.f32 %v1027_v54, %v1015_v63  ;;  %v1017_v27 = vadd.f32 %v1008_v28, %v1589_v37 }
 0x4e0   :  { %v1020_v1 = vadd.f32 %v1019_v0, %v1016_v30 }
 0x4e1   :  { %v1029_v2 = vadd.f32 %v1028_v26, %v1017_v27 }
 0x4e2   :  { %v1021_v3 = vrot.slane %v1020_v1, 4 }
 0x4e3   :  { %v1030_v4 = vrot.slane %v1029_v2, 4 }
 0x4e4   :  { %v1022_v5 = vadd.f32 %v1021_v3, %v1020_v1 }
 0x4e5   :  { %v1031_v6 = vadd.f32 %v1030_v4, %v1029_v2 }
 0x4e6   :  { %v1023_v7 = vrot.slane %v1022_v5, 2 }
 0x4e7   :  { %v1032_v8 = vrot.slane %v1031_v6, 2 }
 0x4e8   :  { %v1024_v39 = vadd.f32 %v1023_v7, %v1022_v5 }
 0x4e9   :  { %v1033_v9 = vadd.f32 %v1032_v8, %v1031_v6 }
 0x4ea   :  { %v1025_v10 = vrot.slane %v1024_v39, 1 }
 0x4eb   :  { %v1034_v11 = vrot.slane %v1033_v9, 1 }
 0x4ec   :  { %v1026_v36 = vadd.f32 %v1025_v10, %v1024_v39 }
 0x4ed   :  { %v1035_v12 = vadd.f32 %v1034_v11, %v1033_v9 }
 0x4ee   :  { %v1037_v13 = vmul.f32 0.03125, %v1026_v36 }
 0x4ef   :  { %v1038_v14 = vmul.f32 0.03125, %v1035_v12 }
 0x4f0   :  { %v1039_v40 = vsub.f32 %v1010_v49, %v1037_v13  ;;  %v1041_v15 = vsub.f32 %v1012_v50, %v1037_v13  ;;  %v1043_v16 = vsub.f32 %v1014_v60, %v1037_v13  ;;  %v1045_v37 = vsub.f32 %v1016_v30, %v1037_v13 }
 0x4f1   :  { %v1040_v17 = vsub.f32 %v1011_v51, %v1038_v14  ;;  %v1042_v18 = vsub.f32 %v1013_v52, %v1038_v14  ;;  %v1044_v19 = vsub.f32 %v1015_v63, %v1038_v14  ;;  %v1046_v20 = vsub.f32 %v1017_v27, %v1038_v14 }
 0x4f2   :  { %v1047_v21 = vmul.f32 %v1039_v40, %v1039_v40  ;;  %v1049_v22 = vmul.f32 %v1041_v15, %v1041_v15  ;;  %v1051_v25 = vmul.f32 %v1043_v16, %v1043_v16  ;;  %v1053_v33 = vmul.f32 %v1045_v37, %v1045_v37 }
 0x4f3   :  { %v1048_v23 = vmul.f32 %v1040_v17, %v1040_v17  ;;  %v1050_v24 = vmul.f32 %v1042_v18, %v1042_v18  ;;  %v1052_v31 = vmul.f32 %v1044_v19, %v1044_v19  ;;  %v1054_v35 = vmul.f32 %v1046_v20, %v1046_v20 }
 0x4f4   :  { %v1055_v29 = vadd.f32 %v1049_v22, %v1047_v21 }
 0x4f5   :  { %v1064_v32 = vadd.f32 %v1050_v24, %v1048_v23 }
 0x4f6   :  { %v1056_v34 = vadd.f32 %v1055_v29, %v1051_v25 }
 0x4f7   :  { %v1065_v38 = vadd.f32 %v1064_v32, %v1052_v31 }
 0x4f8   :  { %v1057_v41 = vadd.f32 %v1056_v34, %v1053_v33 }
 0x4f9   :  { %v1066_v42 = vadd.f32 %v1065_v38, %v1054_v35 }
 0x4fa   :  { %v1058_v43 = vrot.slane %v1057_v41, 4 }
 0x4fb   :  { %v1067_v44 = vrot.slane %v1066_v42, 4 }
 0x4fc   :  { %v1059_v45 = vadd.f32 %v1058_v43, %v1057_v41 }
 0x4fd   :  { %v1068_v46 = vadd.f32 %v1067_v44, %v1066_v42 }
 0x4fe   :  { %v1060_v47 = vrot.slane %v1059_v45, 2 }
 0x4ff   :  { %v1069_v48 = vrot.slane %v1068_v46, 2 }
 0x500   :  { %v1061_v49 = vadd.f32 %v1060_v47, %v1059_v45 }
 0x501   :  { %v1070_v50 = vadd.f32 %v1069_v48, %v1068_v46 }
 0x502   :  { %v1062_v51 = vrot.slane %v1061_v49, 1 }
 0x503   :  { %v1071_v52 = vrot.slane %v1070_v50, 1 }
 0x504   :  { %v1063_v53 = vadd.f32 %v1062_v51, %v1061_v49 }
 0x505   :  { %v1072_v54 = vadd.f32 %v1071_v52, %v1070_v50 }
 0x506   :  { %v1073_v55 = vmul.f32 0.03125, %v1063_v53 }
 0x507   :  { %v1074_v56 = vmul.f32 0.03125, %v1072_v54 }
 0x508   :  { %v1075_v57 = vadd.f32 1e-05, %v1073_v55 }
 0x509   :  { %v1076_v58 = vadd.f32 1e-05, %v1074_v56 }
 0x50a   :  { %1407 = vrsqrt.f32 %v1075_v57 }
 0x50b   :  { %1409 = vrsqrt.f32 %v1076_v58 }
 0x514   :  { %v1408_v59 = vpop.eup %1407 }
 0x515   :  { %v1410_v60 = vpop.eup %1409  ;;  %v1079_v61 = vmul.f32 %v1408_v59, %v1039_v40  ;;  %v1081_v62 = vmul.f32 %v1408_v59, %v1041_v15  ;;  %v1083_v63 = vmul.f32 %v1408_v59, %v1043_v16  ;;  %v1085_v28 = vmul.f32 %v1408_v59, %v1045_v37 }
 0x516   :  { %v1080_v0 = vmul.f32 %v1410_v60, %v1040_v17  ;;  %v1082_v30 = vmul.f32 %v1410_v60, %v1042_v18  ;;  %v1084_v26 = vmul.f32 %v1410_v60, %v1044_v19  ;;  %v1086_v27 = vmul.f32 %v1410_v60, %v1046_v20 }
 0x517   :  { %1087 = vst [vmem:[%s1785_s10] sm:$0xff] %v1079_v61  ;;  %1089 = vst [vmem:[%s1785_s10 + $0x10] sm:$0xff] %v1081_v62 }
 0x518   :  { %1091 = vst [vmem:[%s1785_s10 + $0x20] sm:$0xff] %v1083_v63  ;;  %1093 = vst [vmem:[%s1785_s10 + $0x30] sm:$0xff] %v1085_v28 }
 0x519   :  { %1088 = vst [vmem:[%s1785_s10 + $0x8] sm:$0xff] %v1080_v0  ;;  %1090 = vst [vmem:[%s1785_s10 + $0x18] sm:$0xff] %v1082_v30 }
 0x51a   :  { %1092 = vst [vmem:[%s1785_s10 + $0x28] sm:$0xff] %v1084_v26  ;;  %1094 = vst [vmem:[%s1785_s10 + $0x38] sm:$0xff] %v1086_v27 }

// kernel: feat_extractor.17
= control target key start
LH: loop header
LB: loop body
LE: loop exit
PB: predicated region body
PF: predicated region fallthrough
CT: control target
= control target key end

     0   :  { %s1689_s12 = smov 0   ;;  %s1691_s13 = smov 0   ;;  %s1895_s0 = inlined_call_operand.vmem [shape: bf16[32,2304], index: 0, kind: input, shape index: {}]   ;;  %s1896_s1 = inlined_call_operand.vmem [shape: bf16[2304,256], index: 1, kind: input, shape index: {}]   ;;  %s1897_s2 = inlined_call_operand.vmem [shape: f32[1,256], index: 2, kind: input, shape index: {}]   ;;  %s1898_s3 = inlined_call_operand.vmem [shape: f32[32,256], index: 3, kind: output, shape index: {}]  }
   0x1   :  { %s1693_s14 = smov 0   ;;  %s1695_s15 = smov 0  }
   0x2   :  { %s1697_s16 = smov 0  }
   0x3 LB: > { %s22_s17 = sadd.s32 1, %s1662_s15  ;;  %p41_p1 = scmp.ne.s32.totalorder %s1654_s13, %s1650_s12  ;;  %s1666_s16 = sphi %s1697_s16, %s13_s16   ;;  %s1662_s15 = sphi %s1695_s15, %s1902_s15   ;;  %s1658_s14 = sphi %s1693_s14, %s1901_s14   ;;  %s1654_s13 = sphi %s1691_s13, %s1900_s13   ;;  %s1650_s12 = sphi %s1689_s12, %s1899_s12  }
   0x4   : > { %p23_p0 = scmp.ge.s32.totalorder %s22_s17, 3  ;;  %p42_p2 = scmp.eq.s32.totalorder %s1666_s16, 0 }
   0x5   : > { %s34_s19 = sadd.s32 1, %s1654_s13  ;;  %p1254_p5 = scmp.ge.s32.totalorder %s1666_s16, 3 }
   0x6   : > { %s1904_s17 = smov (%p23_p0, %s22_s17), 0  ;;  %p43_p3 = por %p42_p2, %p41_p1 }
   0x7   : > { %s30_s18 = ssub.s32 %s1662_s15, %s1904_s17  ;;  %143 = sbr.rel (%p1254_p5) target bundleno = 25 (0x19), region = 20 }
   0x8   : > { %p32_p4 = scmp.eq.s32.totalorder %s30_s18, 0 }
   0xa   : > { %s1724_s20 = scalar_select %p32_p4, %s1654_s13, %s34_s19  }
   0xe   : > { %146 = sbr.rel (!%p43_p3) target bundleno = 25 (0x19), region = 24  ;;  %s148_s21 = sand.u32 (%p43_p3), 1, %s1654_s13  }
   0xf   : > { %s1373_s22 = smul.u32 (%p43_p3), 24, %s1662_s15 }
  0x10   : > { %s1423_s23 = smul.u32 (%p43_p3), 96, %s148_s21 }
  0x11   : > { %s156_s26 = scalar_lea.vmem (%p43_p3), %s1895_s0, %s1373_s22 }
  0x12   : > { %v169_v0 = vld [vmem:[%s156_s26] sm:$0xff] (%p43_p3)  ;;  %v171_v1 = vld [vmem:[%s156_s26 + $0x8] sm:$0xff] (%p43_p3)  ;;  %v173_v2 = vld [vmem:[%s156_s26 + $0x10] sm:$0xff] (%p43_p3)  ;;  %s150_s27 = scalar_lea.vmem (%p43_p3), [#allocation3], %s1423_s23 }
  0x13   : > { %170 = vst [vmem:[%s150_s27] sm:$0xff] (%p43_p3), %v169_v0  ;;  %172 = vst [vmem:[%s150_s27 + $0x8] sm:$0xff] (%p43_p3), %v171_v1  ;;  %v175_v3 = vld [vmem:[%s156_s26 + $0x48] sm:$0xff] (%p43_p3)  ;;  %v177_v4 = vld [vmem:[%s156_s26 + $0x50] sm:$0xff] (%p43_p3) }
  0x14   : > { %174 = vst [vmem:[%s150_s27 + $0x10] sm:$0xff] (%p43_p3), %v173_v2  ;;  %v179_v5 = vld [vmem:[%s156_s26 + $0x58] sm:$0xff] (%p43_p3)  ;;  %176 = vst [vmem:[%s150_s27 + $0x18] sm:$0xff] (%p43_p3), %v175_v3  ;;  %v181_v6 = vld [vmem:[%s156_s26 + $0x90] sm:$0xff] (%p43_p3) }
  0x15   : > { %178 = vst [vmem:[%s150_s27 + $0x20] sm:$0xff] %v177_v4  ;;  %180 = vst [vmem:[%s150_s27 + $0x28] sm:$0xff] %v179_v5  ;;  %v183_v7 = vld [vmem:[%s156_s26 + $0x98] sm:$0xff]  ;;  %v185_v8 = vld [vmem:[%s156_s26 + $0xa0] sm:$0xff] }
  0x16   : > { %182 = vst [vmem:[%s150_s27 + $0x30] sm:$0xff] %v181_v6  ;;  %184 = vst [vmem:[%s150_s27 + $0x38] sm:$0xff] %v183_v7  ;;  %v187_v9 = vld [vmem:[%s156_s26 + $0xd8] sm:$0xff]  ;;  %v189_v10 = vld [vmem:[%s156_s26 + $0xe0] sm:$0xff] }
  0x17   : > { %186 = vst [vmem:[%s150_s27 + $0x40] sm:$0xff] %v185_v8  ;;  %v191_v11 = vld [vmem:[%s156_s26 + $0xe8] sm:$0xff]  ;;  %188 = vst [vmem:[%s150_s27 + $0x48] sm:$0xff] %v187_v9 }
  0x18   : > { %190 = vst [vmem:[%s150_s27 + $0x50] sm:$0xff] %v189_v10  ;;  %192 = vst [vmem:[%s150_s27 + $0x58] sm:$0xff] %v191_v11 }
  0x19 PF: > { %p1256_p6 = scmp.ge.s32.totalorder %s1666_s16, 1  ;;  %p207_p7 = scmp.lt.s32.totalorder %s1666_s16, 4 }
  0x1b   : > { %p208_p8 = pnand %p1256_p6, %p207_p7 }
  0x1c   : > { %s214_s28 = sand.u32 (!%p208_p8), 1, %s1650_s12   ;;  %s246_s29 = smul.u32 (!%p208_p8), 96, %s1658_s14 }
  0x1d   : > { %211 = sbr.rel (%p208_p8) target bundleno = 408 (0x198), region = 51  ;;  %p1259_p10 = scmp.ne.s32.totalorder (!%p208_p8), %s1658_s14, 0 }
  0x1e   : > { %s1424_s30 = smul.u32 (!%p208_p8), 96, %s214_s28  ;;  %p247_p9 = scmp.lt.s32.totalorder (!%p208_p8), %s246_s29, 287 }
  0x20   : > { %s1741_s8 = scalar_lea.vmem (!%p208_p8), [#allocation3], %s1424_s30 }
  0x24   : > { %s1906_s29 = smov (!%p247_p9, %s246_s29), 287  ;;  %263 = sbr.rel (%p1259_p10) target bundleno = 43 (0x2b), region = 59 }
  0x25   : > { %s1374_s4 = sshll.u32 %s1906_s29, 3  ;;  %v1668_v12 = vmov (!%p1259_p10), 0.0  }
  0x26   : > { %s1739_s7 = scalar_lea.vmem %s1896_s1, %s1374_s4  ;;  %264 = vst [vmem:[#allocation2] sm:$0xff] (!%p1259_p10), %v1668_v12  ;;  %265 = vst [vmem:[#allocation2 + $0x8] sm:$0xff] (!%p1259_p10), %v1668_v12 }
  0x27   : > { %266 = vst [vmem:[#allocation2 + $0x10] sm:$0xff] (!%p1259_p10), %v1668_v12  ;;  %267 = vst [vmem:[#allocation2 + $0x18] sm:$0xff] (!%p1259_p10), %v1668_v12 }
  0x28   : > { %268 = vst [vmem:[#allocation2 + $0x20] sm:$0xff] (!%p1259_p10), %v1668_v12  ;;  %269 = vst [vmem:[#allocation2 + $0x28] sm:$0xff] (!%p1259_p10), %v1668_v12 }
  0x29   : > { %270 = vst [vmem:[#allocation2 + $0x30] sm:$0xff] (!%p1259_p10), %v1668_v12  ;;  %271 = vst [vmem:[#allocation2 + $0x38] sm:$0xff] (!%p1259_p10), %v1668_v12 }
  0x2b PF: > { %v1466_v13 = vld [vmem:[%s1739_s7 + $0x4] ss:$8 sps:$4 sm:$0xff]   ;;  %v1470_v15 = vld [vmem:[%s1739_s7] ss:$8 sps:$4 sm:$0xff]   ;;  %v1472_v17 = vld [vmem:[%s1739_s7 + $0x14] ss:$8 sps:$4 sm:$0xff]  }
  0x2c   : > { %v1468_v14 = vld [vmem:[%s1739_s7 + $0x104] ss:$8 sps:$4 sm:$0xff]   ;;  %928 = vmatprep.subr.bf16.mxu1 %v1466_v13  ;;  %v1471_v16 = vld [vmem:[%s1739_s7 + $0x100] ss:$8 sps:$4 sm:$0xff]   ;;  %v1474_v18 = vld [vmem:[%s1739_s7 + $0x114] ss:$8 sps:$4 sm:$0xff]  }
  0x2d   : > { %981 = vmatprep.subr.bf16.mxu0 %v1468_v14  ;;  %929 = vmatpush1.bf16.msra.mxu1 %v1470_v15  ;;  %v1476_v19 = vld [vmem:[%s1739_s7 + $0x10] ss:$8 sps:$4 sm:$0xff]   ;;  %v1478_v21 = vld [vmem:[%s1739_s7 + $0x24] ss:$8 sps:$4 sm:$0xff]   ;;  %v1482_v23 = vld [vmem:[%s1739_s7 + $0x20] ss:$8 sps:$4 sm:$0xff]  }
  0x2e   : > { %982 = vmatpush1.bf16.msra.mxu0 %v1471_v16  ;;  %930 = vmatprep.subr.bf16.mxu1 %v1472_v17  ;;  %v1477_v20 = vld [vmem:[%s1739_s7 + $0x110] ss:$8 sps:$4 sm:$0xff]   ;;  %v1480_v22 = vld [vmem:[%s1739_s7 + $0x124] ss:$8 sps:$4 sm:$0xff]   ;;  %v1483_v24 = vld [vmem:[%s1739_s7 + $0x120] ss:$8 sps:$4 sm:$0xff]  }
  0x2f   : > { %983 = vmatprep.subr.bf16.mxu0 %v1474_v18  ;;  %v1484_v25 = vld [vmem:[%s1739_s7 + $0x34] ss:$8 sps:$4 sm:$0xff]   ;;  %v1488_v27 = vld [vmem:[%s1739_s7 + $0x30] ss:$8 sps:$4 sm:$0xff]   ;;  %v1490_v29 = vld [vmem:[%s1739_s7 + $0x44] ss:$8 sps:$4 sm:$0xff]  }
  0x30   : > { %v1486_v26 = vld [vmem:[%s1739_s7 + $0x134] ss:$8 sps:$4 sm:$0xff]   ;;  %v1489_v28 = vld [vmem:[%s1739_s7 + $0x130] ss:$8 sps:$4 sm:$0xff]   ;;  %v1492_v30 = vld [vmem:[%s1739_s7 + $0x144] ss:$8 sps:$4 sm:$0xff]  }
  0x31   : > { %931 = vmatpush1.bf16.msra.mxu1 %v1476_v19  ;;  %v1494_v31 = vld [vmem:[%s1739_s7 + $0x40] ss:$8 sps:$4 sm:$0xff]   ;;  %v1496_v33 = vld [vmem:[%s1739_s7 + $0x54] ss:$8 sps:$4 sm:$0xff]   ;;  %v1500_v35 = vld [vmem:[%s1739_s7 + $0x50] ss:$8 sps:$4 sm:$0xff]  }
  0x32   : > { %984 = vmatpush1.bf16.msra.mxu0 %v1477_v20  ;;  %932 = vmatprep.subr.bf16.mxu1 %v1478_v21  ;;  %v1495_v32 = vld [vmem:[%s1739_s7 + $0x140] ss:$8 sps:$4 sm:$0xff]   ;;  %v1498_v34 = vld [vmem:[%s1739_s7 + $0x154] ss:$8 sps:$4 sm:$0xff]   ;;  %v1501_v36 = vld [vmem:[%s1739_s7 + $0x150] ss:$8 sps:$4 sm:$0xff]  }
  0x33   : > { %985 = vmatprep.subr.bf16.mxu0 %v1480_v22  ;;  %v1502_v37 = vld [vmem:[%s1739_s7 + $0x64] ss:$8 sps:$4 sm:$0xff]   ;;  %v1506_v39 = vld [vmem:[%s1739_s7 + $0x60] ss:$8 sps:$4 sm:$0xff]   ;;  %v1508_v41 = vld [vmem:[%s1739_s7 + $0x74] ss:$8 sps:$4 sm:$0xff]  }
  0x34   : > { %v1504_v38 = vld [vmem:[%s1739_s7 + $0x164] ss:$8 sps:$4 sm:$0xff]   ;;  %v1507_v40 = vld [vmem:[%s1739_s7 + $0x160] ss:$8 sps:$4 sm:$0xff]   ;;  %v1510_v42 = vld [vmem:[%s1739_s7 + $0x174] ss:$8 sps:$4 sm:$0xff]  }
  0x35   : > { %933 = vmatpush1.bf16.msra.mxu1 %v1482_v23  ;;  %v1512_v43 = vld [vmem:[%s1739_s7 + $0x70] ss:$8 sps:$4 sm:$0xff]   ;;  %v1514_v45 = vld [vmem:[%s1739_s7 + $0x84] ss:$8 sps:$4 sm:$0xff]   ;;  %v1518_v47 = vld [vmem:[%s1739_s7 + $0x80] ss:$8 sps:$4 sm:$0xff]  }
  0x36   : > { %986 = vmatpush1.bf16.msra.mxu0 %v1483_v24  ;;  %934 = vmatprep.subr.bf16.mxu1 %v1484_v25  ;;  %v1513_v44 = vld [vmem:[%s1739_s7 + $0x170] ss:$8 sps:$4 sm:$0xff]   ;;  %v1516_v46 = vld [vmem:[%s1739_s7 + $0x184] ss:$8 sps:$4 sm:$0xff]   ;;  %v1519_v48 = vld [vmem:[%s1739_s7 + $0x180] ss:$8 sps:$4 sm:$0xff]  }
  0x37   : > { %987 = vmatprep.subr.bf16.mxu0 %v1486_v26  ;;  %v1520_v49 = vld [vmem:[%s1739_s7 + $0x94] ss:$8 sps:$4 sm:$0xff]   ;;  %v1524_v51 = vld [vmem:[%s1739_s7 + $0x90] ss:$8 sps:$4 sm:$0xff]   ;;  %v1526_v53 = vld [vmem:[%s1739_s7 + $0xa4] ss:$8 sps:$4 sm:$0xff]  }
  0x38   : > { %v1522_v50 = vld [vmem:[%s1739_s7 + $0x194] ss:$8 sps:$4 sm:$0xff]   ;;  %v1525_v52 = vld [vmem:[%s1739_s7 + $0x190] ss:$8 sps:$4 sm:$0xff]   ;;  %v1528_v54 = vld [vmem:[%s1739_s7 + $0x1a4] ss:$8 sps:$4 sm:$0xff]  }
  0x39   : > { %935 = vmatpush1.bf16.msra.mxu1 %v1488_v27  ;;  %v1530_v55 = vld [vmem:[%s1739_s7 + $0xa0] ss:$8 sps:$4 sm:$0xff]   ;;  %v1532_v57 = vld [vmem:[%s1739_s7 + $0xb4] ss:$8 sps:$4 sm:$0xff]   ;;  %v1536_v59 = vld [vmem:[%s1739_s7 + $0xb0] ss:$8 sps:$4 sm:$0xff]  }
  0x3a   : > { %988 = vmatpush1.bf16.msra.mxu0 %v1489_v28  ;;  %936 = vmatprep.subr.bf16.mxu1 %v1490_v29  ;;  %v1531_v56 = vld [vmem:[%s1739_s7 + $0x1a0] ss:$8 sps:$4 sm:$0xff]   ;;  %v1534_v58 = vld [vmem:[%s1739_s7 + $0x1b4] ss:$8 sps:$4 sm:$0xff]   ;;  %v1537_v60 = vld [vmem:[%s1739_s7 + $0x1b0] ss:$8 sps:$4 sm:$0xff]  }
  0x3b   : > { %989 = vmatprep.subr.bf16.mxu0 %v1492_v30  ;;  %v1538_v61 = vld [vmem:[%s1739_s7 + $0xc4] ss:$8 sps:$4 sm:$0xff]   ;;  %v1542_v1 = vld [vmem:[%s1739_s7 + $0xc0] ss:$8 sps:$4 sm:$0xff]   ;;  %v1544_v3 = vld [vmem:[%s1739_s7 + $0xd4] ss:$8 sps:$4 sm:$0xff]  }
  0x3c   : > { %v1564_v62 = vld [vmem:[%s1741_s8 + $0x4] ss:$24 sps:$4 sm:$0xff]   ;;  %v1543_v2 = vld [vmem:[%s1739_s7 + $0x1c0] ss:$8 sps:$4 sm:$0xff]   ;;  %v1548_v5 = vld [vmem:[%s1739_s7 + $0xd0] ss:$8 sps:$4 sm:$0xff]  }
  0x3d   : > { %937 = vmatpush1.bf16.msra.mxu1 %v1494_v31  ;;  %v1540_v63 = vld [vmem:[%s1739_s7 + $0x1c4] ss:$8 sps:$4 sm:$0xff]   ;;  %960 = vmatprep.mubr.bf16.mxu1 %v1564_v62  ;;  %v1546_v4 = vld [vmem:[%s1739_s7 + $0x1d4] ss:$8 sps:$4 sm:$0xff]   ;;  %v1549_v6 = vld [vmem:[%s1739_s7 + $0x1d0] ss:$8 sps:$4 sm:$0xff]  }
  0x3e   : > { %990 = vmatpush1.bf16.msra.mxu0 %v1495_v32  ;;  %938 = vmatprep.subr.bf16.mxu1 %v1496_v33  ;;  %v1567_v0 = vld [vmem:[%s1741_s8 + $0xc] ss:$24 sps:$4 sm:$0xff]   ;;  %v1554_v9 = vld [vmem:[%s1739_s7 + $0xe0] ss:$8 sps:$4 sm:$0xff]   ;;  %v1556_v11 = vld [vmem:[%s1739_s7 + $0xf4] ss:$8 sps:$4 sm:$0xff]  }
  0x3f   : > { %991 = vmatprep.subr.bf16.mxu0 %v1498_v34  ;;  %1013 = vmatprep.mubr.bf16.mxu0 %v1567_v0  ;;  %v1550_v7 = vld [vmem:[%s1739_s7 + $0xe4] ss:$8 sps:$4 sm:$0xff]   ;;  %v1555_v10 = vld [vmem:[%s1739_s7 + $0x1e0] ss:$8 sps:$4 sm:$0xff]   ;;  %v1558_v12 = vld [vmem:[%s1739_s7 + $0x1f4] ss:$8 sps:$4 sm:$0xff]  }
  0x40   : > { %v1552_v8 = vld [vmem:[%s1739_s7 + $0x1e4] ss:$8 sps:$4 sm:$0xff]   ;;  %v1560_v13 = vld [vmem:[%s1739_s7 + $0xf0] ss:$8 sps:$4 sm:$0xff]   ;;  %v1565_v17 = vld [vmem:[%s1741_s8 + $0x8] ss:$24 sps:$4 sm:$0xff]  }
  0x41   : > { %939 = vmatpush1.bf16.msra.mxu1 %v1500_v35  ;;  %v1561_v14 = vld [vmem:[%s1739_s7 + $0x1f0] ss:$8 sps:$4 sm:$0xff]   ;;  %v1570_v15 = vld [vmem:[%s1739_s7 + $0x204] ss:$8 sps:$4 sm:$0xff]   ;;  %v1568_v18 = vld [vmem:[%s1739_s7 + $0x200] ss:$8 sps:$4 sm:$0xff]  }
  0x42   : > { %992 = vmatpush1.bf16.msra.mxu0 %v1501_v36  ;;  %940 = vmatprep.subr.bf16.mxu1 %v1502_v37  ;;  %v1562_v16 = vld [vmem:[%s1741_s8] ss:$24 sps:$4 sm:$0xff]   ;;  %v1573_v19 = vld [vmem:[%s1739_s7 + $0x214] ss:$8 sps:$4 sm:$0xff]   ;;  %v1576_v23 = vld [vmem:[%s1739_s7 + $0x224] ss:$8 sps:$4 sm:$0xff]  }
  0x43   : > { %993 = vmatprep.subr.bf16.mxu0 %v1504_v38  ;;  %v1607_v20 = vld [vmem:[%s1741_s8 + $0x34] ss:$24 sps:$4 sm:$0xff]   ;;  %v1571_v22 = vld [vmem:[%s1739_s7 + $0x210] ss:$8 sps:$4 sm:$0xff]   ;;  %v1574_v26 = vld [vmem:[%s1739_s7 + $0x220] ss:$8 sps:$4 sm:$0xff]  }
  0x44   : > { %v1609_v21 = vld [vmem:[%s1741_s8 + $0x3c] ss:$24 sps:$4 sm:$0xff]   ;;  %v1614_v24 = vld [vmem:[%s1741_s8 + $0x30] ss:$24 sps:$4 sm:$0xff]   ;;  %v1582_v31 = vld [vmem:[%s1739_s7 + $0x244] ss:$8 sps:$4 sm:$0xff]  }
  0x45   : > { %941 = vmatpush1.bf16.msra.mxu1 %v1506_v39  ;;  %v1615_v25 = vld [vmem:[%s1741_s8 + $0x38] ss:$24 sps:$4 sm:$0xff]   ;;  %v1579_v27 = vld [vmem:[%s1739_s7 + $0x234] ss:$8 sps:$4 sm:$0xff]   ;;  %v1580_v32 = vld [vmem:[%s1739_s7 + $0x240] ss:$8 sps:$4 sm:$0xff]  }
  0x46   : > { %994 = vmatpush1.bf16.msra.mxu0 %v1507_v40  ;;  %942 = vmatprep.subr.bf16.mxu1 %v1508_v41  ;;  %v1624_v28 = vld [vmem:[%s1741_s8 + $0x14] ss:$24 sps:$4 sm:$0xff]   ;;  %v1627_v29 = vld [vmem:[%s1741_s8 + $0x44] ss:$24 sps:$4 sm:$0xff]   ;;  %v1577_v30 = vld [vmem:[%s1739_s7 + $0x230] ss:$8 sps:$4 sm:$0xff]  }
  0x47   : > { %995 = vmatprep.subr.bf16.mxu0 %v1510_v42  ;;  %v1585_v33 = vld [vmem:[%s1739_s7 + $0x254] ss:$8 sps:$4 sm:$0xff]   ;;  %v1583_v34 = vld [vmem:[%s1739_s7 + $0x250] ss:$8 sps:$4 sm:$0xff]   ;;  %v1588_v35 = vld [vmem:[%s1739_s7 + $0x264] ss:$8 sps:$4 sm:$0xff]  }
  0x48   : > { %v1586_v36 = vld [vmem:[%s1739_s7 + $0x260] ss:$8 sps:$4 sm:$0xff]   ;;  %v1591_v37 = vld [vmem:[%s1739_s7 + $0x274] ss:$8 sps:$4 sm:$0xff]   ;;  %v1589_v38 = vld [vmem:[%s1739_s7 + $0x270] ss:$8 sps:$4 sm:$0xff]  }
  0x49   : > { %943 = vmatpush1.bf16.msra.mxu1 %v1512_v43  ;;  %v1594_v39 = vld [vmem:[%s1739_s7 + $0x284] ss:$8 sps:$4 sm:$0xff]   ;;  %v1592_v40 = vld [vmem:[%s1739_s7 + $0x280] ss:$8 sps:$4 sm:$0xff]   ;;  %v1597_v41 = vld [vmem:[%s1739_s7 + $0x294] ss:$8 sps:$4 sm:$0xff]  }
  0x4a   : > { %996 = vmatpush1.bf16.msra.mxu0 %v1513_v44  ;;  %944 = vmatprep.subr.bf16.mxu1 %v1514_v45  ;;  %v1595_v42 = vld [vmem:[%s1739_s7 + $0x290] ss:$8 sps:$4 sm:$0xff]   ;;  %v1600_v43 = vld [vmem:[%s1739_s7 + $0x2a4] ss:$8 sps:$4 sm:$0xff]   ;;  %v1598_v44 = vld [vmem:[%s1739_s7 + $0x2a0] ss:$8 sps:$4 sm:$0xff]  }
  0x4b   : > { %997 = vmatprep.subr.bf16.mxu0 %v1516_v46  ;;  %v1603_v45 = vld [vmem:[%s1739_s7 + $0x2b4] ss:$8 sps:$4 sm:$0xff]   ;;  %v1601_v46 = vld [vmem:[%s1739_s7 + $0x2b0] ss:$8 sps:$4 sm:$0xff]   ;;  %p1368_p11 = scmp.ne.s32.totalorder %s1658_s14, 2 }
  0x4d   : > { %945 = vmatpush1.bf16.msra.mxu1 %v1518_v47  ;;  %v1606_v47 = vld [vmem:[%s1739_s7 + $0x2c4] ss:$8 sps:$4 sm:$0xff]  }
  0x4e   : > { %998 = vmatpush1.bf16.msra.mxu0 %v1519_v48  ;;  %946 = vmatprep.subr.bf16.mxu1 %v1520_v49  ;;  %v1604_v48 = vld [vmem:[%s1739_s7 + $0x2c0] ss:$8 sps:$4 sm:$0xff]   ;;  %v1613_v49 = vld [vmem:[%s1739_s7 + $0x2d4] ss:$8 sps:$4 sm:$0xff]  }
  0x4f   : > { %999 = vmatprep.subr.bf16.mxu0 %v1522_v50  ;;  %v1611_v50 = vld [vmem:[%s1739_s7 + $0x2d0] ss:$8 sps:$4 sm:$0xff]  }
  0x51   : > { %947 = vmatpush1.bf16.msra.mxu1 %v1524_v51  ;;  %v1618_v51 = vld [vmem:[%s1739_s7 + $0x2e4] ss:$8 sps:$4 sm:$0xff]  }
  0x52   : > { %1000 = vmatpush1.bf16.msra.mxu0 %v1525_v52  ;;  %948 = vmatprep.subr.bf16.mxu1 %v1526_v53  ;;  %v1616_v52 = vld [vmem:[%s1739_s7 + $0x2e0] ss:$8 sps:$4 sm:$0xff]   ;;  %v1621_v53 = vld [vmem:[%s1739_s7 + $0x2f4] ss:$8 sps:$4 sm:$0xff]  }
  0x53   : > { %1001 = vmatprep.subr.bf16.mxu0 %v1528_v54  ;;  %v1619_v54 = vld [vmem:[%s1739_s7 + $0x2f0] ss:$8 sps:$4 sm:$0xff]  }
  0x55   : > { %949 = vmatpush1.bf16.msra.mxu1 %v1530_v55  ;;  %v1622_v55 = vld [vmem:[%s1741_s8 + $0x10] ss:$24 sps:$4 sm:$0xff]  }
  0x56   : > { %1002 = vmatpush1.bf16.msra.mxu0 %v1531_v56  ;;  %950 = vmatprep.subr.bf16.mxu1 %v1532_v57  ;;  %v1625_v56 = vld [vmem:[%s1741_s8 + $0x40] ss:$24 sps:$4 sm:$0xff]  }
  0x57   : > { %1003 = vmatprep.subr.bf16.mxu0 %v1534_v58 }
  0x59   : > { %951 = vmatpush1.bf16.msra.mxu1 %v1536_v59 }
  0x5a   : > { %1004 = vmatpush1.bf16.msra.mxu0 %v1537_v60  ;;  %952 = vmatprep.subr.bf16.mxu1 %v1538_v61 }
  0x5b   : > { %1005 = vmatprep.subr.bf16.mxu0 %v1540_v63 }
  0x5d   : > { %953 = vmatpush1.bf16.msra.mxu1 %v1542_v1 }
  0x5e   : > { %1006 = vmatpush1.bf16.msra.mxu0 %v1543_v2  ;;  %954 = vmatprep.subr.bf16.mxu1 %v1544_v3 }
  0x5f   : > { %1007 = vmatprep.subr.bf16.mxu0 %v1546_v4 }
  0x61   : > { %955 = vmatpush1.bf16.msra.mxu1 %v1548_v5 }
  0x62   : > { %1008 = vmatpush1.bf16.msra.mxu0 %v1549_v6  ;;  %956 = vmatprep.subr.bf16.mxu1 %v1550_v7 }
  0x63   : > { %1009 = vmatprep.subr.bf16.mxu0 %v1552_v8 }
  0x65   : > { %957 = vmatpush1.bf16.msra.mxu1 %v1554_v9  ;;  %v272_v9 = vld [vmem:[#allocation2] sm:$0xff] }
  0x66   : > { %1010 = vmatpush1.bf16.msra.mxu0 %v1555_v10  ;;  %958 = vmatprep.subr.bf16.mxu1 %v1556_v11  ;;  %v276_v11 = vld [vmem:[#allocation2 + $0x20] sm:$0xff] }
  0x67   : > { %1011 = vmatprep.subr.bf16.mxu0 %v1558_v12 }
  0x69   : > { %959 = vmatpush1.bf16.msra.mxu1 %v1560_v13 }
  0x6a   : > { %1012 = vmatpush1.bf16.msra.mxu0 %v1561_v14  ;;  %1375 = vmatprep.subr.bf16.mxu1 %v1570_v15 }
  0x6b   : > { %1034 = vmatprep.subr.bf16.mxu0 %v1570_v15  ;;  %v273_v15 = vld [vmem:[#allocation2 + $0x8] sm:$0xff] }
  0x6c   : > { %961 = vmatmul.mubr.bf16.vlgmr.msra.gmra.mrb[0].mxu1 %v1562_v16 }
  0x6d   : > { %1014 = vmatmul.mubr.bf16.vlgmr.msra.gmra.mrb[0].mxu0 %v1565_v17  ;;  %1391 = vmatpush1.bf16.msra.mxu1 %v1568_v18  ;;  %v277_v17 = vld [vmem:[#allocation2 + $0x28] sm:$0xff] }
  0x6e   : > { %1035 = vmatpush1.bf16.msra.mxu0 %v1568_v18  ;;  %1376 = vmatprep.subr.bf16.mxu1 %v1573_v19 }
  0x6f   : > { %1036 = vmatprep.subr.bf16.mxu0 %v1573_v19  ;;  %970 = vmatprep.mubr.bf16.mxu1 %v1607_v20 }
  0x70   : > { %1023 = vmatprep.mubr.bf16.mxu0 %v1609_v21  ;;  %v274_v21 = vld [vmem:[#allocation2 + $0x10] sm:$0xff] }
  0x71   : > { %1392 = vmatpush1.bf16.msra.mxu1 %v1571_v22 }
  0x72   : > { %1037 = vmatpush1.bf16.msra.mxu0 %v1571_v22  ;;  %1377 = vmatprep.subr.bf16.mxu1 %v1576_v23 }
  0x73   : > { %1038 = vmatprep.subr.bf16.mxu0 %v1576_v23  ;;  %v278_v23 = vld [vmem:[#allocation2 + $0x30] sm:$0xff] }
  0x74   : > { %971 = vmatmul.mubr.bf16.gmra.mrb[4].mxu1 %v1614_v24 }
  0x75   : > { %1024 = vmatmul.mubr.bf16.gmra.mrb[4].mxu0 %v1615_v25  ;;  %1393 = vmatpush1.bf16.msra.mxu1 %v1574_v26 }
  0x76   : > { %1039 = vmatpush1.bf16.msra.mxu0 %v1574_v26  ;;  %1378 = vmatprep.subr.bf16.mxu1 %v1579_v27 }
  0x77   : > { %1040 = vmatprep.subr.bf16.mxu0 %v1579_v27  ;;  %1066 = vmatprep.mubr.bf16.mxu0 %v1624_v28 }
  0x78   : > { %1076 = vmatprep.mubr.bf16.mxu1 %v1627_v29  ;;  %v275_v29 = vld [vmem:[#allocation2 + $0x18] sm:$0xff] }
  0x79   : > { %1394 = vmatpush1.bf16.msra.mxu1 %v1577_v30 }
  0x7a   : > { %1041 = vmatpush1.bf16.msra.mxu0 %v1577_v30  ;;  %1379 = vmatprep.subr.bf16.mxu1 %v1582_v31 }
  0x7b   : > { %1042 = vmatprep.subr.bf16.mxu0 %v1582_v31  ;;  %v279_v31 = vld [vmem:[#allocation2 + $0x38] sm:$0xff] }
  0x7d   : > { %1395 = vmatpush1.bf16.msra.mxu1 %v1580_v32 }
  0x7e   : > { %1043 = vmatpush1.bf16.msra.mxu0 %v1580_v32  ;;  %1380 = vmatprep.subr.bf16.mxu1 %v1585_v33 }
  0x7f   : > { %1044 = vmatprep.subr.bf16.mxu0 %v1585_v33 }
  0x81   : > { %1396 = vmatpush1.bf16.msra.mxu1 %v1583_v34 }
  0x82   : > { %1045 = vmatpush1.bf16.msra.mxu0 %v1583_v34  ;;  %1381 = vmatprep.subr.bf16.mxu1 %v1588_v35 }
  0x83   : > { %1046 = vmatprep.subr.bf16.mxu0 %v1588_v35 }
  0x85   : > { %1397 = vmatpush1.bf16.msra.mxu1 %v1586_v36 }
  0x86   : > { %1047 = vmatpush1.bf16.msra.mxu0 %v1586_v36  ;;  %1382 = vmatprep.subr.bf16.mxu1 %v1591_v37 }
  0x87   : > { %1048 = vmatprep.subr.bf16.mxu0 %v1591_v37 }
  0x89   : > { %1398 = vmatpush1.bf16.msra.mxu1 %v1589_v38 }
  0x8a   : > { %1049 = vmatpush1.bf16.msra.mxu0 %v1589_v38  ;;  %1383 = vmatprep.subr.bf16.mxu1 %v1594_v39 }
  0x8b   : > { %1050 = vmatprep.subr.bf16.mxu0 %v1594_v39 }
  0x8d   : > { %1399 = vmatpush1.bf16.msra.mxu1 %v1592_v40 }
  0x8e   : > { %1051 = vmatpush1.bf16.msra.mxu0 %v1592_v40  ;;  %1384 = vmatprep.subr.bf16.mxu1 %v1597_v41 }
  0x8f   : > { %1052 = vmatprep.subr.bf16.mxu0 %v1597_v41  ;;  %v1117_v41 = vlaneseq (!%p1368_p11) }
  0x91   : > { %1400 = vmatpush1.bf16.msra.mxu1 %v1595_v42 }
  0x92   : > { %1053 = vmatpush1.bf16.msra.mxu0 %v1595_v42  ;;  %1385 = vmatprep.subr.bf16.mxu1 %v1600_v43  ;;  %v1118_v42 = vshrl.u32 (!%p1368_p11), %v1117_v41, 7 }
  0x93   : > { %1054 = vmatprep.subr.bf16.mxu0 %v1600_v43  ;;  %v1115_v43 = vld [vmem:[%s1897_s2] sm:$0x3] (!%p1368_p11) }
  0x95   : > { %1401 = vmatpush1.bf16.msra.mxu1 %v1598_v44 }
  0x96   : > { %1055 = vmatpush1.bf16.msra.mxu0 %v1598_v44  ;;  %1386 = vmatprep.subr.bf16.mxu1 %v1603_v45 }
  0x97   : > { %1056 = vmatprep.subr.bf16.mxu0 %v1603_v45  ;;  %v1119_v45 = vsub.s32 (!%p1368_p11), 0, %v1118_v42 }
  0x99   : > { %1402 = vmatpush1.bf16.msra.mxu1 %v1601_v46 }
  0x9a   : > { %1057 = vmatpush1.bf16.msra.mxu0 %v1601_v46  ;;  %1387 = vmatprep.subr.bf16.mxu1 %v1606_v47 }
  0x9b   : > { %1058 = vmatprep.subr.bf16.mxu0 %v1606_v47  ;;  %v1123_v47 = vsub.s32 (!%p1368_p11), 1, %v1118_v42 }
  0x9d   : > { %1403 = vmatpush1.bf16.msra.mxu1 %v1604_v48 }
  0x9e   : > { %1059 = vmatpush1.bf16.msra.mxu0 %v1604_v48  ;;  %1388 = vmatprep.subr.bf16.mxu1 %v1613_v49 }
  0x9f   : > { %1060 = vmatprep.subr.bf16.mxu0 %v1613_v49 }
  0xa1   : > { %1404 = vmatpush1.bf16.msra.mxu1 %v1611_v50 }
  0xa2   : > { %1061 = vmatpush1.bf16.msra.mxu0 %v1611_v50  ;;  %1389 = vmatprep.subr.bf16.mxu1 %v1618_v51 }
  0xa3   : > { %1062 = vmatprep.subr.bf16.mxu0 %v1618_v51  ;;  %v1120_v51 = vrot.slane (!%p1368_p11), %v1115_v43, %v1119_v45 }
  0xa5   : > { %1405 = vmatpush1.bf16.msra.mxu1 %v1616_v52 }
  0xa6   : > { %1063 = vmatpush1.bf16.msra.mxu0 %v1616_v52  ;;  %1390 = vmatprep.subr.bf16.mxu1 %v1621_v53  ;;  %v1124_v52 = vrot.slane (!%p1368_p11), %v1115_v43, %v1123_v47 }
  0xa7   : > { %1064 = vmatprep.subr.bf16.mxu0 %v1621_v53 }
  0xa9   : > { %1406 = vmatpush1.bf16.msra.mxu1 %v1619_v54 }
  0xaa   : > { %1065 = vmatpush1.bf16.msra.mxu0 %v1619_v54 }
  0xac   : > { %1077 = vmatmul.mubr.bf16.vlgmr.msra.gmra.mrb[8].mxu1 %v1625_v56 }
  0xad   : > { %1067 = vmatmul.mubr.bf16.vlgmr.msra.gmra.mrb[0].mxu0 %v1622_v55 }
 0x13f   : > { %v962_v57 = vpop.f32.mrb[0].mxu1 }
 0x140   : > { %v964_v58 = vpop.f32.mrb[1].mxu1 }
 0x141   : > { %v966_v59 = vpop.f32.mrb[2].mxu1 }
 0x142   : > { %v968_v60 = vpop.f32.mrb[3].mxu1 }
 0x147   : > { %v972_v61 = vpop.f32.mrb[4].mxu1 }
 0x148   : > { %v1025_v62 = vpop.f32.mrb[4].mxu0  ;;  %v974_v0 = vpop.f32.mrb[5].mxu1 }
 0x149   : > { %v1026_v63 = vadd.f32 %v1025_v62, %v972_v61  ;;  %v1027_v1 = vpop.f32.mrb[5].mxu0  ;;  %v976_v3 = vpop.f32.mrb[6].mxu1 }
 0x14a   : > { %v1028_v2 = vadd.f32 %v1027_v1, %v974_v0  ;;  %v1029_v4 = vpop.f32.mrb[6].mxu0  ;;  %v978_v6 = vpop.f32.mrb[7].mxu1 }
 0x14b   : > { %v1030_v5 = vadd.f32 %v1029_v4, %v976_v3  ;;  %v1031_v7 = vpop.f32.mrb[7].mxu0 }
 0x14c   : > { %v1032_v8 = vadd.f32 %v1031_v7, %v978_v6 }
 0x17f   : > { %v1078_v12 = vpop.f32.mrb[8].mxu1 }
 0x180   : > { %v1068_v10 = vpop.f32.mrb[0].mxu0  ;;  %v1079_v14 = vadd.f32 %v1078_v12, %v1026_v63  ;;  %v1080_v18 = vpop.f32.mrb[9].mxu1 }
 0x181   : > { %v1407_v13 = vadd.f32 %v1068_v10, %v962_v57  ;;  %v1070_v16 = vpop.f32.mrb[1].mxu0  ;;  %v1081_v20 = vadd.f32 %v1080_v18, %v1028_v2  ;;  %v1082_v24 = vpop.f32.mrb[10].mxu1 }
 0x182   : > { %v1408_v19 = vadd.f32 %v1070_v16, %v964_v58  ;;  %v1072_v22 = vpop.f32.mrb[2].mxu0  ;;  %v1091_v26 = vadd.f32 %v1079_v14, %v276_v11  ;;  %v1083_v28 = vadd.f32 %v1082_v24, %v1030_v5  ;;  %v1084_v32 = vpop.f32.mrb[11].mxu1  ;;  %1106 = sbr.rel (%p1368_p11) target bundleno = 408 (0x198), region = 63 }
 0x183   : > { %v1087_v25 = vadd.f32 %v1407_v13, %v272_v9  ;;  %v1409_v27 = vadd.f32 %v1072_v22, %v966_v59  ;;  %v1074_v30 = vpop.f32.mrb[3].mxu0  ;;  %v1092_v34 = vadd.f32 %v1081_v20, %v277_v17  ;;  %v1085_v36 = vadd.f32 %v1084_v32, %v1032_v8 }
 0x184   : > { %v1088_v33 = vadd.f32 %v1408_v19, %v273_v15  ;;  %v1410_v35 = vadd.f32 %v1074_v30, %v968_v60  ;;  %1099 = vst [vmem:[#allocation2 + $0x20] sm:$0xff] %v1091_v26  ;;  %v1093_v38 = vadd.f32 %v1083_v28, %v278_v23 }
 0x185   : > { %1095 = vst [vmem:[#allocation2] sm:$0xff] %v1087_v25  ;;  %v1089_v37 = vadd.f32 %v1409_v27, %v274_v21  ;;  %1100 = vst [vmem:[#allocation2 + $0x28] sm:$0xff] %v1092_v34  ;;  %v1094_v40 = vadd.f32 %v1085_v36, %v279_v31 }
 0x186   : > { %1096 = vst [vmem:[#allocation2 + $0x8] sm:$0xff] %v1088_v33  ;;  %v1090_v39 = vadd.f32 %v1410_v35, %v275_v29  ;;  %1101 = vst [vmem:[#allocation2 + $0x30] sm:$0xff] %v1093_v38 }
 0x187   : > { %1097 = vst [vmem:[#allocation2 + $0x10] sm:$0xff] %v1089_v37  ;;  %1102 = vst [vmem:[#allocation2 + $0x38] sm:$0xff] %v1094_v40 }
 0x188   : > { %1098 = vst [vmem:[#allocation2 + $0x18] sm:$0xff] %v1090_v39 }
 0x18b   : > { %v1111_v50 = vld [vmem:[#allocation2 + $0x20] sm:$0xff] }
 0x18c   : > { %v1107_v44 = vld [vmem:[#allocation2] sm:$0xff]  ;;  %v1112_v53 = vld [vmem:[#allocation2 + $0x28] sm:$0xff]  ;;  %v1131_v60 = vadd.f32 %v1120_v51, %v1111_v50 }
 0x18d   : > { %v1108_v46 = vld [vmem:[#allocation2 + $0x8] sm:$0xff]  ;;  %v1113_v54 = vld [vmem:[#allocation2 + $0x30] sm:$0xff]  ;;  %v1127_v56 = vadd.f32 %v1120_v51, %v1107_v44  ;;  %v1132_v61 = vadd.f32 %v1124_v52, %v1112_v53 }
 0x18e   : > { %v1109_v48 = vld [vmem:[#allocation2 + $0x10] sm:$0xff]  ;;  %v1114_v55 = vld [vmem:[#allocation2 + $0x38] sm:$0xff]  ;;  %v1128_v57 = vadd.f32 %v1124_v52, %v1108_v46  ;;  %v1133_v62 = vadd.f32 %v1120_v51, %v1113_v54  ;;  %vm1139_vm4 = vcmp.ge.f32.partialorder %v1131_v60, 0.0  ;;  %v1147_v6 = vmul.f32 0.1, %v1131_v60 }
 0x18f   : > { %v1110_v49 = vld [vmem:[#allocation2 + $0x18] sm:$0xff]  ;;  %v1129_v58 = vadd.f32 %v1120_v51, %v1109_v48  ;;  %v1134_v63 = vadd.f32 %v1124_v52, %v1114_v55  ;;  %vm1135_vm0 = vcmp.ge.f32.partialorder %v1127_v56, 0.0  ;;  %v1143_v0 = vmul.f32 0.1, %v1127_v56 }
 0x190   : > { %v1130_v59 = vadd.f32 %v1124_v52, %v1110_v49  ;;  %vm1136_vm1 = vcmp.ge.f32.partialorder %v1128_v57, 0.0  ;;  %v1144_v1 = vmul.f32 0.1, %v1128_v57  ;;  %vm1140_vm5 = vcmp.ge.f32.partialorder %v1132_v61, 0.0 }
 0x191   : > { %vm1137_vm2 = vcmp.ge.f32.partialorder %v1129_v58, 0.0  ;;  %v1145_v2 = vmul.f32 0.1, %v1129_v58  ;;  %v1151_v4 = vsel %vm1135_vm0, %v1127_v56, %v1143_v0  ;;  %v1148_v9 = vmul.f32 0.1, %v1132_v61 }
 0x192   : > { %vm1138_vm3 = vcmp.ge.f32.partialorder %v1130_v59, 0.0  ;;  %v1146_v3 = vmul.f32 0.1, %v1130_v59  ;;  %v1152_v5 = vsel %vm1136_vm1, %v1128_v57, %v1144_v1  ;;  %1159 = vst [vmem:[%s1898_s3] sm:$0xff] %v1151_v4  ;;  %v1155_v10 = vsel %vm1139_vm4, %v1131_v60, %v1147_v6 }
 0x193   : > { %1160 = vst [vmem:[%s1898_s3 + $0x8] sm:$0xff] %v1152_v5  ;;  %v1153_v7 = vsel %vm1137_vm2, %v1129_v58, %v1145_v2  ;;  %vm1141_vm6 = vcmp.ge.f32.partialorder %v1133_v62, 0.0  ;;  %v1149_v11 = vmul.f32 0.1, %v1133_v62  ;;  %vm1142_vm7 = vcmp.ge.f32.partialorder %v1134_v63, 0.0  ;;  %1163 = vst [vmem:[%s1898_s3 + $0x20] sm:$0xff] %v1155_v10 }
 0x194   : > { %v1154_v8 = vsel %vm1138_vm3, %v1130_v59, %v1146_v3  ;;  %1161 = vst [vmem:[%s1898_s3 + $0x10] sm:$0xff] %v1153_v7  ;;  %v1156_v12 = vsel %vm1140_vm5, %v1132_v61, %v1148_v9  ;;  %v1150_v13 = vmul.f32 0.1, %v1134_v63 }
 0x195   : > { %1162 = vst [vmem:[%s1898_s3 + $0x18] sm:$0xff] %v1154_v8  ;;  %1164 = vst [vmem:[%s1898_s3 + $0x28] sm:$0xff] %v1156_v12  ;;  %v1157_v14 = vsel %vm1141_vm6, %v1133_v62, %v1149_v11 }
 0x196   : > { %1165 = vst [vmem:[%s1898_s3 + $0x30] sm:$0xff] %v1157_v14  ;;  %v1158_v15 = vsel %vm1142_vm7, %v1134_v63, %v1150_v13 }
 0x197   : > { %1166 = vst [vmem:[%s1898_s3 + $0x38] sm:$0xff] %v1158_v15 }
 0x198 PF: > { %s13_s16 = sadd.s32 1, %s1666_s16   ;;  %s1899_s12 = smov %s1654_s13 }
 0x199   : > { %p10_p12 = scmp.ge.s32.totalorder %s13_s16, 5   ;;  %s1900_s13 = smov %s1724_s20 }
 0x19a   : > { %s1901_s14 = smov %s1662_s15  ;;  %s1902_s15 = smov %s1904_s17 }
 0x19b   :  { %12 = sbr.rel (!%p10_p12) target bundleno = 3 (0x3), region = 101 }

// kernel: feat_extractor.18
= control target key start
LH: loop header
LB: loop body
LE: loop exit
PB: predicated region body
PF: predicated region fallthrough
CT: control target
= control target key end

     0   :  { %vm1670_vm0 = vcmask 261120   ;;  %s4338_s2 = inlined_call_operand.vmem [shape: bf16[512,256], index: 2, kind: input, shape index: {}]   ;;  %s4339_s4 = inlined_call_operand.vmem [shape: bf16[512,256], index: 4, kind: input, shape index: {}]   ;;  %s4340_s0 = inlined_call_operand.vmem [shape: f32[32,512], index: 0, kind: input, shape index: {}]   ;;  %s4341_s6 = inlined_call_operand.vmem [shape: bf16[512,256], index: 6, kind: input, shape index: {}]   ;;  %s4342_s5 = inlined_call_operand.vmem [shape: f32[1,256], index: 5, kind: input, shape index: {}]   ;;  %s4343_s3 = inlined_call_operand.vmem [shape: f32[1,256], index: 3, kind: input, shape index: {}]   ;;  %s4344_s7 = inlined_call_operand.vmem [shape: f32[1,256], index: 7, kind: input, shape index: {}]   ;;  %s4345_s1 = inlined_call_operand.vmem [shape: f32[32,32], index: 1, kind: input, shape index: {}]   ;;  %s4346_s8 = inlined_call_operand.vmem [shape: bf16[256,512], index: 8, kind: input, shape index: {}]   ;;  %s4347_s9 = inlined_call_operand.vmem [shape: f32[1,512], index: 9, kind: input, shape index: {}]   ;;  %s4348_s10 = inlined_call_operand.vmem [shape: f32[32,512], index: 10, kind: output, shape index: {}]  }
   0x1   :  { %v2838_v0 = vld [vmem:[%s4338_s2 + $0x4] ss:$8 sps:$4 sm:$0xff]   ;;  %v2842_v2 = vld [vmem:[%s4338_s2] ss:$8 sps:$4 sm:$0xff]   ;;  %v2844_v4 = vld [vmem:[%s4338_s2 + $0x14] ss:$8 sps:$4 sm:$0xff]  }
   0x2   :  { %v2840_v1 = vld [vmem:[%s4339_s4 + $0x4] ss:$8 sps:$4 sm:$0xff]   ;;  %455 = vmatprep.subr.bf16.mxu0 %v2838_v0  ;;  %v2843_v3 = vld [vmem:[%s4339_s4] ss:$8 sps:$4 sm:$0xff]   ;;  %v2846_v5 = vld [vmem:[%s4339_s4 + $0x14] ss:$8 sps:$4 sm:$0xff]  }
   0x3   :  { %957 = vmatprep.subr.bf16.mxu1 %v2840_v1  ;;  %456 = vmatpush1.bf16.msra.mxu0 %v2842_v2  ;;  %v2848_v6 = vld [vmem:[%s4338_s2 + $0x10] ss:$8 sps:$4 sm:$0xff]   ;;  %v2850_v8 = vld [vmem:[%s4338_s2 + $0x24] ss:$8 sps:$4 sm:$0xff]   ;;  %v2854_v10 = vld [vmem:[%s4338_s2 + $0x20] ss:$8 sps:$4 sm:$0xff]  }
   0x4   :  { %958 = vmatpush1.bf16.msra.mxu1 %v2843_v3  ;;  %457 = vmatprep.subr.bf16.mxu0 %v2844_v4  ;;  %v2849_v7 = vld [vmem:[%s4339_s4 + $0x10] ss:$8 sps:$4 sm:$0xff]   ;;  %v2852_v9 = vld [vmem:[%s4339_s4 + $0x24] ss:$8 sps:$4 sm:$0xff]   ;;  %v2855_v11 = vld [vmem:[%s4339_s4 + $0x20] ss:$8 sps:$4 sm:$0xff]  }
   0x5   :  { %959 = vmatprep.subr.bf16.mxu1 %v2846_v5  ;;  %v2856_v12 = vld [vmem:[%s4338_s2 + $0x34] ss:$8 sps:$4 sm:$0xff]   ;;  %v2860_v14 = vld [vmem:[%s4338_s2 + $0x30] ss:$8 sps:$4 sm:$0xff]   ;;  %v2862_v16 = vld [vmem:[%s4338_s2 + $0x44] ss:$8 sps:$4 sm:$0xff]  }
   0x6   :  { %v2858_v13 = vld [vmem:[%s4339_s4 + $0x34] ss:$8 sps:$4 sm:$0xff]   ;;  %v2861_v15 = vld [vmem:[%s4339_s4 + $0x30] ss:$8 sps:$4 sm:$0xff]   ;;  %v2864_v17 = vld [vmem:[%s4339_s4 + $0x44] ss:$8 sps:$4 sm:$0xff]  }
   0x7   :  { %458 = vmatpush1.bf16.msra.mxu0 %v2848_v6  ;;  %v2866_v18 = vld [vmem:[%s4338_s2 + $0x40] ss:$8 sps:$4 sm:$0xff]   ;;  %v2868_v20 = vld [vmem:[%s4338_s2 + $0x54] ss:$8 sps:$4 sm:$0xff]   ;;  %v2872_v22 = vld [vmem:[%s4338_s2 + $0x50] ss:$8 sps:$4 sm:$0xff]  }
   0x8   :  { %960 = vmatpush1.bf16.msra.mxu1 %v2849_v7  ;;  %459 = vmatprep.subr.bf16.mxu0 %v2850_v8  ;;  %v2867_v19 = vld [vmem:[%s4339_s4 + $0x40] ss:$8 sps:$4 sm:$0xff]   ;;  %v2870_v21 = vld [vmem:[%s4339_s4 + $0x54] ss:$8 sps:$4 sm:$0xff]   ;;  %v2873_v23 = vld [vmem:[%s4339_s4 + $0x50] ss:$8 sps:$4 sm:$0xff]  }
   0x9   :  { %961 = vmatprep.subr.bf16.mxu1 %v2852_v9  ;;  %v2874_v24 = vld [vmem:[%s4338_s2 + $0x64] ss:$8 sps:$4 sm:$0xff]   ;;  %v2878_v26 = vld [vmem:[%s4338_s2 + $0x60] ss:$8 sps:$4 sm:$0xff]   ;;  %v2880_v28 = vld [vmem:[%s4338_s2 + $0x74] ss:$8 sps:$4 sm:$0xff]  }
   0xa   :  { %v2876_v25 = vld [vmem:[%s4339_s4 + $0x64] ss:$8 sps:$4 sm:$0xff]   ;;  %v2879_v27 = vld [vmem:[%s4339_s4 + $0x60] ss:$8 sps:$4 sm:$0xff]   ;;  %v2882_v29 = vld [vmem:[%s4339_s4 + $0x74] ss:$8 sps:$4 sm:$0xff]  }
   0xb   :  { %460 = vmatpush1.bf16.msra.mxu0 %v2854_v10  ;;  %v2884_v30 = vld [vmem:[%s4338_s2 + $0x70] ss:$8 sps:$4 sm:$0xff]   ;;  %v2886_v32 = vld [vmem:[%s4338_s2 + $0x84] ss:$8 sps:$4 sm:$0xff]   ;;  %v2890_v34 = vld [vmem:[%s4338_s2 + $0x80] ss:$8 sps:$4 sm:$0xff]  }
   0xc   :  { %962 = vmatpush1.bf16.msra.mxu1 %v2855_v11  ;;  %461 = vmatprep.subr.bf16.mxu0 %v2856_v12  ;;  %v2885_v31 = vld [vmem:[%s4339_s4 + $0x70] ss:$8 sps:$4 sm:$0xff]   ;;  %v2888_v33 = vld [vmem:[%s4339_s4 + $0x84] ss:$8 sps:$4 sm:$0xff]   ;;  %v2891_v35 = vld [vmem:[%s4339_s4 + $0x80] ss:$8 sps:$4 sm:$0xff]  }
   0xd   :  { %963 = vmatprep.subr.bf16.mxu1 %v2858_v13  ;;  %v2892_v36 = vld [vmem:[%s4338_s2 + $0x94] ss:$8 sps:$4 sm:$0xff]   ;;  %v2896_v38 = vld [vmem:[%s4338_s2 + $0x90] ss:$8 sps:$4 sm:$0xff]   ;;  %v2898_v40 = vld [vmem:[%s4338_s2 + $0xa4] ss:$8 sps:$4 sm:$0xff]  }
   0xe   :  { %v2894_v37 = vld [vmem:[%s4339_s4 + $0x94] ss:$8 sps:$4 sm:$0xff]   ;;  %v2897_v39 = vld [vmem:[%s4339_s4 + $0x90] ss:$8 sps:$4 sm:$0xff]   ;;  %v2900_v41 = vld [vmem:[%s4339_s4 + $0xa4] ss:$8 sps:$4 sm:$0xff]  }
   0xf   :  { %462 = vmatpush1.bf16.msra.mxu0 %v2860_v14  ;;  %v2902_v42 = vld [vmem:[%s4338_s2 + $0xa0] ss:$8 sps:$4 sm:$0xff]   ;;  %v2904_v44 = vld [vmem:[%s4338_s2 + $0xb4] ss:$8 sps:$4 sm:$0xff]   ;;  %v2908_v48 = vld [vmem:[%s4338_s2 + $0xb0] ss:$8 sps:$4 sm:$0xff]  }
  0x10   :  { %964 = vmatpush1.bf16.msra.mxu1 %v2861_v15  ;;  %463 = vmatprep.subr.bf16.mxu0 %v2862_v16  ;;  %v2903_v43 = vld [vmem:[%s4339_s4 + $0xa0] ss:$8 sps:$4 sm:$0xff]   ;;  %v2906_v45 = vld [vmem:[%s4339_s4 + $0xb4] ss:$8 sps:$4 sm:$0xff]   ;;  %v2909_v49 = vld [vmem:[%s4339_s4 + $0xb0] ss:$8 sps:$4 sm:$0xff]  }
  0x11   :  { %965 = vmatprep.subr.bf16.mxu1 %v2864_v17  ;;  %v36_v46 = vld [vmem:[%s4340_s0 + $0x8] sm:$0xff]  ;;  %v2916_v55 = vld [vmem:[%s4338_s2 + $0xd4] ss:$8 sps:$4 sm:$0xff]   ;;  %v2920_v57 = vld [vmem:[%s4338_s2 + $0xd0] ss:$8 sps:$4 sm:$0xff]  }
  0x12   :  { %v40_v47 = vld [vmem:[%s4340_s0 + $0x28] sm:$0xff]  ;;  %v2918_v56 = vld [vmem:[%s4339_s4 + $0xd4] ss:$8 sps:$4 sm:$0xff]   ;;  %v2921_v58 = vld [vmem:[%s4339_s4 + $0xd0] ss:$8 sps:$4 sm:$0xff]  }
  0x13   :  { %464 = vmatpush1.bf16.msra.mxu0 %v2866_v18  ;;  %v3468_v50 = vpack.c.bf16 %v40_v47, %v36_v46  ;;  %v2910_v51 = vld [vmem:[%s4338_s2 + $0xc4] ss:$8 sps:$4 sm:$0xff]   ;;  %v2914_v53 = vld [vmem:[%s4338_s2 + $0xc0] ss:$8 sps:$4 sm:$0xff]   ;;  %v2928_v63 = vld [vmem:[%s4338_s2 + $0xf4] ss:$8 sps:$4 sm:$0xff]  }
  0x14   :  { %966 = vmatpush1.bf16.msra.mxu1 %v2867_v19  ;;  %465 = vmatprep.subr.bf16.mxu0 %v2868_v20  ;;  %v2912_v52 = vld [vmem:[%s4339_s4 + $0xc4] ss:$8 sps:$4 sm:$0xff]   ;;  %v2915_v54 = vld [vmem:[%s4339_s4 + $0xc0] ss:$8 sps:$4 sm:$0xff]   ;;  %v2930_v0 = vld [vmem:[%s4339_s4 + $0xf4] ss:$8 sps:$4 sm:$0xff]  }
  0x15   :  { %967 = vmatprep.subr.bf16.mxu1 %v2870_v21  ;;  %487 = vmatprep.mubr.bf16.mxu0 %v3468_v50  ;;  %v2922_v59 = vld [vmem:[%s4338_s2 + $0xe4] ss:$8 sps:$4 sm:$0xff]   ;;  %v2926_v61 = vld [vmem:[%s4338_s2 + $0xe0] ss:$8 sps:$4 sm:$0xff]   ;;  %v2932_v1 = vld [vmem:[%s4338_s2 + $0xf0] ss:$8 sps:$4 sm:$0xff]  }
  0x16   :  { %989 = vmatprep.mubr.bf16.mxu1 %v3468_v50  ;;  %v2924_v60 = vld [vmem:[%s4339_s4 + $0xe4] ss:$8 sps:$4 sm:$0xff]   ;;  %v2927_v62 = vld [vmem:[%s4339_s4 + $0xe0] ss:$8 sps:$4 sm:$0xff]   ;;  %v2933_v2 = vld [vmem:[%s4339_s4 + $0xf0] ss:$8 sps:$4 sm:$0xff]  }
  0x17   :  { %466 = vmatpush1.bf16.msra.mxu0 %v2872_v22  ;;  %v2936_v3 = vld [vmem:[%s4338_s2 + $0x104] ss:$8 sps:$4 sm:$0xff]   ;;  %v2934_v7 = vld [vmem:[%s4338_s2 + $0x100] ss:$8 sps:$4 sm:$0xff]   ;;  %v2942_v10 = vld [vmem:[%s4338_s2 + $0x114] ss:$8 sps:$4 sm:$0xff]  }
  0x18   :  { %968 = vmatpush1.bf16.msra.mxu1 %v2873_v23  ;;  %467 = vmatprep.subr.bf16.mxu0 %v2874_v24  ;;  %v35_v4 = vld [vmem:[%s4340_s0] sm:$0xff]  ;;  %v2945_v11 = vld [vmem:[%s4339_s4 + $0x114] ss:$8 sps:$4 sm:$0xff]   ;;  %v2940_v12 = vld [vmem:[%s4338_s2 + $0x110] ss:$8 sps:$4 sm:$0xff]  }
  0x19   :  { %969 = vmatprep.subr.bf16.mxu1 %v2876_v25  ;;  %v39_v5 = vld [vmem:[%s4340_s0 + $0x20] sm:$0xff]  ;;  %v2943_v13 = vld [vmem:[%s4339_s4 + $0x110] ss:$8 sps:$4 sm:$0xff]   ;;  %v2954_v18 = vld [vmem:[%s4338_s2 + $0x134] ss:$8 sps:$4 sm:$0xff]  }
  0x1a   :  { %v2939_v6 = vld [vmem:[%s4339_s4 + $0x104] ss:$8 sps:$4 sm:$0xff]   ;;  %v2937_v8 = vld [vmem:[%s4339_s4 + $0x100] ss:$8 sps:$4 sm:$0xff]   ;;  %v3538_v9 = vpack.c.bf16 %v39_v5, %v35_v4  ;;  %v2957_v19 = vld [vmem:[%s4339_s4 + $0x134] ss:$8 sps:$4 sm:$0xff]  }
  0x1b   :  { %468 = vmatpush1.bf16.msra.mxu0 %v2878_v26  ;;  %v2948_v14 = vld [vmem:[%s4338_s2 + $0x124] ss:$8 sps:$4 sm:$0xff]   ;;  %v2946_v16 = vld [vmem:[%s4338_s2 + $0x120] ss:$8 sps:$4 sm:$0xff]   ;;  %v2952_v20 = vld [vmem:[%s4338_s2 + $0x130] ss:$8 sps:$4 sm:$0xff]  }
  0x1c   :  { %970 = vmatpush1.bf16.msra.mxu1 %v2879_v27  ;;  %469 = vmatprep.subr.bf16.mxu0 %v2880_v28  ;;  %v2951_v15 = vld [vmem:[%s4339_s4 + $0x124] ss:$8 sps:$4 sm:$0xff]   ;;  %v2949_v17 = vld [vmem:[%s4339_s4 + $0x120] ss:$8 sps:$4 sm:$0xff]   ;;  %v2955_v21 = vld [vmem:[%s4339_s4 + $0x130] ss:$8 sps:$4 sm:$0xff]  }
  0x1d   :  { %971 = vmatprep.subr.bf16.mxu1 %v2882_v29  ;;  %v2960_v22 = vld [vmem:[%s4338_s2 + $0x144] ss:$8 sps:$4 sm:$0xff]   ;;  %v2958_v24 = vld [vmem:[%s4338_s2 + $0x140] ss:$8 sps:$4 sm:$0xff]   ;;  %v2966_v26 = vld [vmem:[%s4338_s2 + $0x154] ss:$8 sps:$4 sm:$0xff]  }
  0x1e   :  { %v2963_v23 = vld [vmem:[%s4339_s4 + $0x144] ss:$8 sps:$4 sm:$0xff]   ;;  %v2961_v25 = vld [vmem:[%s4339_s4 + $0x140] ss:$8 sps:$4 sm:$0xff]   ;;  %v2969_v27 = vld [vmem:[%s4339_s4 + $0x154] ss:$8 sps:$4 sm:$0xff]  }
  0x1f   :  { %470 = vmatpush1.bf16.msra.mxu0 %v2884_v30  ;;  %v44_v28 = vld [vmem:[%s4340_s0 + $0x48] sm:$0xff]  ;;  %v2979_v46 = vld [vmem:[%s4339_s4 + $0x170] ss:$8 sps:$4 sm:$0xff]   ;;  %v3014_v4 = vld [vmem:[%s4338_s2 + $0x1d4] ss:$8 sps:$4 sm:$0xff]  }
  0x20   :  { %972 = vmatpush1.bf16.msra.mxu1 %v2885_v31  ;;  %471 = vmatprep.subr.bf16.mxu0 %v2886_v32  ;;  %v48_v29 = vld [vmem:[%s4340_s0 + $0x68] sm:$0xff]  ;;  %v43_v31 = vld [vmem:[%s4340_s0 + $0x40] sm:$0xff]  ;;  %v3017_v5 = vld [vmem:[%s4339_s4 + $0x1d4] ss:$8 sps:$4 sm:$0xff]  }
  0x21   :  { %973 = vmatprep.subr.bf16.mxu1 %v2888_v33  ;;  %v3602_v30 = vpack.c.bf16 %v48_v29, %v44_v28  ;;  %v47_v32 = vld [vmem:[%s4340_s0 + $0x60] sm:$0xff]  ;;  %v2964_v33 = vld [vmem:[%s4338_s2 + $0x150] ss:$8 sps:$4 sm:$0xff]  }
  0x22   :  { %v2984_v47 = vld [vmem:[%s4338_s2 + $0x184] ss:$8 sps:$4 sm:$0xff]   ;;  %v3033_v28 = vld [vmem:[%s4341_s6 + $0x10] ss:$8 sps:$4 sm:$0xff]  }
  0x23   :  { %472 = vmatpush1.bf16.msra.mxu0 %v2890_v34  ;;  %v2967_v34 = vld [vmem:[%s4339_s4 + $0x150] ss:$8 sps:$4 sm:$0xff]   ;;  %v3038_v29 = vld [vmem:[%s4341_s6 + $0x24] ss:$8 sps:$4 sm:$0xff]  }
  0x24   :  { %974 = vmatpush1.bf16.msra.mxu1 %v2891_v35  ;;  %473 = vmatprep.subr.bf16.mxu0 %v2892_v36  ;;  %v3616_v35 = vpack.c.bf16 %v47_v32, %v43_v31  ;;  %v2972_v36 = vld [vmem:[%s4338_s2 + $0x164] ss:$8 sps:$4 sm:$0xff]   ;;  %v3036_v32 = vld [vmem:[%s4341_s6 + $0x20] ss:$8 sps:$4 sm:$0xff]  }
  0x25   :  { %975 = vmatprep.subr.bf16.mxu1 %v2894_v37  ;;  %v2975_v37 = vld [vmem:[%s4339_s4 + $0x164] ss:$8 sps:$4 sm:$0xff]  }
  0x27   :  { %474 = vmatpush1.bf16.msra.mxu0 %v2896_v38  ;;  %v2970_v38 = vld [vmem:[%s4338_s2 + $0x160] ss:$8 sps:$4 sm:$0xff]  }
  0x28   :  { %976 = vmatpush1.bf16.msra.mxu1 %v2897_v39  ;;  %475 = vmatprep.subr.bf16.mxu0 %v2898_v40  ;;  %v2973_v39 = vld [vmem:[%s4339_s4 + $0x160] ss:$8 sps:$4 sm:$0xff]   ;;  %v38_v40 = vld [vmem:[%s4340_s0 + $0x18] sm:$0xff] }
  0x29   :  { %977 = vmatprep.subr.bf16.mxu1 %v2900_v41  ;;  %v42_v41 = vld [vmem:[%s4340_s0 + $0x38] sm:$0xff] }
  0x2b   :  { %476 = vmatpush1.bf16.msra.mxu0 %v2902_v42  ;;  %v2978_v42 = vld [vmem:[%s4338_s2 + $0x174] ss:$8 sps:$4 sm:$0xff]  }
  0x2c   :  { %978 = vmatpush1.bf16.msra.mxu1 %v2903_v43  ;;  %477 = vmatprep.subr.bf16.mxu0 %v2904_v44  ;;  %v2981_v43 = vld [vmem:[%s4339_s4 + $0x174] ss:$8 sps:$4 sm:$0xff]   ;;  %v3646_v44 = vpack.c.bf16 %v42_v41, %v38_v40  ;;  %v3048_v40 = vld [vmem:[%s4341_s6 + $0x60] ss:$8 sps:$4 sm:$0xff]  }
  0x2d   :  { %979 = vmatprep.subr.bf16.mxu1 %v2906_v45  ;;  %v2976_v45 = vld [vmem:[%s4338_s2 + $0x170] ss:$8 sps:$4 sm:$0xff]   ;;  %v3053_v41 = vld [vmem:[%s4341_s6 + $0x74] ss:$8 sps:$4 sm:$0xff]  }
  0x2f   :  { %478 = vmatpush1.bf16.msra.mxu0 %v2908_v48  ;;  %v2987_v48 = vld [vmem:[%s4339_s4 + $0x184] ss:$8 sps:$4 sm:$0xff]  }
  0x30   :  { %980 = vmatpush1.bf16.msra.mxu1 %v2909_v49  ;;  %479 = vmatprep.subr.bf16.mxu0 %v2910_v51  ;;  %v2982_v49 = vld [vmem:[%s4338_s2 + $0x180] ss:$8 sps:$4 sm:$0xff]  }
  0x31   :  { %981 = vmatprep.subr.bf16.mxu1 %v2912_v52  ;;  %v2985_v51 = vld [vmem:[%s4339_s4 + $0x180] ss:$8 sps:$4 sm:$0xff]   ;;  %v2990_v52 = vld [vmem:[%s4338_s2 + $0x194] ss:$8 sps:$4 sm:$0xff]  }
  0x33   :  { %480 = vmatpush1.bf16.msra.mxu0 %v2914_v53  ;;  %v2993_v53 = vld [vmem:[%s4339_s4 + $0x194] ss:$8 sps:$4 sm:$0xff]  }
  0x34   :  { %982 = vmatpush1.bf16.msra.mxu1 %v2915_v54  ;;  %481 = vmatprep.subr.bf16.mxu0 %v2916_v55  ;;  %v2988_v54 = vld [vmem:[%s4338_s2 + $0x190] ss:$8 sps:$4 sm:$0xff]  }
  0x35   :  { %983 = vmatprep.subr.bf16.mxu1 %v2918_v56  ;;  %v2991_v55 = vld [vmem:[%s4339_s4 + $0x190] ss:$8 sps:$4 sm:$0xff]   ;;  %v2996_v56 = vld [vmem:[%s4338_s2 + $0x1a4] ss:$8 sps:$4 sm:$0xff]  }
  0x37   :  { %482 = vmatpush1.bf16.msra.mxu0 %v2920_v57  ;;  %v2999_v57 = vld [vmem:[%s4339_s4 + $0x1a4] ss:$8 sps:$4 sm:$0xff]  }
  0x38   :  { %984 = vmatpush1.bf16.msra.mxu1 %v2921_v58  ;;  %483 = vmatprep.subr.bf16.mxu0 %v2922_v59  ;;  %v2994_v58 = vld [vmem:[%s4338_s2 + $0x1a0] ss:$8 sps:$4 sm:$0xff]  }
  0x39   :  { %985 = vmatprep.subr.bf16.mxu1 %v2924_v60  ;;  %v2997_v59 = vld [vmem:[%s4339_s4 + $0x1a0] ss:$8 sps:$4 sm:$0xff]   ;;  %v3002_v60 = vld [vmem:[%s4338_s2 + $0x1b4] ss:$8 sps:$4 sm:$0xff]  }
  0x3b   :  { %484 = vmatpush1.bf16.msra.mxu0 %v2926_v61  ;;  %v3005_v61 = vld [vmem:[%s4339_s4 + $0x1b4] ss:$8 sps:$4 sm:$0xff]  }
  0x3c   :  { %986 = vmatpush1.bf16.msra.mxu1 %v2927_v62  ;;  %485 = vmatprep.subr.bf16.mxu0 %v2928_v63  ;;  %v3000_v62 = vld [vmem:[%s4338_s2 + $0x1b0] ss:$8 sps:$4 sm:$0xff]  }
  0x3d   :  { %987 = vmatprep.subr.bf16.mxu1 %v2930_v0  ;;  %v3003_v63 = vld [vmem:[%s4339_s4 + $0x1b0] ss:$8 sps:$4 sm:$0xff]   ;;  %v3008_v0 = vld [vmem:[%s4338_s2 + $0x1c4] ss:$8 sps:$4 sm:$0xff]  }
  0x3f   :  { %486 = vmatpush1.bf16.msra.mxu0 %v2932_v1  ;;  %v3011_v1 = vld [vmem:[%s4339_s4 + $0x1c4] ss:$8 sps:$4 sm:$0xff]  }
  0x40   :  { %988 = vmatpush1.bf16.msra.mxu1 %v2933_v2  ;;  %508 = vmatprep.subr.bf16.mxu0 %v2936_v3  ;;  %v3006_v2 = vld [vmem:[%s4338_s2 + $0x1c0] ss:$8 sps:$4 sm:$0xff]  }
  0x41   :  { %1010 = vmatprep.subr.bf16.mxu1 %v2939_v6  ;;  %v3009_v3 = vld [vmem:[%s4339_s4 + $0x1c0] ss:$8 sps:$4 sm:$0xff]   ;;  %v3012_v6 = vld [vmem:[%s4338_s2 + $0x1d0] ss:$8 sps:$4 sm:$0xff]  }
  0x42   :  { %488 = vmatmul.mubr.bf16.vlgmr.msra.gmra.mrb[0].mxu0 %v3538_v9 }
  0x43   :  { %990 = vmatmul.mubr.bf16.vlgmr.msra.gmra.mrb[0].mxu1 %v3538_v9  ;;  %509 = vmatpush1.bf16.msra.mxu0 %v2934_v7  ;;  %v3015_v7 = vld [vmem:[%s4339_s4 + $0x1d0] ss:$8 sps:$4 sm:$0xff]  }
  0x44   :  { %1011 = vmatpush1.bf16.msra.mxu1 %v2937_v8  ;;  %510 = vmatprep.subr.bf16.mxu0 %v2942_v10  ;;  %v3020_v8 = vld [vmem:[%s4338_s2 + $0x1e4] ss:$8 sps:$4 sm:$0xff]  }
  0x45   :  { %1012 = vmatprep.subr.bf16.mxu1 %v2945_v11  ;;  %497 = vmatprep.mubr.bf16.mxu0 %v3602_v30  ;;  %v3023_v10 = vld [vmem:[%s4339_s4 + $0x1e4] ss:$8 sps:$4 sm:$0xff]   ;;  %v3018_v11 = vld [vmem:[%s4338_s2 + $0x1e0] ss:$8 sps:$4 sm:$0xff]  }
  0x46   :  { %999 = vmatprep.mubr.bf16.mxu1 %v3602_v30 }
  0x47   :  { %511 = vmatpush1.bf16.msra.mxu0 %v2940_v12  ;;  %v3021_v12 = vld [vmem:[%s4339_s4 + $0x1e0] ss:$8 sps:$4 sm:$0xff]  }
  0x48   :  { %1013 = vmatpush1.bf16.msra.mxu1 %v2943_v13  ;;  %512 = vmatprep.subr.bf16.mxu0 %v2948_v14  ;;  %v3026_v13 = vld [vmem:[%s4338_s2 + $0x1f4] ss:$8 sps:$4 sm:$0xff]  }
  0x49   :  { %1014 = vmatprep.subr.bf16.mxu1 %v2951_v15  ;;  %v3029_v14 = vld [vmem:[%s4339_s4 + $0x1f4] ss:$8 sps:$4 sm:$0xff]   ;;  %v3024_v15 = vld [vmem:[%s4338_s2 + $0x1f0] ss:$8 sps:$4 sm:$0xff]  }
  0x4a   :  { %498 = vmatmul.mubr.bf16.gmra.mrb[4].mxu0 %v3616_v35 }
  0x4b   :  { %513 = vmatpush1.bf16.msra.mxu0 %v2946_v16  ;;  %1000 = vmatmul.mubr.bf16.gmra.mrb[4].mxu1 %v3616_v35  ;;  %v3027_v16 = vld [vmem:[%s4339_s4 + $0x1f0] ss:$8 sps:$4 sm:$0xff]  }
  0x4c   :  { %1015 = vmatpush1.bf16.msra.mxu1 %v2949_v17  ;;  %514 = vmatprep.subr.bf16.mxu0 %v2954_v18  ;;  %v37_v17 = vld [vmem:[%s4340_s0 + $0x10] sm:$0xff] }
  0x4d   :  { %1016 = vmatprep.subr.bf16.mxu1 %v2957_v19  ;;  %540 = vmatprep.mubr.bf16.mxu0 %v3646_v44  ;;  %v41_v18 = vld [vmem:[%s4340_s0 + $0x30] sm:$0xff]  ;;  %v46_v19 = vld [vmem:[%s4340_s0 + $0x58] sm:$0xff] }
  0x4e   :  { %1042 = vmatprep.mubr.bf16.mxu1 %v3646_v44 }
  0x4f   :  { %515 = vmatpush1.bf16.msra.mxu0 %v2952_v20  ;;  %v50_v20 = vld [vmem:[%s4340_s0 + $0x78] sm:$0xff] }
  0x50   :  { %1017 = vmatpush1.bf16.msra.mxu1 %v2955_v21  ;;  %516 = vmatprep.subr.bf16.mxu0 %v2960_v22  ;;  %v3032_v21 = vld [vmem:[%s4341_s6 + $0x4] ss:$8 sps:$4 sm:$0xff]   ;;  %v3767_v22 = vpack.c.bf16 %v41_v18, %v37_v17  ;;  %v3111_v17 = vld [vmem:[%s4341_s6 + $0x1b0] ss:$8 sps:$4 sm:$0xff]  }
  0x51   :  { %1018 = vmatprep.subr.bf16.mxu1 %v2963_v23  ;;  %v3769_v23 = vpack.c.bf16 %v50_v20, %v46_v19  ;;  %v3116_v18 = vld [vmem:[%s4341_s6 + $0x1c4] ss:$8 sps:$4 sm:$0xff]   ;;  %v3114_v19 = vld [vmem:[%s4341_s6 + $0x1c0] ss:$8 sps:$4 sm:$0xff]   ;;  %v3119_v20 = vld [vmem:[%s4341_s6 + $0x1d4] ss:$8 sps:$4 sm:$0xff]  }
  0x53   :  { %517 = vmatpush1.bf16.msra.mxu0 %v2958_v24  ;;  %v3030_v24 = vld [vmem:[%s4341_s6] ss:$8 sps:$4 sm:$0xff]  }
  0x54   :  { %1019 = vmatpush1.bf16.msra.mxu1 %v2961_v25  ;;  %518 = vmatprep.subr.bf16.mxu0 %v2966_v26  ;;  %v3035_v25 = vld [vmem:[%s4341_s6 + $0x14] ss:$8 sps:$4 sm:$0xff]  }
  0x55   :  { %1020 = vmatprep.subr.bf16.mxu1 %v2969_v27  ;;  %v45_v26 = vld [vmem:[%s4340_s0 + $0x50] sm:$0xff] }
  0x56   :  { %v49_v27 = vld [vmem:[%s4340_s0 + $0x70] sm:$0xff] }
  0x57   :  { %519 = vmatpush1.bf16.msra.mxu0 %v2964_v33  ;;  %v3793_v31 = vpack.c.bf16 %v49_v27, %v45_v26  ;;  %v3041_v33 = vld [vmem:[%s4341_s6 + $0x34] ss:$8 sps:$4 sm:$0xff]   ;;  %v3123_v27 = vld [vmem:[%s4341_s6 + $0x1f0] ss:$8 sps:$4 sm:$0xff]  }
  0x58   :  { %1021 = vmatpush1.bf16.msra.mxu1 %v2967_v34  ;;  %520 = vmatprep.subr.bf16.mxu0 %v2972_v36  ;;  %v3039_v34 = vld [vmem:[%s4341_s6 + $0x30] ss:$8 sps:$4 sm:$0xff]   ;;  %v3044_v36 = vld [vmem:[%s4341_s6 + $0x44] ss:$8 sps:$4 sm:$0xff]   ;;  %v3125_v26 = vld [vmem:[%s4341_s6 + $0x1f4] ss:$8 sps:$4 sm:$0xff]  }
  0x59   :  { %1022 = vmatprep.subr.bf16.mxu1 %v2975_v37  ;;  %v3042_v37 = vld [vmem:[%s4341_s6 + $0x40] ss:$8 sps:$4 sm:$0xff]  }
  0x5b   :  { %521 = vmatpush1.bf16.msra.mxu0 %v2970_v38  ;;  %v3045_v38 = vld [vmem:[%s4341_s6 + $0x50] ss:$8 sps:$4 sm:$0xff]  }
  0x5c   :  { %1023 = vmatpush1.bf16.msra.mxu1 %v2973_v39  ;;  %522 = vmatprep.subr.bf16.mxu0 %v2978_v42  ;;  %v3050_v39 = vld [vmem:[%s4341_s6 + $0x64] ss:$8 sps:$4 sm:$0xff]   ;;  %v3051_v42 = vld [vmem:[%s4341_s6 + $0x70] ss:$8 sps:$4 sm:$0xff]  }
  0x5d   :  { %1024 = vmatprep.subr.bf16.mxu1 %v2981_v43  ;;  %v3056_v43 = vld [vmem:[%s4341_s6 + $0x84] ss:$8 sps:$4 sm:$0xff]  }
  0x5f   :  { %523 = vmatpush1.bf16.msra.mxu0 %v2976_v45  ;;  %v3054_v45 = vld [vmem:[%s4341_s6 + $0x80] ss:$8 sps:$4 sm:$0xff]  }
  0x60   :  { %1025 = vmatpush1.bf16.msra.mxu1 %v2979_v46  ;;  %524 = vmatprep.subr.bf16.mxu0 %v2984_v47  ;;  %v3059_v46 = vld [vmem:[%s4341_s6 + $0x94] ss:$8 sps:$4 sm:$0xff]   ;;  %v3057_v47 = vld [vmem:[%s4341_s6 + $0x90] ss:$8 sps:$4 sm:$0xff]  }
  0x61   :  { %1026 = vmatprep.subr.bf16.mxu1 %v2987_v48  ;;  %v3062_v48 = vld [vmem:[%s4341_s6 + $0xa4] ss:$8 sps:$4 sm:$0xff]  }
  0x63   :  { %525 = vmatpush1.bf16.msra.mxu0 %v2982_v49  ;;  %v3060_v49 = vld [vmem:[%s4341_s6 + $0xa0] ss:$8 sps:$4 sm:$0xff]  }
  0x64   :  { %1027 = vmatpush1.bf16.msra.mxu1 %v2985_v51  ;;  %526 = vmatprep.subr.bf16.mxu0 %v2990_v52  ;;  %v3065_v51 = vld [vmem:[%s4341_s6 + $0xb4] ss:$8 sps:$4 sm:$0xff]   ;;  %v3063_v52 = vld [vmem:[%s4341_s6 + $0xb0] ss:$8 sps:$4 sm:$0xff]  }
  0x65   :  { %1028 = vmatprep.subr.bf16.mxu1 %v2993_v53  ;;  %v3068_v53 = vld [vmem:[%s4341_s6 + $0xc4] ss:$8 sps:$4 sm:$0xff]  }
  0x67   :  { %527 = vmatpush1.bf16.msra.mxu0 %v2988_v54  ;;  %v3066_v54 = vld [vmem:[%s4341_s6 + $0xc0] ss:$8 sps:$4 sm:$0xff]  }
  0x68   :  { %1029 = vmatpush1.bf16.msra.mxu1 %v2991_v55  ;;  %528 = vmatprep.subr.bf16.mxu0 %v2996_v56  ;;  %v3071_v55 = vld [vmem:[%s4341_s6 + $0xd4] ss:$8 sps:$4 sm:$0xff]   ;;  %v3069_v56 = vld [vmem:[%s4341_s6 + $0xd0] ss:$8 sps:$4 sm:$0xff]  }
  0x69   :  { %1030 = vmatprep.subr.bf16.mxu1 %v2999_v57  ;;  %v3074_v57 = vld [vmem:[%s4341_s6 + $0xe4] ss:$8 sps:$4 sm:$0xff]  }
  0x6b   :  { %529 = vmatpush1.bf16.msra.mxu0 %v2994_v58  ;;  %v3072_v58 = vld [vmem:[%s4341_s6 + $0xe0] ss:$8 sps:$4 sm:$0xff]  }
  0x6c   :  { %1031 = vmatpush1.bf16.msra.mxu1 %v2997_v59  ;;  %530 = vmatprep.subr.bf16.mxu0 %v3002_v60  ;;  %v3077_v59 = vld [vmem:[%s4341_s6 + $0xf4] ss:$8 sps:$4 sm:$0xff]   ;;  %v3075_v60 = vld [vmem:[%s4341_s6 + $0xf0] ss:$8 sps:$4 sm:$0xff]  }
  0x6d   :  { %1032 = vmatprep.subr.bf16.mxu1 %v3005_v61  ;;  %v3080_v61 = vld [vmem:[%s4341_s6 + $0x104] ss:$8 sps:$4 sm:$0xff]  }
  0x6f   :  { %531 = vmatpush1.bf16.msra.mxu0 %v3000_v62  ;;  %v3078_v62 = vld [vmem:[%s4341_s6 + $0x100] ss:$8 sps:$4 sm:$0xff]  }
  0x70   :  { %1033 = vmatpush1.bf16.msra.mxu1 %v3003_v63  ;;  %532 = vmatprep.subr.bf16.mxu0 %v3008_v0  ;;  %v3083_v63 = vld [vmem:[%s4341_s6 + $0x114] ss:$8 sps:$4 sm:$0xff]   ;;  %v3081_v0 = vld [vmem:[%s4341_s6 + $0x110] ss:$8 sps:$4 sm:$0xff]  }
  0x71   :  { %1034 = vmatprep.subr.bf16.mxu1 %v3011_v1  ;;  %v3086_v1 = vld [vmem:[%s4341_s6 + $0x124] ss:$8 sps:$4 sm:$0xff]  }
  0x73   :  { %533 = vmatpush1.bf16.msra.mxu0 %v3006_v2  ;;  %v3084_v2 = vld [vmem:[%s4341_s6 + $0x120] ss:$8 sps:$4 sm:$0xff]  }
  0x74   :  { %1035 = vmatpush1.bf16.msra.mxu1 %v3009_v3  ;;  %534 = vmatprep.subr.bf16.mxu0 %v3014_v4  ;;  %v3092_v3 = vld [vmem:[%s4341_s6 + $0x144] ss:$8 sps:$4 sm:$0xff]   ;;  %v3090_v4 = vld [vmem:[%s4341_s6 + $0x140] ss:$8 sps:$4 sm:$0xff]  }
  0x75   :  { %1036 = vmatprep.subr.bf16.mxu1 %v3017_v5  ;;  %v3098_v5 = vld [vmem:[%s4341_s6 + $0x164] ss:$8 sps:$4 sm:$0xff]  }
  0x77   :  { %535 = vmatpush1.bf16.msra.mxu0 %v3012_v6  ;;  %v3096_v6 = vld [vmem:[%s4341_s6 + $0x160] ss:$8 sps:$4 sm:$0xff]  }
  0x78   :  { %1037 = vmatpush1.bf16.msra.mxu1 %v3015_v7  ;;  %536 = vmatprep.subr.bf16.mxu0 %v3020_v8  ;;  %v3101_v7 = vld [vmem:[%s4341_s6 + $0x174] ss:$8 sps:$4 sm:$0xff]   ;;  %v3099_v8 = vld [vmem:[%s4341_s6 + $0x170] ss:$8 sps:$4 sm:$0xff]  }
  0x79   :  { %1038 = vmatprep.subr.bf16.mxu1 %v3023_v10  ;;  %v3104_v10 = vld [vmem:[%s4341_s6 + $0x184] ss:$8 sps:$4 sm:$0xff]  }
  0x7b   :  { %537 = vmatpush1.bf16.msra.mxu0 %v3018_v11  ;;  %v3102_v11 = vld [vmem:[%s4341_s6 + $0x180] ss:$8 sps:$4 sm:$0xff]  }
  0x7c   :  { %1039 = vmatpush1.bf16.msra.mxu1 %v3021_v12  ;;  %538 = vmatprep.subr.bf16.mxu0 %v3026_v13  ;;  %v3107_v12 = vld [vmem:[%s4341_s6 + $0x194] ss:$8 sps:$4 sm:$0xff]   ;;  %v3105_v13 = vld [vmem:[%s4341_s6 + $0x190] ss:$8 sps:$4 sm:$0xff]  }
  0x7d   :  { %1040 = vmatprep.subr.bf16.mxu1 %v3029_v14  ;;  %v3110_v14 = vld [vmem:[%s4341_s6 + $0x1a4] ss:$8 sps:$4 sm:$0xff]  }
  0x7f   :  { %539 = vmatpush1.bf16.msra.mxu0 %v3024_v15  ;;  %v3108_v15 = vld [vmem:[%s4341_s6 + $0x1a0] ss:$8 sps:$4 sm:$0xff]  }
  0x80   :  { %1041 = vmatpush1.bf16.msra.mxu1 %v3027_v16  ;;  %1459 = vmatprep.subr.bf16.mxu0 %v3032_v21  ;;  %v3113_v16 = vld [vmem:[%s4341_s6 + $0x1b4] ss:$8 sps:$4 sm:$0xff]   ;;  %v3117_v21 = vld [vmem:[%s4341_s6 + $0x1d0] ss:$8 sps:$4 sm:$0xff]  }
  0x82   :  { %541 = vmatmul.mubr.bf16.vlgmr.msra.gmra.mrb[0].mxu0 %v3767_v22 }
  0x83   :  { %1043 = vmatmul.mubr.bf16.vlgmr.msra.gmra.mrb[0].mxu1 %v3767_v22  ;;  %550 = vmatprep.mubr.bf16.mxu0 %v3769_v23 }
  0x84   :  { %1052 = vmatprep.mubr.bf16.mxu1 %v3769_v23  ;;  %1460 = vmatpush1.bf16.msra.mxu0 %v3030_v24  ;;  %v3122_v24 = vld [vmem:[%s4341_s6 + $0x1e4] ss:$8 sps:$4 sm:$0xff]  }
  0x85   :  { %1461 = vmatprep.subr.bf16.mxu0 %v3035_v25  ;;  %v3120_v25 = vld [vmem:[%s4341_s6 + $0x1e0] ss:$8 sps:$4 sm:$0xff]  }
  0x88   :  { %1462 = vmatpush1.bf16.msra.mxu0 %v3033_v28  ;;  %v125_v28 = vlaneseq }
  0x89   :  { %1463 = vmatprep.subr.bf16.mxu0 %v3038_v29 }
  0x8a   :  { %551 = vmatmul.mubr.bf16.gmra.mrb[4].mxu0 %v3793_v31  ;;  %v3982_v29 = vshrl.u32 %v125_v28, 7 }
  0x8b   :  { %1053 = vmatmul.mubr.bf16.gmra.mrb[4].mxu1 %v3793_v31  ;;  %1491 = vmatprep.mubr.bf16.mxu0 %v3468_v50  ;;  %v3047_v50 = vld [vmem:[%s4341_s6 + $0x54] ss:$8 sps:$4 sm:$0xff]  }
  0x8c   :  { %1464 = vmatpush1.bf16.msra.mxu0 %v3036_v32  ;;  %v3985_v32 = vsub.s32 1, %v3982_v29 }
  0x8d   :  { %1465 = vmatprep.subr.bf16.mxu0 %v3041_v33  ;;  %v3988_v33 = vsub.s32 0, %v3982_v29 }
  0x90   :  { %1466 = vmatpush1.bf16.msra.mxu0 %v3039_v34  ;;  %v625_v34 = vld [vmem:[%s4342_s5] sm:$0x3] }
  0x91   :  { %1467 = vmatprep.subr.bf16.mxu0 %v3044_v36 }
  0x94   :  { %1468 = vmatpush1.bf16.msra.mxu0 %v3042_v37 }
  0x95   :  { %1469 = vmatprep.subr.bf16.mxu0 %v3047_v50 }
  0x98   :  { %1470 = vmatpush1.bf16.msra.mxu0 %v3045_v38 }
  0x99   :  { %1471 = vmatprep.subr.bf16.mxu0 %v3050_v39 }
  0x9c   :  { %1472 = vmatpush1.bf16.msra.mxu0 %v3048_v40 }
  0x9d   :  { %1473 = vmatprep.subr.bf16.mxu0 %v3053_v41 }
  0xa0   :  { %1474 = vmatpush1.bf16.msra.mxu0 %v3051_v42 }
  0xa1   :  { %1475 = vmatprep.subr.bf16.mxu0 %v3056_v43 }
  0xa4   :  { %1476 = vmatpush1.bf16.msra.mxu0 %v3054_v45 }
  0xa5   :  { %1477 = vmatprep.subr.bf16.mxu0 %v3059_v46 }
  0xa8   :  { %1478 = vmatpush1.bf16.msra.mxu0 %v3057_v47 }
  0xa9   :  { %1479 = vmatprep.subr.bf16.mxu0 %v3062_v48 }
  0xac   :  { %1480 = vmatpush1.bf16.msra.mxu0 %v3060_v49 }
  0xad   :  { %1481 = vmatprep.subr.bf16.mxu0 %v3065_v51 }
  0xb0   :  { %1482 = vmatpush1.bf16.msra.mxu0 %v3063_v52 }
  0xb1   :  { %1483 = vmatprep.subr.bf16.mxu0 %v3068_v53 }
  0xb4   :  { %1484 = vmatpush1.bf16.msra.mxu0 %v3066_v54 }
  0xb5   :  { %1485 = vmatprep.subr.bf16.mxu0 %v3071_v55 }
  0xb8   :  { %1486 = vmatpush1.bf16.msra.mxu0 %v3069_v56 }
  0xb9   :  { %1487 = vmatprep.subr.bf16.mxu0 %v3074_v57 }
  0xbc   :  { %1488 = vmatpush1.bf16.msra.mxu0 %v3072_v58 }
  0xbd   :  { %1489 = vmatprep.subr.bf16.mxu0 %v3077_v59 }
  0xc0   :  { %1490 = vmatpush1.bf16.msra.mxu0 %v3075_v60 }
  0xc1   :  { %1512 = vmatprep.subr.bf16.mxu0 %v3080_v61 }
  0xc3   :  { %1492 = vmatmul.mubr.bf16.vlgmr.msra.gmra.mrb[8].mxu0 %v3538_v9  ;;  %v3089_v9 = vld [vmem:[%s4341_s6 + $0x134] ss:$8 sps:$4 sm:$0xff]  }
  0xc4   :  { %1513 = vmatpush1.bf16.msra.mxu0 %v3078_v62  ;;  %1501 = vmatprep.mubr.bf16.mxu0 %v3602_v30  ;;  %v3087_v30 = vld [vmem:[%s4341_s6 + $0x130] ss:$8 sps:$4 sm:$0xff]  }
  0xc5   :  { %1514 = vmatprep.subr.bf16.mxu0 %v3083_v63 }
  0xc8   :  { %1515 = vmatpush1.bf16.msra.mxu0 %v3081_v0 }
  0xc9   :  { %1516 = vmatprep.subr.bf16.mxu0 %v3086_v1 }
  0xcb   :  { %1502 = vmatmul.mubr.bf16.gmra.mrb[12].mxu0 %v3616_v35  ;;  %v3095_v35 = vld [vmem:[%s4341_s6 + $0x154] ss:$8 sps:$4 sm:$0xff]  }
  0xcc   :  { %1517 = vmatpush1.bf16.msra.mxu0 %v3084_v2  ;;  %1544 = vmatprep.mubr.bf16.mxu0 %v3646_v44  ;;  %v3093_v44 = vld [vmem:[%s4341_s6 + $0x150] ss:$8 sps:$4 sm:$0xff]  }
  0xcd   :  { %1518 = vmatprep.subr.bf16.mxu0 %v3089_v9  ;;  %v630_v9 = vrot.slane %v625_v34, %v3988_v33 }
  0xd0   :  { %1519 = vmatpush1.bf16.msra.mxu0 %v3087_v30 }
  0xd1   :  { %1520 = vmatprep.subr.bf16.mxu0 %v3092_v3 }
  0xd4   :  { %1521 = vmatpush1.bf16.msra.mxu0 %v3090_v4 }
  0xd5   :  { %1522 = vmatprep.subr.bf16.mxu0 %v3095_v35 }
  0xd8   :  { %1523 = vmatpush1.bf16.msra.mxu0 %v3093_v44 }
  0xd9   :  { %1524 = vmatprep.subr.bf16.mxu0 %v3098_v5 }
  0xdc   :  { %1525 = vmatpush1.bf16.msra.mxu0 %v3096_v6 }
  0xdd   :  { %1526 = vmatprep.subr.bf16.mxu0 %v3101_v7 }
  0xe0   :  { %1527 = vmatpush1.bf16.msra.mxu0 %v3099_v8 }
  0xe1   :  { %1528 = vmatprep.subr.bf16.mxu0 %v3104_v10 }
  0xe4   :  { %1529 = vmatpush1.bf16.msra.mxu0 %v3102_v11 }
  0xe5   :  { %1530 = vmatprep.subr.bf16.mxu0 %v3107_v12 }
  0xe8   :  { %1531 = vmatpush1.bf16.msra.mxu0 %v3105_v13 }
  0xe9   :  { %1532 = vmatprep.subr.bf16.mxu0 %v3110_v14 }
  0xec   :  { %1533 = vmatpush1.bf16.msra.mxu0 %v3108_v15 }
  0xed   :  { %1534 = vmatprep.subr.bf16.mxu0 %v3113_v16  ;;  %v1127_v16 = vld [vmem:[%s4344_s7] sm:$0x3] }
  0xf0   :  { %1535 = vmatpush1.bf16.msra.mxu0 %v3111_v17  ;;  %v1132_v17 = vrot.slane %v1127_v16, %v3988_v33 }
  0xf1   :  { %1536 = vmatprep.subr.bf16.mxu0 %v3116_v18  ;;  %v1136_v18 = vrot.slane %v1127_v16, %v3985_v32 }
  0xf4   :  { %1537 = vmatpush1.bf16.msra.mxu0 %v3114_v19 }
  0xf5   :  { %1538 = vmatprep.subr.bf16.mxu0 %v3119_v20 }
  0xf8   :  { %1539 = vmatpush1.bf16.msra.mxu0 %v3117_v21 }
  0xf9   :  { %1540 = vmatprep.subr.bf16.mxu0 %v3122_v24 }
  0xfc   :  { %1541 = vmatpush1.bf16.msra.mxu0 %v3120_v25 }
  0xfd   :  { %1542 = vmatprep.subr.bf16.mxu0 %v3125_v26 }
 0x100   :  { %1543 = vmatpush1.bf16.msra.mxu0 %v3123_v27 }
 0x103   :  { %1545 = vmatmul.mubr.bf16.vlgmr.msra.gmra.mrb[8].mxu0 %v3767_v22  ;;  %v123_v22 = vld [vmem:[%s4343_s3] sm:$0x3] }
 0x104   :  { %1554 = vmatprep.mubr.bf16.mxu0 %v3769_v23  ;;  %v634_v23 = vrot.slane %v625_v34, %v3985_v32  ;;  %v132_v50 = vrot.slane %v123_v22, %v3985_v32 }
 0x10b   :  { %1555 = vmatmul.mubr.bf16.gmra.mrb[12].mxu0 %v3793_v31  ;;  %v128_v31 = vrot.slane %v123_v22, %v3988_v33 }
 0x155   :  { %v542_v36 = vpop.f32.mrb[0].mxu0 }
 0x156   :  { %v1044_v37 = vpop.f32.mrb[0].mxu1  ;;  %v544_v38 = vpop.f32.mrb[1].mxu0  ;;  %v2789_v43 = vadd.f32 %v542_v36, %v128_v31 }
 0x157   :  { %v1046_v39 = vpop.f32.mrb[1].mxu1  ;;  %v546_v41 = vpop.f32.mrb[2].mxu0  ;;  %v2790_v48 = vadd.f32 %v544_v38, %v132_v50  ;;  %v2797_v3 = vadd.f32 %v1044_v37, %v630_v9 }
 0x158   :  { %v2798_v40 = vadd.f32 %v1046_v39, %v634_v23  ;;  %v1048_v42 = vpop.f32.mrb[2].mxu1  ;;  %v2791_v45 = vadd.f32 %v546_v41, %v128_v31  ;;  %v548_v46 = vpop.f32.mrb[3].mxu0 }
 0x159   :  { %v1050_v47 = vpop.f32.mrb[3].mxu1  ;;  %v2792_v51 = vadd.f32 %v548_v46, %v132_v50  ;;  %v1565_v35 = vmul.f32 0.0625, %v2797_v3  ;;  %v2799_v44 = vadd.f32 %v1048_v42, %v630_v9  ;;  %v1574_v46 = vld [vmem:[%s4345_s1 + $0x8] sm:$0xff] }
 0x15a   :  { %v1566_v49 = vmul.f32 0.0625, %v2798_v40  ;;  %v2775_v52 = vpack.c.bf16 %v2791_v45, %v2789_v43  ;;  %v2800_v4 = vadd.f32 %v1050_v47, %v634_v23  ;;  %v1573_v43 = vld [vmem:[%s4345_s1] sm:$0xff] }
 0x15b   :  { %v2773_v53 = vpack.c.bf16 %v2792_v51, %v2790_v48  ;;  %v1567_v7 = vmul.f32 0.0625, %v2799_v44  ;;  %v2701_v45 = vadd.f32 -1.0, %v1573_v43  ;;  %v2702_v48 = vadd.f32 -1.0, %v1574_v46 }
 0x15c   :  { %1649 = vmatprep.mubr.f32.mxu0 %v1566_v49  ;;  %v1568_v5 = vmul.f32 0.0625, %v2800_v4  ;;  %v1575_v49 = vld [vmem:[%s4345_s1 + $0x10] sm:$0xff] }
 0x15d   :  { %v552_v54 = vpop.f32.mrb[4].mxu0  ;;  %2774 = vmatprep.subr.bf16.mxu0 %v2773_v53  ;;  %v1581_v47 = vmul.f32 1e+30, %v2701_v45 }
 0x15e   :  { %v1054_v55 = vpop.f32.mrb[4].mxu1  ;;  %v554_v56 = vpop.f32.mrb[5].mxu0  ;;  %2776 = vmatpush1.bf16.xpose.msra.mxu0 %v2775_v52  ;;  %v2793_v60 = vadd.f32 %v552_v54, %v128_v31  ;;  %v1582_v54 = vmul.f32 1e+30, %v2702_v48  ;;  %v3134_v48 = vld [vmem:[%s4346_s8 + $0x44] ss:$16 sps:$4 sm:$0xff]  }
 0x15f   :  { %v1056_v57 = vpop.f32.mrb[5].mxu1  ;;  %v556_v58 = vpop.f32.mrb[6].mxu0  ;;  %v2794_v0 = vadd.f32 %v554_v56, %v132_v50  ;;  %v2801_v8 = vadd.f32 %v1054_v55, %v630_v9  ;;  %v2703_v55 = vadd.f32 -1.0, %v1575_v49  ;;  %v1576_v56 = vld [vmem:[%s4345_s1 + $0x18] sm:$0xff] }
 0x160   :  { %v1058_v59 = vpop.f32.mrb[6].mxu1  ;;  %v2795_v61 = vadd.f32 %v556_v58, %v128_v31  ;;  %v558_v62 = vpop.f32.mrb[7].mxu0  ;;  %v2802_v6 = vadd.f32 %v1056_v57, %v634_v23 }
 0x161   :  { %v1060_v63 = vpop.f32.mrb[7].mxu1  ;;  %v2796_v1 = vadd.f32 %v558_v62, %v132_v50  ;;  %v1569_v12 = vmul.f32 0.0625, %v2801_v8  ;;  %v2803_v13 = vadd.f32 %v1058_v59, %v630_v9  ;;  %v2704_v62 = vadd.f32 -1.0, %v1576_v56 }
 0x162   :  { %v2779_v2 = vpack.c.bf16 %v2795_v61, %v2793_v60  ;;  %v1570_v10 = vmul.f32 0.0625, %v2802_v6  ;;  %v2804_v11 = vadd.f32 %v1060_v63, %v634_v23  ;;  %v1583_v61 = vmul.f32 1e+30, %v2703_v55  ;;  %v3135_v55 = vld [vmem:[%s4346_s8 + $0x60] ss:$16 sps:$4 sm:$0xff]  }
 0x163   :  { %v2777_v30 = vpack.c.bf16 %v2796_v1, %v2794_v0  ;;  %v1571_v15 = vmul.f32 0.0625, %v2803_v13  ;;  %v1584_v9 = vmul.f32 1e+30, %v2704_v62  ;;  %v3144_v62 = vld [vmem:[%s4346_s8 + $0xc0] ss:$16 sps:$4 sm:$0xff]  }
 0x164   :  { %v1572_v14 = vmul.f32 0.0625, %v2804_v11 }
 0x165   :  { %2778 = vmatprep.subr.bf16.mxu0 %v2777_v30 }
 0x166   :  { %2780 = vmatpush1.bf16.xpose.msra.mxu0 %v2779_v2 }
 0x16d   :  { %1650 = vmatmul.mubr.f32.vlgmr.msra.gmra.mrb[16].mxu0 %v1565_v35 }
 0x16e   :  { %1654 = vmatprep.mubr.f32.mxu0 %v1568_v5 }
 0x171   :  { %1655 = vmatmul.mubr.f32.gmra.mrb[18].mxu0 %v1567_v7 }
 0x172   :  { %1659 = vmatprep.mubr.f32.mxu0 %v1570_v10 }
 0x175   :  { %1660 = vmatmul.mubr.f32.gmra.mrb[20].mxu0 %v1569_v12 }
 0x176   :  { %1664 = vmatprep.mubr.f32.mxu0 %v1572_v14 }
 0x179   :  { %1665 = vmatmul.mubr.f32.gmra.mrb[22].mxu0 %v1571_v15 }
 0x1d6   :  { %v1546_v19 = vpop.f32.mrb[8].mxu0 }
 0x1d7   :  { %v2805_v20 = vadd.f32 %v1546_v19, %v1132_v17  ;;  %v1548_v21 = vpop.f32.mrb[9].mxu0 }
 0x1d8   :  { %v2806_v24 = vadd.f32 %v1548_v21, %v1136_v18  ;;  %v1550_v25 = vpop.f32.mrb[10].mxu0 }
 0x1d9   :  { %v2807_v26 = vadd.f32 %v1550_v25, %v1132_v17  ;;  %v1552_v27 = vpop.f32.mrb[11].mxu0 }
 0x1da   :  { %v2808_v28 = vadd.f32 %v1552_v27, %v1136_v18 }
 0x1db   :  { %v2783_v34 = vpack.c.bf16 %v2807_v26, %v2805_v20 }
 0x1dc   :  { %v2781_v22 = vpack.c.bf16 %v2808_v28, %v2806_v24 }
 0x1de   :  { %2782 = vmatprep.subr.bf16.mxu1 %v2781_v22  ;;  %v1556_v23 = vpop.f32.mrb[12].mxu0 }
 0x1df   :  { %2784 = vmatpush1.bf16.msra.mxu1 %v2783_v34  ;;  %v2809_v31 = vadd.f32 %v1556_v23, %v1132_v17  ;;  %v1558_v36 = vpop.f32.mrb[13].mxu0 }
 0x1e0   :  { %v2810_v37 = vadd.f32 %v1558_v36, %v1136_v18  ;;  %v1560_v50 = vpop.f32.mrb[14].mxu0  ;;  %v3128_v36 = vld [vmem:[%s4346_s8 + $0x4] ss:$16 sps:$4 sm:$0xff]  }
 0x1e1   :  { %v2811_v38 = vadd.f32 %v1560_v50, %v1132_v17  ;;  %v1562_v39 = vpop.f32.mrb[15].mxu0 }
 0x1e2   :  { %v2812_v40 = vadd.f32 %v1562_v39, %v1136_v18 }
 0x1e3   :  { %v2787_v41 = vpack.c.bf16 %v2811_v38, %v2809_v31  ;;  %v3262_v31 = vmov 0.0  }
 0x1e4   :  { %v2785_v42 = vpack.c.bf16 %v2812_v40, %v2810_v37  ;;  %1795 = vmatprep.mubr.f32.mxu1 %v3262_v31  ;;  %v3126_v40 = vld [vmem:[%s4346_s8] ss:$16 sps:$4 sm:$0xff]  }
 0x1e6   :  { %2786 = vmatprep.subr.bf16.mxu1 %v2785_v42 }
 0x1e7   :  { %2788 = vmatpush1.bf16.msra.mxu1 %v2787_v41 }
 0x1e8   :  { %2230 = vmatprep.subr.bf16.mxu1 %v3128_v36  ;;  %v3180_v36 = vld [vmem:[%s4346_s8 + $0x48] ss:$16 sps:$4 sm:$0xff]  }
 0x240   :  { %v1651_v51 = vpop.f32.mrb[16].mxu0 }
 0x241   :  { %v1652_v52 = vadd.f32 %v1651_v51, %v1581_v47  ;;  %v1653_v53 = vpop.f32.mrb[17].mxu0  ;;  %v3132_v51 = vld [vmem:[%s4346_s8 + $0x40] ss:$16 sps:$4 sm:$0xff]  }
 0x242   :  { %v3137_v53 = vld [vmem:[%s4346_s8 + $0x64] ss:$16 sps:$4 sm:$0xff]  }
 0x243   :  { %v1671_v57 = vsel %vm1670_vm0, %v1652_v52, -inf }
 0x244   :  { %v1656_v58 = vpop.f32.mrb[18].mxu0  ;;  %1672 = vmax.xlane.f32.xlu0 %v1671_v57  ;;  %v3140_v57 = vld [vmem:[%s4346_s8 + $0x84] ss:$16 sps:$4 sm:$0xff]  }
 0x245   :  { %v1657_v59 = vadd.f32 %v1656_v58, %v1582_v54  ;;  %v1658_v60 = vpop.f32.mrb[19].mxu0  ;;  %v3138_v58 = vld [vmem:[%s4346_s8 + $0x80] ss:$16 sps:$4 sm:$0xff]  }
 0x246   :  { %v3141_v60 = vld [vmem:[%s4346_s8 + $0xa0] ss:$16 sps:$4 sm:$0xff]  }
 0x247   :  { %v1674_v63 = vsel %vm1670_vm0, %v1657_v59, -inf }
 0x248   :  { %v1661_v0 = vpop.f32.mrb[20].mxu0  ;;  %1675 = vmax.xlane.f32.xlu0 %v1674_v63  ;;  %v3149_v63 = vld [vmem:[%s4346_s8 + $0xe4] ss:$16 sps:$4 sm:$0xff]  }
 0x249   :  { %v1662_v1 = vadd.f32 %v1661_v0, %v1583_v61  ;;  %v1663_v2 = vpop.f32.mrb[21].mxu0  ;;  %v3146_v61 = vld [vmem:[%s4346_s8 + $0xc4] ss:$16 sps:$4 sm:$0xff]   ;;  %v3147_v0 = vld [vmem:[%s4346_s8 + $0xe0] ss:$16 sps:$4 sm:$0xff]  }
 0x24a   :  { %v3150_v2 = vld [vmem:[%s4346_s8 + $0x100] ss:$16 sps:$4 sm:$0xff]  }
 0x24b   :  { %v1677_v30 = vsel %vm1670_vm0, %v1662_v1, -inf }
 0x24c   :  { %v1666_v3 = vpop.f32.mrb[22].mxu0  ;;  %1678 = vmax.xlane.f32.xlu1 %v1677_v30  ;;  %v3153_v30 = vld [vmem:[%s4346_s8 + $0x120] ss:$16 sps:$4 sm:$0xff]  }
 0x24d   :  { %v1667_v4 = vadd.f32 %v1666_v3, %v1584_v9  ;;  %v1668_v35 = vpop.f32.mrb[23].mxu0  ;;  %v3155_v9 = vld [vmem:[%s4346_s8 + $0x124] ss:$16 sps:$4 sm:$0xff]  }
 0x24e   :  { %v3158_v3 = vld [vmem:[%s4346_s8 + $0x144] ss:$16 sps:$4 sm:$0xff]  }
 0x24f   :  { %v1680_v44 = vsel %vm1670_vm0, %v1667_v4, -inf  ;;  %v3161_v35 = vld [vmem:[%s4346_s8 + $0x164] ss:$16 sps:$4 sm:$0xff]  }
 0x250   :  { %1681 = vmax.xlane.f32.xlu1 %v1680_v44  ;;  %v3159_v44 = vld [vmem:[%s4346_s8 + $0x160] ss:$16 sps:$4 sm:$0xff]  }
 0x2d1   :  { %v1673_v5 = vpop.xlane.xlu0 %1672 }
 0x2d2   :  { %v1683_v6 = vsub.f32 %v1652_v52, %v1673_v5  ;;  %v3164_v5 = vld [vmem:[%s4346_s8 + $0x184] ss:$16 sps:$4 sm:$0xff]  }
 0x2d4   :  { %v1687_v7 = vmul.f32 1.442695, %v1683_v6  ;;  %v3162_v6 = vld [vmem:[%s4346_s8 + $0x180] ss:$16 sps:$4 sm:$0xff]  }
 0x2d5   :  { %v1676_v8 = vpop.xlane.xlu0 %1675 }
 0x2d6   :  { %3222 = vpow2.f32 %v1687_v7  ;;  %v1684_v10 = vsub.f32 %v1657_v59, %v1676_v8  ;;  %v3143_v59 = vld [vmem:[%s4346_s8 + $0xa4] ss:$16 sps:$4 sm:$0xff]   ;;  %v3165_v8 = vld [vmem:[%s4346_s8 + $0x1a0] ss:$16 sps:$4 sm:$0xff]  }
 0x2d7   :  { %v3167_v7 = vld [vmem:[%s4346_s8 + $0x1a4] ss:$16 sps:$4 sm:$0xff]  }
 0x2d8   :  { %v1689_v11 = vmul.f32 1.442695, %v1684_v10  ;;  %v3170_v10 = vld [vmem:[%s4346_s8 + $0x1c4] ss:$16 sps:$4 sm:$0xff]  }
 0x2d9   :  { %v1679_v12 = vpop.xlane.xlu1 %1678 }
 0x2da   :  { %3224 = vpow2.f32 %v1689_v11  ;;  %v1685_v13 = vsub.f32 %v1662_v1, %v1679_v12  ;;  %v3152_v1 = vld [vmem:[%s4346_s8 + $0x104] ss:$16 sps:$4 sm:$0xff]   ;;  %v3168_v11 = vld [vmem:[%s4346_s8 + $0x1c0] ss:$16 sps:$4 sm:$0xff]  }
 0x2db   :  { %v3173_v12 = vld [vmem:[%s4346_s8 + $0x1e4] ss:$16 sps:$4 sm:$0xff]  }
 0x2dc   :  { %v1691_v14 = vmul.f32 1.442695, %v1685_v13  ;;  %v3171_v13 = vld [vmem:[%s4346_s8 + $0x1e0] ss:$16 sps:$4 sm:$0xff]  }
 0x2dd   :  { %v1682_v15 = vpop.xlane.xlu1 %1681 }
 0x2de   :  { %3226 = vpow2.f32 %v1691_v14  ;;  %v1686_v16 = vsub.f32 %v1667_v4, %v1682_v15  ;;  %v3156_v4 = vld [vmem:[%s4346_s8 + $0x140] ss:$16 sps:$4 sm:$0xff]   ;;  %v3176_v14 = vld [vmem:[%s4346_s8 + $0xc] ss:$16 sps:$4 sm:$0xff]  }
 0x2e0   :  { %v3223_v17 = vpop.eup %3222  ;;  %v1693_v18 = vmul.f32 1.442695, %v1686_v16 }
 0x2e1   :  { %v1695_v19 = vmul.f32 %v3223_v17, %v1573_v43  ;;  %v3131_v43 = vld [vmem:[%s4346_s8 + $0x24] ss:$16 sps:$4 sm:$0xff]  }
 0x2e2   :  { %3228 = vpow2.f32 %v1693_v18 }
 0x2e3   :  { %v1699_v20 = vsel %vm1670_vm0, %v1695_v19, 0.0 }
 0x2e4   :  { %v3225_v21 = vpop.eup %3224  ;;  %1700 = vadd.xlane.f32.xlu0 %v1699_v20 }
 0x2e5   :  { %v1696_v24 = vmul.f32 %v3225_v21, %v1574_v46  ;;  %v3129_v46 = vld [vmem:[%s4346_s8 + $0x20] ss:$16 sps:$4 sm:$0xff]   ;;  %v3174_v21 = vld [vmem:[%s4346_s8 + $0x8] ss:$16 sps:$4 sm:$0xff]  }
 0x2e7   :  { %v1702_v25 = vsel %vm1670_vm0, %v1696_v24, 0.0 }
 0x2e8   :  { %v3227_v26 = vpop.eup %3226  ;;  %1703 = vadd.xlane.f32.xlu1 %v1702_v25 }
 0x2e9   :  { %v1697_v27 = vmul.f32 %v3227_v26, %v1575_v49 }
 0x2eb   :  { %v1705_v28 = vsel %vm1670_vm0, %v1697_v27, 0.0 }
 0x2ec   :  { %v3229_v34 = vpop.eup %3228  ;;  %1706 = vadd.xlane.f32.xlu0 %v1705_v28  ;;  %v3182_v28 = vld [vmem:[%s4346_s8 + $0x4c] ss:$16 sps:$4 sm:$0xff]  }
 0x2ed   :  { %v1698_v22 = vmul.f32 %v3229_v34, %v1576_v56 }
 0x2ef   :  { %v1708_v23 = vsel %vm1670_vm0, %v1698_v22, 0.0 }
 0x2f0   :  { %1709 = vadd.xlane.f32.xlu1 %v1708_v23 }
 0x371   :  { %v1701_v37 = vpop.xlane.xlu0 %1700 }
 0x372   :  { %3230 = vrcp.f32 %v1701_v37  ;;  %v3185_v37 = vld [vmem:[%s4346_s8 + $0x6c] ss:$16 sps:$4 sm:$0xff]  }
 0x375   :  { %v1704_v50 = vpop.xlane.xlu1 %1703 }
 0x376   :  { %3232 = vrcp.f32 %v1704_v50  ;;  %v3183_v50 = vld [vmem:[%s4346_s8 + $0x68] ss:$16 sps:$4 sm:$0xff]  }
 0x379   :  { %v1707_v38 = vpop.xlane.xlu0 %1706 }
 0x37a   :  { %3234 = vrcp.f32 %v1707_v38  ;;  %v3188_v38 = vld [vmem:[%s4346_s8 + $0x8c] ss:$16 sps:$4 sm:$0xff]  }
 0x37c   :  { %v3231_v39 = vpop.eup %3230 }
 0x37d   :  { %v1715_v41 = vmul.f32 %v3231_v39, %v1695_v19  ;;  %v1710_v42 = vpop.xlane.xlu1 %1709  ;;  %v3186_v39 = vld [vmem:[%s4346_s8 + $0x88] ss:$16 sps:$4 sm:$0xff]  }
 0x37e   :  { %3236 = vrcp.f32 %v1710_v42  ;;  %v3194_v42 = vld [vmem:[%s4346_s8 + $0xcc] ss:$16 sps:$4 sm:$0xff]  }
 0x37f   :  { %2705 = vmatmul.mubr.msk.f32.vlgmr.msra.gmra.mrb[8].mxu1 %vm1670_vm0, %v1715_v41  ;;  %v3189_v41 = vld [vmem:[%s4346_s8 + $0xa8] ss:$16 sps:$4 sm:$0xff]  }
 0x380   :  { %v3233_v45 = vpop.eup %3232  ;;  %1801 = vmatprep.mubr.f32.mxu1 %v3262_v31  ;;  %2231 = vmatpush1.bf16.msra.mxu1 %v3126_v40  ;;  %v3191_v40 = vld [vmem:[%s4346_s8 + $0xac] ss:$16 sps:$4 sm:$0xff]  }
 0x381   :  { %v1716_v47 = vmul.f32 %v3233_v45, %v1696_v24  ;;  %2232 = vmatprep.subr.bf16.mxu1 %v3131_v43  ;;  %v3179_v24 = vld [vmem:[%s4346_s8 + $0x2c] ss:$16 sps:$4 sm:$0xff]   ;;  %v3192_v43 = vld [vmem:[%s4346_s8 + $0xc8] ss:$16 sps:$4 sm:$0xff]  }
 0x382   :  { %v3197_v45 = vld [vmem:[%s4346_s8 + $0xec] ss:$16 sps:$4 sm:$0xff]  }
 0x383   :  { %2706 = vmatmul.mubr.msk.f32.gmra.mrb[10].mxu1 %vm1670_vm0, %v1716_v47  ;;  %v3200_v47 = vld [vmem:[%s4346_s8 + $0x10c] ss:$16 sps:$4 sm:$0xff]  }
 0x384   :  { %v3235_v49 = vpop.eup %3234  ;;  %1807 = vmatprep.mubr.f32.mxu1 %v3262_v31  ;;  %2233 = vmatpush1.bf16.msra.mxu1 %v3129_v46  ;;  %v3195_v46 = vld [vmem:[%s4346_s8 + $0xe8] ss:$16 sps:$4 sm:$0xff]  }
 0x385   :  { %v1717_v52 = vmul.f32 %v3235_v49, %v1697_v27  ;;  %2234 = vmatprep.subr.bf16.mxu1 %v3134_v48  ;;  %v3177_v27 = vld [vmem:[%s4346_s8 + $0x28] ss:$16 sps:$4 sm:$0xff]   ;;  %v3203_v49 = vld [vmem:[%s4346_s8 + $0x12c] ss:$16 sps:$4 sm:$0xff]  }
 0x386   :  { %v3198_v48 = vld [vmem:[%s4346_s8 + $0x108] ss:$16 sps:$4 sm:$0xff]  }
 0x387   :  { %2707 = vmatmul.mubr.msk.f32.gmra.mrb[12].mxu1 %vm1670_vm0, %v1717_v52  ;;  %v3206_v52 = vld [vmem:[%s4346_s8 + $0x14c] ss:$16 sps:$4 sm:$0xff]  }
 0x388   :  { %v3237_v54 = vpop.eup %3236  ;;  %1813 = vmatprep.mubr.f32.mxu1 %v3262_v31  ;;  %2235 = vmatpush1.bf16.msra.mxu1 %v3132_v51  ;;  %v3201_v51 = vld [vmem:[%s4346_s8 + $0x128] ss:$16 sps:$4 sm:$0xff]  }
 0x389   :  { %v1718_v56 = vmul.f32 %v3237_v54, %v1698_v22  ;;  %2236 = vmatprep.subr.bf16.mxu1 %v3137_v53  ;;  %v3204_v53 = vld [vmem:[%s4346_s8 + $0x148] ss:$16 sps:$4 sm:$0xff]   ;;  %v3209_v54 = vld [vmem:[%s4346_s8 + $0x16c] ss:$16 sps:$4 sm:$0xff]  }
 0x38b   :  { %2708 = vmatmul.mubr.msk.f32.gmra.mrb[14].mxu1 %vm1670_vm0, %v1718_v56  ;;  %v3212_v56 = vld [vmem:[%s4346_s8 + $0x18c] ss:$16 sps:$4 sm:$0xff]  }
 0x38c   :  { %2237 = vmatpush1.bf16.msra.mxu1 %v3135_v55  ;;  %v3207_v55 = vld [vmem:[%s4346_s8 + $0x168] ss:$16 sps:$4 sm:$0xff]  }
 0x38d   :  { %2238 = vmatprep.subr.bf16.mxu1 %v3140_v57  ;;  %v3210_v57 = vld [vmem:[%s4346_s8 + $0x188] ss:$16 sps:$4 sm:$0xff]  }
 0x390   :  { %2239 = vmatpush1.bf16.msra.mxu1 %v3138_v58  ;;  %v3215_v58 = vld [vmem:[%s4346_s8 + $0x1ac] ss:$16 sps:$4 sm:$0xff]  }
 0x391   :  { %2240 = vmatprep.subr.bf16.mxu1 %v3143_v59  ;;  %v3213_v59 = vld [vmem:[%s4346_s8 + $0x1a8] ss:$16 sps:$4 sm:$0xff]  }
 0x394   :  { %2241 = vmatpush1.bf16.msra.mxu1 %v3141_v60  ;;  %v3218_v60 = vld [vmem:[%s4346_s8 + $0x1cc] ss:$16 sps:$4 sm:$0xff]  }
 0x395   :  { %2242 = vmatprep.subr.bf16.mxu1 %v3146_v61  ;;  %v3216_v61 = vld [vmem:[%s4346_s8 + $0x1c8] ss:$16 sps:$4 sm:$0xff]  }
 0x398   :  { %2243 = vmatpush1.bf16.msra.mxu1 %v3144_v62  ;;  %v3221_v62 = vld [vmem:[%s4346_s8 + $0x1ec] ss:$16 sps:$4 sm:$0xff]  }
 0x399   :  { %2244 = vmatprep.subr.bf16.mxu1 %v3149_v63  ;;  %v3219_v63 = vld [vmem:[%s4346_s8 + $0x1e8] ss:$16 sps:$4 sm:$0xff]  }
 0x39c   :  { %2245 = vmatpush1.bf16.msra.mxu1 %v3147_v0  ;;  %v4232_v0 = vld [vmem:[%s4347_s9] sm:$0xf] }
 0x39d   :  { %2246 = vmatprep.subr.bf16.mxu1 %v3152_v1  ;;  %v1893_v1 = vrot.slane %v4232_v0, %v3988_v33  ;;  %v3247_v33 = vld [vmem:[%s4340_s0 + $0x20] sm:$0xff] }
 0x3a0   :  { %2247 = vmatpush1.bf16.msra.mxu1 %v3150_v2  ;;  %v1897_v2 = vrot.slane %v4232_v0, %v3985_v32  ;;  %v3248_v32 = vld [vmem:[%s4340_s0 + $0x8] sm:$0xff] }
 0x3a1   :  { %2248 = vmatprep.subr.bf16.mxu1 %v3155_v9 }
 0x3a4   :  { %2249 = vmatpush1.bf16.msra.mxu1 %v3153_v30 }
 0x3a5   :  { %2250 = vmatprep.subr.bf16.mxu1 %v3158_v3 }
 0x3a8   :  { %2251 = vmatpush1.bf16.msra.mxu1 %v3156_v4 }
 0x3a9   :  { %2252 = vmatprep.subr.bf16.mxu1 %v3161_v35 }
 0x3ac   :  { %2253 = vmatpush1.bf16.msra.mxu1 %v3159_v44 }
 0x3ad   :  { %2254 = vmatprep.subr.bf16.mxu1 %v3164_v5 }
 0x3b0   :  { %2255 = vmatpush1.bf16.msra.mxu1 %v3162_v6 }
 0x3b1   :  { %2256 = vmatprep.subr.bf16.mxu1 %v3167_v7  ;;  %v3246_v7 = vld [vmem:[%s4340_s0] sm:$0xff] }
 0x3b4   :  { %2257 = vmatpush1.bf16.msra.mxu1 %v3165_v8 }
 0x3b5   :  { %2258 = vmatprep.subr.bf16.mxu1 %v3170_v10 }
 0x3b8   :  { %2259 = vmatpush1.bf16.msra.mxu1 %v3168_v11 }
 0x3b9   :  { %2260 = vmatprep.subr.bf16.mxu1 %v3173_v12  ;;  %v3249_v12 = vld [vmem:[%s4340_s0 + $0x28] sm:$0xff] }
 0x3bc   :  { %2261 = vmatpush1.bf16.msra.mxu1 %v3171_v13 }
 0x3bd   :  { %2283 = vmatprep.subr.bf16.mxu1 %v3176_v14 }
 0x452   :  { %v1797_v15 = vpop.f32.mrb[8].mxu1 }
 0x453   :  { %v1799_v16 = vpop.f32.mrb[9].mxu1 }
 0x456   :  { %v1803_v17 = vpop.f32.mrb[10].mxu1 }
 0x457   :  { %v4128_v18 = vpack.c.bf16 %v1803_v17, %v1797_v15  ;;  %v1805_v19 = vpop.f32.mrb[11].mxu1 }
 0x458   :  { %v1821_v20 = vpack.c.bf16 %v1805_v19, %v1799_v16 }
 0x45a   :  { %v1809_v25 = vpop.f32.mrb[12].mxu1  ;;  %2262 = vmatprep.mubr.bf16.mxu1 %v1821_v20 }
 0x45b   :  { %v1811_v26 = vpop.f32.mrb[13].mxu1  ;;  %2263 = vmatmul.mubr.bf16.vlgmr.msra.gmra.mrb[16].mxu1 %v4128_v18 }
 0x45c   :  { %2284 = vmatpush1.bf16.msra.mxu1 %v3174_v21  ;;  %v3250_v21 = vld [vmem:[%s4340_s0 + $0x40] sm:$0xff] }
 0x45d   :  { %2285 = vmatprep.subr.bf16.mxu1 %v3179_v24 }
 0x45e   :  { %v1815_v34 = vpop.f32.mrb[14].mxu1 }
 0x45f   :  { %v4143_v22 = vpack.c.bf16 %v1815_v34, %v1809_v25  ;;  %v1817_v23 = vpop.f32.mrb[15].mxu1 }
 0x460   :  { %v1823_v31 = vpack.c.bf16 %v1817_v23, %v1811_v26  ;;  %2286 = vmatpush1.bf16.msra.mxu1 %v3177_v27  ;;  %v3251_v27 = vld [vmem:[%s4340_s0 + $0x48] sm:$0xff]  ;;  %v3252_v23 = vld [vmem:[%s4340_s0 + $0x60] sm:$0xff] }
 0x461   :  { %2287 = vmatprep.subr.bf16.mxu1 %v3182_v28 }
 0x462   :  { %2272 = vmatprep.mubr.bf16.mxu1 %v1823_v31 }
 0x463   :  { %2273 = vmatmul.mubr.bf16.gmra.mrb[20].mxu1 %v4143_v22 }
 0x464   :  { %2288 = vmatpush1.bf16.msra.mxu1 %v3180_v36  ;;  %2315 = vmatprep.mubr.bf16.mxu1 %v1821_v20 }
 0x465   :  { %2289 = vmatprep.subr.bf16.mxu1 %v3185_v37  ;;  %v3253_v37 = vld [vmem:[%s4340_s0 + $0x68] sm:$0xff] }
 0x468   :  { %2290 = vmatpush1.bf16.msra.mxu1 %v3183_v50 }
 0x469   :  { %2291 = vmatprep.subr.bf16.mxu1 %v3188_v38 }
 0x46c   :  { %2292 = vmatpush1.bf16.msra.mxu1 %v3186_v39 }
 0x46d   :  { %2293 = vmatprep.subr.bf16.mxu1 %v3191_v40 }
 0x470   :  { %2294 = vmatpush1.bf16.msra.mxu1 %v3189_v41 }
 0x471   :  { %2295 = vmatprep.subr.bf16.mxu1 %v3194_v42 }
 0x474   :  { %2296 = vmatpush1.bf16.msra.mxu1 %v3192_v43 }
 0x475   :  { %2297 = vmatprep.subr.bf16.mxu1 %v3197_v45 }
 0x478   :  { %2298 = vmatpush1.bf16.msra.mxu1 %v3195_v46 }
 0x479   :  { %2299 = vmatprep.subr.bf16.mxu1 %v3200_v47 }
 0x47c   :  { %2300 = vmatpush1.bf16.msra.mxu1 %v3198_v48 }
 0x47d   :  { %2301 = vmatprep.subr.bf16.mxu1 %v3203_v49 }
 0x480   :  { %2302 = vmatpush1.bf16.msra.mxu1 %v3201_v51 }
 0x481   :  { %2303 = vmatprep.subr.bf16.mxu1 %v3206_v52 }
 0x484   :  { %2304 = vmatpush1.bf16.msra.mxu1 %v3204_v53 }
 0x485   :  { %2305 = vmatprep.subr.bf16.mxu1 %v3209_v54 }
 0x488   :  { %2306 = vmatpush1.bf16.msra.mxu1 %v3207_v55 }
 0x489   :  { %2307 = vmatprep.subr.bf16.mxu1 %v3212_v56 }
 0x48c   :  { %2308 = vmatpush1.bf16.msra.mxu1 %v3210_v57 }
 0x48d   :  { %2309 = vmatprep.subr.bf16.mxu1 %v3215_v58 }
 0x490   :  { %2310 = vmatpush1.bf16.msra.mxu1 %v3213_v59 }
 0x491   :  { %2311 = vmatprep.subr.bf16.mxu1 %v3218_v60 }
 0x494   :  { %2312 = vmatpush1.bf16.msra.mxu1 %v3216_v61 }
 0x495   :  { %2313 = vmatprep.subr.bf16.mxu1 %v3221_v62 }
 0x498   :  { %2314 = vmatpush1.bf16.msra.mxu1 %v3219_v63 }
 0x49b   :  { %2316 = vmatmul.mubr.bf16.vlgmr.msra.gmra.mrb[24].mxu1 %v4128_v18 }
 0x49c   :  { %2325 = vmatprep.mubr.bf16.mxu1 %v1823_v31 }
 0x4a3   :  { %2326 = vmatmul.mubr.bf16.gmra.mrb[28].mxu1 %v4143_v22 }
 0x52e   :  { %v2264_v9 = vpop.f32.mrb[16].mxu1 }
 0x52f   :  { %v2265_v30 = vadd.f32 %v2264_v9, %v1893_v1  ;;  %v2266_v3 = vpop.f32.mrb[17].mxu1 }
 0x530   :  { %v2267_v4 = vadd.f32 %v2266_v3, %v1897_v2  ;;  %v2268_v35 = vpop.f32.mrb[18].mxu1 }
 0x531   :  { %v2269_v44 = vadd.f32 %v2268_v35, %v1893_v1  ;;  %v2270_v5 = vpop.f32.mrb[19].mxu1  ;;  %v2336_v8 = vadd.f32 %v3246_v7, %v2265_v30 }
 0x532   :  { %v2271_v6 = vadd.f32 %v2270_v5, %v1897_v2  ;;  %v2337_v11 = vadd.f32 %v3248_v32, %v2267_v4 }
 0x533   :  { %v2340_v10 = vadd.f32 %v3247_v33, %v2269_v44 }
 0x534   :  { %v2341_v13 = vadd.f32 %v3249_v12, %v2271_v6 }
 0x535   :  { %v2352_v14 = vadd.f32 %v2340_v10, %v2336_v8 }
 0x536   :  { %v2361_v15 = vadd.f32 %v2341_v13, %v2337_v11  ;;  %v2274_v16 = vpop.f32.mrb[20].mxu1 }
 0x537   :  { %v2275_v17 = vadd.f32 %v2274_v16, %v1893_v1  ;;  %v2276_v18 = vpop.f32.mrb[21].mxu1 }
 0x538   :  { %v2277_v19 = vadd.f32 %v2276_v18, %v1897_v2  ;;  %v2278_v20 = vpop.f32.mrb[22].mxu1 }
 0x539   :  { %v2344_v24 = vadd.f32 %v3250_v21, %v2275_v17  ;;  %v2279_v25 = vadd.f32 %v2278_v20, %v1893_v1  ;;  %v2280_v26 = vpop.f32.mrb[23].mxu1 }
 0x53a   :  { %v2345_v28 = vadd.f32 %v3251_v27, %v2277_v19  ;;  %v2281_v34 = vadd.f32 %v2280_v26, %v1897_v2 }
 0x53b   :  { %v2353_v22 = vadd.f32 %v2352_v14, %v2344_v24  ;;  %v2348_v31 = vadd.f32 %v3252_v23, %v2279_v25 }
 0x53c   :  { %v2362_v36 = vadd.f32 %v2361_v15, %v2345_v28  ;;  %v2349_v50 = vadd.f32 %v3253_v37, %v2281_v34  ;;  %v1904_v34 = vsub.s32 3, %v3982_v29 }
 0x53d   :  { %v2354_v38 = vadd.f32 %v2353_v22, %v2348_v31 }
 0x53e   :  { %v2363_v39 = vadd.f32 %v2362_v36, %v2349_v50  ;;  %v1905_v23 = vrot.slane %v4232_v0, %v1904_v34 }
 0x53f   :  { %v2355_v40 = vrot.slane %v2354_v38, 4 }
 0x540   :  { %v2364_v41 = vrot.slane %v2363_v39, 4 }
 0x541   :  { %v2356_v42 = vadd.f32 %v2355_v40, %v2354_v38 }
 0x542   :  { %v2365_v43 = vadd.f32 %v2364_v41, %v2363_v39 }
 0x543   :  { %v2357_v45 = vrot.slane %v2356_v42, 2 }
 0x544   :  { %v2366_v46 = vrot.slane %v2365_v43, 2 }
 0x545   :  { %v2358_v47 = vadd.f32 %v2357_v45, %v2356_v42 }
 0x546   :  { %v2367_v48 = vadd.f32 %v2366_v46, %v2365_v43 }
 0x547   :  { %v2359_v49 = vrot.slane %v2358_v47, 1 }
 0x548   :  { %v2368_v51 = vrot.slane %v2367_v48, 1 }
 0x549   :  { %v2360_v52 = vadd.f32 %v2359_v49, %v2358_v47 }
 0x54a   :  { %v2369_v53 = vadd.f32 %v2368_v51, %v2367_v48 }
 0x54b   :  { %v2389_v54 = vmul.f32 0.03125, %v2360_v52 }
 0x54c   :  { %v2390_v55 = vmul.f32 0.03125, %v2369_v53  ;;  %v3255_v53 = vld [vmem:[%s4340_s0 + $0x30] sm:$0xff] }
 0x54d   :  { %v2393_v56 = vsub.f32 %v2336_v8, %v2389_v54  ;;  %v2397_v57 = vsub.f32 %v2340_v10, %v2389_v54  ;;  %v2401_v58 = vsub.f32 %v2344_v24, %v2389_v54  ;;  %v2405_v59 = vsub.f32 %v2348_v31, %v2389_v54 }
 0x54e   :  { %v2394_v60 = vsub.f32 %v2337_v11, %v2390_v55  ;;  %v2398_v61 = vsub.f32 %v2341_v13, %v2390_v55  ;;  %v2402_v62 = vsub.f32 %v2345_v28, %v2390_v55  ;;  %v2406_v63 = vsub.f32 %v2349_v50, %v2390_v55 }
 0x54f   :  { %v2409_v1 = vmul.f32 %v2393_v56, %v2393_v56  ;;  %v2413_v2 = vmul.f32 %v2397_v57, %v2397_v57  ;;  %v2417_v3 = vmul.f32 %v2401_v58, %v2401_v58  ;;  %v2421_v5 = vmul.f32 %v2405_v59, %v2405_v59 }
 0x550   :  { %v2410_v9 = vmul.f32 %v2394_v60, %v2394_v60  ;;  %v2414_v30 = vmul.f32 %v2398_v61, %v2398_v61  ;;  %v2418_v35 = vmul.f32 %v2402_v62, %v2402_v62  ;;  %v2422_v7 = vmul.f32 %v2406_v63, %v2406_v63 }
 0x551   :  { %v2425_v4 = vadd.f32 %v2413_v2, %v2409_v1  ;;  %v1900_v28 = vsub.s32 2, %v3982_v29 }
 0x552   :  { %v2434_v44 = vadd.f32 %v2414_v30, %v2410_v9  ;;  %v3258_v30 = vld [vmem:[%s4340_s0 + $0x50] sm:$0xff] }
 0x553   :  { %v2426_v6 = vadd.f32 %v2425_v4, %v2417_v3  ;;  %v1901_v22 = vrot.slane %v4232_v0, %v1900_v28  ;;  %v3254_v0 = vld [vmem:[%s4340_s0 + $0x10] sm:$0xff] }
 0x554   :  { %v2435_v33 = vadd.f32 %v2434_v44, %v2418_v35  ;;  %v3259_v44 = vld [vmem:[%s4340_s0 + $0x58] sm:$0xff] }
 0x555   :  { %v2427_v8 = vadd.f32 %v2426_v6, %v2421_v5 }
 0x556   :  { %v2436_v10 = vadd.f32 %v2435_v33, %v2422_v7  ;;  %v3260_v33 = vld [vmem:[%s4340_s0 + $0x70] sm:$0xff] }
 0x557   :  { %v2428_v32 = vrot.slane %v2427_v8, 4 }
 0x558   :  { %v2437_v12 = vrot.slane %v2436_v10, 4 }
 0x559   :  { %v2429_v11 = vadd.f32 %v2428_v32, %v2427_v8  ;;  %v3261_v32 = vld [vmem:[%s4340_s0 + $0x78] sm:$0xff] }
 0x55a   :  { %v2438_v13 = vadd.f32 %v2437_v12, %v2436_v10 }
 0x55b   :  { %v2430_v14 = vrot.slane %v2429_v11, 2 }
 0x55c   :  { %v2439_v15 = vrot.slane %v2438_v13, 2 }
 0x55d   :  { %v2431_v16 = vadd.f32 %v2430_v14, %v2429_v11 }
 0x55e   :  { %v2440_v17 = vadd.f32 %v2439_v15, %v2438_v13 }
 0x55f   :  { %v2432_v18 = vrot.slane %v2431_v16, 1 }
 0x560   :  { %v2441_v19 = vrot.slane %v2440_v17, 1 }
 0x561   :  { %v2433_v20 = vadd.f32 %v2432_v18, %v2431_v16 }
 0x562   :  { %v2442_v21 = vadd.f32 %v2441_v19, %v2440_v17 }
 0x563   :  { %v2461_v24 = vmul.f32 0.03125, %v2433_v20 }
 0x564   :  { %v2462_v25 = vmul.f32 0.03125, %v2442_v21 }
 0x565   :  { %v2465_v26 = vadd.f32 1e-05, %v2461_v24 }
 0x566   :  { %v2466_v27 = vadd.f32 1e-05, %v2462_v25 }
 0x567   :  { %3238 = vrsqrt.f32 %v2465_v26 }
 0x568   :  { %3240 = vrsqrt.f32 %v2466_v27 }
 0x56e   :  { %v2317_v31 = vpop.f32.mrb[24].mxu1 }
 0x56f   :  { %v2319_v36 = vpop.f32.mrb[25].mxu1  ;;  %v2318_v37 = vadd.f32 %v2317_v31, %v1901_v22 }
 0x570   :  { %v2321_v50 = vpop.f32.mrb[26].mxu1  ;;  %v2320_v39 = vadd.f32 %v2319_v36, %v1905_v23 }
 0x571   :  { %v3239_v38 = vpop.eup %3238  ;;  %v2322_v40 = vadd.f32 %v2321_v50, %v1901_v22  ;;  %v2323_v41 = vpop.f32.mrb[27].mxu1  ;;  %v2338_v52 = vadd.f32 %v3254_v0, %v2318_v37 }
 0x572   :  { %v3241_v42 = vpop.eup %3240  ;;  %v2473_v43 = vmul.f32 %v3239_v38, %v2393_v56  ;;  %v2477_v45 = vmul.f32 %v3239_v38, %v2397_v57  ;;  %v2481_v46 = vmul.f32 %v3239_v38, %v2401_v58  ;;  %v2485_v47 = vmul.f32 %v3239_v38, %v2405_v59  ;;  %v3256_v56 = vld [vmem:[%s4340_s0 + $0x18] sm:$0xff] }
 0x573   :  { %v2474_v48 = vmul.f32 %v3241_v42, %v2394_v60  ;;  %v2478_v49 = vmul.f32 %v3241_v42, %v2398_v61  ;;  %v2482_v29 = vmul.f32 %v3241_v42, %v2402_v62  ;;  %v2486_v51 = vmul.f32 %v3241_v42, %v2406_v63  ;;  %v3257_v59 = vld [vmem:[%s4340_s0 + $0x38] sm:$0xff] }
 0x574   :  { %2489 = vst [vmem:[%s4348_s10] sm:$0xff] %v2473_v43  ;;  %2493 = vst [vmem:[%s4348_s10 + $0x20] sm:$0xff] %v2477_v45  ;;  %v2342_v54 = vadd.f32 %v3255_v53, %v2322_v40  ;;  %v2324_v55 = vadd.f32 %v2323_v41, %v1905_v23  ;;  %v2339_v57 = vadd.f32 %v3256_v56, %v2320_v39 }
 0x575   :  { %2497 = vst [vmem:[%s4348_s10 + $0x40] sm:$0xff] %v2481_v46  ;;  %2501 = vst [vmem:[%s4348_s10 + $0x60] sm:$0xff] %v2485_v47 }
 0x576   :  { %2490 = vst [vmem:[%s4348_s10 + $0x8] sm:$0xff] %v2474_v48  ;;  %2494 = vst [vmem:[%s4348_s10 + $0x28] sm:$0xff] %v2478_v49  ;;  %v2370_v58 = vadd.f32 %v2342_v54, %v2338_v52  ;;  %v2343_v60 = vadd.f32 %v3257_v59, %v2324_v55  ;;  %v2327_v61 = vpop.f32.mrb[28].mxu1 }
 0x577   :  { %2498 = vst [vmem:[%s4348_s10 + $0x48] sm:$0xff] %v2482_v29  ;;  %2502 = vst [vmem:[%s4348_s10 + $0x68] sm:$0xff] %v2486_v51  ;;  %v2328_v62 = vadd.f32 %v2327_v61, %v1901_v22  ;;  %v2329_v63 = vpop.f32.mrb[29].mxu1 }
 0x578   :  { %v2379_v1 = vadd.f32 %v2343_v60, %v2339_v57  ;;  %v2330_v2 = vadd.f32 %v2329_v63, %v1905_v23  ;;  %v2331_v9 = vpop.f32.mrb[30].mxu1 }
 0x579   :  { %v2346_v3 = vadd.f32 %v3258_v30, %v2328_v62  ;;  %v2332_v4 = vadd.f32 %v2331_v9, %v1901_v22  ;;  %v2333_v35 = vpop.f32.mrb[31].mxu1 }
 0x57a   :  { %v2347_v5 = vadd.f32 %v3259_v44, %v2330_v2  ;;  %v2334_v6 = vadd.f32 %v2333_v35, %v1905_v23 }
 0x57b   :  { %v2371_v7 = vadd.f32 %v2370_v58, %v2346_v3  ;;  %v2350_v8 = vadd.f32 %v3260_v33, %v2332_v4 }
 0x57c   :  { %v2380_v10 = vadd.f32 %v2379_v1, %v2347_v5  ;;  %v2351_v12 = vadd.f32 %v3261_v32, %v2334_v6 }
 0x57d   :  { %v2372_v11 = vadd.f32 %v2371_v7, %v2350_v8 }
 0x57e   :  { %v2381_v13 = vadd.f32 %v2380_v10, %v2351_v12 }
 0x57f   :  { %v2373_v14 = vrot.slane %v2372_v11, 4 }
 0x580   :  { %v2382_v15 = vrot.slane %v2381_v13, 4 }
 0x581   :  { %v2374_v16 = vadd.f32 %v2373_v14, %v2372_v11 }
 0x582   :  { %v2383_v17 = vadd.f32 %v2382_v15, %v2381_v13 }
 0x583   :  { %v2375_v18 = vrot.slane %v2374_v16, 2 }
 0x584   :  { %v2384_v19 = vrot.slane %v2383_v17, 2 }
 0x585   :  { %v2376_v20 = vadd.f32 %v2375_v18, %v2374_v16 }
 0x586   :  { %v2385_v21 = vadd.f32 %v2384_v19, %v2383_v17 }
 0x587   :  { %v2377_v24 = vrot.slane %v2376_v20, 1 }
 0x588   :  { %v2386_v25 = vrot.slane %v2385_v21, 1 }
 0x589   :  { %v2378_v26 = vadd.f32 %v2377_v24, %v2376_v20 }
 0x58a   :  { %v2387_v27 = vadd.f32 %v2386_v25, %v2385_v21 }
 0x58b   :  { %v2391_v28 = vmul.f32 0.03125, %v2378_v26 }
 0x58c   :  { %v2392_v34 = vmul.f32 0.03125, %v2387_v27 }
 0x58d   :  { %v2395_v22 = vsub.f32 %v2338_v52, %v2391_v28  ;;  %v2399_v23 = vsub.f32 %v2342_v54, %v2391_v28  ;;  %v2403_v31 = vsub.f32 %v2346_v3, %v2391_v28  ;;  %v2407_v36 = vsub.f32 %v2350_v8, %v2391_v28 }
 0x58e   :  { %v2396_v37 = vsub.f32 %v2339_v57, %v2392_v34  ;;  %v2400_v50 = vsub.f32 %v2343_v60, %v2392_v34  ;;  %v2404_v38 = vsub.f32 %v2347_v5, %v2392_v34  ;;  %v2408_v39 = vsub.f32 %v2351_v12, %v2392_v34 }
 0x58f   :  { %v2411_v40 = vmul.f32 %v2395_v22, %v2395_v22  ;;  %v2415_v41 = vmul.f32 %v2399_v23, %v2399_v23  ;;  %v2419_v45 = vmul.f32 %v2403_v31, %v2403_v31  ;;  %v2423_v49 = vmul.f32 %v2407_v36, %v2407_v36 }
 0x590   :  { %v2412_v42 = vmul.f32 %v2396_v37, %v2396_v37  ;;  %v2416_v43 = vmul.f32 %v2400_v50, %v2400_v50  ;;  %v2420_v47 = vmul.f32 %v2404_v38, %v2404_v38  ;;  %v2424_v51 = vmul.f32 %v2408_v39, %v2408_v39 }
 0x591   :  { %v2443_v46 = vadd.f32 %v2415_v41, %v2411_v40 }
 0x592   :  { %v2452_v48 = vadd.f32 %v2416_v43, %v2412_v42 }
 0x593   :  { %v2444_v29 = vadd.f32 %v2443_v46, %v2419_v45 }
 0x594   :  { %v2453_v0 = vadd.f32 %v2452_v48, %v2420_v47 }
 0x595   :  { %v2445_v52 = vadd.f32 %v2444_v29, %v2423_v49 }
 0x596   :  { %v2454_v53 = vadd.f32 %v2453_v0, %v2424_v51 }
 0x597   :  { %v2446_v54 = vrot.slane %v2445_v52, 4 }
 0x598   :  { %v2455_v55 = vrot.slane %v2454_v53, 4 }
 0x599   :  { %v2447_v56 = vadd.f32 %v2446_v54, %v2445_v52 }
 0x59a   :  { %v2456_v57 = vadd.f32 %v2455_v55, %v2454_v53 }
 0x59b   :  { %v2448_v58 = vrot.slane %v2447_v56, 2 }
 0x59c   :  { %v2457_v59 = vrot.slane %v2456_v57, 2 }
 0x59d   :  { %v2449_v60 = vadd.f32 %v2448_v58, %v2447_v56 }
 0x59e   :  { %v2458_v61 = vadd.f32 %v2457_v59, %v2456_v57 }
 0x59f   :  { %v2450_v62 = vrot.slane %v2449_v60, 1 }
 0x5a0   :  { %v2459_v63 = vrot.slane %v2458_v61, 1 }
 0x5a1   :  { %v2451_v1 = vadd.f32 %v2450_v62, %v2449_v60 }
 0x5a2   :  { %v2460_v2 = vadd.f32 %v2459_v63, %v2458_v61 }
 0x5a3   :  { %v2463_v9 = vmul.f32 0.03125, %v2451_v1 }
 0x5a4   :  { %v2464_v30 = vmul.f32 0.03125, %v2460_v2 }
 0x5a5   :  { %v2467_v3 = vadd.f32 1e-05, %v2463_v9 }
 0x5a6   :  { %v2468_v4 = vadd.f32 1e-05, %v2464_v30 }
 0x5a7   :  { %3242 = vrsqrt.f32 %v2467_v3 }
 0x5a8   :  { %3244 = vrsqrt.f32 %v2468_v4 }
 0x5b1   :  { %v3243_v35 = vpop.eup %3242 }
 0x5b2   :  { %v3245_v44 = vpop.eup %3244  ;;  %v2475_v5 = vmul.f32 %v3243_v35, %v2395_v22  ;;  %v2479_v6 = vmul.f32 %v3243_v35, %v2399_v23  ;;  %v2483_v7 = vmul.f32 %v3243_v35, %v2403_v31  ;;  %v2487_v33 = vmul.f32 %v3243_v35, %v2407_v36 }
 0x5b3   :  { %v2476_v8 = vmul.f32 %v3245_v44, %v2396_v37  ;;  %v2480_v10 = vmul.f32 %v3245_v44, %v2400_v50  ;;  %v2484_v32 = vmul.f32 %v3245_v44, %v2404_v38  ;;  %v2488_v12 = vmul.f32 %v3245_v44, %v2408_v39 }
 0x5b4   :  { %2491 = vst [vmem:[%s4348_s10 + $0x10] sm:$0xff] %v2475_v5  ;;  %2495 = vst [vmem:[%s4348_s10 + $0x30] sm:$0xff] %v2479_v6 }
 0x5b5   :  { %2499 = vst [vmem:[%s4348_s10 + $0x50] sm:$0xff] %v2483_v7  ;;  %2503 = vst [vmem:[%s4348_s10 + $0x70] sm:$0xff] %v2487_v33 }
 0x5b6   :  { %2492 = vst [vmem:[%s4348_s10 + $0x18] sm:$0xff] %v2476_v8  ;;  %2496 = vst [vmem:[%s4348_s10 + $0x38] sm:$0xff] %v2480_v10 }
 0x5b7   :  { %2500 = vst [vmem:[%s4348_s10 + $0x58] sm:$0xff] %v2484_v32  ;;  %2504 = vst [vmem:[%s4348_s10 + $0x78] sm:$0xff] %v2488_v12 }

// kernel: feat_extractor.19
= control target key start
LH: loop header
LB: loop body
LE: loop exit
PB: predicated region body
PF: predicated region fallthrough
CT: control target
= control target key end

     0   :  { %s1341_s12 = smov 0   ;;  %s1343_s13 = smov 0   ;;  %s1487_s0 = inlined_call_operand.vmem [shape: bf16[32,13824], index: 0, kind: input, shape index: {}]   ;;  %s1488_s1 = inlined_call_operand.vmem [shape: bf16[13824,128], index: 1, kind: input, shape index: {}]   ;;  %s1489_s2 = inlined_call_operand.vmem [shape: f32[1,128], index: 2, kind: input, shape index: {}]   ;;  %s1490_s3 = inlined_call_operand.vmem [shape: f32[32,128], index: 3, kind: output, shape index: {}]  }
   0x1   :  { %s1345_s14 = smov 0   ;;  %s1347_s15 = smov 0  }
   0x2   :  { %s1349_s16 = smov 0  }
   0x3 LB: > { %s22_s17 = sadd.s32 1, %s1314_s15  ;;  %p41_p1 = scmp.ne.s32.totalorder %s1306_s13, %s1302_s12  ;;  %s1318_s16 = sphi %s1349_s16, %s13_s16   ;;  %s1314_s15 = sphi %s1347_s15, %s1494_s15   ;;  %s1310_s14 = sphi %s1345_s14, %s1493_s14   ;;  %s1306_s13 = sphi %s1343_s13, %s1492_s13   ;;  %s1302_s12 = sphi %s1341_s12, %s1491_s12  }
   0x4   : > { %p23_p0 = scmp.ge.s32.totalorder %s22_s17, 18  ;;  %p42_p2 = scmp.eq.s32.totalorder %s1318_s16, 0 }
   0x5   : > { %s34_s19 = sadd.s32 1, %s1306_s13  ;;  %p999_p5 = scmp.ge.s32.totalorder %s1318_s16, 18 }
   0x6   : > { %s1496_s17 = smov (%p23_p0, %s22_s17), 0  ;;  %p43_p3 = por %p42_p2, %p41_p1 }
   0x7   : > { %s30_s18 = ssub.s32 %s1314_s15, %s1496_s17  ;;  %143 = sbr.rel (%p999_p5) target bundleno = 25 (0x19), region = 20 }
   0x8   : > { %p32_p4 = scmp.eq.s32.totalorder %s30_s18, 0 }
   0xa   : > { %s1376_s20 = scalar_select %p32_p4, %s1306_s13, %s34_s19  }
   0xe   : > { %146 = sbr.rel (!%p43_p3) target bundleno = 25 (0x19), region = 24  ;;  %s148_s21 = sand.u32 (%p43_p3), 1, %s1306_s13  }
   0xf   : > { %s1070_s22 = smul.u32 (%p43_p3), 24, %s1314_s15 }
  0x10   : > { %s1171_s23 = smul.u32 (%p43_p3), 96, %s148_s21 }
  0x11   : > { %s156_s26 = scalar_lea.vmem (%p43_p3), %s1487_s0, %s1070_s22 }
  0x12   : > { %v169_v0 = vld [vmem:[%s156_s26] sm:$0xff] (%p43_p3)  ;;  %v171_v1 = vld [vmem:[%s156_s26 + $0x8] sm:$0xff] (%p43_p3)  ;;  %v173_v2 = vld [vmem:[%s156_s26 + $0x10] sm:$0xff] (%p43_p3)  ;;  %s150_s27 = scalar_lea.vmem (%p43_p3), [#allocation3], %s1171_s23 }
  0x13   : > { %170 = vst [vmem:[%s150_s27] sm:$0xff] (%p43_p3), %v169_v0  ;;  %172 = vst [vmem:[%s150_s27 + $0x8] sm:$0xff] (%p43_p3), %v171_v1  ;;  %v175_v3 = vld [vmem:[%s156_s26 + $0x1b0] sm:$0xff] (%p43_p3)  ;;  %v177_v4 = vld [vmem:[%s156_s26 + $0x1b8] sm:$0xff] (%p43_p3) }
  0x14   : > { %174 = vst [vmem:[%s150_s27 + $0x10] sm:$0xff] (%p43_p3), %v173_v2  ;;  %v179_v5 = vld [vmem:[%s156_s26 + $0x1c0] sm:$0xff] (%p43_p3)  ;;  %176 = vst [vmem:[%s150_s27 + $0x18] sm:$0xff] (%p43_p3), %v175_v3  ;;  %v183_v7 = vld [vmem:[%s156_s26 + $0x368] sm:$0xff] (%p43_p3) }
  0x15   : > { %178 = vst [vmem:[%s150_s27 + $0x20] sm:$0xff] %v177_v4  ;;  %180 = vst [vmem:[%s150_s27 + $0x28] sm:$0xff] %v179_v5  ;;  %v181_v6 = vld [vmem:[%s156_s26 + $0x360] sm:$0xff]  ;;  %v185_v8 = vld [vmem:[%s156_s26 + $0x370] sm:$0xff] }
  0x16   : > { %182 = vst [vmem:[%s150_s27 + $0x30] sm:$0xff] %v181_v6  ;;  %184 = vst [vmem:[%s150_s27 + $0x38] sm:$0xff] %v183_v7  ;;  %v187_v9 = vld [vmem:[%s156_s26 + $0x510] sm:$0xff]  ;;  %v189_v10 = vld [vmem:[%s156_s26 + $0x518] sm:$0xff] }
  0x17   : > { %186 = vst [vmem:[%s150_s27 + $0x40] sm:$0xff] %v185_v8  ;;  %v191_v11 = vld [vmem:[%s156_s26 + $0x520] sm:$0xff]  ;;  %188 = vst [vmem:[%s150_s27 + $0x48] sm:$0xff] %v187_v9 }
  0x18   : > { %190 = vst [vmem:[%s150_s27 + $0x50] sm:$0xff] %v189_v10  ;;  %192 = vst [vmem:[%s150_s27 + $0x58] sm:$0xff] %v191_v11 }
  0x19 PF: > { %p1001_p6 = scmp.ge.s32.totalorder %s1318_s16, 1  ;;  %p206_p7 = scmp.lt.s32.totalorder %s1318_s16, 19 }
  0x1b   : > { %p207_p8 = pnand %p1001_p6, %p206_p7 }
  0x1c   : > { %s213_s28 = sand.u32 (!%p207_p8), 1, %s1302_s12   ;;  %s243_s29 = smul.u32 (!%p207_p8), 96, %s1310_s14 }
  0x1d   : > { %210 = sbr.rel (%p207_p8) target bundleno = 345 (0x159), region = 51  ;;  %p1003_p10 = scmp.ne.s32.totalorder (!%p207_p8), %s1310_s14, 0 }
  0x1e   : > { %s1172_s30 = smul.u32 (!%p207_p8), 96, %s213_s28  ;;  %p244_p9 = scmp.lt.s32.totalorder (!%p207_p8), %s243_s29, 1727 }
  0x20   : > { %s1393_s8 = scalar_lea.vmem (!%p207_p8), [#allocation3], %s1172_s30 }
  0x24   : > { %s1498_s29 = smov (!%p244_p9, %s243_s29), 1727  ;;  %259 = sbr.rel (%p1003_p10) target bundleno = 43 (0x2b), region = 59 }
  0x25   : > { %s1002_s4 = sshll.u32 %s1498_s29, 2  ;;  %v1320_v12 = vmov (!%p1003_p10), 0.0  }
  0x26   : > { %s1391_s7 = scalar_lea.vmem %s1488_s1, %s1002_s4  ;;  %260 = vst [vmem:[#allocation2] sm:$0xff] (!%p1003_p10), %v1320_v12  ;;  %261 = vst [vmem:[#allocation2 + $0x8] sm:$0xff] (!%p1003_p10), %v1320_v12 }
  0x27   : > { %262 = vst [vmem:[#allocation2 + $0x10] sm:$0xff] (!%p1003_p10), %v1320_v12  ;;  %263 = vst [vmem:[#allocation2 + $0x18] sm:$0xff] (!%p1003_p10), %v1320_v12 }
  0x2b PF: > { %v1214_v13 = vld [vmem:[%s1391_s7 + $0x40] sm:$0xff]   ;;  %v1218_v17 = vld [vmem:[%s1391_s7 + $0x48] sm:$0xff]   ;;  %v1222_v21 = vld [vmem:[%s1391_s7 + $0x50] sm:$0xff]   ;;  %p1064_p11 = scmp.ne.s32.totalorder %s1310_s14, 17 }
  0x2c   : > { %v1215_v14 = vld [vmem:[%s1391_s7 + $0xc0] sm:$0xff]   ;;  %1071 = vmatprep.subr.bf16.mxu0 %v1214_v13  ;;  %v1219_v18 = vld [vmem:[%s1391_s7 + $0xc8] sm:$0xff]   ;;  %v1223_v22 = vld [vmem:[%s1391_s7 + $0xd0] sm:$0xff]  }
  0x2d   : > { %v1216_v15 = vld [vmem:[%s1391_s7] sm:$0xff]   ;;  %1099 = vmatprep.subr.bf16.mxu1 %v1215_v14  ;;  %v1220_v19 = vld [vmem:[%s1391_s7 + $0x8] sm:$0xff]   ;;  %v1224_v23 = vld [vmem:[%s1391_s7 + $0x10] sm:$0xff]  }
  0x2e   : > { %v1217_v16 = vld [vmem:[%s1391_s7 + $0x80] sm:$0xff]   ;;  %1072 = vmatpush3.bf16.msra.mxu0 %v1216_v15  ;;  %v1221_v20 = vld [vmem:[%s1391_s7 + $0x88] sm:$0xff]   ;;  %v1225_v24 = vld [vmem:[%s1391_s7 + $0x90] sm:$0xff]  }
  0x2f   : > { %1100 = vmatpush3.bf16.msra.mxu1 %v1217_v16  ;;  %1073 = vmatprep.subr.bf16.mxu0 %v1218_v17  ;;  %v1226_v25 = vld [vmem:[%s1391_s7 + $0x58] sm:$0xff]   ;;  %v1230_v29 = vld [vmem:[%s1391_s7 + $0x60] sm:$0xff]   ;;  %v1234_v33 = vld [vmem:[%s1391_s7 + $0x68] sm:$0xff]  }
  0x30   : > { %1101 = vmatprep.subr.bf16.mxu1 %v1219_v18  ;;  %v1227_v26 = vld [vmem:[%s1391_s7 + $0xd8] sm:$0xff]   ;;  %v1231_v30 = vld [vmem:[%s1391_s7 + $0xe0] sm:$0xff]   ;;  %v1235_v34 = vld [vmem:[%s1391_s7 + $0xe8] sm:$0xff]  }
  0x31   : > { %v1228_v27 = vld [vmem:[%s1391_s7 + $0x18] sm:$0xff]   ;;  %v1232_v31 = vld [vmem:[%s1391_s7 + $0x20] sm:$0xff]   ;;  %v1236_v35 = vld [vmem:[%s1391_s7 + $0x28] sm:$0xff]  }
  0x32   : > { %1074 = vmatpush3.bf16.msra.mxu0 %v1220_v19  ;;  %v1229_v28 = vld [vmem:[%s1391_s7 + $0x98] sm:$0xff]   ;;  %v1233_v32 = vld [vmem:[%s1391_s7 + $0xa0] sm:$0xff]   ;;  %v1237_v36 = vld [vmem:[%s1391_s7 + $0xa8] sm:$0xff]  }
  0x33   : > { %1102 = vmatpush3.bf16.msra.mxu1 %v1221_v20  ;;  %1075 = vmatprep.subr.bf16.mxu0 %v1222_v21  ;;  %v1238_v37 = vld [vmem:[%s1391_s7 + $0x70] sm:$0xff]   ;;  %v1242_v41 = vld [vmem:[%s1391_s7 + $0x78] sm:$0xff]   ;;  %v1249_v47 = vld [vmem:[%s1393_s8 + $0x8] ss:$24 sps:$4 sm:$0xff]  }
  0x34   : > { %1103 = vmatprep.subr.bf16.mxu1 %v1223_v22  ;;  %v1239_v38 = vld [vmem:[%s1391_s7 + $0xf0] sm:$0xff]   ;;  %v1243_v42 = vld [vmem:[%s1391_s7 + $0xf8] sm:$0xff]   ;;  %v1251_v48 = vld [vmem:[%s1393_s8 + $0xc] ss:$24 sps:$4 sm:$0xff]  }
  0x35   : > { %v1240_v39 = vld [vmem:[%s1391_s7 + $0x30] sm:$0xff]   ;;  %v1244_v43 = vld [vmem:[%s1391_s7 + $0x38] sm:$0xff]   ;;  %v1252_v49 = vld [vmem:[%s1391_s7 + $0x140] sm:$0xff]   ;;  %805 = vmatprep.mubr.bf16.mxu1 %v1251_v48 }
  0x36   : > { %1076 = vmatpush3.bf16.msra.mxu0 %v1224_v23  ;;  %v1241_v40 = vld [vmem:[%s1391_s7 + $0xb0] sm:$0xff]   ;;  %v1245_v44 = vld [vmem:[%s1391_s7 + $0xb8] sm:$0xff]   ;;  %v1253_v50 = vld [vmem:[%s1391_s7 + $0x100] sm:$0xff]  }
  0x37   : > { %1104 = vmatpush3.bf16.msra.mxu1 %v1225_v24  ;;  %1077 = vmatprep.subr.bf16.mxu0 %v1226_v25  ;;  %v1246_v45 = vld [vmem:[%s1393_s8] ss:$24 sps:$4 sm:$0xff]   ;;  %v1248_v46 = vld [vmem:[%s1393_s8 + $0x4] ss:$24 sps:$4 sm:$0xff]   ;;  %v1254_v51 = vld [vmem:[%s1391_s7 + $0x148] sm:$0xff]  }
  0x38   : > { %1105 = vmatprep.subr.bf16.mxu1 %v1227_v26  ;;  %756 = vmatprep.mubr.bf16.mxu0 %v1248_v46  ;;  %v1255_v52 = vld [vmem:[%s1391_s7 + $0x108] sm:$0xff]   ;;  %v1256_v53 = vld [vmem:[%s1391_s7 + $0x150] sm:$0xff]   ;;  %v1258_v55 = vld [vmem:[%s1391_s7 + $0x158] sm:$0xff]  }
  0x39   : > { %v1257_v54 = vld [vmem:[%s1391_s7 + $0x110] sm:$0xff]   ;;  %v1259_v56 = vld [vmem:[%s1391_s7 + $0x118] sm:$0xff]   ;;  %v1260_v59 = vld [vmem:[%s1391_s7 + $0x160] sm:$0xff]  }
  0x3a   : > { %1078 = vmatpush3.bf16.msra.mxu0 %v1228_v27  ;;  %v1262_v57 = vld [vmem:[%s1393_s8 + $0x34] ss:$24 sps:$4 sm:$0xff]   ;;  %v1267_v60 = vld [vmem:[%s1393_s8 + $0x30] ss:$24 sps:$4 sm:$0xff]   ;;  %v1261_v62 = vld [vmem:[%s1391_s7 + $0x120] sm:$0xff]  }
  0x3b   : > { %1106 = vmatpush3.bf16.msra.mxu1 %v1229_v28  ;;  %1079 = vmatprep.subr.bf16.mxu0 %v1230_v29  ;;  %v1264_v58 = vld [vmem:[%s1393_s8 + $0x3c] ss:$24 sps:$4 sm:$0xff]   ;;  %v1268_v61 = vld [vmem:[%s1393_s8 + $0x38] ss:$24 sps:$4 sm:$0xff]   ;;  %v1266_v63 = vld [vmem:[%s1391_s7 + $0x168] sm:$0xff]  }
  0x3c   : > { %1107 = vmatprep.subr.bf16.mxu1 %v1231_v30  ;;  %v1269_v0 = vld [vmem:[%s1391_s7 + $0x128] sm:$0xff]   ;;  %v1270_v2 = vld [vmem:[%s1391_s7 + $0x170] sm:$0xff]   ;;  %v1279_v3 = vld [vmem:[%s1393_s8 + $0x44] ss:$24 sps:$4 sm:$0xff]  }
  0x3d   : > { %v1276_v1 = vld [vmem:[%s1393_s8 + $0x14] ss:$24 sps:$4 sm:$0xff]   ;;  %v1272_v5 = vld [vmem:[%s1391_s7 + $0x178] sm:$0xff]   ;;  %v1274_v7 = vld [vmem:[%s1393_s8 + $0x10] ss:$24 sps:$4 sm:$0xff]  }
  0x3e   : > { %1080 = vmatpush3.bf16.msra.mxu0 %v1232_v31  ;;  %v1271_v4 = vld [vmem:[%s1391_s7 + $0x130] sm:$0xff]   ;;  %v1273_v6 = vld [vmem:[%s1391_s7 + $0x138] sm:$0xff]  }
  0x3f   : > { %1108 = vmatpush3.bf16.msra.mxu1 %v1233_v32  ;;  %1081 = vmatprep.subr.bf16.mxu0 %v1234_v33  ;;  %v1277_v8 = vld [vmem:[%s1393_s8 + $0x40] ss:$24 sps:$4 sm:$0xff]   ;;  %v266_v48 = vld [vmem:[#allocation2 + $0x10] sm:$0xff] }
  0x40   : > { %1109 = vmatprep.subr.bf16.mxu1 %v1235_v34 }
  0x42   : > { %1082 = vmatpush3.bf16.msra.mxu0 %v1236_v35 }
  0x43   : > { %1110 = vmatpush3.bf16.msra.mxu1 %v1237_v36  ;;  %1083 = vmatprep.subr.bf16.mxu0 %v1238_v37 }
  0x44   : > { %1111 = vmatprep.subr.bf16.mxu1 %v1239_v38 }
  0x46   : > { %1084 = vmatpush3.bf16.msra.mxu0 %v1240_v39 }
  0x47   : > { %1112 = vmatpush3.bf16.msra.mxu1 %v1241_v40  ;;  %1085 = vmatprep.subr.bf16.mxu0 %v1242_v41 }
  0x48   : > { %1113 = vmatprep.subr.bf16.mxu1 %v1243_v42 }
  0x4a   : > { %1086 = vmatpush3.bf16.msra.mxu0 %v1244_v43  ;;  %v264_v43 = vld [vmem:[#allocation2] sm:$0xff] }
  0x4b   : > { %1114 = vmatpush3.bf16.msra.mxu1 %v1245_v44  ;;  %1127 = vmatprep.subr.bf16.mxu0 %v1252_v49 }
  0x4c   : > { %1155 = vmatprep.subr.bf16.mxu1 %v1252_v49 }
  0x4d   : > { %757 = vmatmul.mubr.bf16.vlgmr.msra.gmra.mrb[0].mxu0 %v1246_v45 }
  0x4e   : > { %806 = vmatmul.mubr.bf16.vlgmr.msra.gmra.mrb[0].mxu1 %v1249_v47  ;;  %1128 = vmatpush3.bf16.msra.mxu0 %v1253_v50 }
  0x4f   : > { %1163 = vmatpush3.bf16.msra.mxu1 %v1253_v50  ;;  %1129 = vmatprep.subr.bf16.mxu0 %v1254_v51 }
  0x50   : > { %1156 = vmatprep.subr.bf16.mxu1 %v1254_v51  ;;  %764 = vmatprep.mubr.bf16.mxu0 %v1262_v57 }
  0x51   : > { %813 = vmatprep.mubr.bf16.mxu1 %v1264_v58 }
  0x52   : > { %1130 = vmatpush3.bf16.msra.mxu0 %v1255_v52 }
  0x53   : > { %1164 = vmatpush3.bf16.msra.mxu1 %v1255_v52  ;;  %1131 = vmatprep.subr.bf16.mxu0 %v1256_v53  ;;  %v265_v52 = vld [vmem:[#allocation2 + $0x8] sm:$0xff] }
  0x54   : > { %1157 = vmatprep.subr.bf16.mxu1 %v1256_v53 }
  0x55   : > { %765 = vmatmul.mubr.bf16.gmra.mrb[4].mxu0 %v1267_v60 }
  0x56   : > { %1132 = vmatpush3.bf16.msra.mxu0 %v1257_v54  ;;  %814 = vmatmul.mubr.bf16.gmra.mrb[4].mxu1 %v1268_v61 }
  0x57   : > { %1165 = vmatpush3.bf16.msra.mxu1 %v1257_v54  ;;  %1133 = vmatprep.subr.bf16.mxu0 %v1258_v55 }
  0x58   : > { %1158 = vmatprep.subr.bf16.mxu1 %v1258_v55  ;;  %854 = vmatprep.mubr.bf16.mxu0 %v1276_v1 }
  0x59   : > { %862 = vmatprep.mubr.bf16.mxu1 %v1279_v3 }
  0x5a   : > { %1134 = vmatpush3.bf16.msra.mxu0 %v1259_v56 }
  0x5b   : > { %1166 = vmatpush3.bf16.msra.mxu1 %v1259_v56  ;;  %1135 = vmatprep.subr.bf16.mxu0 %v1260_v59  ;;  %v267_v56 = vld [vmem:[#allocation2 + $0x18] sm:$0xff] }
  0x5c   : > { %1159 = vmatprep.subr.bf16.mxu1 %v1260_v59 }
  0x5e   : > { %1136 = vmatpush3.bf16.msra.mxu0 %v1261_v62 }
  0x5f   : > { %1167 = vmatpush3.bf16.msra.mxu1 %v1261_v62  ;;  %1137 = vmatprep.subr.bf16.mxu0 %v1266_v63  ;;  %v1065_v62 = vld [vmem:[%s1489_s2] ss:$0 sm:$0xff] (!%p1064_p11) }
  0x60   : > { %1160 = vmatprep.subr.bf16.mxu1 %v1266_v63 }
  0x62   : > { %1138 = vmatpush3.bf16.msra.mxu0 %v1269_v0 }
  0x63   : > { %1168 = vmatpush3.bf16.msra.mxu1 %v1269_v0  ;;  %1139 = vmatprep.subr.bf16.mxu0 %v1270_v2 }
  0x64   : > { %1161 = vmatprep.subr.bf16.mxu1 %v1270_v2 }
  0x66   : > { %1140 = vmatpush3.bf16.msra.mxu0 %v1271_v4 }
  0x67   : > { %1169 = vmatpush3.bf16.msra.mxu1 %v1271_v4  ;;  %1141 = vmatprep.subr.bf16.mxu0 %v1272_v5 }
  0x68   : > { %1162 = vmatprep.subr.bf16.mxu1 %v1272_v5 }
  0x6a   : > { %1142 = vmatpush3.bf16.msra.mxu0 %v1273_v6 }
  0x6b   : > { %1170 = vmatpush3.bf16.msra.mxu1 %v1273_v6 }
  0x6d   : > { %855 = vmatmul.mubr.bf16.vlgmr.msra.gmra.mrb[8].mxu0 %v1274_v7 }
  0x6e   : > { %863 = vmatmul.mubr.bf16.vlgmr.msra.gmra.mrb[8].mxu1 %v1277_v8 }
 0x120   : > { %v1087_v9 = vpop.f32.mrb[0].mxu0 }
 0x121   : > { %v1115_v10 = vpop.f32.mrb[0].mxu1  ;;  %v1088_v11 = vpop.f32.mrb[1].mxu0 }
 0x122   : > { %v1089_v12 = vadd.f32 %v1088_v11, %v1087_v9  ;;  %v1116_v13 = vpop.f32.mrb[1].mxu1  ;;  %v1090_v14 = vpop.f32.mrb[2].mxu0 }
 0x123   : > { %v1117_v15 = vadd.f32 %v1116_v13, %v1115_v10  ;;  %v1118_v16 = vpop.f32.mrb[2].mxu1  ;;  %v1091_v17 = vpop.f32.mrb[3].mxu0 }
 0x124   : > { %v1092_v18 = vadd.f32 %v1091_v17, %v1090_v14  ;;  %v1119_v19 = vpop.f32.mrb[3].mxu1 }
 0x125   : > { %v808_v20 = vadd.f32 %v1117_v15, %v1089_v12  ;;  %v1120_v21 = vadd.f32 %v1119_v19, %v1118_v16 }
 0x127   : > { %v811_v22 = vadd.f32 %v1120_v21, %v1092_v18 }
 0x128   : > { %v1093_v23 = vpop.f32.mrb[4].mxu0 }
 0x129   : > { %v1121_v24 = vpop.f32.mrb[4].mxu1  ;;  %v1094_v25 = vpop.f32.mrb[5].mxu0 }
 0x12a   : > { %v1095_v26 = vadd.f32 %v1094_v25, %v1093_v23  ;;  %v1122_v27 = vpop.f32.mrb[5].mxu1  ;;  %v1096_v28 = vpop.f32.mrb[6].mxu0 }
 0x12b   : > { %v1123_v29 = vadd.f32 %v1122_v27, %v1121_v24  ;;  %v1124_v30 = vpop.f32.mrb[6].mxu1  ;;  %v1097_v31 = vpop.f32.mrb[7].mxu0 }
 0x12c   : > { %v1098_v32 = vadd.f32 %v1097_v31, %v1096_v28  ;;  %v1125_v33 = vpop.f32.mrb[7].mxu1 }
 0x12d   : > { %v816_v34 = vadd.f32 %v1123_v29, %v1095_v26  ;;  %v1126_v35 = vadd.f32 %v1125_v33, %v1124_v30 }
 0x12f   : > { %v819_v36 = vadd.f32 %v1126_v35, %v1098_v32 }
 0x140   : > { %v1143_v37 = vpop.f32.mrb[8].mxu0 }
 0x141   : > { %v1149_v38 = vpop.f32.mrb[8].mxu1  ;;  %v1144_v39 = vpop.f32.mrb[9].mxu0 }
 0x142   : > { %v1145_v40 = vadd.f32 %v1144_v39, %v1143_v37  ;;  %v1150_v41 = vpop.f32.mrb[9].mxu1  ;;  %v1146_v42 = vpop.f32.mrb[10].mxu0 }
 0x143   : > { %v1151_v44 = vadd.f32 %v1150_v41, %v1149_v38  ;;  %v1152_v45 = vpop.f32.mrb[10].mxu1  ;;  %v1147_v46 = vpop.f32.mrb[11].mxu0 }
 0x144   : > { %v857_v47 = vadd.f32 %v1145_v40, %v808_v20  ;;  %v1148_v49 = vadd.f32 %v1147_v46, %v1146_v42  ;;  %v1153_v50 = vpop.f32.mrb[11].mxu1 }
 0x145   : > { %v865_v51 = vadd.f32 %v1151_v44, %v816_v34  ;;  %v1154_v53 = vadd.f32 %v1153_v50, %v1152_v45  ;;  %882 = sbr.rel (%p1064_p11) target bundleno = 345 (0x159), region = 63 }
 0x146   : > { %v871_v54 = vadd.f32 %v857_v47, %v264_v43  ;;  %v860_v55 = vadd.f32 %v1148_v49, %v811_v22 }
 0x147   : > { %v873_v57 = vadd.f32 %v865_v51, %v266_v48  ;;  %v868_v58 = vadd.f32 %v1154_v53, %v819_v36 }
 0x148   : > { %875 = vst [vmem:[#allocation2] sm:$0xff] %v871_v54  ;;  %v872_v59 = vadd.f32 %v860_v55, %v265_v52 }
 0x149   : > { %877 = vst [vmem:[#allocation2 + $0x10] sm:$0xff] %v873_v57  ;;  %v874_v60 = vadd.f32 %v868_v58, %v267_v56 }
 0x14a   : > { %876 = vst [vmem:[#allocation2 + $0x8] sm:$0xff] %v872_v59 }
 0x14b   : > { %878 = vst [vmem:[#allocation2 + $0x18] sm:$0xff] %v874_v60 }
 0x14f   : > { %v883_v61 = vld [vmem:[#allocation2] sm:$0xff] }
 0x150   : > { %v894_v0 = vadd.f32 %v1065_v62, %v883_v61  ;;  %v885_v2 = vld [vmem:[#allocation2 + $0x10] sm:$0xff] }
 0x151   : > { %v884_v63 = vld [vmem:[#allocation2 + $0x8] sm:$0xff]  ;;  %v896_v4 = vadd.f32 %v1065_v62, %v885_v2 }
 0x152   : > { %v895_v1 = vadd.f32 %v1065_v62, %v884_v63  ;;  %v886_v3 = vld [vmem:[#allocation2 + $0x18] sm:$0xff]  ;;  %vm898_vm0 = vcmp.ge.f32.partialorder %v894_v0, 0.0  ;;  %v902_v6 = vmul.f32 0.1, %v894_v0 }
 0x153   : > { %v897_v5 = vadd.f32 %v1065_v62, %v886_v3  ;;  %vm900_vm2 = vcmp.ge.f32.partialorder %v896_v4, 0.0  ;;  %v904_v8 = vmul.f32 0.1, %v896_v4 }
 0x154   : > { %vm899_vm1 = vcmp.ge.f32.partialorder %v895_v1, 0.0  ;;  %v903_v7 = vmul.f32 0.1, %v895_v1  ;;  %v906_v10 = vsel %vm898_vm0, %v894_v0, %v902_v6 }
 0x155   : > { %vm901_vm3 = vcmp.ge.f32.partialorder %v897_v5, 0.0  ;;  %v905_v9 = vmul.f32 0.1, %v897_v5  ;;  %910 = vst [vmem:[%s1490_s3] sm:$0xff] %v906_v10  ;;  %v908_v12 = vsel %vm900_vm2, %v896_v4, %v904_v8 }
 0x156   : > { %v907_v11 = vsel %vm899_vm1, %v895_v1, %v903_v7  ;;  %912 = vst [vmem:[%s1490_s3 + $0x10] sm:$0xff] %v908_v12 }
 0x157   : > { %911 = vst [vmem:[%s1490_s3 + $0x8] sm:$0xff] %v907_v11  ;;  %v909_v13 = vsel %vm901_vm3, %v897_v5, %v905_v9 }
 0x158   : > { %913 = vst [vmem:[%s1490_s3 + $0x18] sm:$0xff] %v909_v13 }
 0x159 PF: > { %s13_s16 = sadd.s32 1, %s1318_s16   ;;  %s1491_s12 = smov %s1306_s13 }
 0x15a   : > { %p10_p12 = scmp.ge.s32.totalorder %s13_s16, 20   ;;  %s1492_s13 = smov %s1376_s20 }
 0x15b   : > { %s1493_s14 = smov %s1314_s15  ;;  %s1494_s15 = smov %s1496_s17 }
 0x15c   :  { %12 = sbr.rel (!%p10_p12) target bundleno = 3 (0x3), region = 101 }

</bundles_post_ra>
